<compile_context>
chip_gen: v7x
topology: tpu7x:2x2x1
jax: 0.10.0
libtpu: 0.0.40
codegen_flags: <defaults>
</compile_context>

<pallas_src>
import math

import jax
import jax.numpy as jnp
from jax import lax
from jax.experimental import pallas as pl
from jax.experimental.pallas import tpu as pltpu


# Set to jnp.bfloat16 for production sizes (v5e/v6e/v7x MXU is native bf16); keep f32 for
# the strict toy-size correctness check.  Accumulation is always f32.
_MM_DTYPE = jnp.float32


def _mm(a, w):
    return jnp.dot(a.astype(_MM_DTYPE), w.astype(_MM_DTYPE),
                   preferred_element_type=jnp.float32)


# ---------------------------------------------------------------------------
# elementwise helpers (safe inside Pallas kernels)
# ---------------------------------------------------------------------------
def _sigmoid(x):
    return 1.0 / (1.0 + jnp.exp(-x))


def _silu(x):
    return x * _sigmoid(x)


def _softplus(x):
    return jnp.maximum(x, 0.0) + jnp.log(1.0 + jnp.exp(-jnp.abs(x)))


def _erf(x):
    # Abramowitz & Stegun 7.1.26 rational approximation (|err| < 1.5e-7).
    a1, a2, a3, a4, a5 = (0.254829592, -0.284496736, 1.421413741,
                          -1.453152027, 1.061405429)
    p = 0.3275911
    sgn = jnp.where(x >= 0.0, 1.0, -1.0)
    ax = jnp.abs(x)
    t = 1.0 / (1.0 + p * ax)
    poly = ((((a5 * t + a4) * t + a3) * t + a2) * t + a1) * t
    return sgn * (1.0 - poly * jnp.exp(-ax * ax))


def _gelu_exact(x):
    # nn.GELU() default (exact, erf-based) GELU.
    return 0.5 * x * (1.0 + _erf(x * (1.0 / math.sqrt(2.0))))


# ---------------------------------------------------------------------------
# fused Bi-Mamba block kernel (one batch element per grid step)
# ---------------------------------------------------------------------------
def bi_mamba_block_kernel(
        x_ref,
        ln1_g_ref, ln1_b_ref,
        w_in_ref,
        w_cdn_ref, w_cup_ref, b_conv_ref,
        w_proj_ref, b_dt_ref,
        A_logT2_ref, d_skip_ref, w_out_ref,
        ln2_g_ref, ln2_b_ref,
        ff_w1_ref, ff_b1_ref, ff_w2_ref, ff_b2_ref,
        o_ref,
        dA_s, dBu_s, hall_s):
    L = x_ref.shape[1]
    d_conv = w_cdn_ref.shape[0]
    S = A_logT2_ref.shape[0] // 2            # d_state
    d_inner = A_logT2_ref.shape[1]
    C2 = 2 * d_inner                         # fwd | bwd channels stacked on lanes
    CHUNK = dA_s.shape[0]                    # time-chunk of the scan scratch
    n_chunks = L // CHUNK

    x = x_ref[0].astype(jnp.float32)         # (L, d_model)

    # ---------------- LayerNorm 1 ----------------
    mu = jnp.mean(x, axis=-1, keepdims=True)
    xm = x - mu
    var = jnp.mean(xm * xm, axis=-1, keepdims=True)
    xn = xm * lax.rsqrt(var + 1e-5) * ln1_g_ref[...] + ln1_b_ref[...]     # (L, dm)

    # ---------------- in_proj, both directions in one matmul ----------------
    # No sequence flip is needed anywhere: the backward branch is realized below with an
    # anti-causal conv and a reverse-time scan, which is exactly flip->Mamba->flip.
    # Columns: [x_fwd | x_bwd | z_fwd | z_bwd].
    xz = _mm(xn, w_in_ref[...])                                           # (L, 2*C2)
    xc = xz[:, :C2]
    zg = xz[:, C2:]

    # ---------------- depthwise conv1d (+bias) ----------------
    # fwd half: causal (left-looking) taps; bwd half: anti-causal (right-looking) taps.
    # Per-tap shifted slices + FMA; no shift matrices, no big pad buffer.
    conv = xc * (w_cdn_ref[0:1, :] + w_cup_ref[0:1, :]) + b_conv_ref[...]
    for j in range(1, d_conv):                                            # d_conv is tiny/static
        zpad = jnp.zeros((j, C2), jnp.float32)
        down = jnp.concatenate([zpad, xc[:L - j, :]], axis=0)             # xc[t-j], 0 for t<j
        up = jnp.concatenate([xc[j:, :], zpad], axis=0)                   # xc[t+j], 0 for t>=L-j
        conv = conv + down * w_cdn_ref[j:j + 1, :] + up * w_cup_ref[j:j + 1, :]
    u = _silu(conv)                                                       # (L, C2)

    # ---------------- fused post-conv projection (one wide matmul) ----------------
    # Columns: [delta_eff (C2) | B_f (S) | B_b (S) | C_f (S) | C_b (S)]
    proj = _mm(u, w_proj_ref[...])                                        # (L, C2 + 4S)
    delta = _softplus(proj[:, :C2] + b_dt_ref[...])                       # (L, C2)
    Bf = proj[:, C2:C2 + S]
    Bb = proj[:, C2 + S:C2 + 2 * S]
    Cf = proj[:, C2 + 2 * S:C2 + 3 * S]
    Cb = proj[:, C2 + 3 * S:C2 + 4 * S]

    A_all = -jnp.exp(A_logT2_ref[...])                                    # (2S, d_inner)
    A_f = A_all[:S, :]
    A_b = A_all[S:, :]

    # ---------------- time-chunked selective scan (per direction) ----------------
    # Per chunk: dA/dBu built with pure broadcasts into VMEM scratch (keeps exp off the
    # serial chain), serial recurrence over CHUNK steps (VALU FMA only), then the C
    # reduction as one sum over the S axis.  The hidden state is carried across chunks.
    def run_scan(delta_d, u_d, B_d, C_d, A_d, reverse):
        du = delta_d * u_d                                                # (L, d_inner)
        y_chunks = [None] * n_chunks
        h = jnp.zeros((S, d_inner), jnp.float32)
        order = range(n_chunks - 1, -1, -1) if reverse else range(n_chunks)
        for c in order:
            r0 = c * CHUNK
            d_ch = delta_d[r0:r0 + CHUNK, :]                              # (CHUNK, d_inner)
            du_ch = du[r0:r0 + CHUNK, :]
            B_ch = B_d[r0:r0 + CHUNK, :]                                  # (CHUNK, S)
            C_ch = C_d[r0:r0 + CHUNK, :]
            dA_s[...] = jnp.exp(d_ch[:, None, :] * A_d[None, :, :])       # (CHUNK, S, d_inner)
            dBu_s[...] = du_ch[:, None, :] * B_ch[:, :, None]

            def body(k, hh):
                t = (CHUNK - 1 - k) if reverse else k
                hh = dA_s[t] * hh + dBu_s[t]                              # (S, d_inner)
                hall_s[t] = hh
                return hh

            h = lax.fori_loop(0, CHUNK, body, h, unroll=min(8, CHUNK))
            y_chunks[c] = jnp.sum(hall_s[...] * C_ch[:, :, None], axis=1)  # (CHUNK, d_inner)
        return y_chunks[0] if n_chunks == 1 else jnp.concatenate(y_chunks, axis=0)

    # TODO(synk): for v7x with tiny per-chip batch, add a second parallel grid axis over
    # channel blocks of C2 so both TensorCores are busy; not needed at these toy sizes.
    y_f = run_scan(delta[:, :d_inner], u[:, :d_inner], Bf, Cf, A_f, reverse=False)
    y_b = run_scan(delta[:, d_inner:], u[:, d_inner:], Bb, Cb, A_b, reverse=True)
    y_ssm = jnp.concatenate([y_f, y_b], axis=1) + d_skip_ref[...] * u     # (L, C2)

    # ---------------- gate + out_proj (fwd_out + bwd_out fused in one matmul) ----------
    y = y_ssm * _silu(zg)
    msum = _mm(y, w_out_ref[...])                                         # (L, dm)

    # ---------------- LayerNorm 2 + FFN (GELU) + residual ----------------
    mu2 = jnp.mean(msum, axis=-1, keepdims=True)
    mc = msum - mu2
    var2 = jnp.mean(mc * mc, axis=-1, keepdims=True)
    h2 = mc * lax.rsqrt(var2 + 1e-5) * ln2_g_ref[...] + ln2_b_ref[...]
    ff = _gelu_exact(_mm(h2, ff_w1_ref[...]) + ff_b1_ref[...])
    out = _mm(ff, ff_w2_ref[...]) + ff_b2_ref[...] + x
    o_ref[0] = out.astype(o_ref.dtype)


_PACKED_ORDER = (
    'ln1_g', 'ln1_b',
    'w_in_all',
    'w_conv_dn', 'w_conv_up', 'b_conv',
    'w_proj', 'b_dt',
    'A_logT2', 'Dskip', 'w_out_sum',
    'ln2_g', 'ln2_b',
    'ff_w1', 'ff_b1', 'ff_w2', 'ff_b2')


def _pick_chunk(L, target=128):
    """Largest divisor of L that is <= target (static chunking of the scan)."""
    c = min(L, target)
    while L % c != 0:
        c -= 1
    return c


def bi_mamba_block(x, packed):
    """x: (B, L, d_model) float32.  packed: output of pack_bi_mamba_params."""
    B, L, dm = x.shape
    two_s, d_inner = packed['A_logT2'].shape
    S = two_s // 2
    CHUNK = _pick_chunk(L)
    weights = [packed[name] for name in _PACKED_ORDER]

    def build(single_buffer_weights):
        wspecs = []
        for w in weights:
            kwargs = {}
            if single_buffer_weights:
                # constants never change across the grid -> no double buffering needed
                kwargs['pipeline_mode'] = pl.Buffered(1)
            wspecs.append(pl.BlockSpec(w.shape, lambda b: (0, 0), **kwargs))
        in_specs = [pl.BlockSpec((1, L, dm), lambda b: (b, 0, 0))] + wspecs
        out_specs = pl.BlockSpec((1, L, dm), lambda b: (b, 0, 0))
        return pl.pallas_call(
            bi_mamba_block_kernel,
            grid=(B,),
            in_specs=in_specs,
            out_specs=out_specs,
            out_shape=jax.ShapeDtypeStruct((B, L, dm), jnp.float32),
            scratch_shapes=[pltpu.VMEM((CHUNK, S, d_inner), jnp.float32)
                            for _ in range(3)],
            compiler_params=pltpu.CompilerParams(
                dimension_semantics=("parallel",),
                vmem_limit_bytes=48 * 1024 * 1024),
        )

    try:
        return build(True)(x, *weights)
    except Exception:
        # Fallback for Pallas versions that reject Buffered(1) on the top-level pipeline;
        # identical semantics, the constant weights just stay double-buffered.
        return build(False)(x, *weights)


# ---------------------------------------------------------------------------
# host-side weight packing (direction stacking, conv-tap packing, fused projection)
# ---------------------------------------------------------------------------
def pack_bi_mamba_params(params):
    f, b = params['fwd'], params['bwd']
    d_conv, d_inner = f['w_conv'].shape
    d_state = f['A_logT'].shape[0]
    dt_rank = f['w_dt'].shape[0]
    C2 = 2 * d_inner

    # in_proj columns: [x_fwd | x_bwd | z_fwd | z_bwd]  (both directions share the input).
    wxf, wzf = f['w_in'][:, :d_inner], f['w_in'][:, d_inner:]
    wxb, wzb = b['w_in'][:, :d_inner], b['w_in'][:, d_inner:]
    w_in_all = jnp.concatenate([wxf, wxb, wzf, wzb], axis=1)      # (dm, 2*C2)

    # depthwise conv taps; row j multiplies xc shifted by j.
    #   down (causal, fwd half):  conv_f[t] += w_f[K-1-j] * xc[t-j]
    #   up (anti-causal, bwd half): conv_b[t] += w_b[K-1-j] * xc[t+j]
    zeros_tap = jnp.zeros((d_conv, d_inner), jnp.float32)
    w_conv_dn = jnp.concatenate([f['w_conv'][::-1, :], zeros_tap], axis=1)   # (d_conv, C2)
    w_conv_up = jnp.concatenate([zeros_tap, b['w_conv'][::-1, :]], axis=1)   # (d_conv, C2)
    b_conv = jnp.concatenate([f['b_conv'], b['b_conv']], axis=1)             # (1, C2)

    # fused post-conv projection: [delta_eff (C2) | B_f (S) | B_b (S) | C_f (S) | C_b (S)]
    def dteff(p):                                                 # fold dt_proj into x_proj
        return p['w_x'][:, :dt_rank] @ p['w_dt']                  # (d_inner, d_inner)

    def xB(p):
        return p['w_x'][:, dt_rank:dt_rank + d_state]

    def xC(p):
        return p['w_x'][:, dt_rank + d_state:]

    Zi = jnp.zeros((d_inner, d_inner), jnp.float32)
    Zs = jnp.zeros((d_inner, d_state), jnp.float32)
    w_dteff = jnp.concatenate([
        jnp.concatenate([dteff(f), Zi], axis=1),
        jnp.concatenate([Zi, dteff(b)], axis=1)], axis=0)         # (C2, C2), block-diagonal
    w_bc = jnp.concatenate([
        jnp.concatenate([xB(f), Zs, xC(f), Zs], axis=1),
        jnp.concatenate([Zs, xB(b), Zs, xC(b)], axis=1)], axis=0)  # (C2, 4S)
    w_proj = jnp.concatenate([w_dteff, w_bc], axis=1)             # (C2, C2 + 4S)
    b_dt = jnp.concatenate([f['b_dt'], b['b_dt']], axis=1)        # (1, C2)

    A_logT2 = jnp.concatenate([f['A_logT'], b['A_logT']], axis=0)  # (2S, d_inner)
    Dskip = jnp.concatenate([f['D'], b['D']], axis=1)              # (1, C2)
    # out_proj of both directions and their sum fused: rows [fwd ; bwd]
    w_out_sum = jnp.concatenate([f['w_out'], b['w_out']], axis=0)  # (C2, dm)

    return dict(
        ln1_g=params['ln1_g'], ln1_b=params['ln1_b'],
        w_in_all=w_in_all,
        w_conv_dn=w_conv_dn, w_conv_up=w_conv_up, b_conv=b_conv,
        w_proj=w_proj, b_dt=b_dt,
        A_logT2=A_logT2, Dskip=Dskip, w_out_sum=w_out_sum,
        ln2_g=params['ln2_g'], ln2_b=params['ln2_b'],
        ff_w1=params['ff_w1'], ff_b1=params['ff_b1'],
        ff_w2=params['ff_w2'], ff_b2=params['ff_b2'])


# ---------------------------------------------------------------------------
# deterministic parameter initialization (synthetic; no checkpoint load)
# ---------------------------------------------------------------------------
def init_mamba_params(key, d_model, d_state, d_conv, expand):
    d_inner = expand * d_model
    dt_rank = math.ceil(d_model / 16)
    ks = jax.random.split(key, 7)

    def uni(k, shape, bound):
        return jax.random.uniform(k, shape, jnp.float32, -bound, bound)

    dt = jnp.exp(jax.random.uniform(ks[5], (1, d_inner), jnp.float32)
                 * (math.log(0.1) - math.log(1e-3)) + math.log(1e-3))
    dt = jnp.clip(dt, 1e-4)
    b_dt = dt + jnp.log(-jnp.expm1(-dt))                          # inverse softplus
    A_logT = jnp.log(jnp.broadcast_to(
        jnp.arange(1, d_state + 1, dtype=jnp.float32)[:, None],
        (d_state, d_inner)))                                      # S4D-real, transposed

    return {
        'w_in': uni(ks[0], (d_model, 2 * d_inner), 1.0 / math.sqrt(d_model)),
        'w_conv': uni(ks[1], (d_conv, d_inner), 1.0 / math.sqrt(d_conv)),
        'b_conv': uni(ks[2], (1, d_inner), 1.0 / math.sqrt(d_conv)),
        'w_x': uni(ks[3], (d_inner, dt_rank + 2 * d_state), 1.0 / math.sqrt(d_inner)),
        'w_dt': uni(ks[4], (dt_rank, d_inner), dt_rank ** -0.5),
        'b_dt': b_dt,
        'A_logT': A_logT,
        'D': jnp.ones((1, d_inner), jnp.float32),
        'w_out': uni(ks[6], (d_inner, d_model), 1.0 / math.sqrt(d_inner)),
    }


def init_block_params(key, d_model, d_state, d_conv, expand):
    kf, kb, k1, k2, k3, k4 = jax.random.split(key, 6)
    d_ff = 4 * d_model

    def uni(k, shape, bound):
        return jax.random.uniform(k, shape, jnp.float32, -bound, bound)

    return {
        'fwd': init_mamba_params(kf, d_model, d_state, d_conv, expand),
        'bwd': init_mamba_params(kb, d_model, d_state, d_conv, expand),
        'ln1_g': jnp.ones((1, d_model), jnp.float32),
        'ln1_b': jnp.zeros((1, d_model), jnp.float32),
        'ln2_g': jnp.ones((1, d_model), jnp.float32),
        'ln2_b': jnp.zeros((1, d_model), jnp.float32),
        'ff_w1': uni(k1, (d_model, d_ff), 1.0 / math.sqrt(d_model)),
        'ff_b1': uni(k2, (1, d_ff), 1.0 / math.sqrt(d_model)),
        'ff_w2': uni(k3, (d_ff, d_model), 1.0 / math.sqrt(d_ff)),
        'ff_b2': uni(k4, (1, d_model), 1.0 / math.sqrt(d_ff)),
    }


# ---------------------------------------------------------------------------
# pure-JAX reference (mirrors the PyTorch math) for the correctness check
# ---------------------------------------------------------------------------
def _layernorm_ref(x, g, b, eps=1e-5):
    mu = jnp.mean(x, axis=-1, keepdims=True)
    xc = x - mu
    var = jnp.mean(xc * xc, axis=-1, keepdims=True)
    return xc / jnp.sqrt(var + eps) * g + b


def _mamba_ref(x, p):
    B, L, _ = x.shape
    d_conv, d_inner = p['w_conv'].shape
    d_state = p['A_logT'].shape[0]
    dt_rank = p['w_dt'].shape[0]
    xz = x @ p['w_in']
    xc, z = xz[..., :d_inner], xz[..., d_inner:]
    xp_ = jnp.concatenate(
        [jnp.zeros((B, d_conv - 1, d_inner), x.dtype), xc], axis=1)
    conv = jnp.zeros_like(xc) + p['b_conv']
    for k in range(d_conv):
        conv = conv + xp_[:, k:k + L, :] * p['w_conv'][k]
    u = jax.nn.silu(conv)
    dbc = u @ p['w_x']
    dt_low = dbc[..., :dt_rank]
    Bm = dbc[..., dt_rank:dt_rank + d_state]
    Cm = dbc[..., dt_rank + d_state:]
    delta = jax.nn.softplus(dt_low @ p['w_dt'] + p['b_dt'])
    A = -jnp.exp(p['A_logT'].T)                                   # (d_inner, d_state)
    h = jnp.zeros((B, d_inner, d_state), x.dtype)
    ys = []
    for t in range(L):
        dA = jnp.exp(delta[:, t, :, None] * A[None])
        dBu = delta[:, t, :, None] * u[:, t, :, None] * Bm[:, t, None, :]
        h = dA * h + dBu
        ys.append(jnp.sum(h * Cm[:, t, None, :], axis=-1) + p['D'][0] * u[:, t])
    y = jnp.stack(ys, axis=1) * jax.nn.silu(z)
    return y @ p['w_out']


def _bi_mamba_block_ref(x, params):
    residual = x
    xn = _layernorm_ref(x, params['ln1_g'], params['ln1_b'])
    fwd = _mamba_ref(xn, params['fwd'])
    bwd = jnp.flip(_mamba_ref(jnp.flip(xn, axis=1), params['bwd']), axis=1)
    mo = _layernorm_ref(fwd + bwd, params['ln2_g'], params['ln2_b'])
    h = jax.nn.gelu(mo @ params['ff_w1'] + params['ff_b1'], approximate=False)
    return h @ params['ff_w2'] + params['ff_b2'] + residual


# ---------------------------------------------------------------------------
if __name__ == "__main__":
    d_model, d_state, d_conv, expand = 32, 16, 4, 2
    batch, seq = 2, 8

    root = jax.random.PRNGKey(0)
    kx, kp = jax.random.split(root)
    x = jax.random.normal(kx, (batch, seq, d_model), jnp.float32)
    params = init_block_params(kp, d_model, d_state, d_conv, expand)
    packed = pack_bi_mamba_params(params)

    out = bi_mamba_block(x, packed)
    out = jax.block_until_ready(out)

    ref = _bi_mamba_block_ref(x, params)
    assert out.shape == (batch, seq, d_model)
    max_err = float(jnp.max(jnp.abs(out - ref)))
    assert max_err < 2e-3, f"mismatch vs reference: {max_err}"
    print("KERNEL_OK")
</pallas_src>

<mosaic_0001>
module attributes {stable_mosaic.version = 11 : i64} {
  func.func @bi_mamba_block_kernel(%arg0: i32, %arg1: memref<1x8x32xf32, #tpu.memory_space<vmem>>, %arg2: memref<1x32xf32, #tpu.memory_space<vmem>>, %arg3: memref<1x32xf32, #tpu.memory_space<vmem>>, %arg4: memref<32x256xf32, #tpu.memory_space<vmem>>, %arg5: memref<4x128xf32, #tpu.memory_space<vmem>>, %arg6: memref<4x128xf32, #tpu.memory_space<vmem>>, %arg7: memref<1x128xf32, #tpu.memory_space<vmem>>, %arg8: memref<128x192xf32, #tpu.memory_space<vmem>>, %arg9: memref<1x128xf32, #tpu.memory_space<vmem>>, %arg10: memref<32x64xf32, #tpu.memory_space<vmem>>, %arg11: memref<1x128xf32, #tpu.memory_space<vmem>>, %arg12: memref<128x32xf32, #tpu.memory_space<vmem>>, %arg13: memref<1x32xf32, #tpu.memory_space<vmem>>, %arg14: memref<1x32xf32, #tpu.memory_space<vmem>>, %arg15: memref<32x128xf32, #tpu.memory_space<vmem>>, %arg16: memref<1x128xf32, #tpu.memory_space<vmem>>, %arg17: memref<128x32xf32, #tpu.memory_space<vmem>>, %arg18: memref<1x32xf32, #tpu.memory_space<vmem>>, %arg19: memref<1x8x32xf32, #tpu.memory_space<vmem>>, %arg20: memref<8x16x64xf32, #tpu.memory_space<vmem>>, %arg21: memref<8x16x64xf32, #tpu.memory_space<vmem>>, %arg22: memref<8x16x64xf32, #tpu.memory_space<vmem>>) attributes {dimension_semantics = [#tpu.dimension_semantics<parallel>], iteration_bounds = array<i64: 2>, scalar_prefetch = 0 : i64, scratch_operands = 3 : i64, tpu.core_type = #tpu.core_type<tc>, window_params = [{transform_indices = @transform_0, window_bounds = array<i64: 1, 8, 32>}, {pipeline_mode = #tpu.pipeline_mode<synchronous>, transform_indices = @transform_1, window_bounds = array<i64: 1, 32>}, {pipeline_mode = #tpu.pipeline_mode<synchronous>, transform_indices = @transform_2, window_bounds = array<i64: 1, 32>}, {pipeline_mode = #tpu.pipeline_mode<synchronous>, transform_indices = @transform_3, window_bounds = array<i64: 32, 256>}, {pipeline_mode = #tpu.pipeline_mode<synchronous>, transform_indices = @transform_4, window_bounds = array<i64: 4, 128>}, {pipeline_mode = #tpu.pipeline_mode<synchronous>, transform_indices = @transform_5, window_bounds = array<i64: 4, 128>}, {pipeline_mode = #tpu.pipeline_mode<synchronous>, transform_indices = @transform_6, window_bounds = array<i64: 1, 128>}, {pipeline_mode = #tpu.pipeline_mode<synchronous>, transform_indices = @transform_7, window_bounds = array<i64: 128, 192>}, {pipeline_mode = #tpu.pipeline_mode<synchronous>, transform_indices = @transform_8, window_bounds = array<i64: 1, 128>}, {pipeline_mode = #tpu.pipeline_mode<synchronous>, transform_indices = @transform_9, window_bounds = array<i64: 32, 64>}, {pipeline_mode = #tpu.pipeline_mode<synchronous>, transform_indices = @transform_10, window_bounds = array<i64: 1, 128>}, {pipeline_mode = #tpu.pipeline_mode<synchronous>, transform_indices = @transform_11, window_bounds = array<i64: 128, 32>}, {pipeline_mode = #tpu.pipeline_mode<synchronous>, transform_indices = @transform_12, window_bounds = array<i64: 1, 32>}, {pipeline_mode = #tpu.pipeline_mode<synchronous>, transform_indices = @transform_13, window_bounds = array<i64: 1, 32>}, {pipeline_mode = #tpu.pipeline_mode<synchronous>, transform_indices = @transform_14, window_bounds = array<i64: 32, 128>}, {pipeline_mode = #tpu.pipeline_mode<synchronous>, transform_indices = @transform_15, window_bounds = array<i64: 1, 128>}, {pipeline_mode = #tpu.pipeline_mode<synchronous>, transform_indices = @transform_16, window_bounds = array<i64: 128, 32>}, {pipeline_mode = #tpu.pipeline_mode<synchronous>, transform_indices = @transform_17, window_bounds = array<i64: 1, 32>}, {transform_indices = @transform_18, window_bounds = array<i64: 1, 8, 32>}]} {
    %c0 = arith.constant 0 : index
    %c0_0 = arith.constant 0 : index
    %c0_1 = arith.constant 0 : index
    %0 = vector.load %arg1[%c0, %c0_0, %c0_1] : memref<1x8x32xf32, #tpu.memory_space<vmem>>, vector<1x8x32xf32>
    %1 = vector.shape_cast %0 : vector<1x8x32xf32> to vector<8x32xf32>
    %cst = arith.constant dense<0.000000e+00> : vector<8xf32>
    %2 = vector.multi_reduction <add>, %1, %cst [1] : vector<8x32xf32> to vector<8xf32>
    %3 = vector.shape_cast %2 : vector<8xf32> to vector<8x1xf32>
    %cst_2 = arith.constant 3.200000e+01 : f32
    %4 = vector.broadcast %cst_2 : f32 to vector<8x1xf32>
    %5 = arith.divf %3, %4 : vector<8x1xf32>
    %6 = vector.broadcast %5 : vector<8x1xf32> to vector<8x32xf32>
    %7 = arith.subf %1, %6 : vector<8x32xf32>
    %8 = arith.mulf %7, %7 : vector<8x32xf32>
    %cst_3 = arith.constant dense<0.000000e+00> : vector<8xf32>
    %9 = vector.multi_reduction <add>, %8, %cst_3 [1] : vector<8x32xf32> to vector<8xf32>
    %10 = vector.shape_cast %9 : vector<8xf32> to vector<8x1xf32>
    %cst_4 = arith.constant 3.200000e+01 : f32
    %11 = vector.broadcast %cst_4 : f32 to vector<8x1xf32>
    %12 = arith.divf %10, %11 : vector<8x1xf32>
    %cst_5 = arith.constant 9.99999974E-6 : f32
    %13 = vector.broadcast %cst_5 : f32 to vector<8x1xf32>
    %14 = arith.addf %12, %13 : vector<8x1xf32>
    %15 = math.rsqrt %14 : vector<8x1xf32>
    %16 = vector.broadcast %15 : vector<8x1xf32> to vector<8x32xf32>
    %17 = arith.mulf %7, %16 : vector<8x32xf32>
    %c0_6 = arith.constant 0 : index
    %c0_7 = arith.constant 0 : index
    %18 = vector.load %arg2[%c0_6, %c0_7] : memref<1x32xf32, #tpu.memory_space<vmem>>, vector<1x32xf32>
    %19 = vector.broadcast %18 : vector<1x32xf32> to vector<8x32xf32>
    %20 = arith.mulf %17, %19 : vector<8x32xf32>
    %c0_8 = arith.constant 0 : index
    %c0_9 = arith.constant 0 : index
    %21 = vector.load %arg3[%c0_8, %c0_9] : memref<1x32xf32, #tpu.memory_space<vmem>>, vector<1x32xf32>
    %22 = vector.broadcast %21 : vector<1x32xf32> to vector<8x32xf32>
    %23 = arith.addf %20, %22 : vector<8x32xf32>
    %c0_10 = arith.constant 0 : index
    %c0_11 = arith.constant 0 : index
    %24 = vector.load %arg4[%c0_10, %c0_11] : memref<32x256xf32, #tpu.memory_space<vmem>>, vector<32x256xf32>
    %cst_12 = arith.constant dense<0.000000e+00> : vector<8x256xf32>
    %25 = tpu.matmul %23, %24, %cst_12 {dimension_numbers = #tpu.dot_dimension_numbers<[1], [0], [0], [1], [0, 0, 1, 1], [], []>} : vector<8x32xf32>, vector<32x256xf32>, vector<8x256xf32> -> vector<8x256xf32>
    %26 = vector.extract_strided_slice %25 {offsets = [0, 0], sizes = [8, 128], strides = [1, 1]} : vector<8x256xf32> to vector<8x128xf32>
    %27 = vector.extract_strided_slice %25 {offsets = [0, 128], sizes = [8, 128], strides = [1, 1]} : vector<8x256xf32> to vector<8x128xf32>
    %c0_13 = arith.constant 0 : index
    %c0_14 = arith.constant 0 : index
    %28 = vector.load %arg5[%c0_13, %c0_14] : memref<4x128xf32, #tpu.memory_space<vmem>>, vector<1x128xf32>
    %c0_15 = arith.constant 0 : index
    %c0_16 = arith.constant 0 : index
    %29 = vector.load %arg6[%c0_15, %c0_16] : memref<4x128xf32, #tpu.memory_space<vmem>>, vector<1x128xf32>
    %30 = arith.addf %28, %29 : vector<1x128xf32>
    %31 = vector.broadcast %30 : vector<1x128xf32> to vector<8x128xf32>
    %32 = arith.mulf %26, %31 : vector<8x128xf32>
    %c0_17 = arith.constant 0 : index
    %c0_18 = arith.constant 0 : index
    %33 = vector.load %arg7[%c0_17, %c0_18] : memref<1x128xf32, #tpu.memory_space<vmem>>, vector<1x128xf32>
    %34 = vector.broadcast %33 : vector<1x128xf32> to vector<8x128xf32>
    %35 = arith.addf %32, %34 : vector<8x128xf32>
    %cst_19 = arith.constant 0.000000e+00 : f32
    %36 = vector.broadcast %cst_19 : f32 to vector<1x128xf32>
    %37 = vector.extract_strided_slice %26 {offsets = [0, 0], sizes = [7, 128], strides = [1, 1]} : vector<8x128xf32> to vector<7x128xf32>
    %38 = tpu.concatenate %36, %37 in 0 : vector<1x128xf32>, vector<7x128xf32> -> vector<8x128xf32>
    %39 = vector.extract_strided_slice %26 {offsets = [1, 0], sizes = [7, 128], strides = [1, 1]} : vector<8x128xf32> to vector<7x128xf32>
    %40 = tpu.concatenate %39, %36 in 0 : vector<7x128xf32>, vector<1x128xf32> -> vector<8x128xf32>
    %c1 = arith.constant 1 : index
    %c0_20 = arith.constant 0 : index
    %41 = vector.load %arg5[%c1, %c0_20] : memref<4x128xf32, #tpu.memory_space<vmem>>, vector<1x128xf32>
    %42 = vector.broadcast %41 : vector<1x128xf32> to vector<8x128xf32>
    %43 = arith.mulf %38, %42 : vector<8x128xf32>
    %44 = arith.addf %35, %43 : vector<8x128xf32>
    %c1_21 = arith.constant 1 : index
    %c0_22 = arith.constant 0 : index
    %45 = vector.load %arg6[%c1_21, %c0_22] : memref<4x128xf32, #tpu.memory_space<vmem>>, vector<1x128xf32>
    %46 = vector.broadcast %45 : vector<1x128xf32> to vector<8x128xf32>
    %47 = arith.mulf %40, %46 : vector<8x128xf32>
    %48 = arith.addf %44, %47 : vector<8x128xf32>
    %cst_23 = arith.constant 0.000000e+00 : f32
    %49 = vector.broadcast %cst_23 : f32 to vector<2x128xf32>
    %50 = vector.extract_strided_slice %26 {offsets = [0, 0], sizes = [6, 128], strides = [1, 1]} : vector<8x128xf32> to vector<6x128xf32>
    %51 = tpu.concatenate %49, %50 in 0 : vector<2x128xf32>, vector<6x128xf32> -> vector<8x128xf32>
    %52 = vector.extract_strided_slice %26 {offsets = [2, 0], sizes = [6, 128], strides = [1, 1]} : vector<8x128xf32> to vector<6x128xf32>
    %53 = tpu.concatenate %52, %49 in 0 : vector<6x128xf32>, vector<2x128xf32> -> vector<8x128xf32>
    %c2 = arith.constant 2 : index
    %c0_24 = arith.constant 0 : index
    %54 = vector.load %arg5[%c2, %c0_24] : memref<4x128xf32, #tpu.memory_space<vmem>>, vector<1x128xf32>
    %55 = vector.broadcast %54 : vector<1x128xf32> to vector<8x128xf32>
    %56 = arith.mulf %51, %55 : vector<8x128xf32>
    %57 = arith.addf %48, %56 : vector<8x128xf32>
    %c2_25 = arith.constant 2 : index
    %c0_26 = arith.constant 0 : index
    %58 = vector.load %arg6[%c2_25, %c0_26] : memref<4x128xf32, #tpu.memory_space<vmem>>, vector<1x128xf32>
    %59 = vector.broadcast %58 : vector<1x128xf32> to vector<8x128xf32>
    %60 = arith.mulf %53, %59 : vector<8x128xf32>
    %61 = arith.addf %57, %60 : vector<8x128xf32>
    %cst_27 = arith.constant 0.000000e+00 : f32
    %62 = vector.broadcast %cst_27 : f32 to vector<3x128xf32>
    %63 = vector.extract_strided_slice %26 {offsets = [0, 0], sizes = [5, 128], strides = [1, 1]} : vector<8x128xf32> to vector<5x128xf32>
    %64 = tpu.concatenate %62, %63 in 0 : vector<3x128xf32>, vector<5x128xf32> -> vector<8x128xf32>
    %65 = vector.extract_strided_slice %26 {offsets = [3, 0], sizes = [5, 128], strides = [1, 1]} : vector<8x128xf32> to vector<5x128xf32>
    %66 = tpu.concatenate %65, %62 in 0 : vector<5x128xf32>, vector<3x128xf32> -> vector<8x128xf32>
    %c3 = arith.constant 3 : index
    %c0_28 = arith.constant 0 : index
    %67 = vector.load %arg5[%c3, %c0_28] : memref<4x128xf32, #tpu.memory_space<vmem>>, vector<1x128xf32>
    %68 = vector.broadcast %67 : vector<1x128xf32> to vector<8x128xf32>
    %69 = arith.mulf %64, %68 : vector<8x128xf32>
    %70 = arith.addf %61, %69 : vector<8x128xf32>
    %c3_29 = arith.constant 3 : index
    %c0_30 = arith.constant 0 : index
    %71 = vector.load %arg6[%c3_29, %c0_30] : memref<4x128xf32, #tpu.memory_space<vmem>>, vector<1x128xf32>
    %72 = vector.broadcast %71 : vector<1x128xf32> to vector<8x128xf32>
    %73 = arith.mulf %66, %72 : vector<8x128xf32>
    %74 = arith.addf %70, %73 : vector<8x128xf32>
    %cst_31 = arith.constant 0.000000e+00 : f32
    %75 = vector.broadcast %cst_31 : f32 to vector<8x128xf32>
    %76 = arith.subf %75, %74 : vector<8x128xf32>
    %77 = math.exp %76 : vector<8x128xf32>
    %cst_32 = arith.constant 1.000000e+00 : f32
    %78 = vector.broadcast %cst_32 : f32 to vector<8x128xf32>
    %79 = arith.addf %78, %77 : vector<8x128xf32>
    %cst_33 = arith.constant 1.000000e+00 : f32
    %80 = vector.broadcast %cst_33 : f32 to vector<8x128xf32>
    %81 = arith.divf %80, %79 : vector<8x128xf32>
    %82 = arith.mulf %74, %81 : vector<8x128xf32>
    %c0_34 = arith.constant 0 : index
    %c0_35 = arith.constant 0 : index
    %83 = vector.load %arg8[%c0_34, %c0_35] : memref<128x192xf32, #tpu.memory_space<vmem>>, vector<128x192xf32>
    %cst_36 = arith.constant dense<0.000000e+00> : vector<8x192xf32>
    %84 = tpu.matmul %82, %83, %cst_36 {dimension_numbers = #tpu.dot_dimension_numbers<[1], [0], [0], [1], [0, 0, 1, 1], [], []>} : vector<8x128xf32>, vector<128x192xf32>, vector<8x192xf32> -> vector<8x192xf32>
    %85 = vector.extract_strided_slice %84 {offsets = [0, 0], sizes = [8, 128], strides = [1, 1]} : vector<8x192xf32> to vector<8x128xf32>
    %c0_37 = arith.constant 0 : index
    %c0_38 = arith.constant 0 : index
    %86 = vector.load %arg9[%c0_37, %c0_38] : memref<1x128xf32, #tpu.memory_space<vmem>>, vector<1x128xf32>
    %87 = vector.broadcast %86 : vector<1x128xf32> to vector<8x128xf32>
    %88 = arith.addf %85, %87 : vector<8x128xf32>
    %cst_39 = arith.constant 0.000000e+00 : f32
    %89 = vector.broadcast %cst_39 : f32 to vector<8x128xf32>
    %90 = arith.maximumf %88, %89 : vector<8x128xf32>
    %91 = math.absf %88 : vector<8x128xf32>
    %cst_40 = arith.constant 0.000000e+00 : f32
    %92 = vector.broadcast %cst_40 : f32 to vector<8x128xf32>
    %93 = arith.subf %92, %91 : vector<8x128xf32>
    %94 = math.exp %93 : vector<8x128xf32>
    %cst_41 = arith.constant 1.000000e+00 : f32
    %95 = vector.broadcast %cst_41 : f32 to vector<8x128xf32>
    %96 = arith.addf %95, %94 : vector<8x128xf32>
    %97 = math.log %96 : vector<8x128xf32>
    %98 = arith.addf %90, %97 : vector<8x128xf32>
    %99 = vector.extract_strided_slice %84 {offsets = [0, 128], sizes = [8, 16], strides = [1, 1]} : vector<8x192xf32> to vector<8x16xf32>
    %100 = vector.extract_strided_slice %84 {offsets = [0, 144], sizes = [8, 16], strides = [1, 1]} : vector<8x192xf32> to vector<8x16xf32>
    %101 = vector.extract_strided_slice %84 {offsets = [0, 160], sizes = [8, 16], strides = [1, 1]} : vector<8x192xf32> to vector<8x16xf32>
    %102 = vector.extract_strided_slice %84 {offsets = [0, 176], sizes = [8, 16], strides = [1, 1]} : vector<8x192xf32> to vector<8x16xf32>
    %c0_42 = arith.constant 0 : index
    %c0_43 = arith.constant 0 : index
    %103 = vector.load %arg10[%c0_42, %c0_43] : memref<32x64xf32, #tpu.memory_space<vmem>>, vector<32x64xf32>
    %104 = math.exp %103 : vector<32x64xf32>
    %cst_44 = arith.constant 0.000000e+00 : f32
    %105 = vector.broadcast %cst_44 : f32 to vector<32x64xf32>
    %106 = arith.subf %105, %104 : vector<32x64xf32>
    %107 = vector.extract_strided_slice %106 {offsets = [0, 0], sizes = [16, 64], strides = [1, 1]} : vector<32x64xf32> to vector<16x64xf32>
    %108 = vector.extract_strided_slice %106 {offsets = [16, 0], sizes = [16, 64], strides = [1, 1]} : vector<32x64xf32> to vector<16x64xf32>
    %109 = vector.extract_strided_slice %98 {offsets = [0, 0], sizes = [8, 64], strides = [1, 1]} : vector<8x128xf32> to vector<8x64xf32>
    %110 = vector.extract_strided_slice %82 {offsets = [0, 0], sizes = [8, 64], strides = [1, 1]} : vector<8x128xf32> to vector<8x64xf32>
    %111 = arith.mulf %109, %110 : vector<8x64xf32>
    %cst_45 = arith.constant 0.000000e+00 : f32
    %112 = vector.broadcast %cst_45 : f32 to vector<16x64xf32>
    %113 = vector.shape_cast %109 : vector<8x64xf32> to vector<8x1x64xf32>
    %114 = vector.shape_cast %107 : vector<16x64xf32> to vector<1x16x64xf32>
    %115 = vector.broadcast %113 : vector<8x1x64xf32> to vector<8x16x64xf32>
    %116 = vector.broadcast %114 : vector<1x16x64xf32> to vector<8x16x64xf32>
    %117 = arith.mulf %115, %116 : vector<8x16x64xf32>
    %118 = math.exp %117 : vector<8x16x64xf32>
    %c0_46 = arith.constant 0 : index
    %c0_47 = arith.constant 0 : index
    %c0_48 = arith.constant 0 : index
    %119 = vector.load %arg20[%c0_46, %c0_47, %c0_48] : memref<8x16x64xf32, #tpu.memory_space<vmem>>, vector<8x16x64xf32>
    tpu.vector_store %arg20[%c0_46, %c0_47, %c0_48], %118 {strides = array<i32>} : memref<8x16x64xf32, #tpu.memory_space<vmem>>, vector<8x16x64xf32>,
    %120 = vector.shape_cast %111 : vector<8x64xf32> to vector<8x1x64xf32>
    %121 = vector.shape_cast %99 : vector<8x16xf32> to vector<8x16x1xf32>
    %122 = vector.broadcast %120 : vector<8x1x64xf32> to vector<8x16x64xf32>
    %123 = vector.broadcast %121 : vector<8x16x1xf32> to vector<8x16x64xf32>
    %124 = arith.mulf %122, %123 : vector<8x16x64xf32>
    %c0_49 = arith.constant 0 : index
    %c0_50 = arith.constant 0 : index
    %c0_51 = arith.constant 0 : index
    %125 = vector.load %arg21[%c0_49, %c0_50, %c0_51] : memref<8x16x64xf32, #tpu.memory_space<vmem>>, vector<8x16x64xf32>
    tpu.vector_store %arg21[%c0_49, %c0_50, %c0_51], %124 {strides = array<i32>} : memref<8x16x64xf32, #tpu.memory_space<vmem>>, vector<8x16x64xf32>,
    %c0_i32 = arith.constant 0 : i32
    %126 = arith.index_cast %c0_i32 : i32 to index
    %c0_52 = arith.constant 0 : index
    %c0_53 = arith.constant 0 : index
    %127 = vector.load %arg20[%126, %c0_52, %c0_53] : memref<8x16x64xf32, #tpu.memory_space<vmem>>, vector<1x16x64xf32>
    %128 = vector.shape_cast %127 : vector<1x16x64xf32> to vector<16x64xf32>
    %129 = arith.mulf %128, %112 : vector<16x64xf32>
    %130 = arith.index_cast %c0_i32 : i32 to index
    %c0_54 = arith.constant 0 : index
    %c0_55 = arith.constant 0 : index
    %131 = vector.load %arg21[%130, %c0_54, %c0_55] : memref<8x16x64xf32, #tpu.memory_space<vmem>>, vector<1x16x64xf32>
    %132 = vector.shape_cast %131 : vector<1x16x64xf32> to vector<16x64xf32>
    %133 = arith.addf %129, %132 : vector<16x64xf32>
    %134 = arith.index_cast %c0_i32 : i32 to index
    %c0_56 = arith.constant 0 : index
    %c0_57 = arith.constant 0 : index
    %135 = vector.load %arg22[%134, %c0_56, %c0_57] : memref<8x16x64xf32, #tpu.memory_space<vmem>>, vector<1x16x64xf32>
    %136 = vector.shape_cast %135 : vector<1x16x64xf32> to vector<16x64xf32>
    %137 = vector.shape_cast %133 : vector<16x64xf32> to vector<1x16x64xf32>
    tpu.vector_store %arg22[%134, %c0_56, %c0_57], %137 {strides = array<i32>} : memref<8x16x64xf32, #tpu.memory_space<vmem>>, vector<1x16x64xf32>,
    %c1_i32 = arith.constant 1 : i32
    %138 = arith.index_cast %c1_i32 : i32 to index
    %c0_58 = arith.constant 0 : index
    %c0_59 = arith.constant 0 : index
    %139 = vector.load %arg20[%138, %c0_58, %c0_59] : memref<8x16x64xf32, #tpu.memory_space<vmem>>, vector<1x16x64xf32>
    %140 = vector.shape_cast %139 : vector<1x16x64xf32> to vector<16x64xf32>
    %141 = arith.mulf %140, %133 : vector<16x64xf32>
    %142 = arith.index_cast %c1_i32 : i32 to index
    %c0_60 = arith.constant 0 : index
    %c0_61 = arith.constant 0 : index
    %143 = vector.load %arg21[%142, %c0_60, %c0_61] : memref<8x16x64xf32, #tpu.memory_space<vmem>>, vector<1x16x64xf32>
    %144 = vector.shape_cast %143 : vector<1x16x64xf32> to vector<16x64xf32>
    %145 = arith.addf %141, %144 : vector<16x64xf32>
    %146 = arith.index_cast %c1_i32 : i32 to index
    %c0_62 = arith.constant 0 : index
    %c0_63 = arith.constant 0 : index
    %147 = vector.load %arg22[%146, %c0_62, %c0_63] : memref<8x16x64xf32, #tpu.memory_space<vmem>>, vector<1x16x64xf32>
    %148 = vector.shape_cast %147 : vector<1x16x64xf32> to vector<16x64xf32>
    %149 = vector.shape_cast %145 : vector<16x64xf32> to vector<1x16x64xf32>
    tpu.vector_store %arg22[%146, %c0_62, %c0_63], %149 {strides = array<i32>} : memref<8x16x64xf32, #tpu.memory_space<vmem>>, vector<1x16x64xf32>,
    %c2_i32 = arith.constant 2 : i32
    %150 = arith.index_cast %c2_i32 : i32 to index
    %c0_64 = arith.constant 0 : index
    %c0_65 = arith.constant 0 : index
    %151 = vector.load %arg20[%150, %c0_64, %c0_65] : memref<8x16x64xf32, #tpu.memory_space<vmem>>, vector<1x16x64xf32>
    %152 = vector.shape_cast %151 : vector<1x16x64xf32> to vector<16x64xf32>
    %153 = arith.mulf %152, %145 : vector<16x64xf32>
    %154 = arith.index_cast %c2_i32 : i32 to index
    %c0_66 = arith.constant 0 : index
    %c0_67 = arith.constant 0 : index
    %155 = vector.load %arg21[%154, %c0_66, %c0_67] : memref<8x16x64xf32, #tpu.memory_space<vmem>>, vector<1x16x64xf32>
    %156 = vector.shape_cast %155 : vector<1x16x64xf32> to vector<16x64xf32>
    %157 = arith.addf %153, %156 : vector<16x64xf32>
    %158 = arith.index_cast %c2_i32 : i32 to index
    %c0_68 = arith.constant 0 : index
    %c0_69 = arith.constant 0 : index
    %159 = vector.load %arg22[%158, %c0_68, %c0_69] : memref<8x16x64xf32, #tpu.memory_space<vmem>>, vector<1x16x64xf32>
    %160 = vector.shape_cast %159 : vector<1x16x64xf32> to vector<16x64xf32>
    %161 = vector.shape_cast %157 : vector<16x64xf32> to vector<1x16x64xf32>
    tpu.vector_store %arg22[%158, %c0_68, %c0_69], %161 {strides = array<i32>} : memref<8x16x64xf32, #tpu.memory_space<vmem>>, vector<1x16x64xf32>,
    %c3_i32 = arith.constant 3 : i32
    %162 = arith.index_cast %c3_i32 : i32 to index
    %c0_70 = arith.constant 0 : index
    %c0_71 = arith.constant 0 : index
    %163 = vector.load %arg20[%162, %c0_70, %c0_71] : memref<8x16x64xf32, #tpu.memory_space<vmem>>, vector<1x16x64xf32>
    %164 = vector.shape_cast %163 : vector<1x16x64xf32> to vector<16x64xf32>
    %165 = arith.mulf %164, %157 : vector<16x64xf32>
    %166 = arith.index_cast %c3_i32 : i32 to index
    %c0_72 = arith.constant 0 : index
    %c0_73 = arith.constant 0 : index
    %167 = vector.load %arg21[%166, %c0_72, %c0_73] : memref<8x16x64xf32, #tpu.memory_space<vmem>>, vector<1x16x64xf32>
    %168 = vector.shape_cast %167 : vector<1x16x64xf32> to vector<16x64xf32>
    %169 = arith.addf %165, %168 : vector<16x64xf32>
    %170 = arith.index_cast %c3_i32 : i32 to index
    %c0_74 = arith.constant 0 : index
    %c0_75 = arith.constant 0 : index
    %171 = vector.load %arg22[%170, %c0_74, %c0_75] : memref<8x16x64xf32, #tpu.memory_space<vmem>>, vector<1x16x64xf32>
    %172 = vector.shape_cast %171 : vector<1x16x64xf32> to vector<16x64xf32>
    %173 = vector.shape_cast %169 : vector<16x64xf32> to vector<1x16x64xf32>
    tpu.vector_store %arg22[%170, %c0_74, %c0_75], %173 {strides = array<i32>} : memref<8x16x64xf32, #tpu.memory_space<vmem>>, vector<1x16x64xf32>,
    %c4_i32 = arith.constant 4 : i32
    %174 = arith.index_cast %c4_i32 : i32 to index
    %c0_76 = arith.constant 0 : index
    %c0_77 = arith.constant 0 : index
    %175 = vector.load %arg20[%174, %c0_76, %c0_77] : memref<8x16x64xf32, #tpu.memory_space<vmem>>, vector<1x16x64xf32>
    %176 = vector.shape_cast %175 : vector<1x16x64xf32> to vector<16x64xf32>
    %177 = arith.mulf %176, %169 : vector<16x64xf32>
    %178 = arith.index_cast %c4_i32 : i32 to index
    %c0_78 = arith.constant 0 : index
    %c0_79 = arith.constant 0 : index
    %179 = vector.load %arg21[%178, %c0_78, %c0_79] : memref<8x16x64xf32, #tpu.memory_space<vmem>>, vector<1x16x64xf32>
    %180 = vector.shape_cast %179 : vector<1x16x64xf32> to vector<16x64xf32>
    %181 = arith.addf %177, %180 : vector<16x64xf32>
    %182 = arith.index_cast %c4_i32 : i32 to index
    %c0_80 = arith.constant 0 : index
    %c0_81 = arith.constant 0 : index
    %183 = vector.load %arg22[%182, %c0_80, %c0_81] : memref<8x16x64xf32, #tpu.memory_space<vmem>>, vector<1x16x64xf32>
    %184 = vector.shape_cast %183 : vector<1x16x64xf32> to vector<16x64xf32>
    %185 = vector.shape_cast %181 : vector<16x64xf32> to vector<1x16x64xf32>
    tpu.vector_store %arg22[%182, %c0_80, %c0_81], %185 {strides = array<i32>} : memref<8x16x64xf32, #tpu.memory_space<vmem>>, vector<1x16x64xf32>,
    %c5_i32 = arith.constant 5 : i32
    %186 = arith.index_cast %c5_i32 : i32 to index
    %c0_82 = arith.constant 0 : index
    %c0_83 = arith.constant 0 : index
    %187 = vector.load %arg20[%186, %c0_82, %c0_83] : memref<8x16x64xf32, #tpu.memory_space<vmem>>, vector<1x16x64xf32>
    %188 = vector.shape_cast %187 : vector<1x16x64xf32> to vector<16x64xf32>
    %189 = arith.mulf %188, %181 : vector<16x64xf32>
    %190 = arith.index_cast %c5_i32 : i32 to index
    %c0_84 = arith.constant 0 : index
    %c0_85 = arith.constant 0 : index
    %191 = vector.load %arg21[%190, %c0_84, %c0_85] : memref<8x16x64xf32, #tpu.memory_space<vmem>>, vector<1x16x64xf32>
    %192 = vector.shape_cast %191 : vector<1x16x64xf32> to vector<16x64xf32>
    %193 = arith.addf %189, %192 : vector<16x64xf32>
    %194 = arith.index_cast %c5_i32 : i32 to index
    %c0_86 = arith.constant 0 : index
    %c0_87 = arith.constant 0 : index
    %195 = vector.load %arg22[%194, %c0_86, %c0_87] : memref<8x16x64xf32, #tpu.memory_space<vmem>>, vector<1x16x64xf32>
    %196 = vector.shape_cast %195 : vector<1x16x64xf32> to vector<16x64xf32>
    %197 = vector.shape_cast %193 : vector<16x64xf32> to vector<1x16x64xf32>
    tpu.vector_store %arg22[%194, %c0_86, %c0_87], %197 {strides = array<i32>} : memref<8x16x64xf32, #tpu.memory_space<vmem>>, vector<1x16x64xf32>,
    %c6_i32 = arith.constant 6 : i32
    %198 = arith.index_cast %c6_i32 : i32 to index
    %c0_88 = arith.constant 0 : index
    %c0_89 = arith.constant 0 : index
    %199 = vector.load %arg20[%198, %c0_88, %c0_89] : memref<8x16x64xf32, #tpu.memory_space<vmem>>, vector<1x16x64xf32>
    %200 = vector.shape_cast %199 : vector<1x16x64xf32> to vector<16x64xf32>
    %201 = arith.mulf %200, %193 : vector<16x64xf32>
    %202 = arith.index_cast %c6_i32 : i32 to index
    %c0_90 = arith.constant 0 : index
    %c0_91 = arith.constant 0 : index
    %203 = vector.load %arg21[%202, %c0_90, %c0_91] : memref<8x16x64xf32, #tpu.memory_space<vmem>>, vector<1x16x64xf32>
    %204 = vector.shape_cast %203 : vector<1x16x64xf32> to vector<16x64xf32>
    %205 = arith.addf %201, %204 : vector<16x64xf32>
    %206 = arith.index_cast %c6_i32 : i32 to index
    %c0_92 = arith.constant 0 : index
    %c0_93 = arith.constant 0 : index
    %207 = vector.load %arg22[%206, %c0_92, %c0_93] : memref<8x16x64xf32, #tpu.memory_space<vmem>>, vector<1x16x64xf32>
    %208 = vector.shape_cast %207 : vector<1x16x64xf32> to vector<16x64xf32>
    %209 = vector.shape_cast %205 : vector<16x64xf32> to vector<1x16x64xf32>
    tpu.vector_store %arg22[%206, %c0_92, %c0_93], %209 {strides = array<i32>} : memref<8x16x64xf32, #tpu.memory_space<vmem>>, vector<1x16x64xf32>,
    %c7_i32 = arith.constant 7 : i32
    %210 = arith.index_cast %c7_i32 : i32 to index
    %c0_94 = arith.constant 0 : index
    %c0_95 = arith.constant 0 : index
    %211 = vector.load %arg20[%210, %c0_94, %c0_95] : memref<8x16x64xf32, #tpu.memory_space<vmem>>, vector<1x16x64xf32>
    %212 = vector.shape_cast %211 : vector<1x16x64xf32> to vector<16x64xf32>
    %213 = arith.mulf %212, %205 : vector<16x64xf32>
    %214 = arith.index_cast %c7_i32 : i32 to index
    %c0_96 = arith.constant 0 : index
    %c0_97 = arith.constant 0 : index
    %215 = vector.load %arg21[%214, %c0_96, %c0_97] : memref<8x16x64xf32, #tpu.memory_space<vmem>>, vector<1x16x64xf32>
    %216 = vector.shape_cast %215 : vector<1x16x64xf32> to vector<16x64xf32>
    %217 = arith.addf %213, %216 : vector<16x64xf32>
    %218 = arith.index_cast %c7_i32 : i32 to index
    %c0_98 = arith.constant 0 : index
    %c0_99 = arith.constant 0 : index
    %219 = vector.load %arg22[%218, %c0_98, %c0_99] : memref<8x16x64xf32, #tpu.memory_space<vmem>>, vector<1x16x64xf32>
    %220 = vector.shape_cast %219 : vector<1x16x64xf32> to vector<16x64xf32>
    %221 = vector.shape_cast %217 : vector<16x64xf32> to vector<1x16x64xf32>
    tpu.vector_store %arg22[%218, %c0_98, %c0_99], %221 {strides = array<i32>} : memref<8x16x64xf32, #tpu.memory_space<vmem>>, vector<1x16x64xf32>,
    %c8_i32 = arith.constant 8 : i32
    %c0_100 = arith.constant 0 : index
    %c0_101 = arith.constant 0 : index
    %c0_102 = arith.constant 0 : index
    %222 = vector.load %arg22[%c0_100, %c0_101, %c0_102] : memref<8x16x64xf32, #tpu.memory_space<vmem>>, vector<8x16x64xf32>
    %223 = vector.shape_cast %101 : vector<8x16xf32> to vector<8x16x1xf32>
    %224 = vector.broadcast %223 : vector<8x16x1xf32> to vector<8x16x64xf32>
    %225 = arith.mulf %222, %224 : vector<8x16x64xf32>
    %cst_103 = arith.constant dense<0.000000e+00> : vector<8x64xf32>
    %226 = vector.multi_reduction <add>, %225, %cst_103 [1] : vector<8x16x64xf32> to vector<8x64xf32>
    %227 = vector.extract_strided_slice %98 {offsets = [0, 64], sizes = [8, 64], strides = [1, 1]} : vector<8x128xf32> to vector<8x64xf32>
    %228 = vector.extract_strided_slice %82 {offsets = [0, 64], sizes = [8, 64], strides = [1, 1]} : vector<8x128xf32> to vector<8x64xf32>
    %229 = arith.mulf %227, %228 : vector<8x64xf32>
    %cst_104 = arith.constant 0.000000e+00 : f32
    %230 = vector.broadcast %cst_104 : f32 to vector<16x64xf32>
    %231 = vector.shape_cast %227 : vector<8x64xf32> to vector<8x1x64xf32>
    %232 = vector.shape_cast %108 : vector<16x64xf32> to vector<1x16x64xf32>
    %233 = vector.broadcast %231 : vector<8x1x64xf32> to vector<8x16x64xf32>
    %234 = vector.broadcast %232 : vector<1x16x64xf32> to vector<8x16x64xf32>
    %235 = arith.mulf %233, %234 : vector<8x16x64xf32>
    %236 = math.exp %235 : vector<8x16x64xf32>
    %c0_105 = arith.constant 0 : index
    %c0_106 = arith.constant 0 : index
    %c0_107 = arith.constant 0 : index
    %237 = vector.load %arg20[%c0_105, %c0_106, %c0_107] : memref<8x16x64xf32, #tpu.memory_space<vmem>>, vector<8x16x64xf32>
    tpu.vector_store %arg20[%c0_105, %c0_106, %c0_107], %236 {strides = array<i32>} : memref<8x16x64xf32, #tpu.memory_space<vmem>>, vector<8x16x64xf32>,
    %238 = vector.shape_cast %229 : vector<8x64xf32> to vector<8x1x64xf32>
    %239 = vector.shape_cast %100 : vector<8x16xf32> to vector<8x16x1xf32>
    %240 = vector.broadcast %238 : vector<8x1x64xf32> to vector<8x16x64xf32>
    %241 = vector.broadcast %239 : vector<8x16x1xf32> to vector<8x16x64xf32>
    %242 = arith.mulf %240, %241 : vector<8x16x64xf32>
    %c0_108 = arith.constant 0 : index
    %c0_109 = arith.constant 0 : index
    %c0_110 = arith.constant 0 : index
    %243 = vector.load %arg21[%c0_108, %c0_109, %c0_110] : memref<8x16x64xf32, #tpu.memory_space<vmem>>, vector<8x16x64xf32>
    tpu.vector_store %arg21[%c0_108, %c0_109, %c0_110], %242 {strides = array<i32>} : memref<8x16x64xf32, #tpu.memory_space<vmem>>, vector<8x16x64xf32>,
    %c0_i32_111 = arith.constant 0 : i32
    %c7_i32_112 = arith.constant 7 : i32
    %244 = arith.subi %c7_i32_112, %c0_i32_111 : i32
    %245 = arith.index_cast %244 : i32 to index
    %c0_113 = arith.constant 0 : index
    %c0_114 = arith.constant 0 : index
    %246 = vector.load %arg20[%245, %c0_113, %c0_114] : memref<8x16x64xf32, #tpu.memory_space<vmem>>, vector<1x16x64xf32>
    %247 = vector.shape_cast %246 : vector<1x16x64xf32> to vector<16x64xf32>
    %248 = arith.mulf %247, %230 : vector<16x64xf32>
    %249 = arith.index_cast %244 : i32 to index
    %c0_115 = arith.constant 0 : index
    %c0_116 = arith.constant 0 : index
    %250 = vector.load %arg21[%249, %c0_115, %c0_116] : memref<8x16x64xf32, #tpu.memory_space<vmem>>, vector<1x16x64xf32>
    %251 = vector.shape_cast %250 : vector<1x16x64xf32> to vector<16x64xf32>
    %252 = arith.addf %248, %251 : vector<16x64xf32>
    %253 = arith.index_cast %244 : i32 to index
    %c0_117 = arith.constant 0 : index
    %c0_118 = arith.constant 0 : index
    %254 = vector.load %arg22[%253, %c0_117, %c0_118] : memref<8x16x64xf32, #tpu.memory_space<vmem>>, vector<1x16x64xf32>
    %255 = vector.shape_cast %254 : vector<1x16x64xf32> to vector<16x64xf32>
    %256 = vector.shape_cast %252 : vector<16x64xf32> to vector<1x16x64xf32>
    tpu.vector_store %arg22[%253, %c0_117, %c0_118], %256 {strides = array<i32>} : memref<8x16x64xf32, #tpu.memory_space<vmem>>, vector<1x16x64xf32>,
    %c1_i32_119 = arith.constant 1 : i32
    %c7_i32_120 = arith.constant 7 : i32
    %257 = arith.subi %c7_i32_120, %c1_i32_119 : i32
    %258 = arith.index_cast %257 : i32 to index
    %c0_121 = arith.constant 0 : index
    %c0_122 = arith.constant 0 : index
    %259 = vector.load %arg20[%258, %c0_121, %c0_122] : memref<8x16x64xf32, #tpu.memory_space<vmem>>, vector<1x16x64xf32>
    %260 = vector.shape_cast %259 : vector<1x16x64xf32> to vector<16x64xf32>
    %261 = arith.mulf %260, %252 : vector<16x64xf32>
    %262 = arith.index_cast %257 : i32 to index
    %c0_123 = arith.constant 0 : index
    %c0_124 = arith.constant 0 : index
    %263 = vector.load %arg21[%262, %c0_123, %c0_124] : memref<8x16x64xf32, #tpu.memory_space<vmem>>, vector<1x16x64xf32>
    %264 = vector.shape_cast %263 : vector<1x16x64xf32> to vector<16x64xf32>
    %265 = arith.addf %261, %264 : vector<16x64xf32>
    %266 = arith.index_cast %257 : i32 to index
    %c0_125 = arith.constant 0 : index
    %c0_126 = arith.constant 0 : index
    %267 = vector.load %arg22[%266, %c0_125, %c0_126] : memref<8x16x64xf32, #tpu.memory_space<vmem>>, vector<1x16x64xf32>
    %268 = vector.shape_cast %267 : vector<1x16x64xf32> to vector<16x64xf32>
    %269 = vector.shape_cast %265 : vector<16x64xf32> to vector<1x16x64xf32>
    tpu.vector_store %arg22[%266, %c0_125, %c0_126], %269 {strides = array<i32>} : memref<8x16x64xf32, #tpu.memory_space<vmem>>, vector<1x16x64xf32>,
    %c2_i32_127 = arith.constant 2 : i32
    %c7_i32_128 = arith.constant 7 : i32
    %270 = arith.subi %c7_i32_128, %c2_i32_127 : i32
    %271 = arith.index_cast %270 : i32 to index
    %c0_129 = arith.constant 0 : index
    %c0_130 = arith.constant 0 : index
    %272 = vector.load %arg20[%271, %c0_129, %c0_130] : memref<8x16x64xf32, #tpu.memory_space<vmem>>, vector<1x16x64xf32>
    %273 = vector.shape_cast %272 : vector<1x16x64xf32> to vector<16x64xf32>
    %274 = arith.mulf %273, %265 : vector<16x64xf32>
    %275 = arith.index_cast %270 : i32 to index
    %c0_131 = arith.constant 0 : index
    %c0_132 = arith.constant 0 : index
    %276 = vector.load %arg21[%275, %c0_131, %c0_132] : memref<8x16x64xf32, #tpu.memory_space<vmem>>, vector<1x16x64xf32>
    %277 = vector.shape_cast %276 : vector<1x16x64xf32> to vector<16x64xf32>
    %278 = arith.addf %274, %277 : vector<16x64xf32>
    %279 = arith.index_cast %270 : i32 to index
    %c0_133 = arith.constant 0 : index
    %c0_134 = arith.constant 0 : index
    %280 = vector.load %arg22[%279, %c0_133, %c0_134] : memref<8x16x64xf32, #tpu.memory_space<vmem>>, vector<1x16x64xf32>
    %281 = vector.shape_cast %280 : vector<1x16x64xf32> to vector<16x64xf32>
    %282 = vector.shape_cast %278 : vector<16x64xf32> to vector<1x16x64xf32>
    tpu.vector_store %arg22[%279, %c0_133, %c0_134], %282 {strides = array<i32>} : memref<8x16x64xf32, #tpu.memory_space<vmem>>, vector<1x16x64xf32>,
    %c3_i32_135 = arith.constant 3 : i32
    %c7_i32_136 = arith.constant 7 : i32
    %283 = arith.subi %c7_i32_136, %c3_i32_135 : i32
    %284 = arith.index_cast %283 : i32 to index
    %c0_137 = arith.constant 0 : index
    %c0_138 = arith.constant 0 : index
    %285 = vector.load %arg20[%284, %c0_137, %c0_138] : memref<8x16x64xf32, #tpu.memory_space<vmem>>, vector<1x16x64xf32>
    %286 = vector.shape_cast %285 : vector<1x16x64xf32> to vector<16x64xf32>
    %287 = arith.mulf %286, %278 : vector<16x64xf32>
    %288 = arith.index_cast %283 : i32 to index
    %c0_139 = arith.constant 0 : index
    %c0_140 = arith.constant 0 : index
    %289 = vector.load %arg21[%288, %c0_139, %c0_140] : memref<8x16x64xf32, #tpu.memory_space<vmem>>, vector<1x16x64xf32>
    %290 = vector.shape_cast %289 : vector<1x16x64xf32> to vector<16x64xf32>
    %291 = arith.addf %287, %290 : vector<16x64xf32>
    %292 = arith.index_cast %283 : i32 to index
    %c0_141 = arith.constant 0 : index
    %c0_142 = arith.constant 0 : index
    %293 = vector.load %arg22[%292, %c0_141, %c0_142] : memref<8x16x64xf32, #tpu.memory_space<vmem>>, vector<1x16x64xf32>
    %294 = vector.shape_cast %293 : vector<1x16x64xf32> to vector<16x64xf32>
    %295 = vector.shape_cast %291 : vector<16x64xf32> to vector<1x16x64xf32>
    tpu.vector_store %arg22[%292, %c0_141, %c0_142], %295 {strides = array<i32>} : memref<8x16x64xf32, #tpu.memory_space<vmem>>, vector<1x16x64xf32>,
    %c4_i32_143 = arith.constant 4 : i32
    %c7_i32_144 = arith.constant 7 : i32
    %296 = arith.subi %c7_i32_144, %c4_i32_143 : i32
    %297 = arith.index_cast %296 : i32 to index
    %c0_145 = arith.constant 0 : index
    %c0_146 = arith.constant 0 : index
    %298 = vector.load %arg20[%297, %c0_145, %c0_146] : memref<8x16x64xf32, #tpu.memory_space<vmem>>, vector<1x16x64xf32>
    %299 = vector.shape_cast %298 : vector<1x16x64xf32> to vector<16x64xf32>
    %300 = arith.mulf %299, %291 : vector<16x64xf32>
    %301 = arith.index_cast %296 : i32 to index
    %c0_147 = arith.constant 0 : index
    %c0_148 = arith.constant 0 : index
    %302 = vector.load %arg21[%301, %c0_147, %c0_148] : memref<8x16x64xf32, #tpu.memory_space<vmem>>, vector<1x16x64xf32>
    %303 = vector.shape_cast %302 : vector<1x16x64xf32> to vector<16x64xf32>
    %304 = arith.addf %300, %303 : vector<16x64xf32>
    %305 = arith.index_cast %296 : i32 to index
    %c0_149 = arith.constant 0 : index
    %c0_150 = arith.constant 0 : index
    %306 = vector.load %arg22[%305, %c0_149, %c0_150] : memref<8x16x64xf32, #tpu.memory_space<vmem>>, vector<1x16x64xf32>
    %307 = vector.shape_cast %306 : vector<1x16x64xf32> to vector<16x64xf32>
    %308 = vector.shape_cast %304 : vector<16x64xf32> to vector<1x16x64xf32>
    tpu.vector_store %arg22[%305, %c0_149, %c0_150], %308 {strides = array<i32>} : memref<8x16x64xf32, #tpu.memory_space<vmem>>, vector<1x16x64xf32>,
    %c5_i32_151 = arith.constant 5 : i32
    %c7_i32_152 = arith.constant 7 : i32
    %309 = arith.subi %c7_i32_152, %c5_i32_151 : i32
    %310 = arith.index_cast %309 : i32 to index
    %c0_153 = arith.constant 0 : index
    %c0_154 = arith.constant 0 : index
    %311 = vector.load %arg20[%310, %c0_153, %c0_154] : memref<8x16x64xf32, #tpu.memory_space<vmem>>, vector<1x16x64xf32>
    %312 = vector.shape_cast %311 : vector<1x16x64xf32> to vector<16x64xf32>
    %313 = arith.mulf %312, %304 : vector<16x64xf32>
    %314 = arith.index_cast %309 : i32 to index
    %c0_155 = arith.constant 0 : index
    %c0_156 = arith.constant 0 : index
    %315 = vector.load %arg21[%314, %c0_155, %c0_156] : memref<8x16x64xf32, #tpu.memory_space<vmem>>, vector<1x16x64xf32>
    %316 = vector.shape_cast %315 : vector<1x16x64xf32> to vector<16x64xf32>
    %317 = arith.addf %313, %316 : vector<16x64xf32>
    %318 = arith.index_cast %309 : i32 to index
    %c0_157 = arith.constant 0 : index
    %c0_158 = arith.constant 0 : index
    %319 = vector.load %arg22[%318, %c0_157, %c0_158] : memref<8x16x64xf32, #tpu.memory_space<vmem>>, vector<1x16x64xf32>
    %320 = vector.shape_cast %319 : vector<1x16x64xf32> to vector<16x64xf32>
    %321 = vector.shape_cast %317 : vector<16x64xf32> to vector<1x16x64xf32>
    tpu.vector_store %arg22[%318, %c0_157, %c0_158], %321 {strides = array<i32>} : memref<8x16x64xf32, #tpu.memory_space<vmem>>, vector<1x16x64xf32>,
    %c6_i32_159 = arith.constant 6 : i32
    %c7_i32_160 = arith.constant 7 : i32
    %322 = arith.subi %c7_i32_160, %c6_i32_159 : i32
    %323 = arith.index_cast %322 : i32 to index
    %c0_161 = arith.constant 0 : index
    %c0_162 = arith.constant 0 : index
    %324 = vector.load %arg20[%323, %c0_161, %c0_162] : memref<8x16x64xf32, #tpu.memory_space<vmem>>, vector<1x16x64xf32>
    %325 = vector.shape_cast %324 : vector<1x16x64xf32> to vector<16x64xf32>
    %326 = arith.mulf %325, %317 : vector<16x64xf32>
    %327 = arith.index_cast %322 : i32 to index
    %c0_163 = arith.constant 0 : index
    %c0_164 = arith.constant 0 : index
    %328 = vector.load %arg21[%327, %c0_163, %c0_164] : memref<8x16x64xf32, #tpu.memory_space<vmem>>, vector<1x16x64xf32>
    %329 = vector.shape_cast %328 : vector<1x16x64xf32> to vector<16x64xf32>
    %330 = arith.addf %326, %329 : vector<16x64xf32>
    %331 = arith.index_cast %322 : i32 to index
    %c0_165 = arith.constant 0 : index
    %c0_166 = arith.constant 0 : index
    %332 = vector.load %arg22[%331, %c0_165, %c0_166] : memref<8x16x64xf32, #tpu.memory_space<vmem>>, vector<1x16x64xf32>
    %333 = vector.shape_cast %332 : vector<1x16x64xf32> to vector<16x64xf32>
    %334 = vector.shape_cast %330 : vector<16x64xf32> to vector<1x16x64xf32>
    tpu.vector_store %arg22[%331, %c0_165, %c0_166], %334 {strides = array<i32>} : memref<8x16x64xf32, #tpu.memory_space<vmem>>, vector<1x16x64xf32>,
    %c7_i32_167 = arith.constant 7 : i32
    %c7_i32_168 = arith.constant 7 : i32
    %335 = arith.subi %c7_i32_168, %c7_i32_167 : i32
    %336 = arith.index_cast %335 : i32 to index
    %c0_169 = arith.constant 0 : index
    %c0_170 = arith.constant 0 : index
    %337 = vector.load %arg20[%336, %c0_169, %c0_170] : memref<8x16x64xf32, #tpu.memory_space<vmem>>, vector<1x16x64xf32>
    %338 = vector.shape_cast %337 : vector<1x16x64xf32> to vector<16x64xf32>
    %339 = arith.mulf %338, %330 : vector<16x64xf32>
    %340 = arith.index_cast %335 : i32 to index
    %c0_171 = arith.constant 0 : index
    %c0_172 = arith.constant 0 : index
    %341 = vector.load %arg21[%340, %c0_171, %c0_172] : memref<8x16x64xf32, #tpu.memory_space<vmem>>, vector<1x16x64xf32>
    %342 = vector.shape_cast %341 : vector<1x16x64xf32> to vector<16x64xf32>
    %343 = arith.addf %339, %342 : vector<16x64xf32>
    %344 = arith.index_cast %335 : i32 to index
    %c0_173 = arith.constant 0 : index
    %c0_174 = arith.constant 0 : index
    %345 = vector.load %arg22[%344, %c0_173, %c0_174] : memref<8x16x64xf32, #tpu.memory_space<vmem>>, vector<1x16x64xf32>
    %346 = vector.shape_cast %345 : vector<1x16x64xf32> to vector<16x64xf32>
    %347 = vector.shape_cast %343 : vector<16x64xf32> to vector<1x16x64xf32>
    tpu.vector_store %arg22[%344, %c0_173, %c0_174], %347 {strides = array<i32>} : memref<8x16x64xf32, #tpu.memory_space<vmem>>, vector<1x16x64xf32>,
    %c8_i32_175 = arith.constant 8 : i32
    %c0_176 = arith.constant 0 : index
    %c0_177 = arith.constant 0 : index
    %c0_178 = arith.constant 0 : index
    %348 = vector.load %arg22[%c0_176, %c0_177, %c0_178] : memref<8x16x64xf32, #tpu.memory_space<vmem>>, vector<8x16x64xf32>
    %349 = vector.shape_cast %102 : vector<8x16xf32> to vector<8x16x1xf32>
    %350 = vector.broadcast %349 : vector<8x16x1xf32> to vector<8x16x64xf32>
    %351 = arith.mulf %348, %350 : vector<8x16x64xf32>
    %cst_179 = arith.constant dense<0.000000e+00> : vector<8x64xf32>
    %352 = vector.multi_reduction <add>, %351, %cst_179 [1] : vector<8x16x64xf32> to vector<8x64xf32>
    %353 = tpu.concatenate %226, %352 in 1 : vector<8x64xf32>, vector<8x64xf32> -> vector<8x128xf32>
    %c0_180 = arith.constant 0 : index
    %c0_181 = arith.constant 0 : index
    %354 = vector.load %arg11[%c0_180, %c0_181] : memref<1x128xf32, #tpu.memory_space<vmem>>, vector<1x128xf32>
    %355 = vector.broadcast %354 : vector<1x128xf32> to vector<8x128xf32>
    %356 = arith.mulf %355, %82 : vector<8x128xf32>
    %357 = arith.addf %353, %356 : vector<8x128xf32>
    %cst_182 = arith.constant 0.000000e+00 : f32
    %358 = vector.broadcast %cst_182 : f32 to vector<8x128xf32>
    %359 = arith.subf %358, %27 : vector<8x128xf32>
    %360 = math.exp %359 : vector<8x128xf32>
    %cst_183 = arith.constant 1.000000e+00 : f32
    %361 = vector.broadcast %cst_183 : f32 to vector<8x128xf32>
    %362 = arith.addf %361, %360 : vector<8x128xf32>
    %cst_184 = arith.constant 1.000000e+00 : f32
    %363 = vector.broadcast %cst_184 : f32 to vector<8x128xf32>
    %364 = arith.divf %363, %362 : vector<8x128xf32>
    %365 = arith.mulf %27, %364 : vector<8x128xf32>
    %366 = arith.mulf %357, %365 : vector<8x128xf32>
    %c0_185 = arith.constant 0 : index
    %c0_186 = arith.constant 0 : index
    %367 = vector.load %arg12[%c0_185, %c0_186] : memref<128x32xf32, #tpu.memory_space<vmem>>, vector<128x32xf32>
    %cst_187 = arith.constant dense<0.000000e+00> : vector<8x32xf32>
    %368 = tpu.matmul %366, %367, %cst_187 {dimension_numbers = #tpu.dot_dimension_numbers<[1], [0], [0], [1], [0, 0, 1, 1], [], []>} : vector<8x128xf32>, vector<128x32xf32>, vector<8x32xf32> -> vector<8x32xf32>
    %cst_188 = arith.constant dense<0.000000e+00> : vector<8xf32>
    %369 = vector.multi_reduction <add>, %368, %cst_188 [1] : vector<8x32xf32> to vector<8xf32>
    %370 = vector.shape_cast %369 : vector<8xf32> to vector<8x1xf32>
    %cst_189 = arith.constant 3.200000e+01 : f32
    %371 = vector.broadcast %cst_189 : f32 to vector<8x1xf32>
    %372 = arith.divf %370, %371 : vector<8x1xf32>
    %373 = vector.broadcast %372 : vector<8x1xf32> to vector<8x32xf32>
    %374 = arith.subf %368, %373 : vector<8x32xf32>
    %375 = arith.mulf %374, %374 : vector<8x32xf32>
    %cst_190 = arith.constant dense<0.000000e+00> : vector<8xf32>
    %376 = vector.multi_reduction <add>, %375, %cst_190 [1] : vector<8x32xf32> to vector<8xf32>
    %377 = vector.shape_cast %376 : vector<8xf32> to vector<8x1xf32>
    %cst_191 = arith.constant 3.200000e+01 : f32
    %378 = vector.broadcast %cst_191 : f32 to vector<8x1xf32>
    %379 = arith.divf %377, %378 : vector<8x1xf32>
    %cst_192 = arith.constant 9.99999974E-6 : f32
    %380 = vector.broadcast %cst_192 : f32 to vector<8x1xf32>
    %381 = arith.addf %379, %380 : vector<8x1xf32>
    %382 = math.rsqrt %381 : vector<8x1xf32>
    %383 = vector.broadcast %382 : vector<8x1xf32> to vector<8x32xf32>
    %384 = arith.mulf %374, %383 : vector<8x32xf32>
    %c0_193 = arith.constant 0 : index
    %c0_194 = arith.constant 0 : index
    %385 = vector.load %arg13[%c0_193, %c0_194] : memref<1x32xf32, #tpu.memory_space<vmem>>, vector<1x32xf32>
    %386 = vector.broadcast %385 : vector<1x32xf32> to vector<8x32xf32>
    %387 = arith.mulf %384, %386 : vector<8x32xf32>
    %c0_195 = arith.constant 0 : index
    %c0_196 = arith.constant 0 : index
    %388 = vector.load %arg14[%c0_195, %c0_196] : memref<1x32xf32, #tpu.memory_space<vmem>>, vector<1x32xf32>
    %389 = vector.broadcast %388 : vector<1x32xf32> to vector<8x32xf32>
    %390 = arith.addf %387, %389 : vector<8x32xf32>
    %c0_197 = arith.constant 0 : index
    %c0_198 = arith.constant 0 : index
    %391 = vector.load %arg15[%c0_197, %c0_198] : memref<32x128xf32, #tpu.memory_space<vmem>>, vector<32x128xf32>
    %cst_199 = arith.constant dense<0.000000e+00> : vector<8x128xf32>
    %392 = tpu.matmul %390, %391, %cst_199 {dimension_numbers = #tpu.dot_dimension_numbers<[1], [0], [0], [1], [0, 0, 1, 1], [], []>} : vector<8x32xf32>, vector<32x128xf32>, vector<8x128xf32> -> vector<8x128xf32>
    %c0_200 = arith.constant 0 : index
    %c0_201 = arith.constant 0 : index
    %393 = vector.load %arg16[%c0_200, %c0_201] : memref<1x128xf32, #tpu.memory_space<vmem>>, vector<1x128xf32>
    %394 = vector.broadcast %393 : vector<1x128xf32> to vector<8x128xf32>
    %395 = arith.addf %392, %394 : vector<8x128xf32>
    %cst_202 = arith.constant 5.000000e-01 : f32
    %396 = vector.broadcast %cst_202 : f32 to vector<8x128xf32>
    %397 = arith.mulf %396, %395 : vector<8x128xf32>
    %cst_203 = arith.constant 0.707106769 : f32
    %398 = vector.broadcast %cst_203 : f32 to vector<8x128xf32>
    %399 = arith.mulf %395, %398 : vector<8x128xf32>
    %cst_204 = arith.constant 0.000000e+00 : f32
    %400 = vector.broadcast %cst_204 : f32 to vector<8x128xf32>
    %401 = arith.cmpf oge, %399, %400 : vector<8x128xf32>
    %cst_205 = arith.constant 1.000000e+00 : f32
    %cst_206 = arith.constant -1.000000e+00 : f32
    %402 = vector.broadcast %cst_205 : f32 to vector<8x128xf32>
    %403 = vector.broadcast %cst_206 : f32 to vector<8x128xf32>
    %404 = arith.select %401, %402, %403 : vector<8x128xi1>, vector<8x128xf32>
    %405 = math.absf %399 : vector<8x128xf32>
    %cst_207 = arith.constant 0.327591091 : f32
    %406 = vector.broadcast %cst_207 : f32 to vector<8x128xf32>
    %407 = arith.mulf %406, %405 : vector<8x128xf32>
    %cst_208 = arith.constant 1.000000e+00 : f32
    %408 = vector.broadcast %cst_208 : f32 to vector<8x128xf32>
    %409 = arith.addf %408, %407 : vector<8x128xf32>
    %cst_209 = arith.constant 1.000000e+00 : f32
    %410 = vector.broadcast %cst_209 : f32 to vector<8x128xf32>
    %411 = arith.divf %410, %409 : vector<8x128xf32>
    %cst_210 = arith.constant 1.06140542 : f32
    %412 = vector.broadcast %cst_210 : f32 to vector<8x128xf32>
    %413 = arith.mulf %412, %411 : vector<8x128xf32>
    %cst_211 = arith.constant -1.45315206 : f32
    %414 = vector.broadcast %cst_211 : f32 to vector<8x128xf32>
    %415 = arith.addf %413, %414 : vector<8x128xf32>
    %416 = arith.mulf %415, %411 : vector<8x128xf32>
    %cst_212 = arith.constant 1.42141378 : f32
    %417 = vector.broadcast %cst_212 : f32 to vector<8x128xf32>
    %418 = arith.addf %416, %417 : vector<8x128xf32>
    %419 = arith.mulf %418, %411 : vector<8x128xf32>
    %cst_213 = arith.constant -0.284496725 : f32
    %420 = vector.broadcast %cst_213 : f32 to vector<8x128xf32>
    %421 = arith.addf %419, %420 : vector<8x128xf32>
    %422 = arith.mulf %421, %411 : vector<8x128xf32>
    %cst_214 = arith.constant 0.254829586 : f32
    %423 = vector.broadcast %cst_214 : f32 to vector<8x128xf32>
    %424 = arith.addf %422, %423 : vector<8x128xf32>
    %425 = arith.mulf %424, %411 : vector<8x128xf32>
    %cst_215 = arith.constant 0.000000e+00 : f32
    %426 = vector.broadcast %cst_215 : f32 to vector<8x128xf32>
    %427 = arith.subf %426, %405 : vector<8x128xf32>
    %428 = arith.mulf %427, %405 : vector<8x128xf32>
    %429 = math.exp %428 : vector<8x128xf32>
    %430 = arith.mulf %425, %429 : vector<8x128xf32>
    %cst_216 = arith.constant 1.000000e+00 : f32
    %431 = vector.broadcast %cst_216 : f32 to vector<8x128xf32>
    %432 = arith.subf %431, %430 : vector<8x128xf32>
    %433 = arith.mulf %404, %432 : vector<8x128xf32>
    %cst_217 = arith.constant 1.000000e+00 : f32
    %434 = vector.broadcast %cst_217 : f32 to vector<8x128xf32>
    %435 = arith.addf %434, %433 : vector<8x128xf32>
    %436 = arith.mulf %397, %435 : vector<8x128xf32>
    %c0_218 = arith.constant 0 : index
    %c0_219 = arith.constant 0 : index
    %437 = vector.load %arg17[%c0_218, %c0_219] : memref<128x32xf32, #tpu.memory_space<vmem>>, vector<128x32xf32>
    %cst_220 = arith.constant dense<0.000000e+00> : vector<8x32xf32>
    %438 = tpu.matmul %436, %437, %cst_220 {dimension_numbers = #tpu.dot_dimension_numbers<[1], [0], [0], [1], [0, 0, 1, 1], [], []>} : vector<8x128xf32>, vector<128x32xf32>, vector<8x32xf32> -> vector<8x32xf32>
    %c0_221 = arith.constant 0 : index
    %c0_222 = arith.constant 0 : index
    %439 = vector.load %arg18[%c0_221, %c0_222] : memref<1x32xf32, #tpu.memory_space<vmem>>, vector<1x32xf32>
    %440 = vector.broadcast %439 : vector<1x32xf32> to vector<8x32xf32>
    %441 = arith.addf %438, %440 : vector<8x32xf32>
    %442 = arith.addf %441, %1 : vector<8x32xf32>
    %c0_223 = arith.constant 0 : index
    %c0_224 = arith.constant 0 : index
    %c0_225 = arith.constant 0 : index
    %443 = vector.load %arg19[%c0_223, %c0_224, %c0_225] : memref<1x8x32xf32, #tpu.memory_space<vmem>>, vector<1x8x32xf32>
    %444 = vector.shape_cast %443 : vector<1x8x32xf32> to vector<8x32xf32>
    %445 = vector.shape_cast %442 : vector<8x32xf32> to vector<1x8x32xf32>
    tpu.vector_store %arg19[%c0_223, %c0_224, %c0_225], %445 {strides = array<i32>} : memref<1x8x32xf32, #tpu.memory_space<vmem>>, vector<1x8x32xf32>,
    return
  }
  func.func @transform_0(%arg0: i32) -> (i32, i32, i32) {
    %c0_i32 = arith.constant 0 : i32
    %c0_i32_0 = arith.constant 0 : i32
    %c0_i32_1 = arith.constant 0 : i32
    return %arg0, %c0_i32, %c0_i32_0 : i32, i32, i32
  }
  func.func @transform_1(%arg0: i32) -> (i32, i32) {
    %c0_i32 = arith.constant 0 : i32
    %c0_i32_0 = arith.constant 0 : i32
    %c0_i32_1 = arith.constant 0 : i32
    return %c0_i32, %c0_i32_0 : i32, i32
  }
  func.func @transform_2(%arg0: i32) -> (i32, i32) {
    %c0_i32 = arith.constant 0 : i32
    %c0_i32_0 = arith.constant 0 : i32
    %c0_i32_1 = arith.constant 0 : i32
    return %c0_i32, %c0_i32_0 : i32, i32
  }
  func.func @transform_3(%arg0: i32) -> (i32, i32) {
    %c0_i32 = arith.constant 0 : i32
    %c0_i32_0 = arith.constant 0 : i32
    %c0_i32_1 = arith.constant 0 : i32
    return %c0_i32, %c0_i32_0 : i32, i32
  }
  func.func @transform_4(%arg0: i32) -> (i32, i32) {
    %c0_i32 = arith.constant 0 : i32
    %c0_i32_0 = arith.constant 0 : i32
    %c0_i32_1 = arith.constant 0 : i32
    return %c0_i32, %c0_i32_0 : i32, i32
  }
  func.func @transform_5(%arg0: i32) -> (i32, i32) {
    %c0_i32 = arith.constant 0 : i32
    %c0_i32_0 = arith.constant 0 : i32
    %c0_i32_1 = arith.constant 0 : i32
    return %c0_i32, %c0_i32_0 : i32, i32
  }
  func.func @transform_6(%arg0: i32) -> (i32, i32) {
    %c0_i32 = arith.constant 0 : i32
    %c0_i32_0 = arith.constant 0 : i32
    %c0_i32_1 = arith.constant 0 : i32
    return %c0_i32, %c0_i32_0 : i32, i32
  }
  func.func @transform_7(%arg0: i32) -> (i32, i32) {
    %c0_i32 = arith.constant 0 : i32
    %c0_i32_0 = arith.constant 0 : i32
    %c0_i32_1 = arith.constant 0 : i32
    return %c0_i32, %c0_i32_0 : i32, i32
  }
  func.func @transform_8(%arg0: i32) -> (i32, i32) {
    %c0_i32 = arith.constant 0 : i32
    %c0_i32_0 = arith.constant 0 : i32
    %c0_i32_1 = arith.constant 0 : i32
    return %c0_i32, %c0_i32_0 : i32, i32
  }
  func.func @transform_9(%arg0: i32) -> (i32, i32) {
    %c0_i32 = arith.constant 0 : i32
    %c0_i32_0 = arith.constant 0 : i32
    %c0_i32_1 = arith.constant 0 : i32
    return %c0_i32, %c0_i32_0 : i32, i32
  }
  func.func @transform_10(%arg0: i32) -> (i32, i32) {
    %c0_i32 = arith.constant 0 : i32
    %c0_i32_0 = arith.constant 0 : i32
    %c0_i32_1 = arith.constant 0 : i32
    return %c0_i32, %c0_i32_0 : i32, i32
  }
  func.func @transform_11(%arg0: i32) -> (i32, i32) {
    %c0_i32 = arith.constant 0 : i32
    %c0_i32_0 = arith.constant 0 : i32
    %c0_i32_1 = arith.constant 0 : i32
    return %c0_i32, %c0_i32_0 : i32, i32
  }
  func.func @transform_12(%arg0: i32) -> (i32, i32) {
    %c0_i32 = arith.constant 0 : i32
    %c0_i32_0 = arith.constant 0 : i32
    %c0_i32_1 = arith.constant 0 : i32
    return %c0_i32, %c0_i32_0 : i32, i32
  }
  func.func @transform_13(%arg0: i32) -> (i32, i32) {
    %c0_i32 = arith.constant 0 : i32
    %c0_i32_0 = arith.constant 0 : i32
    %c0_i32_1 = arith.constant 0 : i32
    return %c0_i32, %c0_i32_0 : i32, i32
  }
  func.func @transform_14(%arg0: i32) -> (i32, i32) {
    %c0_i32 = arith.constant 0 : i32
    %c0_i32_0 = arith.constant 0 : i32
    %c0_i32_1 = arith.constant 0 : i32
    return %c0_i32, %c0_i32_0 : i32, i32
  }
  func.func @transform_15(%arg0: i32) -> (i32, i32) {
    %c0_i32 = arith.constant 0 : i32
    %c0_i32_0 = arith.constant 0 : i32
    %c0_i32_1 = arith.constant 0 : i32
    return %c0_i32, %c0_i32_0 : i32, i32
  }
  func.func @transform_16(%arg0: i32) -> (i32, i32) {
    %c0_i32 = arith.constant 0 : i32
    %c0_i32_0 = arith.constant 0 : i32
    %c0_i32_1 = arith.constant 0 : i32
    return %c0_i32, %c0_i32_0 : i32, i32
  }
  func.func @transform_17(%arg0: i32) -> (i32, i32) {
    %c0_i32 = arith.constant 0 : i32
    %c0_i32_0 = arith.constant 0 : i32
    %c0_i32_1 = arith.constant 0 : i32
    return %c0_i32, %c0_i32_0 : i32, i32
  }
  func.func @transform_18(%arg0: i32) -> (i32, i32, i32) {
    %c0_i32 = arith.constant 0 : i32
    %c0_i32_0 = arith.constant 0 : i32
    %c0_i32_1 = arith.constant 0 : i32
    return %arg0, %c0_i32, %c0_i32_0 : i32, i32, i32
  }
}

module attributes {stable_mosaic.version = 11 : i64} {
  func.func @bi_mamba_block_kernel(%arg0: i32, %arg1: memref<1x8x32xf32, #tpu.memory_space<vmem>>, %arg2: memref<1x32xf32, #tpu.memory_space<vmem>>, %arg3: memref<1x32xf32, #tpu.memory_space<vmem>>, %arg4: memref<32x256xf32, #tpu.memory_space<vmem>>, %arg5: memref<4x128xf32, #tpu.memory_space<vmem>>, %arg6: memref<4x128xf32, #tpu.memory_space<vmem>>, %arg7: memref<1x128xf32, #tpu.memory_space<vmem>>, %arg8: memref<128x192xf32, #tpu.memory_space<vmem>>, %arg9: memref<1x128xf32, #tpu.memory_space<vmem>>, %arg10: memref<32x64xf32, #tpu.memory_space<vmem>>, %arg11: memref<1x128xf32, #tpu.memory_space<vmem>>, %arg12: memref<128x32xf32, #tpu.memory_space<vmem>>, %arg13: memref<1x32xf32, #tpu.memory_space<vmem>>, %arg14: memref<1x32xf32, #tpu.memory_space<vmem>>, %arg15: memref<32x128xf32, #tpu.memory_space<vmem>>, %arg16: memref<1x128xf32, #tpu.memory_space<vmem>>, %arg17: memref<128x32xf32, #tpu.memory_space<vmem>>, %arg18: memref<1x32xf32, #tpu.memory_space<vmem>>, %arg19: memref<1x8x32xf32, #tpu.memory_space<vmem>>, %arg20: memref<8x16x64xf32, #tpu.memory_space<vmem>>, %arg21: memref<8x16x64xf32, #tpu.memory_space<vmem>>, %arg22: memref<8x16x64xf32, #tpu.memory_space<vmem>>) attributes {dimension_semantics = [#tpu.dimension_semantics<parallel>], iteration_bounds = array<i64: 2>, scalar_prefetch = 0 : i64, scratch_operands = 3 : i64, tpu.core_type = #tpu.core_type<tc>, window_params = [{transform_indices = @transform_0, window_bounds = array<i64: 1, 8, 32>}, {pipeline_mode = #tpu.pipeline_mode<synchronous>, transform_indices = @transform_1, window_bounds = array<i64: 1, 32>}, {pipeline_mode = #tpu.pipeline_mode<synchronous>, transform_indices = @transform_2, window_bounds = array<i64: 1, 32>}, {pipeline_mode = #tpu.pipeline_mode<synchronous>, transform_indices = @transform_3, window_bounds = array<i64: 32, 256>}, {pipeline_mode = #tpu.pipeline_mode<synchronous>, transform_indices = @transform_4, window_bounds = array<i64: 4, 128>}, {pipeline_mode = #tpu.pipeline_mode<synchronous>, transform_indices = @transform_5, window_bounds = array<i64: 4, 128>}, {pipeline_mode = #tpu.pipeline_mode<synchronous>, transform_indices = @transform_6, window_bounds = array<i64: 1, 128>}, {pipeline_mode = #tpu.pipeline_mode<synchronous>, transform_indices = @transform_7, window_bounds = array<i64: 128, 192>}, {pipeline_mode = #tpu.pipeline_mode<synchronous>, transform_indices = @transform_8, window_bounds = array<i64: 1, 128>}, {pipeline_mode = #tpu.pipeline_mode<synchronous>, transform_indices = @transform_9, window_bounds = array<i64: 32, 64>}, {pipeline_mode = #tpu.pipeline_mode<synchronous>, transform_indices = @transform_10, window_bounds = array<i64: 1, 128>}, {pipeline_mode = #tpu.pipeline_mode<synchronous>, transform_indices = @transform_11, window_bounds = array<i64: 128, 32>}, {pipeline_mode = #tpu.pipeline_mode<synchronous>, transform_indices = @transform_12, window_bounds = array<i64: 1, 32>}, {pipeline_mode = #tpu.pipeline_mode<synchronous>, transform_indices = @transform_13, window_bounds = array<i64: 1, 32>}, {pipeline_mode = #tpu.pipeline_mode<synchronous>, transform_indices = @transform_14, window_bounds = array<i64: 32, 128>}, {pipeline_mode = #tpu.pipeline_mode<synchronous>, transform_indices = @transform_15, window_bounds = array<i64: 1, 128>}, {pipeline_mode = #tpu.pipeline_mode<synchronous>, transform_indices = @transform_16, window_bounds = array<i64: 128, 32>}, {pipeline_mode = #tpu.pipeline_mode<synchronous>, transform_indices = @transform_17, window_bounds = array<i64: 1, 32>}, {transform_indices = @transform_18, window_bounds = array<i64: 1, 8, 32>}]} {
    %c0 = arith.constant 0 : index
    %c0_0 = arith.constant 0 : index
    %c0_1 = arith.constant 0 : index
    %0 = vector.load %arg1[%c0, %c0_0, %c0_1] : memref<1x8x32xf32, #tpu.memory_space<vmem>>, vector<1x8x32xf32>
    %1 = vector.shape_cast %0 : vector<1x8x32xf32> to vector<8x32xf32>
    %cst = arith.constant dense<0.000000e+00> : vector<8xf32>
    %2 = vector.multi_reduction <add>, %1, %cst [1] : vector<8x32xf32> to vector<8xf32>
    %3 = vector.shape_cast %2 : vector<8xf32> to vector<8x1xf32>
    %cst_2 = arith.constant 3.200000e+01 : f32
    %4 = vector.broadcast %cst_2 : f32 to vector<8x1xf32>
    %5 = arith.divf %3, %4 : vector<8x1xf32>
    %6 = vector.broadcast %5 : vector<8x1xf32> to vector<8x32xf32>
    %7 = arith.subf %1, %6 : vector<8x32xf32>
    %8 = arith.mulf %7, %7 : vector<8x32xf32>
    %cst_3 = arith.constant dense<0.000000e+00> : vector<8xf32>
    %9 = vector.multi_reduction <add>, %8, %cst_3 [1] : vector<8x32xf32> to vector<8xf32>
    %10 = vector.shape_cast %9 : vector<8xf32> to vector<8x1xf32>
    %cst_4 = arith.constant 3.200000e+01 : f32
    %11 = vector.broadcast %cst_4 : f32 to vector<8x1xf32>
    %12 = arith.divf %10, %11 : vector<8x1xf32>
    %cst_5 = arith.constant 9.99999974E-6 : f32
    %13 = vector.broadcast %cst_5 : f32 to vector<8x1xf32>
    %14 = arith.addf %12, %13 : vector<8x1xf32>
    %15 = math.rsqrt %14 : vector<8x1xf32>
    %16 = vector.broadcast %15 : vector<8x1xf32> to vector<8x32xf32>
    %17 = arith.mulf %7, %16 : vector<8x32xf32>
    %c0_6 = arith.constant 0 : index
    %c0_7 = arith.constant 0 : index
    %18 = vector.load %arg2[%c0_6, %c0_7] : memref<1x32xf32, #tpu.memory_space<vmem>>, vector<1x32xf32>
    %19 = vector.broadcast %18 : vector<1x32xf32> to vector<8x32xf32>
    %20 = arith.mulf %17, %19 : vector<8x32xf32>
    %c0_8 = arith.constant 0 : index
    %c0_9 = arith.constant 0 : index
    %21 = vector.load %arg3[%c0_8, %c0_9] : memref<1x32xf32, #tpu.memory_space<vmem>>, vector<1x32xf32>
    %22 = vector.broadcast %21 : vector<1x32xf32> to vector<8x32xf32>
    %23 = arith.addf %20, %22 : vector<8x32xf32>
    %c0_10 = arith.constant 0 : index
    %c0_11 = arith.constant 0 : index
    %24 = vector.load %arg4[%c0_10, %c0_11] : memref<32x256xf32, #tpu.memory_space<vmem>>, vector<32x256xf32>
    %cst_12 = arith.constant dense<0.000000e+00> : vector<8x256xf32>
    %25 = tpu.matmul %23, %24, %cst_12 {dimension_numbers = #tpu.dot_dimension_numbers<[1], [0], [0], [1], [0, 0, 1, 1], [], []>} : vector<8x32xf32>, vector<32x256xf32>, vector<8x256xf32> -> vector<8x256xf32>
    %26 = vector.extract_strided_slice %25 {offsets = [0, 0], sizes = [8, 128], strides = [1, 1]} : vector<8x256xf32> to vector<8x128xf32>
    %27 = vector.extract_strided_slice %25 {offsets = [0, 128], sizes = [8, 128], strides = [1, 1]} : vector<8x256xf32> to vector<8x128xf32>
    %c0_13 = arith.constant 0 : index
    %c0_14 = arith.constant 0 : index
    %28 = vector.load %arg5[%c0_13, %c0_14] : memref<4x128xf32, #tpu.memory_space<vmem>>, vector<1x128xf32>
    %c0_15 = arith.constant 0 : index
    %c0_16 = arith.constant 0 : index
    %29 = vector.load %arg6[%c0_15, %c0_16] : memref<4x128xf32, #tpu.memory_space<vmem>>, vector<1x128xf32>
    %30 = arith.addf %28, %29 : vector<1x128xf32>
    %31 = vector.broadcast %30 : vector<1x128xf32> to vector<8x128xf32>
    %32 = arith.mulf %26, %31 : vector<8x128xf32>
    %c0_17 = arith.constant 0 : index
    %c0_18 = arith.constant 0 : index
    %33 = vector.load %arg7[%c0_17, %c0_18] : memref<1x128xf32, #tpu.memory_space<vmem>>, vector<1x128xf32>
    %34 = vector.broadcast %33 : vector<1x128xf32> to vector<8x128xf32>
    %35 = arith.addf %32, %34 : vector<8x128xf32>
    %cst_19 = arith.constant 0.000000e+00 : f32
    %36 = vector.broadcast %cst_19 : f32 to vector<1x128xf32>
    %37 = vector.extract_strided_slice %26 {offsets = [0, 0], sizes = [7, 128], strides = [1, 1]} : vector<8x128xf32> to vector<7x128xf32>
    %38 = tpu.concatenate %36, %37 in 0 : vector<1x128xf32>, vector<7x128xf32> -> vector<8x128xf32>
    %39 = vector.extract_strided_slice %26 {offsets = [1, 0], sizes = [7, 128], strides = [1, 1]} : vector<8x128xf32> to vector<7x128xf32>
    %40 = tpu.concatenate %39, %36 in 0 : vector<7x128xf32>, vector<1x128xf32> -> vector<8x128xf32>
    %c1 = arith.constant 1 : index
    %c0_20 = arith.constant 0 : index
    %41 = vector.load %arg5[%c1, %c0_20] : memref<4x128xf32, #tpu.memory_space<vmem>>, vector<1x128xf32>
    %42 = vector.broadcast %41 : vector<1x128xf32> to vector<8x128xf32>
    %43 = arith.mulf %38, %42 : vector<8x128xf32>
    %44 = arith.addf %35, %43 : vector<8x128xf32>
    %c1_21 = arith.constant 1 : index
    %c0_22 = arith.constant 0 : index
    %45 = vector.load %arg6[%c1_21, %c0_22] : memref<4x128xf32, #tpu.memory_space<vmem>>, vector<1x128xf32>
    %46 = vector.broadcast %45 : vector<1x128xf32> to vector<8x128xf32>
    %47 = arith.mulf %40, %46 : vector<8x128xf32>
    %48 = arith.addf %44, %47 : vector<8x128xf32>
    %cst_23 = arith.constant 0.000000e+00 : f32
    %49 = vector.broadcast %cst_23 : f32 to vector<2x128xf32>
    %50 = vector.extract_strided_slice %26 {offsets = [0, 0], sizes = [6, 128], strides = [1, 1]} : vector<8x128xf32> to vector<6x128xf32>
    %51 = tpu.concatenate %49, %50 in 0 : vector<2x128xf32>, vector<6x128xf32> -> vector<8x128xf32>
    %52 = vector.extract_strided_slice %26 {offsets = [2, 0], sizes = [6, 128], strides = [1, 1]} : vector<8x128xf32> to vector<6x128xf32>
    %53 = tpu.concatenate %52, %49 in 0 : vector<6x128xf32>, vector<2x128xf32> -> vector<8x128xf32>
    %c2 = arith.constant 2 : index
    %c0_24 = arith.constant 0 : index
    %54 = vector.load %arg5[%c2, %c0_24] : memref<4x128xf32, #tpu.memory_space<vmem>>, vector<1x128xf32>
    %55 = vector.broadcast %54 : vector<1x128xf32> to vector<8x128xf32>
    %56 = arith.mulf %51, %55 : vector<8x128xf32>
    %57 = arith.addf %48, %56 : vector<8x128xf32>
    %c2_25 = arith.constant 2 : index
    %c0_26 = arith.constant 0 : index
    %58 = vector.load %arg6[%c2_25, %c0_26] : memref<4x128xf32, #tpu.memory_space<vmem>>, vector<1x128xf32>
    %59 = vector.broadcast %58 : vector<1x128xf32> to vector<8x128xf32>
    %60 = arith.mulf %53, %59 : vector<8x128xf32>
    %61 = arith.addf %57, %60 : vector<8x128xf32>
    %cst_27 = arith.constant 0.000000e+00 : f32
    %62 = vector.broadcast %cst_27 : f32 to vector<3x128xf32>
    %63 = vector.extract_strided_slice %26 {offsets = [0, 0], sizes = [5, 128], strides = [1, 1]} : vector<8x128xf32> to vector<5x128xf32>
    %64 = tpu.concatenate %62, %63 in 0 : vector<3x128xf32>, vector<5x128xf32> -> vector<8x128xf32>
    %65 = vector.extract_strided_slice %26 {offsets = [3, 0], sizes = [5, 128], strides = [1, 1]} : vector<8x128xf32> to vector<5x128xf32>
    %66 = tpu.concatenate %65, %62 in 0 : vector<5x128xf32>, vector<3x128xf32> -> vector<8x128xf32>
    %c3 = arith.constant 3 : index
    %c0_28 = arith.constant 0 : index
    %67 = vector.load %arg5[%c3, %c0_28] : memref<4x128xf32, #tpu.memory_space<vmem>>, vector<1x128xf32>
    %68 = vector.broadcast %67 : vector<1x128xf32> to vector<8x128xf32>
    %69 = arith.mulf %64, %68 : vector<8x128xf32>
    %70 = arith.addf %61, %69 : vector<8x128xf32>
    %c3_29 = arith.constant 3 : index
    %c0_30 = arith.constant 0 : index
    %71 = vector.load %arg6[%c3_29, %c0_30] : memref<4x128xf32, #tpu.memory_space<vmem>>, vector<1x128xf32>
    %72 = vector.broadcast %71 : vector<1x128xf32> to vector<8x128xf32>
    %73 = arith.mulf %66, %72 : vector<8x128xf32>
    %74 = arith.addf %70, %73 : vector<8x128xf32>
    %cst_31 = arith.constant 0.000000e+00 : f32
    %75 = vector.broadcast %cst_31 : f32 to vector<8x128xf32>
    %76 = arith.subf %75, %74 : vector<8x128xf32>
    %77 = math.exp %76 : vector<8x128xf32>
    %cst_32 = arith.constant 1.000000e+00 : f32
    %78 = vector.broadcast %cst_32 : f32 to vector<8x128xf32>
    %79 = arith.addf %78, %77 : vector<8x128xf32>
    %cst_33 = arith.constant 1.000000e+00 : f32
    %80 = vector.broadcast %cst_33 : f32 to vector<8x128xf32>
    %81 = arith.divf %80, %79 : vector<8x128xf32>
    %82 = arith.mulf %74, %81 : vector<8x128xf32>
    %c0_34 = arith.constant 0 : index
    %c0_35 = arith.constant 0 : index
    %83 = vector.load %arg8[%c0_34, %c0_35] : memref<128x192xf32, #tpu.memory_space<vmem>>, vector<128x192xf32>
    %cst_36 = arith.constant dense<0.000000e+00> : vector<8x192xf32>
    %84 = tpu.matmul %82, %83, %cst_36 {dimension_numbers = #tpu.dot_dimension_numbers<[1], [0], [0], [1], [0, 0, 1, 1], [], []>} : vector<8x128xf32>, vector<128x192xf32>, vector<8x192xf32> -> vector<8x192xf32>
    %85 = vector.extract_strided_slice %84 {offsets = [0, 0], sizes = [8, 128], strides = [1, 1]} : vector<8x192xf32> to vector<8x128xf32>
    %c0_37 = arith.constant 0 : index
    %c0_38 = arith.constant 0 : index
    %86 = vector.load %arg9[%c0_37, %c0_38] : memref<1x128xf32, #tpu.memory_space<vmem>>, vector<1x128xf32>
    %87 = vector.broadcast %86 : vector<1x128xf32> to vector<8x128xf32>
    %88 = arith.addf %85, %87 : vector<8x128xf32>
    %cst_39 = arith.constant 0.000000e+00 : f32
    %89 = vector.broadcast %cst_39 : f32 to vector<8x128xf32>
    %90 = arith.maximumf %88, %89 : vector<8x128xf32>
    %91 = math.absf %88 : vector<8x128xf32>
    %cst_40 = arith.constant 0.000000e+00 : f32
    %92 = vector.broadcast %cst_40 : f32 to vector<8x128xf32>
    %93 = arith.subf %92, %91 : vector<8x128xf32>
    %94 = math.exp %93 : vector<8x128xf32>
    %cst_41 = arith.constant 1.000000e+00 : f32
    %95 = vector.broadcast %cst_41 : f32 to vector<8x128xf32>
    %96 = arith.addf %95, %94 : vector<8x128xf32>
    %97 = math.log %96 : vector<8x128xf32>
    %98 = arith.addf %90, %97 : vector<8x128xf32>
    %99 = vector.extract_strided_slice %84 {offsets = [0, 128], sizes = [8, 16], strides = [1, 1]} : vector<8x192xf32> to vector<8x16xf32>
    %100 = vector.extract_strided_slice %84 {offsets = [0, 144], sizes = [8, 16], strides = [1, 1]} : vector<8x192xf32> to vector<8x16xf32>
    %101 = vector.extract_strided_slice %84 {offsets = [0, 160], sizes = [8, 16], strides = [1, 1]} : vector<8x192xf32> to vector<8x16xf32>
    %102 = vector.extract_strided_slice %84 {offsets = [0, 176], sizes = [8, 16], strides = [1, 1]} : vector<8x192xf32> to vector<8x16xf32>
    %c0_42 = arith.constant 0 : index
    %c0_43 = arith.constant 0 : index
    %103 = vector.load %arg10[%c0_42, %c0_43] : memref<32x64xf32, #tpu.memory_space<vmem>>, vector<32x64xf32>
    %104 = math.exp %103 : vector<32x64xf32>
    %cst_44 = arith.constant 0.000000e+00 : f32
    %105 = vector.broadcast %cst_44 : f32 to vector<32x64xf32>
    %106 = arith.subf %105, %104 : vector<32x64xf32>
    %107 = vector.extract_strided_slice %106 {offsets = [0, 0], sizes = [16, 64], strides = [1, 1]} : vector<32x64xf32> to vector<16x64xf32>
    %108 = vector.extract_strided_slice %106 {offsets = [16, 0], sizes = [16, 64], strides = [1, 1]} : vector<32x64xf32> to vector<16x64xf32>
    %109 = vector.extract_strided_slice %98 {offsets = [0, 0], sizes = [8, 64], strides = [1, 1]} : vector<8x128xf32> to vector<8x64xf32>
    %110 = vector.extract_strided_slice %82 {offsets = [0, 0], sizes = [8, 64], strides = [1, 1]} : vector<8x128xf32> to vector<8x64xf32>
    %111 = arith.mulf %109, %110 : vector<8x64xf32>
    %cst_45 = arith.constant 0.000000e+00 : f32
    %112 = vector.broadcast %cst_45 : f32 to vector<16x64xf32>
    %113 = vector.shape_cast %109 : vector<8x64xf32> to vector<8x1x64xf32>
    %114 = vector.shape_cast %107 : vector<16x64xf32> to vector<1x16x64xf32>
    %115 = vector.broadcast %113 : vector<8x1x64xf32> to vector<8x16x64xf32>
    %116 = vector.broadcast %114 : vector<1x16x64xf32> to vector<8x16x64xf32>
    %117 = arith.mulf %115, %116 : vector<8x16x64xf32>
    %118 = math.exp %117 : vector<8x16x64xf32>
    %c0_46 = arith.constant 0 : index
    %c0_47 = arith.constant 0 : index
    %c0_48 = arith.constant 0 : index
    %119 = vector.load %arg20[%c0_46, %c0_47, %c0_48] : memref<8x16x64xf32, #tpu.memory_space<vmem>>, vector<8x16x64xf32>
    tpu.vector_store %arg20[%c0_46, %c0_47, %c0_48], %118 {strides = array<i32>} : memref<8x16x64xf32, #tpu.memory_space<vmem>>, vector<8x16x64xf32>,
    %120 = vector.shape_cast %111 : vector<8x64xf32> to vector<8x1x64xf32>
    %121 = vector.shape_cast %99 : vector<8x16xf32> to vector<8x16x1xf32>
    %122 = vector.broadcast %120 : vector<8x1x64xf32> to vector<8x16x64xf32>
    %123 = vector.broadcast %121 : vector<8x16x1xf32> to vector<8x16x64xf32>
    %124 = arith.mulf %122, %123 : vector<8x16x64xf32>
    %c0_49 = arith.constant 0 : index
    %c0_50 = arith.constant 0 : index
    %c0_51 = arith.constant 0 : index
    %125 = vector.load %arg21[%c0_49, %c0_50, %c0_51] : memref<8x16x64xf32, #tpu.memory_space<vmem>>, vector<8x16x64xf32>
    tpu.vector_store %arg21[%c0_49, %c0_50, %c0_51], %124 {strides = array<i32>} : memref<8x16x64xf32, #tpu.memory_space<vmem>>, vector<8x16x64xf32>,
    %c0_i32 = arith.constant 0 : i32
    %126 = arith.index_cast %c0_i32 : i32 to index
    %c0_52 = arith.constant 0 : index
    %c0_53 = arith.constant 0 : index
    %127 = vector.load %arg20[%126, %c0_52, %c0_53] : memref<8x16x64xf32, #tpu.memory_space<vmem>>, vector<1x16x64xf32>
    %128 = vector.shape_cast %127 : vector<1x16x64xf32> to vector<16x64xf32>
    %129 = arith.mulf %128, %112 : vector<16x64xf32>
    %130 = arith.index_cast %c0_i32 : i32 to index
    %c0_54 = arith.constant 0 : index
    %c0_55 = arith.constant 0 : index
    %131 = vector.load %arg21[%130, %c0_54, %c0_55] : memref<8x16x64xf32, #tpu.memory_space<vmem>>, vector<1x16x64xf32>
    %132 = vector.shape_cast %131 : vector<1x16x64xf32> to vector<16x64xf32>
    %133 = arith.addf %129, %132 : vector<16x64xf32>
    %134 = arith.index_cast %c0_i32 : i32 to index
    %c0_56 = arith.constant 0 : index
    %c0_57 = arith.constant 0 : index
    %135 = vector.load %arg22[%134, %c0_56, %c0_57] : memref<8x16x64xf32, #tpu.memory_space<vmem>>, vector<1x16x64xf32>
    %136 = vector.shape_cast %135 : vector<1x16x64xf32> to vector<16x64xf32>
    %137 = vector.shape_cast %133 : vector<16x64xf32> to vector<1x16x64xf32>
    tpu.vector_store %arg22[%134, %c0_56, %c0_57], %137 {strides = array<i32>} : memref<8x16x64xf32, #tpu.memory_space<vmem>>, vector<1x16x64xf32>,
    %c1_i32 = arith.constant 1 : i32
    %138 = arith.index_cast %c1_i32 : i32 to index
    %c0_58 = arith.constant 0 : index
    %c0_59 = arith.constant 0 : index
    %139 = vector.load %arg20[%138, %c0_58, %c0_59] : memref<8x16x64xf32, #tpu.memory_space<vmem>>, vector<1x16x64xf32>
    %140 = vector.shape_cast %139 : vector<1x16x64xf32> to vector<16x64xf32>
    %141 = arith.mulf %140, %133 : vector<16x64xf32>
    %142 = arith.index_cast %c1_i32 : i32 to index
    %c0_60 = arith.constant 0 : index
    %c0_61 = arith.constant 0 : index
    %143 = vector.load %arg21[%142, %c0_60, %c0_61] : memref<8x16x64xf32, #tpu.memory_space<vmem>>, vector<1x16x64xf32>
    %144 = vector.shape_cast %143 : vector<1x16x64xf32> to vector<16x64xf32>
    %145 = arith.addf %141, %144 : vector<16x64xf32>
    %146 = arith.index_cast %c1_i32 : i32 to index
    %c0_62 = arith.constant 0 : index
    %c0_63 = arith.constant 0 : index
    %147 = vector.load %arg22[%146, %c0_62, %c0_63] : memref<8x16x64xf32, #tpu.memory_space<vmem>>, vector<1x16x64xf32>
    %148 = vector.shape_cast %147 : vector<1x16x64xf32> to vector<16x64xf32>
    %149 = vector.shape_cast %145 : vector<16x64xf32> to vector<1x16x64xf32>
    tpu.vector_store %arg22[%146, %c0_62, %c0_63], %149 {strides = array<i32>} : memref<8x16x64xf32, #tpu.memory_space<vmem>>, vector<1x16x64xf32>,
    %c2_i32 = arith.constant 2 : i32
    %150 = arith.index_cast %c2_i32 : i32 to index
    %c0_64 = arith.constant 0 : index
    %c0_65 = arith.constant 0 : index
    %151 = vector.load %arg20[%150, %c0_64, %c0_65] : memref<8x16x64xf32, #tpu.memory_space<vmem>>, vector<1x16x64xf32>
    %152 = vector.shape_cast %151 : vector<1x16x64xf32> to vector<16x64xf32>
    %153 = arith.mulf %152, %145 : vector<16x64xf32>
    %154 = arith.index_cast %c2_i32 : i32 to index
    %c0_66 = arith.constant 0 : index
    %c0_67 = arith.constant 0 : index
    %155 = vector.load %arg21[%154, %c0_66, %c0_67] : memref<8x16x64xf32, #tpu.memory_space<vmem>>, vector<1x16x64xf32>
    %156 = vector.shape_cast %155 : vector<1x16x64xf32> to vector<16x64xf32>
    %157 = arith.addf %153, %156 : vector<16x64xf32>
    %158 = arith.index_cast %c2_i32 : i32 to index
    %c0_68 = arith.constant 0 : index
    %c0_69 = arith.constant 0 : index
    %159 = vector.load %arg22[%158, %c0_68, %c0_69] : memref<8x16x64xf32, #tpu.memory_space<vmem>>, vector<1x16x64xf32>
    %160 = vector.shape_cast %159 : vector<1x16x64xf32> to vector<16x64xf32>
    %161 = vector.shape_cast %157 : vector<16x64xf32> to vector<1x16x64xf32>
    tpu.vector_store %arg22[%158, %c0_68, %c0_69], %161 {strides = array<i32>} : memref<8x16x64xf32, #tpu.memory_space<vmem>>, vector<1x16x64xf32>,
    %c3_i32 = arith.constant 3 : i32
    %162 = arith.index_cast %c3_i32 : i32 to index
    %c0_70 = arith.constant 0 : index
    %c0_71 = arith.constant 0 : index
    %163 = vector.load %arg20[%162, %c0_70, %c0_71] : memref<8x16x64xf32, #tpu.memory_space<vmem>>, vector<1x16x64xf32>
    %164 = vector.shape_cast %163 : vector<1x16x64xf32> to vector<16x64xf32>
    %165 = arith.mulf %164, %157 : vector<16x64xf32>
    %166 = arith.index_cast %c3_i32 : i32 to index
    %c0_72 = arith.constant 0 : index
    %c0_73 = arith.constant 0 : index
    %167 = vector.load %arg21[%166, %c0_72, %c0_73] : memref<8x16x64xf32, #tpu.memory_space<vmem>>, vector<1x16x64xf32>
    %168 = vector.shape_cast %167 : vector<1x16x64xf32> to vector<16x64xf32>
    %169 = arith.addf %165, %168 : vector<16x64xf32>
    %170 = arith.index_cast %c3_i32 : i32 to index
    %c0_74 = arith.constant 0 : index
    %c0_75 = arith.constant 0 : index
    %171 = vector.load %arg22[%170, %c0_74, %c0_75] : memref<8x16x64xf32, #tpu.memory_space<vmem>>, vector<1x16x64xf32>
    %172 = vector.shape_cast %171 : vector<1x16x64xf32> to vector<16x64xf32>
    %173 = vector.shape_cast %169 : vector<16x64xf32> to vector<1x16x64xf32>
    tpu.vector_store %arg22[%170, %c0_74, %c0_75], %173 {strides = array<i32>} : memref<8x16x64xf32, #tpu.memory_space<vmem>>, vector<1x16x64xf32>,
    %c4_i32 = arith.constant 4 : i32
    %174 = arith.index_cast %c4_i32 : i32 to index
    %c0_76 = arith.constant 0 : index
    %c0_77 = arith.constant 0 : index
    %175 = vector.load %arg20[%174, %c0_76, %c0_77] : memref<8x16x64xf32, #tpu.memory_space<vmem>>, vector<1x16x64xf32>
    %176 = vector.shape_cast %175 : vector<1x16x64xf32> to vector<16x64xf32>
    %177 = arith.mulf %176, %169 : vector<16x64xf32>
    %178 = arith.index_cast %c4_i32 : i32 to index
    %c0_78 = arith.constant 0 : index
    %c0_79 = arith.constant 0 : index
    %179 = vector.load %arg21[%178, %c0_78, %c0_79] : memref<8x16x64xf32, #tpu.memory_space<vmem>>, vector<1x16x64xf32>
    %180 = vector.shape_cast %179 : vector<1x16x64xf32> to vector<16x64xf32>
    %181 = arith.addf %177, %180 : vector<16x64xf32>
    %182 = arith.index_cast %c4_i32 : i32 to index
    %c0_80 = arith.constant 0 : index
    %c0_81 = arith.constant 0 : index
    %183 = vector.load %arg22[%182, %c0_80, %c0_81] : memref<8x16x64xf32, #tpu.memory_space<vmem>>, vector<1x16x64xf32>
    %184 = vector.shape_cast %183 : vector<1x16x64xf32> to vector<16x64xf32>
    %185 = vector.shape_cast %181 : vector<16x64xf32> to vector<1x16x64xf32>
    tpu.vector_store %arg22[%182, %c0_80, %c0_81], %185 {strides = array<i32>} : memref<8x16x64xf32, #tpu.memory_space<vmem>>, vector<1x16x64xf32>,
    %c5_i32 = arith.constant 5 : i32
    %186 = arith.index_cast %c5_i32 : i32 to index
    %c0_82 = arith.constant 0 : index
    %c0_83 = arith.constant 0 : index
    %187 = vector.load %arg20[%186, %c0_82, %c0_83] : memref<8x16x64xf32, #tpu.memory_space<vmem>>, vector<1x16x64xf32>
    %188 = vector.shape_cast %187 : vector<1x16x64xf32> to vector<16x64xf32>
    %189 = arith.mulf %188, %181 : vector<16x64xf32>
    %190 = arith.index_cast %c5_i32 : i32 to index
    %c0_84 = arith.constant 0 : index
    %c0_85 = arith.constant 0 : index
    %191 = vector.load %arg21[%190, %c0_84, %c0_85] : memref<8x16x64xf32, #tpu.memory_space<vmem>>, vector<1x16x64xf32>
    %192 = vector.shape_cast %191 : vector<1x16x64xf32> to vector<16x64xf32>
    %193 = arith.addf %189, %192 : vector<16x64xf32>
    %194 = arith.index_cast %c5_i32 : i32 to index
    %c0_86 = arith.constant 0 : index
    %c0_87 = arith.constant 0 : index
    %195 = vector.load %arg22[%194, %c0_86, %c0_87] : memref<8x16x64xf32, #tpu.memory_space<vmem>>, vector<1x16x64xf32>
    %196 = vector.shape_cast %195 : vector<1x16x64xf32> to vector<16x64xf32>
    %197 = vector.shape_cast %193 : vector<16x64xf32> to vector<1x16x64xf32>
    tpu.vector_store %arg22[%194, %c0_86, %c0_87], %197 {strides = array<i32>} : memref<8x16x64xf32, #tpu.memory_space<vmem>>, vector<1x16x64xf32>,
    %c6_i32 = arith.constant 6 : i32
    %198 = arith.index_cast %c6_i32 : i32 to index
    %c0_88 = arith.constant 0 : index
    %c0_89 = arith.constant 0 : index
    %199 = vector.load %arg20[%198, %c0_88, %c0_89] : memref<8x16x64xf32, #tpu.memory_space<vmem>>, vector<1x16x64xf32>
    %200 = vector.shape_cast %199 : vector<1x16x64xf32> to vector<16x64xf32>
    %201 = arith.mulf %200, %193 : vector<16x64xf32>
    %202 = arith.index_cast %c6_i32 : i32 to index
    %c0_90 = arith.constant 0 : index
    %c0_91 = arith.constant 0 : index
    %203 = vector.load %arg21[%202, %c0_90, %c0_91] : memref<8x16x64xf32, #tpu.memory_space<vmem>>, vector<1x16x64xf32>
    %204 = vector.shape_cast %203 : vector<1x16x64xf32> to vector<16x64xf32>
    %205 = arith.addf %201, %204 : vector<16x64xf32>
    %206 = arith.index_cast %c6_i32 : i32 to index
    %c0_92 = arith.constant 0 : index
    %c0_93 = arith.constant 0 : index
    %207 = vector.load %arg22[%206, %c0_92, %c0_93] : memref<8x16x64xf32, #tpu.memory_space<vmem>>, vector<1x16x64xf32>
    %208 = vector.shape_cast %207 : vector<1x16x64xf32> to vector<16x64xf32>
    %209 = vector.shape_cast %205 : vector<16x64xf32> to vector<1x16x64xf32>
    tpu.vector_store %arg22[%206, %c0_92, %c0_93], %209 {strides = array<i32>} : memref<8x16x64xf32, #tpu.memory_space<vmem>>, vector<1x16x64xf32>,
    %c7_i32 = arith.constant 7 : i32
    %210 = arith.index_cast %c7_i32 : i32 to index
    %c0_94 = arith.constant 0 : index
    %c0_95 = arith.constant 0 : index
    %211 = vector.load %arg20[%210, %c0_94, %c0_95] : memref<8x16x64xf32, #tpu.memory_space<vmem>>, vector<1x16x64xf32>
    %212 = vector.shape_cast %211 : vector<1x16x64xf32> to vector<16x64xf32>
    %213 = arith.mulf %212, %205 : vector<16x64xf32>
    %214 = arith.index_cast %c7_i32 : i32 to index
    %c0_96 = arith.constant 0 : index
    %c0_97 = arith.constant 0 : index
    %215 = vector.load %arg21[%214, %c0_96, %c0_97] : memref<8x16x64xf32, #tpu.memory_space<vmem>>, vector<1x16x64xf32>
    %216 = vector.shape_cast %215 : vector<1x16x64xf32> to vector<16x64xf32>
    %217 = arith.addf %213, %216 : vector<16x64xf32>
    %218 = arith.index_cast %c7_i32 : i32 to index
    %c0_98 = arith.constant 0 : index
    %c0_99 = arith.constant 0 : index
    %219 = vector.load %arg22[%218, %c0_98, %c0_99] : memref<8x16x64xf32, #tpu.memory_space<vmem>>, vector<1x16x64xf32>
    %220 = vector.shape_cast %219 : vector<1x16x64xf32> to vector<16x64xf32>
    %221 = vector.shape_cast %217 : vector<16x64xf32> to vector<1x16x64xf32>
    tpu.vector_store %arg22[%218, %c0_98, %c0_99], %221 {strides = array<i32>} : memref<8x16x64xf32, #tpu.memory_space<vmem>>, vector<1x16x64xf32>,
    %c8_i32 = arith.constant 8 : i32
    %c0_100 = arith.constant 0 : index
    %c0_101 = arith.constant 0 : index
    %c0_102 = arith.constant 0 : index
    %222 = vector.load %arg22[%c0_100, %c0_101, %c0_102] : memref<8x16x64xf32, #tpu.memory_space<vmem>>, vector<8x16x64xf32>
    %223 = vector.shape_cast %101 : vector<8x16xf32> to vector<8x16x1xf32>
    %224 = vector.broadcast %223 : vector<8x16x1xf32> to vector<8x16x64xf32>
    %225 = arith.mulf %222, %224 : vector<8x16x64xf32>
    %cst_103 = arith.constant dense<0.000000e+00> : vector<8x64xf32>
    %226 = vector.multi_reduction <add>, %225, %cst_103 [1] : vector<8x16x64xf32> to vector<8x64xf32>
    %227 = vector.extract_strided_slice %98 {offsets = [0, 64], sizes = [8, 64], strides = [1, 1]} : vector<8x128xf32> to vector<8x64xf32>
    %228 = vector.extract_strided_slice %82 {offsets = [0, 64], sizes = [8, 64], strides = [1, 1]} : vector<8x128xf32> to vector<8x64xf32>
    %229 = arith.mulf %227, %228 : vector<8x64xf32>
    %cst_104 = arith.constant 0.000000e+00 : f32
    %230 = vector.broadcast %cst_104 : f32 to vector<16x64xf32>
    %231 = vector.shape_cast %227 : vector<8x64xf32> to vector<8x1x64xf32>
    %232 = vector.shape_cast %108 : vector<16x64xf32> to vector<1x16x64xf32>
    %233 = vector.broadcast %231 : vector<8x1x64xf32> to vector<8x16x64xf32>
    %234 = vector.broadcast %232 : vector<1x16x64xf32> to vector<8x16x64xf32>
    %235 = arith.mulf %233, %234 : vector<8x16x64xf32>
    %236 = math.exp %235 : vector<8x16x64xf32>
    %c0_105 = arith.constant 0 : index
    %c0_106 = arith.constant 0 : index
    %c0_107 = arith.constant 0 : index
    %237 = vector.load %arg20[%c0_105, %c0_106, %c0_107] : memref<8x16x64xf32, #tpu.memory_space<vmem>>, vector<8x16x64xf32>
    tpu.vector_store %arg20[%c0_105, %c0_106, %c0_107], %236 {strides = array<i32>} : memref<8x16x64xf32, #tpu.memory_space<vmem>>, vector<8x16x64xf32>,
    %238 = vector.shape_cast %229 : vector<8x64xf32> to vector<8x1x64xf32>
    %239 = vector.shape_cast %100 : vector<8x16xf32> to vector<8x16x1xf32>
    %240 = vector.broadcast %238 : vector<8x1x64xf32> to vector<8x16x64xf32>
    %241 = vector.broadcast %239 : vector<8x16x1xf32> to vector<8x16x64xf32>
    %242 = arith.mulf %240, %241 : vector<8x16x64xf32>
    %c0_108 = arith.constant 0 : index
    %c0_109 = arith.constant 0 : index
    %c0_110 = arith.constant 0 : index
    %243 = vector.load %arg21[%c0_108, %c0_109, %c0_110] : memref<8x16x64xf32, #tpu.memory_space<vmem>>, vector<8x16x64xf32>
    tpu.vector_store %arg21[%c0_108, %c0_109, %c0_110], %242 {strides = array<i32>} : memref<8x16x64xf32, #tpu.memory_space<vmem>>, vector<8x16x64xf32>,
    %c0_i32_111 = arith.constant 0 : i32
    %c7_i32_112 = arith.constant 7 : i32
    %244 = arith.subi %c7_i32_112, %c0_i32_111 : i32
    %245 = arith.index_cast %244 : i32 to index
    %c0_113 = arith.constant 0 : index
    %c0_114 = arith.constant 0 : index
    %246 = vector.load %arg20[%245, %c0_113, %c0_114] : memref<8x16x64xf32, #tpu.memory_space<vmem>>, vector<1x16x64xf32>
    %247 = vector.shape_cast %246 : vector<1x16x64xf32> to vector<16x64xf32>
    %248 = arith.mulf %247, %230 : vector<16x64xf32>
    %249 = arith.index_cast %244 : i32 to index
    %c0_115 = arith.constant 0 : index
    %c0_116 = arith.constant 0 : index
    %250 = vector.load %arg21[%249, %c0_115, %c0_116] : memref<8x16x64xf32, #tpu.memory_space<vmem>>, vector<1x16x64xf32>
    %251 = vector.shape_cast %250 : vector<1x16x64xf32> to vector<16x64xf32>
    %252 = arith.addf %248, %251 : vector<16x64xf32>
    %253 = arith.index_cast %244 : i32 to index
    %c0_117 = arith.constant 0 : index
    %c0_118 = arith.constant 0 : index
    %254 = vector.load %arg22[%253, %c0_117, %c0_118] : memref<8x16x64xf32, #tpu.memory_space<vmem>>, vector<1x16x64xf32>
    %255 = vector.shape_cast %254 : vector<1x16x64xf32> to vector<16x64xf32>
    %256 = vector.shape_cast %252 : vector<16x64xf32> to vector<1x16x64xf32>
    tpu.vector_store %arg22[%253, %c0_117, %c0_118], %256 {strides = array<i32>} : memref<8x16x64xf32, #tpu.memory_space<vmem>>, vector<1x16x64xf32>,
    %c1_i32_119 = arith.constant 1 : i32
    %c7_i32_120 = arith.constant 7 : i32
    %257 = arith.subi %c7_i32_120, %c1_i32_119 : i32
    %258 = arith.index_cast %257 : i32 to index
    %c0_121 = arith.constant 0 : index
    %c0_122 = arith.constant 0 : index
    %259 = vector.load %arg20[%258, %c0_121, %c0_122] : memref<8x16x64xf32, #tpu.memory_space<vmem>>, vector<1x16x64xf32>
    %260 = vector.shape_cast %259 : vector<1x16x64xf32> to vector<16x64xf32>
    %261 = arith.mulf %260, %252 : vector<16x64xf32>
    %262 = arith.index_cast %257 : i32 to index
    %c0_123 = arith.constant 0 : index
    %c0_124 = arith.constant 0 : index
    %263 = vector.load %arg21[%262, %c0_123, %c0_124] : memref<8x16x64xf32, #tpu.memory_space<vmem>>, vector<1x16x64xf32>
    %264 = vector.shape_cast %263 : vector<1x16x64xf32> to vector<16x64xf32>
    %265 = arith.addf %261, %264 : vector<16x64xf32>
    %266 = arith.index_cast %257 : i32 to index
    %c0_125 = arith.constant 0 : index
    %c0_126 = arith.constant 0 : index
    %267 = vector.load %arg22[%266, %c0_125, %c0_126] : memref<8x16x64xf32, #tpu.memory_space<vmem>>, vector<1x16x64xf32>
    %268 = vector.shape_cast %267 : vector<1x16x64xf32> to vector<16x64xf32>
    %269 = vector.shape_cast %265 : vector<16x64xf32> to vector<1x16x64xf32>
    tpu.vector_store %arg22[%266, %c0_125, %c0_126], %269 {strides = array<i32>} : memref<8x16x64xf32, #tpu.memory_space<vmem>>, vector<1x16x64xf32>,
    %c2_i32_127 = arith.constant 2 : i32
    %c7_i32_128 = arith.constant 7 : i32
    %270 = arith.subi %c7_i32_128, %c2_i32_127 : i32
    %271 = arith.index_cast %270 : i32 to index
    %c0_129 = arith.constant 0 : index
    %c0_130 = arith.constant 0 : index
    %272 = vector.load %arg20[%271, %c0_129, %c0_130] : memref<8x16x64xf32, #tpu.memory_space<vmem>>, vector<1x16x64xf32>
    %273 = vector.shape_cast %272 : vector<1x16x64xf32> to vector<16x64xf32>
    %274 = arith.mulf %273, %265 : vector<16x64xf32>
    %275 = arith.index_cast %270 : i32 to index
    %c0_131 = arith.constant 0 : index
    %c0_132 = arith.constant 0 : index
    %276 = vector.load %arg21[%275, %c0_131, %c0_132] : memref<8x16x64xf32, #tpu.memory_space<vmem>>, vector<1x16x64xf32>
    %277 = vector.shape_cast %276 : vector<1x16x64xf32> to vector<16x64xf32>
    %278 = arith.addf %274, %277 : vector<16x64xf32>
    %279 = arith.index_cast %270 : i32 to index
    %c0_133 = arith.constant 0 : index
    %c0_134 = arith.constant 0 : index
    %280 = vector.load %arg22[%279, %c0_133, %c0_134] : memref<8x16x64xf32, #tpu.memory_space<vmem>>, vector<1x16x64xf32>
    %281 = vector.shape_cast %280 : vector<1x16x64xf32> to vector<16x64xf32>
    %282 = vector.shape_cast %278 : vector<16x64xf32> to vector<1x16x64xf32>
    tpu.vector_store %arg22[%279, %c0_133, %c0_134], %282 {strides = array<i32>} : memref<8x16x64xf32, #tpu.memory_space<vmem>>, vector<1x16x64xf32>,
    %c3_i32_135 = arith.constant 3 : i32
    %c7_i32_136 = arith.constant 7 : i32
    %283 = arith.subi %c7_i32_136, %c3_i32_135 : i32
    %284 = arith.index_cast %283 : i32 to index
    %c0_137 = arith.constant 0 : index
    %c0_138 = arith.constant 0 : index
    %285 = vector.load %arg20[%284, %c0_137, %c0_138] : memref<8x16x64xf32, #tpu.memory_space<vmem>>, vector<1x16x64xf32>
    %286 = vector.shape_cast %285 : vector<1x16x64xf32> to vector<16x64xf32>
    %287 = arith.mulf %286, %278 : vector<16x64xf32>
    %288 = arith.index_cast %283 : i32 to index
    %c0_139 = arith.constant 0 : index
    %c0_140 = arith.constant 0 : index
    %289 = vector.load %arg21[%288, %c0_139, %c0_140] : memref<8x16x64xf32, #tpu.memory_space<vmem>>, vector<1x16x64xf32>
    %290 = vector.shape_cast %289 : vector<1x16x64xf32> to vector<16x64xf32>
    %291 = arith.addf %287, %290 : vector<16x64xf32>
    %292 = arith.index_cast %283 : i32 to index
    %c0_141 = arith.constant 0 : index
    %c0_142 = arith.constant 0 : index
    %293 = vector.load %arg22[%292, %c0_141, %c0_142] : memref<8x16x64xf32, #tpu.memory_space<vmem>>, vector<1x16x64xf32>
    %294 = vector.shape_cast %293 : vector<1x16x64xf32> to vector<16x64xf32>
    %295 = vector.shape_cast %291 : vector<16x64xf32> to vector<1x16x64xf32>
    tpu.vector_store %arg22[%292, %c0_141, %c0_142], %295 {strides = array<i32>} : memref<8x16x64xf32, #tpu.memory_space<vmem>>, vector<1x16x64xf32>,
    %c4_i32_143 = arith.constant 4 : i32
    %c7_i32_144 = arith.constant 7 : i32
    %296 = arith.subi %c7_i32_144, %c4_i32_143 : i32
    %297 = arith.index_cast %296 : i32 to index
    %c0_145 = arith.constant 0 : index
    %c0_146 = arith.constant 0 : index
    %298 = vector.load %arg20[%297, %c0_145, %c0_146] : memref<8x16x64xf32, #tpu.memory_space<vmem>>, vector<1x16x64xf32>
    %299 = vector.shape_cast %298 : vector<1x16x64xf32> to vector<16x64xf32>
    %300 = arith.mulf %299, %291 : vector<16x64xf32>
    %301 = arith.index_cast %296 : i32 to index
    %c0_147 = arith.constant 0 : index
    %c0_148 = arith.constant 0 : index
    %302 = vector.load %arg21[%301, %c0_147, %c0_148] : memref<8x16x64xf32, #tpu.memory_space<vmem>>, vector<1x16x64xf32>
    %303 = vector.shape_cast %302 : vector<1x16x64xf32> to vector<16x64xf32>
    %304 = arith.addf %300, %303 : vector<16x64xf32>
    %305 = arith.index_cast %296 : i32 to index
    %c0_149 = arith.constant 0 : index
    %c0_150 = arith.constant 0 : index
    %306 = vector.load %arg22[%305, %c0_149, %c0_150] : memref<8x16x64xf32, #tpu.memory_space<vmem>>, vector<1x16x64xf32>
    %307 = vector.shape_cast %306 : vector<1x16x64xf32> to vector<16x64xf32>
    %308 = vector.shape_cast %304 : vector<16x64xf32> to vector<1x16x64xf32>
    tpu.vector_store %arg22[%305, %c0_149, %c0_150], %308 {strides = array<i32>} : memref<8x16x64xf32, #tpu.memory_space<vmem>>, vector<1x16x64xf32>,
    %c5_i32_151 = arith.constant 5 : i32
    %c7_i32_152 = arith.constant 7 : i32
    %309 = arith.subi %c7_i32_152, %c5_i32_151 : i32
    %310 = arith.index_cast %309 : i32 to index
    %c0_153 = arith.constant 0 : index
    %c0_154 = arith.constant 0 : index
    %311 = vector.load %arg20[%310, %c0_153, %c0_154] : memref<8x16x64xf32, #tpu.memory_space<vmem>>, vector<1x16x64xf32>
    %312 = vector.shape_cast %311 : vector<1x16x64xf32> to vector<16x64xf32>
    %313 = arith.mulf %312, %304 : vector<16x64xf32>
    %314 = arith.index_cast %309 : i32 to index
    %c0_155 = arith.constant 0 : index
    %c0_156 = arith.constant 0 : index
    %315 = vector.load %arg21[%314, %c0_155, %c0_156] : memref<8x16x64xf32, #tpu.memory_space<vmem>>, vector<1x16x64xf32>
    %316 = vector.shape_cast %315 : vector<1x16x64xf32> to vector<16x64xf32>
    %317 = arith.addf %313, %316 : vector<16x64xf32>
    %318 = arith.index_cast %309 : i32 to index
    %c0_157 = arith.constant 0 : index
    %c0_158 = arith.constant 0 : index
    %319 = vector.load %arg22[%318, %c0_157, %c0_158] : memref<8x16x64xf32, #tpu.memory_space<vmem>>, vector<1x16x64xf32>
    %320 = vector.shape_cast %319 : vector<1x16x64xf32> to vector<16x64xf32>
    %321 = vector.shape_cast %317 : vector<16x64xf32> to vector<1x16x64xf32>
    tpu.vector_store %arg22[%318, %c0_157, %c0_158], %321 {strides = array<i32>} : memref<8x16x64xf32, #tpu.memory_space<vmem>>, vector<1x16x64xf32>,
    %c6_i32_159 = arith.constant 6 : i32
    %c7_i32_160 = arith.constant 7 : i32
    %322 = arith.subi %c7_i32_160, %c6_i32_159 : i32
    %323 = arith.index_cast %322 : i32 to index
    %c0_161 = arith.constant 0 : index
    %c0_162 = arith.constant 0 : index
    %324 = vector.load %arg20[%323, %c0_161, %c0_162] : memref<8x16x64xf32, #tpu.memory_space<vmem>>, vector<1x16x64xf32>
    %325 = vector.shape_cast %324 : vector<1x16x64xf32> to vector<16x64xf32>
    %326 = arith.mulf %325, %317 : vector<16x64xf32>
    %327 = arith.index_cast %322 : i32 to index
    %c0_163 = arith.constant 0 : index
    %c0_164 = arith.constant 0 : index
    %328 = vector.load %arg21[%327, %c0_163, %c0_164] : memref<8x16x64xf32, #tpu.memory_space<vmem>>, vector<1x16x64xf32>
    %329 = vector.shape_cast %328 : vector<1x16x64xf32> to vector<16x64xf32>
    %330 = arith.addf %326, %329 : vector<16x64xf32>
    %331 = arith.index_cast %322 : i32 to index
    %c0_165 = arith.constant 0 : index
    %c0_166 = arith.constant 0 : index
    %332 = vector.load %arg22[%331, %c0_165, %c0_166] : memref<8x16x64xf32, #tpu.memory_space<vmem>>, vector<1x16x64xf32>
    %333 = vector.shape_cast %332 : vector<1x16x64xf32> to vector<16x64xf32>
    %334 = vector.shape_cast %330 : vector<16x64xf32> to vector<1x16x64xf32>
    tpu.vector_store %arg22[%331, %c0_165, %c0_166], %334 {strides = array<i32>} : memref<8x16x64xf32, #tpu.memory_space<vmem>>, vector<1x16x64xf32>,
    %c7_i32_167 = arith.constant 7 : i32
    %c7_i32_168 = arith.constant 7 : i32
    %335 = arith.subi %c7_i32_168, %c7_i32_167 : i32
    %336 = arith.index_cast %335 : i32 to index
    %c0_169 = arith.constant 0 : index
    %c0_170 = arith.constant 0 : index
    %337 = vector.load %arg20[%336, %c0_169, %c0_170] : memref<8x16x64xf32, #tpu.memory_space<vmem>>, vector<1x16x64xf32>
    %338 = vector.shape_cast %337 : vector<1x16x64xf32> to vector<16x64xf32>
    %339 = arith.mulf %338, %330 : vector<16x64xf32>
    %340 = arith.index_cast %335 : i32 to index
    %c0_171 = arith.constant 0 : index
    %c0_172 = arith.constant 0 : index
    %341 = vector.load %arg21[%340, %c0_171, %c0_172] : memref<8x16x64xf32, #tpu.memory_space<vmem>>, vector<1x16x64xf32>
    %342 = vector.shape_cast %341 : vector<1x16x64xf32> to vector<16x64xf32>
    %343 = arith.addf %339, %342 : vector<16x64xf32>
    %344 = arith.index_cast %335 : i32 to index
    %c0_173 = arith.constant 0 : index
    %c0_174 = arith.constant 0 : index
    %345 = vector.load %arg22[%344, %c0_173, %c0_174] : memref<8x16x64xf32, #tpu.memory_space<vmem>>, vector<1x16x64xf32>
    %346 = vector.shape_cast %345 : vector<1x16x64xf32> to vector<16x64xf32>
    %347 = vector.shape_cast %343 : vector<16x64xf32> to vector<1x16x64xf32>
    tpu.vector_store %arg22[%344, %c0_173, %c0_174], %347 {strides = array<i32>} : memref<8x16x64xf32, #tpu.memory_space<vmem>>, vector<1x16x64xf32>,
    %c8_i32_175 = arith.constant 8 : i32
    %c0_176 = arith.constant 0 : index
    %c0_177 = arith.constant 0 : index
    %c0_178 = arith.constant 0 : index
    %348 = vector.load %arg22[%c0_176, %c0_177, %c0_178] : memref<8x16x64xf32, #tpu.memory_space<vmem>>, vector<8x16x64xf32>
    %349 = vector.shape_cast %102 : vector<8x16xf32> to vector<8x16x1xf32>
    %350 = vector.broadcast %349 : vector<8x16x1xf32> to vector<8x16x64xf32>
    %351 = arith.mulf %348, %350 : vector<8x16x64xf32>
    %cst_179 = arith.constant dense<0.000000e+00> : vector<8x64xf32>
    %352 = vector.multi_reduction <add>, %351, %cst_179 [1] : vector<8x16x64xf32> to vector<8x64xf32>
    %353 = tpu.concatenate %226, %352 in 1 : vector<8x64xf32>, vector<8x64xf32> -> vector<8x128xf32>
    %c0_180 = arith.constant 0 : index
    %c0_181 = arith.constant 0 : index
    %354 = vector.load %arg11[%c0_180, %c0_181] : memref<1x128xf32, #tpu.memory_space<vmem>>, vector<1x128xf32>
    %355 = vector.broadcast %354 : vector<1x128xf32> to vector<8x128xf32>
    %356 = arith.mulf %355, %82 : vector<8x128xf32>
    %357 = arith.addf %353, %356 : vector<8x128xf32>
    %cst_182 = arith.constant 0.000000e+00 : f32
    %358 = vector.broadcast %cst_182 : f32 to vector<8x128xf32>
    %359 = arith.subf %358, %27 : vector<8x128xf32>
    %360 = math.exp %359 : vector<8x128xf32>
    %cst_183 = arith.constant 1.000000e+00 : f32
    %361 = vector.broadcast %cst_183 : f32 to vector<8x128xf32>
    %362 = arith.addf %361, %360 : vector<8x128xf32>
    %cst_184 = arith.constant 1.000000e+00 : f32
    %363 = vector.broadcast %cst_184 : f32 to vector<8x128xf32>
    %364 = arith.divf %363, %362 : vector<8x128xf32>
    %365 = arith.mulf %27, %364 : vector<8x128xf32>
    %366 = arith.mulf %357, %365 : vector<8x128xf32>
    %c0_185 = arith.constant 0 : index
    %c0_186 = arith.constant 0 : index
    %367 = vector.load %arg12[%c0_185, %c0_186] : memref<128x32xf32, #tpu.memory_space<vmem>>, vector<128x32xf32>
    %cst_187 = arith.constant dense<0.000000e+00> : vector<8x32xf32>
    %368 = tpu.matmul %366, %367, %cst_187 {dimension_numbers = #tpu.dot_dimension_numbers<[1], [0], [0], [1], [0, 0, 1, 1], [], []>} : vector<8x128xf32>, vector<128x32xf32>, vector<8x32xf32> -> vector<8x32xf32>
    %cst_188 = arith.constant dense<0.000000e+00> : vector<8xf32>
    %369 = vector.multi_reduction <add>, %368, %cst_188 [1] : vector<8x32xf32> to vector<8xf32>
    %370 = vector.shape_cast %369 : vector<8xf32> to vector<8x1xf32>
    %cst_189 = arith.constant 3.200000e+01 : f32
    %371 = vector.broadcast %cst_189 : f32 to vector<8x1xf32>
    %372 = arith.divf %370, %371 : vector<8x1xf32>
    %373 = vector.broadcast %372 : vector<8x1xf32> to vector<8x32xf32>
    %374 = arith.subf %368, %373 : vector<8x32xf32>
    %375 = arith.mulf %374, %374 : vector<8x32xf32>
    %cst_190 = arith.constant dense<0.000000e+00> : vector<8xf32>
    %376 = vector.multi_reduction <add>, %375, %cst_190 [1] : vector<8x32xf32> to vector<8xf32>
    %377 = vector.shape_cast %376 : vector<8xf32> to vector<8x1xf32>
    %cst_191 = arith.constant 3.200000e+01 : f32
    %378 = vector.broadcast %cst_191 : f32 to vector<8x1xf32>
    %379 = arith.divf %377, %378 : vector<8x1xf32>
    %cst_192 = arith.constant 9.99999974E-6 : f32
    %380 = vector.broadcast %cst_192 : f32 to vector<8x1xf32>
    %381 = arith.addf %379, %380 : vector<8x1xf32>
    %382 = math.rsqrt %381 : vector<8x1xf32>
    %383 = vector.broadcast %382 : vector<8x1xf32> to vector<8x32xf32>
    %384 = arith.mulf %374, %383 : vector<8x32xf32>
    %c0_193 = arith.constant 0 : index
    %c0_194 = arith.constant 0 : index
    %385 = vector.load %arg13[%c0_193, %c0_194] : memref<1x32xf32, #tpu.memory_space<vmem>>, vector<1x32xf32>
    %386 = vector.broadcast %385 : vector<1x32xf32> to vector<8x32xf32>
    %387 = arith.mulf %384, %386 : vector<8x32xf32>
    %c0_195 = arith.constant 0 : index
    %c0_196 = arith.constant 0 : index
    %388 = vector.load %arg14[%c0_195, %c0_196] : memref<1x32xf32, #tpu.memory_space<vmem>>, vector<1x32xf32>
    %389 = vector.broadcast %388 : vector<1x32xf32> to vector<8x32xf32>
    %390 = arith.addf %387, %389 : vector<8x32xf32>
    %c0_197 = arith.constant 0 : index
    %c0_198 = arith.constant 0 : index
    %391 = vector.load %arg15[%c0_197, %c0_198] : memref<32x128xf32, #tpu.memory_space<vmem>>, vector<32x128xf32>
    %cst_199 = arith.constant dense<0.000000e+00> : vector<8x128xf32>
    %392 = tpu.matmul %390, %391, %cst_199 {dimension_numbers = #tpu.dot_dimension_numbers<[1], [0], [0], [1], [0, 0, 1, 1], [], []>} : vector<8x32xf32>, vector<32x128xf32>, vector<8x128xf32> -> vector<8x128xf32>
    %c0_200 = arith.constant 0 : index
    %c0_201 = arith.constant 0 : index
    %393 = vector.load %arg16[%c0_200, %c0_201] : memref<1x128xf32, #tpu.memory_space<vmem>>, vector<1x128xf32>
    %394 = vector.broadcast %393 : vector<1x128xf32> to vector<8x128xf32>
    %395 = arith.addf %392, %394 : vector<8x128xf32>
    %cst_202 = arith.constant 5.000000e-01 : f32
    %396 = vector.broadcast %cst_202 : f32 to vector<8x128xf32>
    %397 = arith.mulf %396, %395 : vector<8x128xf32>
    %cst_203 = arith.constant 0.707106769 : f32
    %398 = vector.broadcast %cst_203 : f32 to vector<8x128xf32>
    %399 = arith.mulf %395, %398 : vector<8x128xf32>
    %cst_204 = arith.constant 0.000000e+00 : f32
    %400 = vector.broadcast %cst_204 : f32 to vector<8x128xf32>
    %401 = arith.cmpf oge, %399, %400 : vector<8x128xf32>
    %cst_205 = arith.constant 1.000000e+00 : f32
    %cst_206 = arith.constant -1.000000e+00 : f32
    %402 = vector.broadcast %cst_205 : f32 to vector<8x128xf32>
    %403 = vector.broadcast %cst_206 : f32 to vector<8x128xf32>
    %404 = arith.select %401, %402, %403 : vector<8x128xi1>, vector<8x128xf32>
    %405 = math.absf %399 : vector<8x128xf32>
    %cst_207 = arith.constant 0.327591091 : f32
    %406 = vector.broadcast %cst_207 : f32 to vector<8x128xf32>
    %407 = arith.mulf %406, %405 : vector<8x128xf32>
    %cst_208 = arith.constant 1.000000e+00 : f32
    %408 = vector.broadcast %cst_208 : f32 to vector<8x128xf32>
    %409 = arith.addf %408, %407 : vector<8x128xf32>
    %cst_209 = arith.constant 1.000000e+00 : f32
    %410 = vector.broadcast %cst_209 : f32 to vector<8x128xf32>
    %411 = arith.divf %410, %409 : vector<8x128xf32>
    %cst_210 = arith.constant 1.06140542 : f32
    %412 = vector.broadcast %cst_210 : f32 to vector<8x128xf32>
    %413 = arith.mulf %412, %411 : vector<8x128xf32>
    %cst_211 = arith.constant -1.45315206 : f32
    %414 = vector.broadcast %cst_211 : f32 to vector<8x128xf32>
    %415 = arith.addf %413, %414 : vector<8x128xf32>
    %416 = arith.mulf %415, %411 : vector<8x128xf32>
    %cst_212 = arith.constant 1.42141378 : f32
    %417 = vector.broadcast %cst_212 : f32 to vector<8x128xf32>
    %418 = arith.addf %416, %417 : vector<8x128xf32>
    %419 = arith.mulf %418, %411 : vector<8x128xf32>
    %cst_213 = arith.constant -0.284496725 : f32
    %420 = vector.broadcast %cst_213 : f32 to vector<8x128xf32>
    %421 = arith.addf %419, %420 : vector<8x128xf32>
    %422 = arith.mulf %421, %411 : vector<8x128xf32>
    %cst_214 = arith.constant 0.254829586 : f32
    %423 = vector.broadcast %cst_214 : f32 to vector<8x128xf32>
    %424 = arith.addf %422, %423 : vector<8x128xf32>
    %425 = arith.mulf %424, %411 : vector<8x128xf32>
    %cst_215 = arith.constant 0.000000e+00 : f32
    %426 = vector.broadcast %cst_215 : f32 to vector<8x128xf32>
    %427 = arith.subf %426, %405 : vector<8x128xf32>
    %428 = arith.mulf %427, %405 : vector<8x128xf32>
    %429 = math.exp %428 : vector<8x128xf32>
    %430 = arith.mulf %425, %429 : vector<8x128xf32>
    %cst_216 = arith.constant 1.000000e+00 : f32
    %431 = vector.broadcast %cst_216 : f32 to vector<8x128xf32>
    %432 = arith.subf %431, %430 : vector<8x128xf32>
    %433 = arith.mulf %404, %432 : vector<8x128xf32>
    %cst_217 = arith.constant 1.000000e+00 : f32
    %434 = vector.broadcast %cst_217 : f32 to vector<8x128xf32>
    %435 = arith.addf %434, %433 : vector<8x128xf32>
    %436 = arith.mulf %397, %435 : vector<8x128xf32>
    %c0_218 = arith.constant 0 : index
    %c0_219 = arith.constant 0 : index
    %437 = vector.load %arg17[%c0_218, %c0_219] : memref<128x32xf32, #tpu.memory_space<vmem>>, vector<128x32xf32>
    %cst_220 = arith.constant dense<0.000000e+00> : vector<8x32xf32>
    %438 = tpu.matmul %436, %437, %cst_220 {dimension_numbers = #tpu.dot_dimension_numbers<[1], [0], [0], [1], [0, 0, 1, 1], [], []>} : vector<8x128xf32>, vector<128x32xf32>, vector<8x32xf32> -> vector<8x32xf32>
    %c0_221 = arith.constant 0 : index
    %c0_222 = arith.constant 0 : index
    %439 = vector.load %arg18[%c0_221, %c0_222] : memref<1x32xf32, #tpu.memory_space<vmem>>, vector<1x32xf32>
    %440 = vector.broadcast %439 : vector<1x32xf32> to vector<8x32xf32>
    %441 = arith.addf %438, %440 : vector<8x32xf32>
    %442 = arith.addf %441, %1 : vector<8x32xf32>
    %c0_223 = arith.constant 0 : index
    %c0_224 = arith.constant 0 : index
    %c0_225 = arith.constant 0 : index
    %443 = vector.load %arg19[%c0_223, %c0_224, %c0_225] : memref<1x8x32xf32, #tpu.memory_space<vmem>>, vector<1x8x32xf32>
    %444 = vector.shape_cast %443 : vector<1x8x32xf32> to vector<8x32xf32>
    %445 = vector.shape_cast %442 : vector<8x32xf32> to vector<1x8x32xf32>
    tpu.vector_store %arg19[%c0_223, %c0_224, %c0_225], %445 {strides = array<i32>} : memref<1x8x32xf32, #tpu.memory_space<vmem>>, vector<1x8x32xf32>,
    return
  }
  func.func @transform_0(%arg0: i32) -> (i32, i32, i32) {
    %c0_i32 = arith.constant 0 : i32
    %c0_i32_0 = arith.constant 0 : i32
    %c0_i32_1 = arith.constant 0 : i32
    return %arg0, %c0_i32, %c0_i32_0 : i32, i32, i32
  }
  func.func @transform_1(%arg0: i32) -> (i32, i32) {
    %c0_i32 = arith.constant 0 : i32
    %c0_i32_0 = arith.constant 0 : i32
    %c0_i32_1 = arith.constant 0 : i32
    return %c0_i32, %c0_i32_0 : i32, i32
  }
  func.func @transform_2(%arg0: i32) -> (i32, i32) {
    %c0_i32 = arith.constant 0 : i32
    %c0_i32_0 = arith.constant 0 : i32
    %c0_i32_1 = arith.constant 0 : i32
    return %c0_i32, %c0_i32_0 : i32, i32
  }
  func.func @transform_3(%arg0: i32) -> (i32, i32) {
    %c0_i32 = arith.constant 0 : i32
    %c0_i32_0 = arith.constant 0 : i32
    %c0_i32_1 = arith.constant 0 : i32
    return %c0_i32, %c0_i32_0 : i32, i32
  }
  func.func @transform_4(%arg0: i32) -> (i32, i32) {
    %c0_i32 = arith.constant 0 : i32
    %c0_i32_0 = arith.constant 0 : i32
    %c0_i32_1 = arith.constant 0 : i32
    return %c0_i32, %c0_i32_0 : i32, i32
  }
  func.func @transform_5(%arg0: i32) -> (i32, i32) {
    %c0_i32 = arith.constant 0 : i32
    %c0_i32_0 = arith.constant 0 : i32
    %c0_i32_1 = arith.constant 0 : i32
    return %c0_i32, %c0_i32_0 : i32, i32
  }
  func.func @transform_6(%arg0: i32) -> (i32, i32) {
    %c0_i32 = arith.constant 0 : i32
    %c0_i32_0 = arith.constant 0 : i32
    %c0_i32_1 = arith.constant 0 : i32
    return %c0_i32, %c0_i32_0 : i32, i32
  }
  func.func @transform_7(%arg0: i32) -> (i32, i32) {
    %c0_i32 = arith.constant 0 : i32
    %c0_i32_0 = arith.constant 0 : i32
    %c0_i32_1 = arith.constant 0 : i32
    return %c0_i32, %c0_i32_0 : i32, i32
  }
  func.func @transform_8(%arg0: i32) -> (i32, i32) {
    %c0_i32 = arith.constant 0 : i32
    %c0_i32_0 = arith.constant 0 : i32
    %c0_i32_1 = arith.constant 0 : i32
    return %c0_i32, %c0_i32_0 : i32, i32
  }
  func.func @transform_9(%arg0: i32) -> (i32, i32) {
    %c0_i32 = arith.constant 0 : i32
    %c0_i32_0 = arith.constant 0 : i32
    %c0_i32_1 = arith.constant 0 : i32
    return %c0_i32, %c0_i32_0 : i32, i32
  }
  func.func @transform_10(%arg0: i32) -> (i32, i32) {
    %c0_i32 = arith.constant 0 : i32
    %c0_i32_0 = arith.constant 0 : i32
    %c0_i32_1 = arith.constant 0 : i32
    return %c0_i32, %c0_i32_0 : i32, i32
  }
  func.func @transform_11(%arg0: i32) -> (i32, i32) {
    %c0_i32 = arith.constant 0 : i32
    %c0_i32_0 = arith.constant 0 : i32
    %c0_i32_1 = arith.constant 0 : i32
    return %c0_i32, %c0_i32_0 : i32, i32
  }
  func.func @transform_12(%arg0: i32) -> (i32, i32) {
    %c0_i32 = arith.constant 0 : i32
    %c0_i32_0 = arith.constant 0 : i32
    %c0_i32_1 = arith.constant 0 : i32
    return %c0_i32, %c0_i32_0 : i32, i32
  }
  func.func @transform_13(%arg0: i32) -> (i32, i32) {
    %c0_i32 = arith.constant 0 : i32
    %c0_i32_0 = arith.constant 0 : i32
    %c0_i32_1 = arith.constant 0 : i32
    return %c0_i32, %c0_i32_0 : i32, i32
  }
  func.func @transform_14(%arg0: i32) -> (i32, i32) {
    %c0_i32 = arith.constant 0 : i32
    %c0_i32_0 = arith.constant 0 : i32
    %c0_i32_1 = arith.constant 0 : i32
    return %c0_i32, %c0_i32_0 : i32, i32
  }
  func.func @transform_15(%arg0: i32) -> (i32, i32) {
    %c0_i32 = arith.constant 0 : i32
    %c0_i32_0 = arith.constant 0 : i32
    %c0_i32_1 = arith.constant 0 : i32
    return %c0_i32, %c0_i32_0 : i32, i32
  }
  func.func @transform_16(%arg0: i32) -> (i32, i32) {
    %c0_i32 = arith.constant 0 : i32
    %c0_i32_0 = arith.constant 0 : i32
    %c0_i32_1 = arith.constant 0 : i32
    return %c0_i32, %c0_i32_0 : i32, i32
  }
  func.func @transform_17(%arg0: i32) -> (i32, i32) {
    %c0_i32 = arith.constant 0 : i32
    %c0_i32_0 = arith.constant 0 : i32
    %c0_i32_1 = arith.constant 0 : i32
    return %c0_i32, %c0_i32_0 : i32, i32
  }
  func.func @transform_18(%arg0: i32) -> (i32, i32, i32) {
    %c0_i32 = arith.constant 0 : i32
    %c0_i32_0 = arith.constant 0 : i32
    %c0_i32_1 = arith.constant 0 : i32
    return %arg0, %c0_i32, %c0_i32_0 : i32, i32, i32
  }
}

</mosaic_0001>

<bundles_post_ra>
// kernel: tpu_custom_call.1
= control target key start
LH: loop header
LB: loop body
LE: loop exit
PB: predicated region body
PF: predicated region fallthrough
CT: control target
= control target key end

     0   :  { %s4004_s0 = inlined_call_operand.vmem [shape: f32[2,8,32], index: 0, kind: input, shape index: {}]   ;;  %s4005_s1 = inlined_call_operand.vmem [shape: f32[1,32], index: 1, kind: input, shape index: {}]   ;;  %s4006_s2 = inlined_call_operand.vmem [shape: f32[1,32], index: 2, kind: input, shape index: {}]   ;;  %s4007_s3 = inlined_call_operand.vmem [shape: f32[32,256], index: 3, kind: input, shape index: {}]   ;;  %s4008_s4 = inlined_call_operand.vmem [shape: f32[4,128], index: 4, kind: input, shape index: {}]   ;;  %s4009_s5 = inlined_call_operand.vmem [shape: f32[4,128], index: 5, kind: input, shape index: {}]   ;;  %s4010_s6 = inlined_call_operand.vmem [shape: f32[1,128], index: 6, kind: input, shape index: {}]   ;;  %s4011_s7 = inlined_call_operand.vmem [shape: f32[128,192], index: 7, kind: input, shape index: {}]   ;;  %s4012_s8 = inlined_call_operand.vmem [shape: f32[1,128], index: 8, kind: input, shape index: {}]   ;;  %s4013_s9 = inlined_call_operand.vmem [shape: f32[32,64], index: 9, kind: input, shape index: {}]   ;;  %s4014_s10 = inlined_call_operand.vmem [shape: f32[1,128], index: 10, kind: input, shape index: {}]   ;;  %s4015_s11 = inlined_call_operand.vmem [shape: f32[128,32], index: 11, kind: input, shape index: {}]   ;;  %s4016_s12 = inlined_call_operand.vmem [shape: f32[1,32], index: 12, kind: input, shape index: {}]   ;;  %s4017_s13 = inlined_call_operand.vmem [shape: f32[1,32], index: 13, kind: input, shape index: {}]   ;;  %s4018_s14 = inlined_call_operand.vmem [shape: f32[32,128], index: 14, kind: input, shape index: {}]   ;;  %s4019_s15 = inlined_call_operand.vmem [shape: f32[1,128], index: 15, kind: input, shape index: {}]   ;;  %s4020_s16 = inlined_call_operand.vmem [shape: f32[128,32], index: 16, kind: input, shape index: {}]   ;;  %s4021_s17 = inlined_call_operand.vmem [shape: f32[1,32], index: 17, kind: input, shape index: {}]   ;;  %s4022_s18 = inlined_call_operand.hbm [shape: f32[2,8,32], index: 18, kind: output, shape index: {}]  }
   0x1   :  { %4029 = sst [smem:[#allocation14_spill]] %s4004_s0 }
   0x2   :  { %4030 = sst [smem:[#allocation15_spill]] %s4005_s1 }
   0x3   :  { %4031 = sst [smem:[#allocation16_spill]] %s4006_s2 }
   0x4   :  { %23 = vsyncpa [#allocation6], 0 }
   0x5   :  { %25 = vsyncpa [#allocation6 + $0x1], 0  ;;  %s3088_s27 = smov 0   ;;  %s3090_s28 = smov 0  }
   0x6   :  { %s3092_s29 = smov 0   ;;  %s3094_s30 = smov 0  }
   0x7 LB: > { %4032 = sst [smem:[#allocation8_spill]] %s2972_s27  ;;  %s3109_s0 = sadd.s32 4294967295, %s2984_s30   ;;  %s2984_s30 = sphi %s3094_s30, %s4046_s30   ;;  %s2980_s29 = sphi %s3092_s29, %s4051_s29   ;;  %s2976_s28 = sphi %s3090_s28, %s4050_s28   ;;  %s2972_s27 = sphi %s3088_s27, %s4049_s27  }
   0x8   : > { %4033 = sst [smem:[#allocation9_spill]] %s2980_s29  ;;  %s2543_s19 = sadd.s32 4294967294, %s2984_s30  }
   0x9   : > { %4034 = sst [smem:[#allocation10_spill]] %s2984_s30  ;;  %s3113_s1 = sadd.s32 1, %s2984_s30  }
   0xa   : > { %4035 = sst [smem:[#allocation11_spill]] %s3113_s1  ;;  %s421_s20 = sadd.s32 1, %s2980_s29 }
   0xb   : > { %s418_s21 = ssub.s32 %s2984_s30, %s3113_s1  ;;  %p431_p0 = scmp.ne.s32.totalorder %s2980_s29, %s2976_s28 }
   0xc   : > { %p419_p1 = scmp.eq.s32.totalorder %s418_s21, 0  ;;  %p432_p2 = scmp.eq.s32.totalorder %s3109_s0, 1 }
   0xd   : > { %p437_p3 = scmp.ne.s32.totalorder %s2976_s28, %s2972_s27  ;;  %p438_p4 = scmp.eq.s32.totalorder %s2543_s19, 1 }
   0xe   : > { %s3124_s22 = scalar_select %p419_p1, %s2980_s29, %s421_s20  }
   0xf   : > { %p3126_p5 = por %p432_p2, %p431_p0  ;;  %p3130_p6 = por %p438_p4, %p437_p3 }
  0x10   : > { %4036 = sst [smem:[#allocation12_spill]] %s3124_s22  ;;  %p2546_p7 = scmp.ge.s32.totalorder %s2984_s30, 1 }
  0x11   : > { %s4038_s23 = scalar_select %p3130_p6, 1, 0 }
  0x12   : > { %p514_p8 = scmp.lt.s32.totalorder %s2984_s30, 3 }
  0x13   : > { %4039 = sst [smem:[#allocation13_spill]] %s4038_s23 }
  0x14   : > { %p515_p9 = pnand %p2546_p7, %p514_p8 }
  0x15   : > { %p567_p10 = scmp.lt.s32.totalorder (!%p515_p9), %s3109_s0, 1  ;;  %vm572_vm0 = vcmask (!%p515_p9), 261120   ;;  %s4040_s20 = sld [smem:[#allocation14_spill]] (!%p515_p9)  ;;  %v604_v7 = vld [vmem:[%s4007_s3 + $0x8] sm:$0xff] (!%p515_p9)  ;;  %v606_v8 = vld [vmem:[%s4007_s3 + $0x18] sm:$0xff] (!%p515_p9)  ;;  %v603_v9 = vld [vmem:[%s4007_s3] sm:$0xff] (!%p515_p9) }
  0x16   : > { %518 = sbr.rel (%p515_p9) target bundleno = 2268 (0x8dc), region = 92  ;;  %v2690_v10 = vpack.c.bf16 (!%p515_p9), %v606_v8, %v604_v7  ;;  %v605_v11 = vld [vmem:[%s4007_s3 + $0x10] sm:$0xff] (!%p515_p9)  ;;  %v608_v12 = vld [vmem:[%s4007_s3 + $0x28] sm:$0xff] (!%p515_p9)  ;;  %v610_v13 = vld [vmem:[%s4007_s3 + $0x38] sm:$0xff] (!%p515_p9)  ;;  %v2986_v14 = vmov (!%p515_p9), 0.0   ;;  %s4041_s23 = sld [smem:[#allocation15_spill]] (!%p515_p9) }
  0x17   : > { %678 = vmatprep.mubr.f32.mxu1 (!%p515_p9), %v2986_v14  ;;  %v2692_v15 = vpack.c.bf16 (!%p515_p9), %v605_v11, %v603_v9  ;;  %v2694_v16 = vpack.c.bf16 (!%p515_p9), %v610_v13, %v608_v12  ;;  %v607_v17 = vld [vmem:[%s4007_s3 + $0x20] sm:$0xff] (!%p515_p9)  ;;  %v609_v18 = vld [vmem:[%s4007_s3 + $0x30] sm:$0xff] (!%p515_p9)  ;;  %v776_v29 = vld [vmem:[%s4011_s7 + $0x8] sm:$0xff] (!%p515_p9)  ;;  %vm704_vm1 = vcmask (!%p515_p9), 1040384   ;;  %vm708_vm2 = vcmask (!%p515_p9), 1046528   ;;  %s564_s29 = sand.u32 (!%p515_p9), 1, %s2976_s28  }
  0x18   : > { %2691 = vmatprep.subr.bf16.mxu1 (!%p515_p9), %v2690_v10  ;;  %v2696_v19 = vpack.c.bf16 (!%p515_p9), %v609_v18, %v607_v17  ;;  %v778_v30 = vld [vmem:[%s4011_s7 + $0x18] sm:$0xff] (!%p515_p9)  ;;  %v775_v32 = vld [vmem:[%s4011_s7] sm:$0xff] (!%p515_p9)  ;;  %v777_v33 = vld [vmem:[%s4011_s7 + $0x10] sm:$0xff] (!%p515_p9)  ;;  %vm726_vm3 = vcmask (!%p515_p9), 1041408   ;;  %vm730_vm4 = vcmask (!%p515_p9), 1045504   ;;  %vm748_vm5 = vcmask (!%p515_p9), 1042432  }
  0x19   : > { %2693 = vmatpush1.bf16.msra.mxu1 (!%p515_p9), %v2692_v15  ;;  %v2698_v31 = vpack.c.bf16 (!%p515_p9), %v778_v30, %v776_v29  ;;  %v2700_v34 = vpack.c.bf16 (!%p515_p9), %v777_v33, %v775_v32  ;;  %v780_v35 = vld [vmem:[%s4011_s7 + $0x28] sm:$0xff] (!%p515_p9)  ;;  %v782_v36 = vld [vmem:[%s4011_s7 + $0x38] sm:$0xff] (!%p515_p9)  ;;  %v779_v38 = vld [vmem:[%s4011_s7 + $0x20] sm:$0xff] (!%p515_p9)  ;;  %vm752_vm6 = vcmask (!%p515_p9), 1044480   ;;  %vm1050_vm7 = vcmask (!%p515_p9), 523264   ;;  %s2547_s26 = sshll.u32 (!%p515_p9), %s564_s29, 3 }
  0x1a   : > { %2695 = vmatprep.subr.bf16.mxu1 (!%p515_p9), %v2694_v16  ;;  %v2702_v37 = vpack.c.bf16 (!%p515_p9), %v782_v36, %v780_v35  ;;  %v781_v39 = vld [vmem:[%s4011_s7 + $0x30] sm:$0xff] (!%p515_p9)  ;;  %v784_v41 = vld [vmem:[%s4011_s7 + $0x48] sm:$0xff] (!%p515_p9)  ;;  %v786_v42 = vld [vmem:[%s4011_s7 + $0x58] sm:$0xff] (!%p515_p9)  ;;  %vm2098_vm8 = vcmask (!%p515_p9), 1041409   ;;  %vm2100_vm9 = vcmask (!%p515_p9), 1042434   ;;  %vm2102_vm10 = vcmask (!%p515_p9), 1043459  }
  0x1b   : > { %v2704_v40 = vpack.c.bf16 (!%p515_p9), %v781_v39, %v779_v38  ;;  %v2706_v43 = vpack.c.bf16 (!%p515_p9), %v786_v42, %v784_v41  ;;  %v783_v44 = vld [vmem:[%s4011_s7 + $0x40] sm:$0xff] (!%p515_p9)  ;;  %v785_v45 = vld [vmem:[%s4011_s7 + $0x50] sm:$0xff] (!%p515_p9)  ;;  %v788_v47 = vld [vmem:[%s4011_s7 + $0x68] sm:$0xff] (!%p515_p9)  ;;  %vm2104_vm11 = vcmask (!%p515_p9), 1044484   ;;  %vm2106_vm12 = vcmask (!%p515_p9), 1045509   ;;  %s2567_s30 = sshll.u32 (!%p515_p9), %s3109_s0, 7 }
  0x1c   : > { %v2549_v24 = vld [vmem:[%s4041_s23] ss:$0 sm:$0xff] (!%p515_p9)  ;;  %v2708_v46 = vpack.c.bf16 (!%p515_p9), %v785_v45, %v783_v44  ;;  %v790_v48 = vld [vmem:[%s4011_s7 + $0x78] sm:$0xff] (!%p515_p9)  ;;  %v789_v51 = vld [vmem:[%s4011_s7 + $0x70] sm:$0xff] (!%p515_p9)  ;;  %vm2108_vm13 = vcmask (!%p515_p9), 1046534   ;;  %vm2990_vm14 = vmmov (!%p515_p9), 0  }
  0x1d   : > { %s568_s24 = scalar_select %p567_p10, %s3109_s0, 1  ;;  %2697 = vmatpush1.bf16.msra.mxu1 %v2696_v19  ;;  %v2710_v49 = vpack.c.bf16 %v790_v48, %v788_v47  ;;  %v787_v50 = vld [vmem:[%s4011_s7 + $0x60] sm:$0xff]  ;;  %v792_v53 = vld [vmem:[%s4011_s7 + $0x88] sm:$0xff]  ;;  %v794_v54 = vld [vmem:[%s4011_s7 + $0x98] sm:$0xff]  ;;  %2641 = vmatprep.mubr.msk.f32.mxu0 %vm2990_vm14, %v2986_v14  ;;  %vm2110_vm15 = vcmask 1047559  }
  0x1e   : > { %2699 = vmatprep.subr.bf16.mxu1 %v2698_v31  ;;  %v2712_v52 = vpack.c.bf16 %v789_v51, %v787_v50  ;;  %v791_v55 = vld [vmem:[%s4011_s7 + $0x80] sm:$0xff]  ;;  %v2714_v56 = vpack.c.bf16 %v794_v54, %v792_v53  ;;  %v793_v57 = vld [vmem:[%s4011_s7 + $0x90] sm:$0xff]  ;;  %v796_v58 = vld [vmem:[%s4011_s7 + $0xa8] sm:$0xff]  ;;  %s566_s23 = scalar_lea.vmem [#allocation5], %s2547_s26  ;;  %s2471_s22 = scalar_lea.sflag [#allocation6], %s564_s29 }
  0x1f   : > { %s2548_s25 = sshll.u32 %s568_s24, 3  ;;  %v798_v59 = vld [vmem:[%s4011_s7 + $0xb8] sm:$0xff]  ;;  %v2716_v60 = vpack.c.bf16 %v793_v57, %v791_v55  ;;  %v795_v62 = vld [vmem:[%s4011_s7 + $0xa0] sm:$0xff]  ;;  %v797_v63 = vld [vmem:[%s4011_s7 + $0xb0] sm:$0xff]  ;;  %s2987_s24 = smov 64  }
  0x20   : > { %s3141_s21 = scalar_lea.vmem %s4040_s20, %s2548_s25  ;;  %s4042_s20 = sld [smem:[#allocation16_spill]]  ;;  %v2718_v61 = vpack.c.bf16 %v798_v59, %v796_v58  ;;  %v806_v7 = vld [vmem:[%s4011_s7 + $0xf8] sm:$0xff]  ;;  %v803_v10 = vld [vmem:[%s4011_s7 + $0xe0] sm:$0xff]  ;;  %v805_v11 = vld [vmem:[%s4011_s7 + $0xf0] sm:$0xff] }
  0x21   : > { %v571_v0 = vld [vmem:[%s3141_s21] sm:$0xff]  ;;  %v2728_v12 = vpack.c.bf16 %v805_v11, %v803_v10  ;;  %v897_v13 = vld [vmem:[%s4013_s9 + $0x10] sm:$0xff]  ;;  %v898_v15 = vld [vmem:[%s4013_s9 + $0x18] sm:$0xff]  ;;  %s2484_s25 = sshll.u32 %s566_s23, 4  ;;  %s3963_s25 = int_to_ptr.vmem [resolvable:$true] %s2484_s25 }
  0x22   : > { %v573_v1 = vsel %vm572_vm0, %v571_v0, 0.0  ;;  %v903_v16 = vmul.f32 1.442695, %v897_v13  ;;  %v905_v17 = vmul.f32 1.442695, %v898_v15  ;;  %s2922_s0 = scalar_lea.vmem %s3963_s25, 128 }
  0x23   : > { %574 = vadd.xlane.f32.xlu0 %v573_v1  ;;  %v802_v1 = vld [vmem:[%s4011_s7 + $0xd8] sm:$0xff]  ;;  %v2552_v30 = vld [vmem:[%s4010_s6] ss:$0 sm:$0xff]  ;;  %v2555_v45 = vld [vmem:[%s4008_s4 + $0x2] ss:$0 sm:$0xff]  ;;  %p2923_p11 = scmp.ne.s32.totalorder %s3963_s25, %s2922_s0 }
  0x24   : > { %v2557_v54 = vld [vmem:[%s4008_s4 + $0x3] ss:$0 sm:$0xff] }
  0x25   : > { %v2558_v58 = vld [vmem:[%s4009_s5 + $0x3] ss:$0 sm:$0xff]  ;;  %p2924_p12 = pnand %p2923_p11, %p3126_p5 }
  0x26   : > { %v2550_v26 = vld [vmem:[%s4042_s20] ss:$0 sm:$0xff]  ;;  %s3961_s20 = scalar_lea.hbm %s4022_s18, %s2567_s30 }
  0x27   : > { %p2925_p13 = pneg %p2924_p12 }
  0xb0   : > { %v575_v2 = vpop.xlane.xlu0 %574 }
  0xb1   : > { %v577_v3 = vmul.f32 0.03125, %v575_v2  ;;  %v2720_v2 = vpack.c.bf16 %v797_v63, %v795_v62 }
  0xb3   : > { %v578_v4 = vsub.f32 %v571_v0, %v577_v3  ;;  %v800_v0 = vld [vmem:[%s4011_s7 + $0xc8] sm:$0xff] }
  0xb4   : > { %v2722_v3 = vpack.c.bf16 %v802_v1, %v800_v0 }
  0xb5   : > { %v579_v5 = vmul.f32 %v578_v4, %v578_v4 }
  0xb7   : > { %v580_v6 = vsel %vm572_vm0, %v579_v5, 0.0  ;;  %v801_v5 = vld [vmem:[%s4011_s7 + $0xd0] sm:$0xff] }
  0xb8   : > { %581 = vadd.xlane.f32.xlu0 %v580_v6  ;;  %v804_v6 = vld [vmem:[%s4011_s7 + $0xe8] sm:$0xff] }
  0xb9   : > { %v2726_v9 = vpack.c.bf16 %v806_v7, %v804_v6  ;;  %v2559_v6 = vld [vmem:[%s4012_s8] ss:$0 sm:$0xff] }
 0x145   : > { %v582_v20 = vpop.xlane.xlu0 %581 }
 0x146   : > { %v583_v21 = vmul.f32 0.03125, %v582_v20 }
 0x148   : > { %v584_v22 = vadd.f32 1e-05, %v583_v21 }
 0x14a   : > { %2829 = vrsqrt.f32 %v584_v22  ;;  %v688_v22 = vlaneseq }
 0x14b   : > { %2831 = vpow2.f32 %v903_v16 }
 0x14c   : > { %2833 = vpow2.f32 %v905_v17 }
 0x154   : > { %v2830_v23 = vpop.eup %2829 }
 0x155   : > { %v586_v25 = vmul.f32 %v2830_v23, %v578_v4  ;;  %v799_v4 = vld [vmem:[%s4011_s7 + $0xc0] sm:$0xff]  ;;  %v2832_v18 = vpop.eup %2831  ;;  %v3283_v23 = vshrl.u32 %v688_v22, 7 }
 0x156   : > { %v2724_v8 = vpack.c.bf16 %v801_v5, %v799_v4  ;;  %v2834_v19 = vpop.eup %2833  ;;  %v909_v20 = vsub.f32 0.0, %v2832_v18 }
 0x157   : > { %v594_v27 = vmul.f32 %v2549_v24, %v586_v25  ;;  %v910_v21 = vsub.f32 0.0, %v2834_v19  ;;  %v685_v24 = vld [vmem:[%s4008_s4] sm:$0x1]  ;;  %v1185_v13 = vsub.s32 6, %v3283_v23  ;;  %v1152_v18 = vsub.s32 3, %v3283_v23 }
 0x158   : > { %1548 = vrot.lane.b32.xlu1 %v909_v20, %s2987_s24  ;;  %v686_v25 = vld [vmem:[%s4009_s5] sm:$0x1] }
 0x159   : > { %v602_v28 = vadd.f32 %v2550_v26, %v594_v27  ;;  %v687_v26 = vadd.f32 %v686_v25, %v685_v24  ;;  %v3292_v27 = vsub.s32 0, %v3283_v23  ;;  %v1174_v24 = vsub.s32 5, %v3283_v23 }
 0x15a   : > { %v1130_v25 = vsub.s32 1, %v3283_v23 }
 0x15b   : > { %2551 = vmatmul.mubr.msk.f32.vlgmr.msra.gmra.mrb[0].mxu1 %vm572_vm0, %v602_v28  ;;  %v691_v28 = vrot.slane %v687_v26, %v3292_v27 }
 0x15c   : > { %871 = vmatprep.mubr.f32.mxu1 %v2986_v14  ;;  %2701 = vmatpush1.bf16.msra.mxu1 %v2700_v34  ;;  %v2553_v34 = vld [vmem:[%s4008_s4 + $0x1] ss:$0 sm:$0xff] }
 0x15d   : > { %2703 = vmatprep.subr.bf16.mxu1 %v2702_v37  ;;  %1550 = vrot.lane.b32.xlu1 %v910_v21, %s2987_s24  ;;  %v1141_v21 = vsub.s32 2, %v3283_v23 }
 0x160   : > { %2705 = vmatpush1.bf16.msra.mxu1 %v2704_v40  ;;  %v2554_v40 = vld [vmem:[%s4009_s5 + $0x1] ss:$0 sm:$0xff] }
 0x161   : > { %2707 = vmatprep.subr.bf16.mxu1 %v2706_v43 }
 0x164   : > { %2709 = vmatpush1.bf16.msra.mxu1 %v2708_v46 }
 0x165   : > { %2711 = vmatprep.subr.bf16.mxu1 %v2710_v49  ;;  %v2556_v49 = vld [vmem:[%s4009_s5 + $0x2] ss:$0 sm:$0xff] }
 0x168   : > { %2713 = vmatpush1.bf16.msra.mxu1 %v2712_v52 }
 0x169   : > { %2715 = vmatprep.subr.bf16.mxu1 %v2714_v56 }
 0x16c   : > { %2717 = vmatpush1.bf16.msra.mxu1 %v2716_v60 }
 0x16d   : > { %2719 = vmatprep.subr.bf16.mxu1 %v2718_v61 }
 0x170   : > { %2721 = vmatpush1.bf16.msra.mxu1 %v2720_v2 }
 0x171   : > { %2723 = vmatprep.subr.bf16.mxu1 %v2722_v3 }
 0x174   : > { %2725 = vmatpush1.bf16.msra.mxu1 %v2724_v8  ;;  %v1196_v8 = vsub.s32 7, %v3283_v23 }
 0x175   : > { %2727 = vmatprep.subr.bf16.mxu1 %v2726_v9 }
 0x178   : > { %2729 = vmatpush1.bf16.msra.mxu1 %v2728_v12  ;;  %v1163_v12 = vsub.s32 4, %v3283_v23 }
 0x22e   : > { %v680_v29 = vpop.f32.mrb[0].mxu1 }
 0x22f   : > { %v692_v31 = vmul.f32 %v691_v28, %v680_v29  ;;  %v702_v32 = vrot.slane %v680_v29, 7  ;;  %v706_v33 = vrot.slane %v680_v29, 1  ;;  %v724_v35 = vrot.slane %v680_v29, 6  ;;  %v3301_v36 = vpop.f32.mrb[1].mxu1 }
 0x230   : > { %v728_v41 = vrot.slane %v680_v29, 2  ;;  %v746_v44 = vrot.slane %v680_v29, 5  ;;  %v750_v50 = vrot.slane %v680_v29, 3 }
 0x231   : > { %v700_v37 = vadd.f32 %v2552_v30, %v692_v31  ;;  %v705_v38 = vsel %vm704_vm1, 0.0, %v702_v32  ;;  %v709_v39 = vsel %vm708_vm2, %v706_v33, 0.0  ;;  %v727_v43 = vsel %vm726_vm3, 0.0, %v724_v35 }
 0x232   : > { %v715_v42 = vmul.f32 %v2553_v34, %v705_v38  ;;  %v722_v46 = vmul.f32 %v2554_v40, %v709_v39  ;;  %v731_v48 = vsel %vm730_vm4, %v728_v41, 0.0  ;;  %v737_v52 = vmul.f32 %v2555_v45, %v727_v43 }
 0x233   : > { %v749_v53 = vsel %vm748_vm5, 0.0, %v746_v44  ;;  %v744_v56 = vmul.f32 %v2556_v49, %v731_v48  ;;  %v753_v57 = vsel %vm752_vm6, %v750_v50, 0.0  ;;  %v2988_v33 = vmov 1966171168   ;;  %v895_v50 = vld [vmem:[%s4013_s9] sm:$0xff] }
 0x234   : > { %v716_v47 = vadd.f32 %v715_v42, %v700_v37  ;;  %v759_v60 = vmul.f32 %v2557_v54, %v749_v53  ;;  %v766_v62 = vmul.f32 %v2558_v58, %v753_v57  ;;  %v915_v34 = vunpack.c.l.s4 %v2988_v33  ;;  %v896_v42 = vld [vmem:[%s4013_s9 + $0x8] sm:$0xff]  ;;  %v3374_v53 = vpop.permute.xlu1 %1548 }
 0x236   : > { %v723_v51 = vadd.f32 %v722_v46, %v716_v47  ;;  %v916_v35 = vunpack.c.0.s8 %v915_v34 }
 0x238   : > { %v738_v55 = vadd.f32 %v737_v52, %v723_v51  ;;  %v919_v40 = vsub.s32 %v916_v35, %v3283_v23  ;;  %v901_v23 = vmul.f32 1.442695, %v896_v42 }
 0x23a   : > { %v745_v59 = vadd.f32 %v744_v56, %v738_v55  ;;  %v899_v55 = vmul.f32 1.442695, %v895_v50 }
 0x23c   : > { %v760_v61 = vadd.f32 %v759_v60, %v745_v59 }
 0x23e   : > { %v767_v63 = vadd.f32 %v766_v62, %v760_v61 }
 0x240   : > { %v768_v0 = vsub.f32 0.0, %v767_v63 }
 0x242   : > { %v769_v1 = vmul.f32 1.442695, %v768_v0  ;;  %v3384_v0 = vpop.permute.xlu1 %1550 }
 0x244   : > { %2835 = vpow2.f32 %v769_v1 }
 0x24e   : > { %v2836_v2 = vpop.eup %2835 }
 0x24f   : > { %v771_v3 = vadd.f32 1.0, %v2836_v2 }
 0x251   : > { %2837 = vrcp.f32 %v771_v3 }
 0x25b   : > { %v2838_v4 = vpop.eup %2837 }
 0x25c   : > { %v3318_v5 = vmul.f32 %v2838_v4, %v767_v63 }
 0x25e   : > { %872 = vmatmul.mubr.f32.vlgmr.msra.gmra.mrb[2].mxu1 %v3318_v5 }
 0x25f   : > { %2652 = vmatprep.mubr.msk.f32.mxu1 %vm2990_vm14, %v2986_v14 }
 0x331   : > { %v873_v7 = vpop.f32.mrb[2].mxu1 }
 0x332   : > { %v885_v9 = vadd.f32 %v2559_v6, %v873_v7  ;;  %v875_v10 = vpop.f32.mrb[3].mxu1 }
 0x333   : > { %v3327_v15 = vrot.slane %v875_v10, %v1196_v8  ;;  %v3332_v19 = vrot.slane %v875_v10, %v1163_v12  ;;  %v3334_v20 = vrot.slane %v875_v10, %v1185_v13  ;;  %v3339_v22 = vrot.slane %v875_v10, %v1152_v18 }
 0x334   : > { %v887_v11 = vand.u32 2147483647, %v885_v9  ;;  %v3345_v26 = vrot.slane %v875_v10, %v1141_v21  ;;  %v3347_v28 = vrot.slane %v875_v10, %v1174_v24  ;;  %v3351_v31 = vrot.slane %v875_v10, %v1130_v25 }
 0x335   : > { %1744 = vbcast.lane.b32.xlu1 %v3327_v15, 280  ;;  %1740 = vbcast.lane.b32.xlu0 %v3327_v15, 272  ;;  %v3356_v32 = vrot.slane %v875_v10, %v3292_v27  ;;  %v886_v38 = vmax.f32 %v885_v9, 0.0 }
 0x336   : > { %v888_v16 = vsub.f32 0.0, %v887_v11 }
 0x338   : > { %v889_v17 = vmul.f32 1.442695, %v888_v16 }
 0x339   : > { %1732 = vbcast.lane.b32.xlu1 %v3334_v20, 272  ;;  %1720 = vbcast.lane.b32.xlu0 %v3332_v19, 280 }
 0x33a   : > { %2839 = vpow2.f32 %v889_v17 }
 0x33d   : > { %1736 = vbcast.lane.b32.xlu1 %v3334_v20, 280  ;;  %1712 = vbcast.lane.b32.xlu0 %v3339_v22, 280 }
 0x341   : > { %1724 = vbcast.lane.b32.xlu1 %v3347_v28, 272  ;;  %1704 = vbcast.lane.b32.xlu0 %v3345_v26, 280 }
 0x344   : > { %v2840_v29 = vpop.eup %2839 }
 0x345   : > { %v891_v30 = vadd.f32 1.0, %v2840_v29  ;;  %1728 = vbcast.lane.b32.xlu1 %v3347_v28, 280  ;;  %1696 = vbcast.lane.b32.xlu0 %v3351_v31, 280 }
 0x347   : > { %2841 = vlog2.f32 %v891_v30 }
 0x348   : > { %2843 = vpow2.f32 %v901_v23 }
 0x349   : > { %1716 = vbcast.lane.b32.xlu1 %v3332_v19, 272  ;;  %1688 = vbcast.lane.b32.xlu0 %v3356_v32, 280  ;;  %2845 = vpow2.f32 %v899_v55 }
 0x34d   : > { %1708 = vbcast.lane.b32.xlu1 %v3339_v22, 272  ;;  %1203 = vbcast.lane.b32.xlu0 %v3327_v15, 264 }
 0x351   : > { %v2842_v37 = vpop.eup %2841  ;;  %1700 = vbcast.lane.b32.xlu1 %v3345_v26, 272  ;;  %1192 = vbcast.lane.b32.xlu0 %v3334_v20, 264 }
 0x352   : > { %v893_v39 = vmul.f32 0.6931472, %v2842_v37  ;;  %v2844_v13 = vpop.eup %2843 }
 0x353   : > { %v908_v33 = vsub.f32 0.0, %v2844_v13  ;;  %v2846_v37 = vpop.eup %2845 }
 0x354   : > { %v894_v41 = vadd.f32 %v893_v39, %v886_v38 }
 0x355   : > { %1692 = vbcast.lane.b32.xlu1 %v3351_v31, 272  ;;  %1126 = vbcast.lane.b32.xlu0 %v3356_v32, 264 }
 0x356   : > { %v911_v43 = vmul.f32 %v894_v41, %v3318_v5  ;;  %v913_v44 = vcombine.high %v894_v41, %v894_v41  ;;  %v920_v45 = vrot.slane %v894_v41, %v919_v40 }
 0x358   : > { %v927_v46 = vrot.slane %v913_v44, %v919_v40  ;;  %v1068_v47 = vcombine.high %v911_v43, %v911_v43  ;;  %v1075_v48 = vrot.slane %v911_v43, %v919_v40  ;;  %v936_v49 = vrot.slane %v920_v45, %v919_v40 }
 0x359   : > { %v928_v51 = vcombine.high %v920_v45, %v920_v45  ;;  %1181 = vbcast.lane.b32.xlu0 %v3347_v28, 264  ;;  %1684 = vbcast.lane.b32.xlu1 %v3356_v32, 272 }
 0x35a   : > { %v1082_v52 = vrot.slane %v1068_v47, %v919_v40  ;;  %v943_v54 = vrot.slane %v927_v46, %v919_v40  ;;  %v929_v56 = vcombine.high %v927_v46, %v927_v46  ;;  %v958_v57 = vcombine.high %v936_v49, %v936_v49 }
 0x35b   : > { %v950_v58 = vrot.slane %v928_v51, %v919_v40  ;;  %v965_v61 = vrot.slane %v936_v49, %v3292_v27  ;;  %v1083_v62 = vcombine.high %v1075_v48, %v1075_v48  ;;  %v3404_v11 = vrot.slane %v1075_v48, %v919_v40 }
 0x35c   : > { %v1084_v59 = vcombine.high %v1082_v52, %v1082_v52  ;;  %v959_v60 = vcombine.high %v943_v54, %v943_v54  ;;  %v3382_v63 = vrot.slane %v943_v54, %v3292_v27  ;;  %v957_v1 = vrot.slane %v929_v56, %v919_v40 }
 0x35d   : > { %1137 = vbcast.lane.b32.xlu0 %v3351_v31, 264  ;;  %1199 = vbcast.lane.b32.xlu1 %v3327_v15, 256  ;;  %v3387_v2 = vrot.slane %v958_v57, %v3292_v27  ;;  %v960_v3 = vcombine.high %v950_v58, %v950_v58  ;;  %v3390_v4 = vrot.slane %v950_v58, %v3292_v27  ;;  %v907_v46 = vsub.f32 0.0, %v2846_v37 }
 0x35e   : > { %v3393_v6 = vrot.slane %v1084_v59, %v919_v40  ;;  %v3395_v7 = vrot.slane %v1082_v52, %v919_v40  ;;  %v3398_v8 = vrot.slane %v959_v60, %v3292_v27  ;;  %v1555_v9 = vmul.f32 %v3384_v0, %v965_v61 }
 0x35f   : > { %v3402_v10 = vrot.slane %v1083_v62, %v919_v40  ;;  %v1563_v12 = vmul.f32 %v3384_v0, %v3382_v63  ;;  %v3409_v16 = vrot.slane %v957_v1, %v3292_v27  ;;  %v1559_v17 = vmul.f32 %v3384_v0, %v3387_v2 }
 0x360   : > { %v1557_v18 = vmul.f32 %v3384_v0, %v3390_v4  ;;  %v3417_v21 = vrot.slane %v960_v3, %v3292_v27  ;;  %v1567_v24 = vmul.f32 %v3384_v0, %v3398_v8  ;;  %v1572_v25 = vmul.f32 1.442695, %v1555_v9 }
 0x361   : > { %1170 = vbcast.lane.b32.xlu0 %v3332_v19, 264  ;;  %1188 = vbcast.lane.b32.xlu1 %v3334_v20, 256  ;;  %v1554_v29 = vmul.f32 %v3374_v53, %v965_v61  ;;  %v1588_v30 = vmul.f32 1.442695, %v1563_v12  ;;  %v1565_v34 = vmul.f32 %v3384_v0, %v3409_v16  ;;  %v1580_v35 = vmul.f32 1.442695, %v1559_v17 }
 0x362   : > { %v1562_v38 = vmul.f32 %v3374_v53, %v3382_v63  ;;  %v1576_v39 = vmul.f32 1.442695, %v1557_v18  ;;  %v1561_v40 = vmul.f32 %v3384_v0, %v3417_v21  ;;  %2847 = vpow2.f32 %v1572_v25 }
 0x363   : > { %v1596_v41 = vmul.f32 1.442695, %v1567_v24  ;;  %2849 = vpow2.f32 %v1588_v30  ;;  %v1570_v42 = vmul.f32 1.442695, %v1554_v29  ;;  %v1003_v43 = vmul.f32 %v965_v61, %v908_v33 }
 0x364   : > { %2851 = vpow2.f32 %v1580_v35  ;;  %v1592_v44 = vmul.f32 1.442695, %v1565_v34  ;;  %v1011_v45 = vmul.f32 %v3382_v63, %v908_v33  ;;  %v961_v47 = vcombine.high %v957_v1, %v957_v1 }
 0x365   : > { %1148 = vbcast.lane.b32.xlu0 %v3345_v26, 264  ;;  %1122 = vbcast.lane.b32.xlu1 %v3356_v32, 256  ;;  %2853 = vpow2.f32 %v1576_v39  ;;  %v1586_v23 = vmul.f32 1.442695, %v1562_v38  ;;  %v1007_v48 = vmul.f32 %v3387_v2, %v908_v33  ;;  %v1584_v49 = vmul.f32 1.442695, %v1561_v40 }
 0x366   : > { %2855 = vpow2.f32 %v1596_v41  ;;  %v1005_v50 = vmul.f32 %v3390_v4, %v908_v33  ;;  %v1020_v51 = vmul.f32 1.442695, %v1003_v43  ;;  %v1015_v52 = vmul.f32 %v3398_v8, %v908_v33 }
 0x367   : > { %2857 = vpow2.f32 %v1570_v42  ;;  %v1036_v54 = vmul.f32 1.442695, %v1011_v45  ;;  %v1002_v55 = vmul.f32 %v965_v61, %v907_v46  ;;  %v3438_v56 = vrot.slane %v961_v47, %v3292_v27 }
 0x368   : > { %2859 = vpow2.f32 %v1592_v44  ;;  %v1028_v57 = vmul.f32 1.442695, %v1007_v48  ;;  %v1013_v58 = vmul.f32 %v3409_v16, %v908_v33  ;;  %v1024_v59 = vmul.f32 1.442695, %v1005_v50 }
 0x369   : > { %1159 = vbcast.lane.b32.xlu0 %v3339_v22, 264  ;;  %1177 = vbcast.lane.b32.xlu1 %v3347_v28, 256  ;;  %2861 = vpow2.f32 %v1586_v23  ;;  %v1010_v60 = vmul.f32 %v3382_v63, %v907_v46  ;;  %v1044_v62 = vmul.f32 1.442695, %v1015_v52  ;;  %v1009_v1 = vmul.f32 %v3417_v21, %v908_v33 }
 0x36a   : > { %2863 = vpow2.f32 %v1584_v49  ;;  %v1018_v3 = vmul.f32 1.442695, %v1002_v55  ;;  %v1006_v9 = vmul.f32 %v3387_v2, %v907_v46  ;;  %v1040_v13 = vmul.f32 1.442695, %v1013_v58 }
 0x36b   : > { %2865 = vpow2.f32 %v1020_v51  ;;  %v1017_v17 = vmul.f32 %v3438_v56, %v908_v33  ;;  %v1034_v63 = vmul.f32 1.442695, %v1010_v60  ;;  %v1004_v24 = vmul.f32 %v3390_v4, %v907_v46 }
 0x36c   : > { %v2848_v61 = vpop.eup %2847  ;;  %2867 = vpow2.f32 %v1036_v54  ;;  %v1032_v29 = vmul.f32 1.442695, %v1009_v1  ;;  %v1014_v30 = vmul.f32 %v3398_v8, %v907_v46  ;;  %v1026_v35 = vmul.f32 1.442695, %v1006_v9 }
 0x36d   : > { %1944 = vbcast.lane.b32.xlu0 %v3356_v32, 312  ;;  %1133 = vbcast.lane.b32.xlu1 %v3351_v31, 256  ;;  %v2850_v12 = vpop.eup %2849  ;;  %2869 = vpow2.f32 %v1028_v57  ;;  %v1012_v37 = vmul.f32 %v3409_v16, %v907_v46  ;;  %v1048_v33 = vmul.f32 1.442695, %v1017_v17  ;;  %v1008_v39 = vmul.f32 %v3417_v21, %v907_v46 }
 0x36e   : > { %v2852_v18 = vpop.eup %2851  ;;  %2871 = vpow2.f32 %v1024_v59  ;;  %v1022_v41 = vmul.f32 1.442695, %v1004_v24  ;;  %v1016_v42 = vmul.f32 %v3438_v56, %v907_v46  ;;  %v1558_v44 = vmul.f32 %v3374_v53, %v3387_v2 }
 0x36f   : > { %v2854_v25 = vpop.eup %2853  ;;  %2873 = vpow2.f32 %v1044_v62  ;;  %v1042_v45 = vmul.f32 1.442695, %v1014_v30  ;;  %v1038_v23 = vmul.f32 1.442695, %v1012_v37  ;;  %v1030_v49 = vmul.f32 1.442695, %v1008_v39 }
 0x370   : > { %v2856_v34 = vpop.eup %2855  ;;  %2875 = vpow2.f32 %v1018_v3  ;;  %v1569_v46 = vmul.f32 %v3384_v0, %v3438_v56  ;;  %v1046_v2 = vmul.f32 1.442695, %v1016_v42  ;;  %v1556_v52 = vmul.f32 %v3374_v53, %v3390_v4 }
 0x371   : > { %1952 = vbcast.lane.b32.xlu0 %v3351_v31, 312  ;;  %1166 = vbcast.lane.b32.xlu1 %v3332_v19, 256  ;;  %v2858_v38 = vpop.eup %2857  ;;  %2877 = vpow2.f32 %v1040_v13  ;;  %v1578_v54 = vmul.f32 1.442695, %v1558_v44  ;;  %v1566_v59 = vmul.f32 %v3374_v53, %v3398_v8  ;;  %v1564_v8 = vmul.f32 %v3374_v53, %v3409_v16 }
 0x372   : > { %v2860_v40 = vpop.eup %2859  ;;  %2879 = vpow2.f32 %v1034_v63  ;;  %v1600_v58 = vmul.f32 1.442695, %v1569_v46  ;;  %v1574_v60 = vmul.f32 1.442695, %v1556_v52  ;;  %v1560_v16 = vmul.f32 %v3374_v53, %v3417_v21 }
 0x373   : > { %v2862_v43 = vpop.eup %2861  ;;  %2881 = vpow2.f32 %v1032_v29  ;;  %v1594_v9 = vmul.f32 1.442695, %v1566_v59  ;;  %v1590_v63 = vmul.f32 1.442695, %v1564_v8  ;;  %v1568_v29 = vmul.f32 %v3374_v53, %v3438_v56 }
 0x374   : > { %v3458_v47 = vpop.eup %2863  ;;  %2883 = vpow2.f32 %v1026_v35  ;;  %v1582_v21 = vmul.f32 1.442695, %v1560_v16  ;;  %v1116_v56 = vcombine.high %v3393_v6, %v3393_v6 }
 0x375   : > { %1620 = vrot.lane.b32.xlu0 %v2848_v61, %s2987_s24  ;;  %1144 = vbcast.lane.b32.xlu1 %v3345_v26, 256  ;;  %v2866_v48 = vpop.eup %2865  ;;  %2885 = vpow2.f32 %v1048_v33  ;;  %v1598_v35 = vmul.f32 1.442695, %v1568_v29  ;;  %v1208_v29 = vrot.slane %v3404_v11, %v3292_v27 }
 0x376   : > { %v2868_v50 = vpop.eup %2867  ;;  %1052 = vst.msk [vmem:[#allocation2 + $0x8] sm:$0xff] %vm1050_vm7, %v2866_v48  ;;  %2887 = vpow2.f32 %v1022_v41  ;;  %v3508_v39 = vrot.slane %v1116_v56, %v3292_v27 }
 0x377   : > { %v2870_v51 = vpop.eup %2869  ;;  %1060 = vst.msk [vmem:[#allocation2 + $0x48] sm:$0xff] %vm1050_vm7, %v2868_v50  ;;  %2889 = vpow2.f32 %v1042_v45 }
 0x378   : > { %v2872_v55 = vpop.eup %2871  ;;  %1056 = vst.msk [vmem:[#allocation2 + $0x28] sm:$0xff] %vm1050_vm7, %v2870_v51  ;;  %2891 = vpow2.f32 %v1038_v23 }
 0x379   : > { %1636 = vrot.lane.b32.xlu0 %v2850_v12, %s2987_s24  ;;  %1155 = vbcast.lane.b32.xlu1 %v3339_v22, 256  ;;  %v2874_v57 = vpop.eup %2873  ;;  %1054 = vst.msk [vmem:[#allocation2 + $0x18] sm:$0xff] %vm1050_vm7, %v2872_v55  ;;  %2893 = vpow2.f32 %v1030_v49 }
 0x37a   : > { %v2876_v0 = vpop.eup %2875  ;;  %1064 = vst.msk [vmem:[#allocation2 + $0x68] sm:$0xff] %vm1050_vm7, %v2874_v57  ;;  %2895 = vpow2.f32 %v1046_v2  ;;  %v3525_v2 = vrot.slane %v3393_v6, %v3292_v27 }
 0x37b   : > { %v2878_v4 = vpop.eup %2877  ;;  %2897 = vpow2.f32 %v1578_v54  ;;  %1051 = vst.msk [vmem:[#allocation2] sm:$0xff] %vm1050_vm7, %v2876_v0 }
 0x37c   : > { %v2880_v62 = vpop.eup %2879  ;;  %1062 = vst.msk [vmem:[#allocation2 + $0x58] sm:$0xff] %vm1050_vm7, %v2878_v4  ;;  %2899 = vpow2.f32 %v1600_v58  ;;  %v3532_v58 = vrot.slane %v3395_v7, %v3292_v27  ;;  %v1115_v4 = vcombine.high %v3402_v10, %v3402_v10 }
 0x37d   : > { %1628 = vrot.lane.b32.xlu0 %v2852_v18, %s2987_s24  ;;  %1940 = vbcast.lane.b32.xlu1 %v3356_v32, 304  ;;  %v2882_v1 = vpop.eup %2881  ;;  %1059 = vst.msk [vmem:[#allocation2 + $0x40] sm:$0xff] %vm1050_vm7, %v2880_v62  ;;  %2901 = vpow2.f32 %v1574_v60 }
 0x37e   : > { %v2884_v61 = vpop.eup %2883  ;;  %1058 = vst.msk [vmem:[#allocation2 + $0x38] sm:$0xff] %vm1050_vm7, %v2882_v1  ;;  %2903 = vpow2.f32 %v1594_v9  ;;  %v3540_v1 = vrot.slane %v1115_v4, %v3292_v27 }
 0x37f   : > { %v2886_v3 = vpop.eup %2885  ;;  %1055 = vst.msk [vmem:[#allocation2 + $0x20] sm:$0xff] %vm1050_vm7, %v2884_v61  ;;  %2905 = vpow2.f32 %v1590_v63  ;;  %v1113_v61 = vcombine.high %v3404_v11, %v3404_v11 }
 0x380   : > { %v2888_v12 = vpop.eup %2887  ;;  %1066 = vst.msk [vmem:[#allocation2 + $0x78] sm:$0xff] %vm1050_vm7, %v2886_v3  ;;  %2907 = vpow2.f32 %v1582_v21 }
 0x381   : > { %1624 = vrot.lane.b32.xlu0 %v2854_v25, %s2987_s24  ;;  %1948 = vbcast.lane.b32.xlu1 %v3351_v31, 304  ;;  %v2890_v13 = vpop.eup %2889  ;;  %1053 = vst.msk [vmem:[#allocation2 + $0x10] sm:$0xff] %vm1050_vm7, %v2888_v12  ;;  %2909 = vpow2.f32 %v1598_v35 }
 0x382   : > { %v2892_v17 = vpop.eup %2891  ;;  %1063 = vst.msk [vmem:[#allocation2 + $0x60] sm:$0xff] %vm1050_vm7, %v2890_v13  ;;  %v3550_v13 = vrot.slane %v1113_v61, %v3292_v27  ;;  %v1302_v61 = vld [vmem:[#allocation2 + $0x28] sm:$0xff] }
 0x383   : > { %v2894_v18 = vpop.eup %2893  ;;  %1061 = vst.msk [vmem:[#allocation2 + $0x50] sm:$0xff] %vm1050_vm7, %v2892_v17 }
 0x384   : > { %v2896_v24 = vpop.eup %2895  ;;  %1057 = vst.msk [vmem:[#allocation2 + $0x30] sm:$0xff] %vm1050_vm7, %v2894_v18 }
 0x385   : > { %1644 = vrot.lane.b32.xlu0 %v2856_v34, %s2987_s24  ;;  %1618 = vrot.lane.b32.xlu1 %v2858_v38, %s2987_s24  ;;  %v2898_v25 = vpop.eup %2897  ;;  %1065 = vst.msk [vmem:[#allocation2 + $0x70] sm:$0xff] %vm1050_vm7, %v2896_v24 }
 0x386   : > { %v2900_v30 = vpop.eup %2899 }
 0x387   : > { %v2902_v34 = vpop.eup %2901 }
 0x388   : > { %v2904_v37 = vpop.eup %2903 }
 0x389   : > { %1640 = vrot.lane.b32.xlu0 %v2860_v40, %s2987_s24  ;;  %1634 = vrot.lane.b32.xlu1 %v2862_v43, %s2987_s24  ;;  %v2906_v38 = vpop.eup %2905  ;;  %v1114_v40 = vcombine.high %v3395_v7, %v3395_v7 }
 0x38a   : > { %v2908_v33 = vpop.eup %2907 }
 0x38b   : > { %v2910_v53 = vpop.eup %2909  ;;  %v3517_v45 = vrot.slane %v1114_v40, %v3292_v27 }
 0x38d   : > { %1632 = vrot.lane.b32.xlu0 %v3458_v47, %s2987_s24  ;;  %1626 = vrot.lane.b32.xlu1 %v2898_v25, %s2987_s24  ;;  %v3560_v25 = vrot.slane %v3402_v10, %v3292_v27 }
 0x391   : > { %1648 = vrot.lane.b32.xlu0 %v2900_v30, %s2987_s24  ;;  %1622 = vrot.lane.b32.xlu1 %v2902_v34, %s2987_s24 }
 0x395   : > { %1642 = vrot.lane.b32.xlu1 %v2904_v37, %s2987_s24 }
 0x399   : > { %1638 = vrot.lane.b32.xlu1 %v2906_v38, %s2987_s24 }
 0x39d   : > { %1630 = vrot.lane.b32.xlu1 %v2908_v33, %s2987_s24 }
 0x3a1   : > { %1646 = vrot.lane.b32.xlu1 %v2910_v53, %s2987_s24  ;;  %v1278_v53 = vld [vmem:[#allocation2 + $0x8] sm:$0xff] }
 0x3a7   : > { %v1745_v41 = vpop.permute.xlu1 %1744  ;;  %v1741_v42 = vpop.permute.xlu0 %1740 }
 0x3a8   : > { %v1761_v43 = vmul.f32 %v1745_v41, %v3508_v39  ;;  %v1760_v44 = vmul.f32 %v1741_v42, %v3508_v39  ;;  %v1280_v42 = vmul.f32 0.0, %v1278_v53 }
 0x3aa   : > { %1808 = vrot.lane.b32.xlu0 %v1761_v43, %s2987_s24  ;;  %1806 = vrot.lane.b32.xlu1 %v1760_v44, %s2987_s24 }
 0x3ab   : > { %v1733_v47 = vpop.permute.xlu1 %1732  ;;  %v1721_v23 = vpop.permute.xlu0 %1720 }
 0x3ac   : > { %v1758_v48 = vmul.f32 %v1733_v47, %v3517_v45  ;;  %v1755_v60 = vmul.f32 %v1721_v23, %v3532_v58 }
 0x3ae   : > { %1802 = vrot.lane.b32.xlu1 %v1758_v48, %s2987_s24 }
 0x3af   : > { %v1737_v49 = vpop.permute.xlu1 %1736  ;;  %v1713_v50 = vpop.permute.xlu0 %1712 }
 0x3b0   : > { %v1759_v46 = vmul.f32 %v1737_v49, %v3517_v45  ;;  %v1753_v8 = vmul.f32 %v1713_v50, %v3540_v1 }
 0x3b2   : > { %1804 = vrot.lane.b32.xlu0 %v1759_v46, %s2987_s24  ;;  %v1289_v46 = vld [vmem:[#allocation2 + $0x18] sm:$0xff] }
 0x3b3   : > { %v1725_v51 = vpop.permute.xlu1 %1724  ;;  %v1705_v52 = vpop.permute.xlu0 %1704 }
 0x3b4   : > { %v1756_v54 = vmul.f32 %v1725_v51, %v3525_v2  ;;  %v1751_v16 = vmul.f32 %v1705_v52, %v3550_v13 }
 0x3b6   : > { %1798 = vrot.lane.b32.xlu1 %v1756_v54, %s2987_s24 }
 0x3b7   : > { %v1729_v55 = vpop.permute.xlu1 %1728  ;;  %v1697_v57 = vpop.permute.xlu0 %1696 }
 0x3b8   : > { %v1757_v0 = vmul.f32 %v1729_v55, %v3525_v2  ;;  %v1749_v34 = vmul.f32 %v1697_v57, %v3560_v25 }
 0x3ba   : > { %1800 = vrot.lane.b32.xlu0 %v1757_v0, %s2987_s24 }
 0x3bb   : > { %v1717_v6 = vpop.permute.xlu1 %1716  ;;  %v1689_v59 = vpop.permute.xlu0 %1688 }
 0x3bc   : > { %v1754_v62 = vmul.f32 %v1717_v6, %v3532_v58  ;;  %v1747_v11 = vmul.f32 %v1689_v59, %v1208_v29 }
 0x3be   : > { %1796 = vrot.lane.b32.xlu0 %v1755_v60, %s2987_s24  ;;  %1794 = vrot.lane.b32.xlu1 %v1754_v62, %s2987_s24  ;;  %v1277_v60 = vld [vmem:[#allocation2] sm:$0xff] }
 0x3bf   : > { %v1709_v7 = vpop.permute.xlu1 %1708  ;;  %v1204_v3 = vpop.permute.xlu0 %1203 }
 0x3c0   : > { %v1752_v9 = vmul.f32 %v1709_v7, %v3540_v1  ;;  %v1260_v12 = vmul.f32 %v3508_v39, %v1204_v3 }
 0x3c2   : > { %1276 = vst.msk [vmem:[#allocation3 + $0x78] sm:$0xff] %vm1050_vm7, %v1260_v12  ;;  %1792 = vrot.lane.b32.xlu0 %v1753_v8, %s2987_s24  ;;  %1790 = vrot.lane.b32.xlu1 %v1752_v9, %s2987_s24  ;;  %v1279_v9 = vmul.f32 0.0, %v1277_v60 }
 0x3c3   : > { %v1701_v17 = vpop.permute.xlu1 %1700  ;;  %v1193_v18 = vpop.permute.xlu0 %1192 }
 0x3c4   : > { %v1750_v63 = vmul.f32 %v1701_v17, %v3550_v13  ;;  %v1258_v24 = vmul.f32 %v3517_v45, %v1193_v18 }
 0x3c6   : > { %1274 = vst.msk [vmem:[#allocation3 + $0x68] sm:$0xff] %vm1050_vm7, %v1258_v24  ;;  %1788 = vrot.lane.b32.xlu0 %v1751_v16, %s2987_s24  ;;  %1786 = vrot.lane.b32.xlu1 %v1750_v63, %s2987_s24  ;;  %v1315_v16 = vld [vmem:[#allocation2 + $0x38] sm:$0xff] }
 0x3c7   : > { %v1693_v21 = vpop.permute.xlu1 %1692  ;;  %v1127_v30 = vpop.permute.xlu0 %1126 }
 0x3c8   : > { %v1748_v35 = vmul.f32 %v1693_v21, %v3560_v25  ;;  %v1246_v37 = vmul.f32 %v1208_v29, %v1127_v30 }
 0x3ca   : > { %1262 = vst.msk [vmem:[#allocation3 + $0x8] sm:$0xff] %vm1050_vm7, %v1246_v37  ;;  %1784 = vrot.lane.b32.xlu0 %v1749_v34, %s2987_s24  ;;  %1782 = vrot.lane.b32.xlu1 %v1748_v35, %s2987_s24  ;;  %v1328_v35 = vld [vmem:[#allocation2 + $0x48] sm:$0xff] }
 0x3cb   : > { %v1182_v27 = vpop.permute.xlu0 %1181  ;;  %v1685_v10 = vpop.permute.xlu1 %1684 }
 0x3cc   : > { %v1256_v38 = vmul.f32 %v3525_v2, %v1182_v27  ;;  %v1746_v33 = vmul.f32 %v1685_v10, %v1208_v29  ;;  %v1288_v27 = vld [vmem:[#allocation2 + $0x10] sm:$0xff] }
 0x3ce   : > { %1272 = vst.msk [vmem:[#allocation3 + $0x58] sm:$0xff] %vm1050_vm7, %v1256_v38  ;;  %1780 = vrot.lane.b32.xlu0 %v1747_v11, %s2987_s24  ;;  %1778 = vrot.lane.b32.xlu1 %v1746_v33, %s2987_s24 }
 0x3cf   : > { %v1138_v56 = vpop.permute.xlu0 %1137  ;;  %v1200_v41 = vpop.permute.xlu1 %1199 }
 0x3d0   : > { %v1248_v40 = vmul.f32 %v3560_v25, %v1138_v56  ;;  %v1259_v43 = vmul.f32 %v3508_v39, %v1200_v41 }
 0x3d1   : > { %v1282_v44 = vld [vmem:[#allocation3 + $0x8] sm:$0xff] }
 0x3d2   : > { %1264 = vst.msk [vmem:[#allocation3 + $0x18] sm:$0xff] %vm1050_vm7, %v1248_v40  ;;  %1960 = vbcast.lane.b32.xlu0 %v3345_v26, 312  ;;  %1956 = vbcast.lane.b32.xlu1 %v3345_v26, 304  ;;  %v1284_v47 = vadd.f32 %v1282_v44, %v1280_v42  ;;  %1275 = vst.msk [vmem:[#allocation3 + $0x70] sm:$0xff] %vm1050_vm7, %v1259_v43  ;;  %v1341_v40 = vld [vmem:[#allocation2 + $0x58] sm:$0xff] }
 0x3d3   : > { %v1171_v23 = vpop.permute.xlu0 %1170  ;;  %v1189_v49 = vpop.permute.xlu1 %1188 }
 0x3d4   : > { %v1254_v48 = vmul.f32 %v3532_v58, %v1171_v23  ;;  %1286 = vst.msk [vmem:[#allocation4 + $0x8] sm:$0xff] %vm1050_vm7, %v1284_v47  ;;  %v1257_v50 = vmul.f32 %v3517_v45, %v1189_v49  ;;  %v1291_v54 = vmul.f32 %v1289_v46, %v1284_v47  ;;  %v1354_v23 = vld [vmem:[#allocation2 + $0x68] sm:$0xff]  ;;  %v1301_v49 = vld [vmem:[#allocation2 + $0x20] sm:$0xff] }
 0x3d5   : > { %v1346_v44 = vld [vmem:[#allocation3 + $0x58] sm:$0xff] }
 0x3d6   : > { %1270 = vst.msk [vmem:[#allocation3 + $0x48] sm:$0xff] %vm1050_vm7, %v1254_v48  ;;  %1968 = vbcast.lane.b32.xlu0 %v3339_v22, 312  ;;  %1964 = vbcast.lane.b32.xlu1 %v3339_v22, 304  ;;  %1273 = vst.msk [vmem:[#allocation3 + $0x60] sm:$0xff] %vm1050_vm7, %v1257_v50  ;;  %v1359_v50 = vld [vmem:[#allocation3 + $0x68] sm:$0xff] }
 0x3d7   : > { %v1149_v39 = vpop.permute.xlu0 %1148  ;;  %v1123_v52 = vpop.permute.xlu1 %1122 }
 0x3d8   : > { %v1250_v51 = vmul.f32 %v3550_v13, %v1149_v39  ;;  %v1245_v55 = vmul.f32 %v1208_v29, %v1123_v52  ;;  %v1367_v52 = vld [vmem:[#allocation2 + $0x78] sm:$0xff] }
 0x3d9   : > { %v1294_v57 = vld [vmem:[#allocation3 + $0x18] sm:$0xff] }
 0x3da   : > { %1266 = vst.msk [vmem:[#allocation3 + $0x28] sm:$0xff] %vm1050_vm7, %v1250_v51  ;;  %1976 = vbcast.lane.b32.xlu0 %v3332_v19, 312  ;;  %1972 = vbcast.lane.b32.xlu1 %v3332_v19, 304  ;;  %v1296_v45 = vadd.f32 %v1294_v57, %v1291_v54  ;;  %1261 = vst.msk [vmem:[#allocation3] sm:$0xff] %vm1050_vm7, %v1245_v55  ;;  %v1314_v57 = vld [vmem:[#allocation2 + $0x30] sm:$0xff] }
 0x3db   : > { %v1160_v0 = vpop.permute.xlu0 %1159  ;;  %v1178_v6 = vpop.permute.xlu1 %1177 }
 0x3dc   : > { %v1252_v4 = vmul.f32 %v3540_v1, %v1160_v0  ;;  %1299 = vst.msk [vmem:[#allocation4 + $0x18] sm:$0xff] %vm1050_vm7, %v1296_v45  ;;  %v1255_v59 = vmul.f32 %v3525_v2, %v1178_v6  ;;  %v1304_v3 = vmul.f32 %v1302_v61, %v1296_v45  ;;  %v1372_v0 = vld [vmem:[#allocation3 + $0x78] sm:$0xff] }
 0x3dd   : > { %v1333_v11 = vld [vmem:[#allocation3 + $0x48] sm:$0xff] }
 0x3de   : > { %1268 = vst.msk [vmem:[#allocation3 + $0x38] sm:$0xff] %vm1050_vm7, %v1252_v4  ;;  %1984 = vbcast.lane.b32.xlu0 %v3347_v28, 312  ;;  %1980 = vbcast.lane.b32.xlu1 %v3347_v28, 304  ;;  %1271 = vst.msk [vmem:[#allocation3 + $0x50] sm:$0xff] %vm1050_vm7, %v1255_v59 }
 0x3df   : > { %v3601_v62 = vpop.permute.xlu0 %1944  ;;  %v1134_v7 = vpop.permute.xlu1 %1133 }
 0x3e0   : > { %v1247_v8 = vmul.f32 %v3560_v25, %v1134_v7  ;;  %v1327_v7 = vld [vmem:[#allocation2 + $0x40] sm:$0xff] }
 0x3e1   : > { %v1307_v12 = vld [vmem:[#allocation3 + $0x28] sm:$0xff]  ;;  %v1281_v17 = vld [vmem:[#allocation3] sm:$0xff] }
 0x3e2   : > { %1992 = vbcast.lane.b32.xlu0 %v3334_v20, 312  ;;  %1988 = vbcast.lane.b32.xlu1 %v3334_v20, 304  ;;  %v1309_v2 = vadd.f32 %v1307_v12, %v1304_v3  ;;  %1263 = vst.msk [vmem:[#allocation3 + $0x10] sm:$0xff] %vm1050_vm7, %v1247_v8  ;;  %v1283_v63 = vadd.f32 %v1281_v17, %v1279_v9 }
 0x3e3   : > { %v3607_v18 = vpop.permute.xlu0 %1952  ;;  %v1167_v24 = vpop.permute.xlu1 %1166 }
 0x3e4   : > { %1312 = vst.msk [vmem:[#allocation4 + $0x28] sm:$0xff] %vm1050_vm7, %v1309_v2  ;;  %v1317_v29 = vmul.f32 %v1315_v16, %v1309_v2  ;;  %v1253_v25 = vmul.f32 %v3532_v58, %v1167_v24  ;;  %1285 = vst.msk [vmem:[#allocation4] sm:$0xff] %vm1050_vm7, %v1283_v63  ;;  %v1290_v38 = vmul.f32 %v1288_v27, %v1283_v63  ;;  %v1340_v2 = vld [vmem:[#allocation2 + $0x50] sm:$0xff] }
 0x3e5   : > { %v1320_v21 = vld [vmem:[#allocation3 + $0x38] sm:$0xff]  ;;  %v1345_v16 = vld [vmem:[#allocation3 + $0x50] sm:$0xff] }
 0x3e6   : > { %2000 = vbcast.lane.b32.xlu0 %v3327_v15, 312  ;;  %1996 = vbcast.lane.b32.xlu1 %v3327_v15, 304  ;;  %v1322_v30 = vadd.f32 %v1320_v21, %v1317_v29  ;;  %1269 = vst.msk [vmem:[#allocation3 + $0x40] sm:$0xff] %vm1050_vm7, %v1253_v25  ;;  %v1353_v29 = vld [vmem:[#allocation2 + $0x60] sm:$0xff] }
 0x3e7   : > { %v1621_v34 = vpop.permute.xlu0 %1620  ;;  %v1145_v37 = vpop.permute.xlu1 %1144  ;;  %v1358_v21 = vld [vmem:[#allocation3 + $0x60] sm:$0xff] }
 0x3e8   : > { %1667 = vst.msk [vmem:[#allocation2 + $0x8] sm:$0xff] %vm1050_vm7, %v1621_v34  ;;  %1325 = vst.msk [vmem:[#allocation4 + $0x38] sm:$0xff] %vm1050_vm7, %v1322_v30  ;;  %v1330_v10 = vmul.f32 %v1328_v35, %v1322_v30  ;;  %v1249_v58 = vmul.f32 %v3550_v13, %v1145_v37  ;;  %v1366_v35 = vld [vmem:[#allocation2 + $0x70] sm:$0xff] }
 0x3e9   : > { %v1293_v33 = vld [vmem:[#allocation3 + $0x10] sm:$0xff] }
 0x3ea   : > { %1400 = vbcast.lane.b32.xlu0 %v3356_v32, 296  ;;  %1396 = vbcast.lane.b32.xlu1 %v3356_v32, 288  ;;  %v1335_v53 = vadd.f32 %v1333_v11, %v1330_v10  ;;  %1265 = vst.msk [vmem:[#allocation3 + $0x20] sm:$0xff] %vm1050_vm7, %v1249_v58  ;;  %v1295_v41 = vadd.f32 %v1293_v33, %v1290_v38  ;;  %v1371_v37 = vld [vmem:[#allocation3 + $0x70] sm:$0xff]  ;;  %v2150_v10 = vld [vmem:[%s4015_s11 + $0x8] sm:$0xff]  ;;  %v2989_v38 = vmov 0.0|0.0  }
 0x3eb   : > { %v1637_v56 = vpop.permute.xlu0 %1636  ;;  %v1156_v42 = vpop.permute.xlu1 %1155  ;;  %v2151_v58 = vld [vmem:[%s4015_s11 + $0x10] sm:$0xff]  ;;  %2730 = vmatprep.subr.bf16.mxu0 %v2989_v38  ;;  %2754 = vmatprep.subr.bf16.mxu1 %v2989_v38 }
 0x3ec   : > { %1675 = vst.msk [vmem:[#allocation2 + $0x48] sm:$0xff] %vm1050_vm7, %v1637_v56  ;;  %1338 = vst.msk [vmem:[#allocation4 + $0x48] sm:$0xff] %vm1050_vm7, %v1335_v53  ;;  %v1343_v43 = vmul.f32 %v1341_v40, %v1335_v53  ;;  %v1251_v13 = vmul.f32 %v3540_v1, %v1156_v42  ;;  %v1303_v39 = vmul.f32 %v1301_v49, %v1295_v41  ;;  %v2153_v40 = vld [vmem:[%s4015_s11 + $0x20] sm:$0xff]  ;;  %v2158_v49 = vld [vmem:[%s4015_s11 + $0x48] sm:$0xff] }
 0x3ed   : > { %1298 = vst.msk [vmem:[#allocation4 + $0x10] sm:$0xff] %vm1050_vm7, %v1295_v41  ;;  %v2154_v41 = vld [vmem:[%s4015_s11 + $0x28] sm:$0xff] }
 0x3ee   : > { %1408 = vbcast.lane.b32.xlu0 %v3351_v31, 296  ;;  %1404 = vbcast.lane.b32.xlu1 %v3351_v31, 288  ;;  %v1348_v32 = vadd.f32 %v1346_v44, %v1343_v43  ;;  %1267 = vst.msk [vmem:[#allocation3 + $0x30] sm:$0xff] %vm1050_vm7, %v1251_v13  ;;  %v2737_v43 = vpack.c.bf16 %v2154_v41, %v2153_v40  ;;  %v2155_v13 = vld [vmem:[%s4015_s11 + $0x30] sm:$0xff]  ;;  %v2156_v44 = vld [vmem:[%s4015_s11 + $0x38] sm:$0xff] }
 0x3ef   : > { %v1629_v47 = vpop.permute.xlu0 %1628  ;;  %v3629_v48 = vpop.permute.xlu1 %1940 }
 0x3f0   : > { %1671 = vst.msk [vmem:[#allocation2 + $0x28] sm:$0xff] %vm1050_vm7, %v1629_v47  ;;  %1351 = vst.msk [vmem:[#allocation4 + $0x58] sm:$0xff] %vm1050_vm7, %v1348_v32  ;;  %v1356_v1 = vmul.f32 %v1354_v23, %v1348_v32  ;;  %v2740_v47 = vpack.c.bf16 %v2156_v44, %v2155_v13  ;;  %v2157_v23 = vld [vmem:[%s4015_s11 + $0x40] sm:$0xff] }
 0x3f1   : > { %v1306_v31 = vld [vmem:[#allocation3 + $0x20] sm:$0xff] }
 0x3f2   : > { %1416 = vbcast.lane.b32.xlu0 %v3345_v26, 296  ;;  %1412 = vbcast.lane.b32.xlu1 %v3345_v26, 288  ;;  %v1361_v46 = vadd.f32 %v1359_v50, %v1356_v1  ;;  %v1308_v54 = vadd.f32 %v1306_v31, %v1303_v39  ;;  %v2743_v50 = vpack.c.bf16 %v2158_v49, %v2157_v23  ;;  %v2159_v39 = vld [vmem:[%s4015_s11 + $0x50] sm:$0xff]  ;;  %v2160_v31 = vld [vmem:[%s4015_s11 + $0x58] sm:$0xff] }
 0x3f3   : > { %v1625_v51 = vpop.permute.xlu0 %1624  ;;  %v3635_v55 = vpop.permute.xlu1 %1948  ;;  %v1873_v41 = vld [vmem:[#allocation2 + $0x48] sm:$0xff] }
 0x3f4   : > { %1669 = vst.msk [vmem:[#allocation2 + $0x18] sm:$0xff] %vm1050_vm7, %v1625_v51  ;;  %1364 = vst.msk [vmem:[#allocation4 + $0x68] sm:$0xff] %vm1050_vm7, %v1361_v46  ;;  %v1369_v45 = vmul.f32 %v1367_v52, %v1361_v46  ;;  %v1316_v4 = vmul.f32 %v1314_v57, %v1308_v54  ;;  %v2746_v46 = vpack.c.bf16 %v2160_v31, %v2159_v39  ;;  %v2161_v51 = vld [vmem:[%s4015_s11 + $0x60] sm:$0xff]  ;;  %v2162_v52 = vld [vmem:[%s4015_s11 + $0x68] sm:$0xff] }
 0x3f5   : > { %1311 = vst.msk [vmem:[#allocation4 + $0x20] sm:$0xff] %vm1050_vm7, %v1308_v54  ;;  %v1319_v26 = vld [vmem:[#allocation3 + $0x30] sm:$0xff]  ;;  %v3748_v39 = vld [vmem:[#allocation4 + $0x48] sm:$0xff] }
 0x3f6   : > { %1424 = vbcast.lane.b32.xlu0 %v3339_v22, 296  ;;  %1420 = vbcast.lane.b32.xlu1 %v3339_v22, 288  ;;  %v1374_v6 = vadd.f32 %v1372_v0, %v1369_v45  ;;  %v1321_v60 = vadd.f32 %v1319_v26, %v1316_v4  ;;  %v1332_v22 = vld [vmem:[#allocation3 + $0x40] sm:$0xff]  ;;  %v2749_v45 = vpack.c.bf16 %v2162_v52, %v2161_v51 }
 0x3f7   : > { %v1645_v59 = vpop.permute.xlu0 %1644  ;;  %v1619_v61 = vpop.permute.xlu1 %1618 }
 0x3f8   : > { %1679 = vst.msk [vmem:[#allocation2 + $0x68] sm:$0xff] %vm1050_vm7, %v1645_v59  ;;  %1377 = vst.msk [vmem:[#allocation4 + $0x78] sm:$0xff] %vm1050_vm7, %v1374_v6  ;;  %v1329_v3 = vmul.f32 %v1327_v7, %v1321_v60 }
 0x3f9   : > { %1666 = vst.msk [vmem:[#allocation2] sm:$0xff] %vm1050_vm7, %v1619_v61  ;;  %1324 = vst.msk [vmem:[#allocation4 + $0x30] sm:$0xff] %vm1050_vm7, %v1321_v60 }
 0x3fa   : > { %1432 = vbcast.lane.b32.xlu0 %v3332_v19, 296  ;;  %1428 = vbcast.lane.b32.xlu1 %v3332_v19, 288  ;;  %v1334_v9 = vadd.f32 %v1332_v22, %v1329_v3 }
 0x3fb   : > { %v1641_v8 = vpop.permute.xlu0 %1640  ;;  %v1635_v12 = vpop.permute.xlu1 %1634 }
 0x3fc   : > { %1677 = vst.msk [vmem:[#allocation2 + $0x58] sm:$0xff] %vm1050_vm7, %v1641_v8  ;;  %1674 = vst.msk [vmem:[#allocation2 + $0x40] sm:$0xff] %vm1050_vm7, %v1635_v12  ;;  %v1342_v17 = vmul.f32 %v1340_v2, %v1334_v9 }
 0x3fd   : > { %1337 = vst.msk [vmem:[#allocation4 + $0x40] sm:$0xff] %vm1050_vm7, %v1334_v9 }
 0x3fe   : > { %1440 = vbcast.lane.b32.xlu0 %v3347_v28, 296  ;;  %1436 = vbcast.lane.b32.xlu1 %v3347_v28, 288  ;;  %v1347_v24 = vadd.f32 %v1345_v16, %v1342_v17 }
 0x3ff   : > { %v1633_v63 = vpop.permute.xlu0 %1632  ;;  %v1627_v19 = vpop.permute.xlu1 %1626  ;;  %v3722_v9 = vld [vmem:[#allocation4 + $0x78] sm:$0xff] }
 0x400   : > { %1673 = vst.msk [vmem:[#allocation2 + $0x38] sm:$0xff] %vm1050_vm7, %v1633_v63  ;;  %1670 = vst.msk [vmem:[#allocation2 + $0x20] sm:$0xff] %vm1050_vm7, %v1627_v19  ;;  %v1355_v25 = vmul.f32 %v1353_v29, %v1347_v24 }
 0x401   : > { %1350 = vst.msk [vmem:[#allocation4 + $0x50] sm:$0xff] %vm1050_vm7, %v1347_v24  ;;  %v1853_v24 = vld [vmem:[#allocation2 + $0x68] sm:$0xff] }
 0x402   : > { %1448 = vbcast.lane.b32.xlu0 %v3334_v20, 296  ;;  %1444 = vbcast.lane.b32.xlu1 %v3334_v20, 288  ;;  %v1360_v34 = vadd.f32 %v1358_v21, %v1355_v25  ;;  %v2149_v20 = vld [vmem:[%s4015_s11] sm:$0xff] }
 0x403   : > { %v1649_v30 = vpop.permute.xlu0 %1648  ;;  %v1623_v28 = vpop.permute.xlu1 %1622  ;;  %v2731_v33 = vpack.c.bf16 %v2150_v10, %v2149_v20 }
 0x404   : > { %1681 = vst.msk [vmem:[#allocation2 + $0x78] sm:$0xff] %vm1050_vm7, %v1649_v30  ;;  %1668 = vst.msk [vmem:[#allocation2 + $0x10] sm:$0xff] %vm1050_vm7, %v1623_v28  ;;  %v1368_v27 = vmul.f32 %v1366_v35, %v1360_v34  ;;  %v3733_v28 = vld [vmem:[#allocation4 + $0x68] sm:$0xff]  ;;  %v3750_v51 = vld [vmem:[#allocation4 + $0x40] sm:$0xff] }
 0x405   : > { %1363 = vst.msk [vmem:[#allocation4 + $0x60] sm:$0xff] %vm1050_vm7, %v1360_v34  ;;  %2732 = vmatpush3.bf16.msra.mxu0 %v2731_v33 }
 0x406   : > { %1456 = vbcast.lane.b32.xlu0 %v3327_v15, 296  ;;  %1452 = vbcast.lane.b32.xlu1 %v3327_v15, 288  ;;  %v1373_v11 = vadd.f32 %v1371_v37, %v1368_v27  ;;  %v2152_v15 = vld [vmem:[%s4015_s11 + $0x18] sm:$0xff] }
 0x407   : > { %v1643_v53 = vpop.permute.xlu1 %1642  ;;  %v2734_v56 = vpack.c.bf16 %v2152_v15, %v2151_v58  ;;  %2733 = vmatprep.subr.bf16.mxu0 %v2989_v38  ;;  %v1863_v58 = vld [vmem:[#allocation2 + $0x58] sm:$0xff] }
 0x408   : > { %1678 = vst.msk [vmem:[#allocation2 + $0x60] sm:$0xff] %vm1050_vm7, %v1643_v53  ;;  %1376 = vst.msk [vmem:[#allocation4 + $0x70] sm:$0xff] %vm1050_vm7, %v1373_v11  ;;  %v3738_v11 = vld [vmem:[#allocation4 + $0x50] sm:$0xff]  ;;  %v1883_v31 = vld [vmem:[#allocation2 + $0x38] sm:$0xff] }
 0x409   : > { %2735 = vmatpush3.bf16.msra.mxu0 %v2734_v56 }
 0x40a   : > { %2736 = vmatprep.subr.bf16.mxu0 %v2989_v38 }
 0x40b   : > { %v1639_v42 = vpop.permute.xlu1 %1638  ;;  %v1843_v0 = vld [vmem:[#allocation2 + $0x78] sm:$0xff] }
 0x40c   : > { %1676 = vst.msk [vmem:[#allocation2 + $0x50] sm:$0xff] %vm1050_vm7, %v1639_v42  ;;  %v1845_v6 = vmul.f32 0.0, %v1843_v0  ;;  %v3729_v19 = vld [vmem:[#allocation4 + $0x60] sm:$0xff] }
 0x40d   : > { %2738 = vmatpush3.bf16.msra.mxu0 %v2737_v43  ;;  %v1872_v42 = vld [vmem:[#allocation2 + $0x40] sm:$0xff]  ;;  %v3743_v43 = vld [vmem:[#allocation4 + $0x58] sm:$0xff] }
 0x40e   : > { %2739 = vmatprep.subr.bf16.mxu0 %v2989_v38 }
 0x40f   : > { %v1631_v32 = vpop.permute.xlu1 %1630  ;;  %v1852_v8 = vld [vmem:[#allocation2 + $0x60] sm:$0xff]  ;;  %v3724_v12 = vld [vmem:[#allocation4 + $0x70] sm:$0xff] }
 0x410   : > { %1672 = vst.msk [vmem:[#allocation2 + $0x30] sm:$0xff] %vm1050_vm7, %v1631_v32 }
 0x411   : > { %2741 = vmatpush3.bf16.msra.mxu0 %v2740_v47 }
 0x412   : > { %2742 = vmatprep.subr.bf16.mxu0 %v2989_v38 }
 0x413   : > { %v1647_v1 = vpop.permute.xlu1 %1646  ;;  %v1862_v34 = vld [vmem:[#allocation2 + $0x50] sm:$0xff] }
 0x414   : > { %1680 = vst.msk [vmem:[#allocation2 + $0x70] sm:$0xff] %vm1050_vm7, %v1647_v1 }
 0x415   : > { %2744 = vmatpush3.bf16.msra.mxu0 %v2743_v50 }
 0x416   : > { %2745 = vmatprep.subr.bf16.mxu0 %v2989_v38 }
 0x419   : > { %2747 = vmatpush3.bf16.msra.mxu0 %v2746_v46  ;;  %v1882_v46 = vld [vmem:[#allocation2 + $0x30] sm:$0xff] }
 0x41a   : > { %2748 = vmatprep.subr.bf16.mxu0 %v2989_v38 }
 0x41b   : > { %v1842_v4 = vld [vmem:[#allocation2 + $0x70] sm:$0xff] }
 0x41c   : > { %v1809_v54 = vpop.permute.xlu0 %1808  ;;  %v1807_v57 = vpop.permute.xlu1 %1806  ;;  %v1844_v59 = vmul.f32 0.0, %v1842_v4 }
 0x41d   : > { %1841 = vst.msk [vmem:[#allocation3 + $0x78] sm:$0xff] %vm1050_vm7, %v1809_v54  ;;  %1840 = vst.msk [vmem:[#allocation3 + $0x70] sm:$0xff] %vm1050_vm7, %v1807_v57  ;;  %2750 = vmatpush3.bf16.msra.mxu0 %v2749_v45 }
 0x41e   : > { %2751 = vmatprep.subr.bf16.mxu0 %v2989_v38 }
 0x420   : > { %v1803_v26 = vpop.permute.xlu1 %1802 }
 0x421   : > { %1838 = vst.msk [vmem:[#allocation3 + $0x60] sm:$0xff] %vm1050_vm7, %v1803_v26  ;;  %v3756_v26 = vld [vmem:[#allocation4 + $0x38] sm:$0xff] }
 0x424   : > { %v1847_v60 = vld [vmem:[#allocation3 + $0x78] sm:$0xff]  ;;  %v1846_v61 = vld [vmem:[#allocation3 + $0x70] sm:$0xff]  ;;  %v1805_v7 = vpop.permute.xlu0 %1804 }
 0x425   : > { %v1849_v3 = vadd.f32 %v1847_v60, %v1845_v6  ;;  %v1848_v22 = vadd.f32 %v1846_v61, %v1844_v59  ;;  %1839 = vst.msk [vmem:[#allocation3 + $0x68] sm:$0xff] %vm1050_vm7, %v1805_v7  ;;  %v1893_v60 = vld [vmem:[#allocation2 + $0x28] sm:$0xff]  ;;  %v3758_v61 = vld [vmem:[#allocation4 + $0x30] sm:$0xff]  ;;  %v1892_v7 = vld [vmem:[#allocation2 + $0x20] sm:$0xff] }
 0x427   : > { %v1854_v2 = vmul.f32 %v1852_v8, %v1848_v22  ;;  %1851 = vst.msk [vmem:[#allocation4 + $0x78] sm:$0xff] %vm1050_vm7, %v1849_v3  ;;  %1850 = vst.msk [vmem:[#allocation4 + $0x70] sm:$0xff] %vm1050_vm7, %v1848_v22  ;;  %v1855_v29 = vmul.f32 %v1853_v24, %v1849_v3 }
 0x428   : > { %v1856_v17 = vld [vmem:[#allocation3 + $0x60] sm:$0xff]  ;;  %v1799_v16 = vpop.permute.xlu1 %1798 }
 0x429   : > { %v1858_v63 = vadd.f32 %v1856_v17, %v1854_v2  ;;  %1836 = vst.msk [vmem:[#allocation3 + $0x50] sm:$0xff] %vm1050_vm7, %v1799_v16 }
 0x42b   : > { %1860 = vst.msk [vmem:[#allocation4 + $0x60] sm:$0xff] %vm1050_vm7, %v1858_v63  ;;  %v1864_v35 = vmul.f32 %v1862_v34, %v1858_v63  ;;  %v3762_v63 = vld [vmem:[#allocation4 + $0x28] sm:$0xff] }
 0x42c   : > { %v1857_v25 = vld [vmem:[#allocation3 + $0x68] sm:$0xff]  ;;  %v1801_v21 = vpop.permute.xlu0 %1800 }
 0x42d   : > { %v1859_v30 = vadd.f32 %v1857_v25, %v1855_v29  ;;  %1837 = vst.msk [vmem:[#allocation3 + $0x58] sm:$0xff] %vm1050_vm7, %v1801_v21  ;;  %v3766_v25 = vld [vmem:[#allocation4 + $0x20] sm:$0xff]  ;;  %v1903_v21 = vld [vmem:[#allocation2 + $0x18] sm:$0xff] }
 0x42f   : > { %1861 = vst.msk [vmem:[#allocation4 + $0x68] sm:$0xff] %vm1050_vm7, %v1859_v30  ;;  %v1865_v33 = vmul.f32 %v1863_v58, %v1859_v30  ;;  %v1902_v30 = vld [vmem:[#allocation2 + $0x10] sm:$0xff] }
 0x430   : > { %v1866_v37 = vld [vmem:[#allocation3 + $0x50] sm:$0xff]  ;;  %v1797_v27 = vpop.permute.xlu0 %1796  ;;  %v1795_v20 = vpop.permute.xlu1 %1794 }
 0x431   : > { %v1868_v10 = vadd.f32 %v1866_v37, %v1864_v35  ;;  %1835 = vst.msk [vmem:[#allocation3 + $0x48] sm:$0xff] %vm1050_vm7, %v1797_v27  ;;  %1834 = vst.msk [vmem:[#allocation3 + $0x40] sm:$0xff] %vm1050_vm7, %v1795_v20 }
 0x433   : > { %1870 = vst.msk [vmem:[#allocation4 + $0x50] sm:$0xff] %vm1050_vm7, %v1868_v10  ;;  %v1874_v44 = vmul.f32 %v1872_v42, %v1868_v10 }
 0x434   : > { %v1867_v15 = vld [vmem:[#allocation3 + $0x58] sm:$0xff]  ;;  %v1793_v53 = vpop.permute.xlu0 %1792  ;;  %v1791_v56 = vpop.permute.xlu1 %1790 }
 0x435   : > { %v1869_v40 = vadd.f32 %v1867_v15, %v1865_v33  ;;  %1833 = vst.msk [vmem:[#allocation3 + $0x38] sm:$0xff] %vm1050_vm7, %v1793_v53  ;;  %1832 = vst.msk [vmem:[#allocation3 + $0x30] sm:$0xff] %vm1050_vm7, %v1791_v56  ;;  %v3770_v15 = vld [vmem:[#allocation4 + $0x18] sm:$0xff]  ;;  %v1913_v53 = vld [vmem:[#allocation2 + $0x8] sm:$0xff] }
 0x436   : > { %v1912_v56 = vld [vmem:[#allocation2] sm:$0xff] }
 0x437   : > { %v1875_v13 = vmul.f32 %v1873_v41, %v1869_v40  ;;  %1871 = vst.msk [vmem:[#allocation4 + $0x58] sm:$0xff] %vm1050_vm7, %v1869_v40  ;;  %v3772_v40 = vld [vmem:[#allocation4 + $0x10] sm:$0xff] }
 0x438   : > { %v1877_v32 = vld [vmem:[#allocation3 + $0x48] sm:$0xff]  ;;  %v1876_v47 = vld [vmem:[#allocation3 + $0x40] sm:$0xff]  ;;  %v1789_v23 = vpop.permute.xlu0 %1788  ;;  %v1787_v49 = vpop.permute.xlu1 %1786 }
 0x439   : > { %v1879_v1 = vadd.f32 %v1877_v32, %v1875_v13  ;;  %v1878_v50 = vadd.f32 %v1876_v47, %v1874_v44  ;;  %1831 = vst.msk [vmem:[#allocation3 + $0x28] sm:$0xff] %vm1050_vm7, %v1789_v23  ;;  %1830 = vst.msk [vmem:[#allocation3 + $0x20] sm:$0xff] %vm1050_vm7, %v1787_v49 }
 0x43b   : > { %1881 = vst.msk [vmem:[#allocation4 + $0x48] sm:$0xff] %vm1050_vm7, %v1879_v1  ;;  %v1885_v52 = vmul.f32 %v1883_v31, %v1879_v1  ;;  %1880 = vst.msk [vmem:[#allocation4 + $0x40] sm:$0xff] %vm1050_vm7, %v1878_v50  ;;  %v1884_v54 = vmul.f32 %v1882_v46, %v1878_v50  ;;  %v3776_v31 = vld [vmem:[#allocation4 + $0x8] sm:$0xff] }
 0x43c   : > { %v1785_v57 = vpop.permute.xlu0 %1784  ;;  %v1783_v45 = vpop.permute.xlu1 %1782  ;;  %v1887_v0 = vld [vmem:[#allocation3 + $0x38] sm:$0xff]  ;;  %v1886_v4 = vld [vmem:[#allocation3 + $0x30] sm:$0xff] }
 0x43d   : > { %1829 = vst.msk [vmem:[#allocation3 + $0x18] sm:$0xff] %vm1050_vm7, %v1785_v57  ;;  %1828 = vst.msk [vmem:[#allocation3 + $0x10] sm:$0xff] %vm1050_vm7, %v1783_v45  ;;  %v1889_v6 = vadd.f32 %v1887_v0, %v1885_v52  ;;  %v1888_v59 = vadd.f32 %v1886_v4, %v1884_v54  ;;  %v3778_v45 = vld [vmem:[#allocation4] sm:$0xff] }
 0x43f   : > { %1891 = vst.msk [vmem:[#allocation4 + $0x38] sm:$0xff] %vm1050_vm7, %v1889_v6  ;;  %v1895_v3 = vmul.f32 %v1893_v60, %v1889_v6  ;;  %1890 = vst.msk [vmem:[#allocation4 + $0x30] sm:$0xff] %vm1050_vm7, %v1888_v59  ;;  %v1894_v22 = vmul.f32 %v1892_v7, %v1888_v59 }
 0x440   : > { %v1897_v8 = vld [vmem:[#allocation3 + $0x28] sm:$0xff]  ;;  %v1781_v2 = vpop.permute.xlu0 %1780  ;;  %v1896_v17 = vld [vmem:[#allocation3 + $0x20] sm:$0xff]  ;;  %v1779_v16 = vpop.permute.xlu1 %1778 }
 0x441   : > { %v1899_v24 = vadd.f32 %v1897_v8, %v1895_v3  ;;  %1827 = vst.msk [vmem:[#allocation3 + $0x8] sm:$0xff] %vm1050_vm7, %v1781_v2  ;;  %v1898_v29 = vadd.f32 %v1896_v17, %v1894_v22  ;;  %1826 = vst.msk [vmem:[#allocation3] sm:$0xff] %vm1050_vm7, %v1779_v16 }
 0x442   : > { %v1931_v7 = vld [vmem:[#allocation4 + $0x48] sm:$0xff]  ;;  %v1930_v22 = vld [vmem:[#allocation4 + $0x40] sm:$0xff] }
 0x443   : > { %1901 = vst.msk [vmem:[#allocation4 + $0x28] sm:$0xff] %vm1050_vm7, %v1899_v24  ;;  %1900 = vst.msk [vmem:[#allocation4 + $0x20] sm:$0xff] %vm1050_vm7, %v1898_v29  ;;  %v1905_v34 = vmul.f32 %v1903_v21, %v1899_v24  ;;  %v1904_v35 = vmul.f32 %v1902_v30, %v1898_v29 }
 0x444   : > { %v1961_v37 = vpop.permute.xlu0 %1960  ;;  %v1957_v27 = vpop.permute.xlu1 %1956  ;;  %v1907_v20 = vld [vmem:[#allocation3 + $0x18] sm:$0xff]  ;;  %v1906_v10 = vld [vmem:[#allocation3 + $0x10] sm:$0xff] }
 0x445   : > { %v1909_v58 = vadd.f32 %v1907_v20, %v1905_v34  ;;  %v1908_v33 = vadd.f32 %v1906_v10, %v1904_v35 }
 0x446   : > { %v1929_v41 = vld [vmem:[#allocation4 + $0x38] sm:$0xff]  ;;  %v1928_v32 = vld [vmem:[#allocation4 + $0x30] sm:$0xff] }
 0x447   : > { %v1915_v42 = vmul.f32 %v1913_v53, %v1909_v58  ;;  %v1914_v13 = vmul.f32 %v1912_v56, %v1908_v33  ;;  %1911 = vst.msk [vmem:[#allocation4 + $0x18] sm:$0xff] %vm1050_vm7, %v1909_v58  ;;  %1910 = vst.msk [vmem:[#allocation4 + $0x10] sm:$0xff] %vm1050_vm7, %v1908_v33  ;;  %v1933_v53 = vld [vmem:[#allocation4 + $0x58] sm:$0xff] }
 0x448   : > { %v1969_v44 = vpop.permute.xlu0 %1968  ;;  %v1965_v47 = vpop.permute.xlu1 %1964  ;;  %v1917_v23 = vld [vmem:[#allocation3 + $0x8] sm:$0xff]  ;;  %v1916_v49 = vld [vmem:[#allocation3] sm:$0xff] }
 0x449   : > { %v2009_v1 = vmul.f32 %v1969_v44, %v1929_v41  ;;  %v2008_v50 = vmul.f32 %v1965_v47, %v1928_v32  ;;  %v1919_v46 = vadd.f32 %v1917_v23, %v1915_v42  ;;  %v1918_v52 = vadd.f32 %v1916_v49, %v1914_v13  ;;  %v1932_v41 = vld [vmem:[#allocation4 + $0x50] sm:$0xff] }
 0x44a   : > { %v1927_v54 = vld [vmem:[#allocation4 + $0x28] sm:$0xff]  ;;  %v1926_v57 = vld [vmem:[#allocation4 + $0x20] sm:$0xff] }
 0x44b   : > { %v2007_v0 = vmul.f32 %v1961_v37, %v1927_v54  ;;  %v2006_v4 = vmul.f32 %v1957_v27, %v1926_v57  ;;  %v2046_v6 = vsel %vm1050_vm7, %v2009_v1, 0.0  ;;  %v2045_v59 = vsel %vm1050_vm7, %v2008_v50, 0.0  ;;  %1921 = vst.msk [vmem:[#allocation4 + $0x8] sm:$0xff] %vm1050_vm7, %v1919_v46  ;;  %1920 = vst.msk [vmem:[#allocation4] sm:$0xff] %vm1050_vm7, %v1918_v52 }
 0x44c   : > { %v2047_v60 = vadd.f32 %v2046_v6, %v2045_v59  ;;  %v1977_v3 = vpop.permute.xlu0 %1976  ;;  %v1973_v8 = vpop.permute.xlu1 %1972 }
 0x44d   : > { %v2037_v2 = vsel %vm1050_vm7, %v2007_v0, 0.0  ;;  %v2036_v17 = vsel %vm1050_vm7, %v2006_v4, 0.0  ;;  %v2011_v16 = vmul.f32 %v1977_v3, %v1931_v7  ;;  %v2010_v24 = vmul.f32 %v1973_v8, %v1930_v22  ;;  %v1934_v3 = vld [vmem:[#allocation4 + $0x60] sm:$0xff] }
 0x44e   : > { %v2038_v29 = vadd.f32 %v2037_v2, %v2036_v17  ;;  %v2048_v21 = vrot.slane %v2047_v60, 4  ;;  %v1924_v30 = vld [vmem:[#allocation4 + $0x10] sm:$0xff]  ;;  %v1925_v34 = vld [vmem:[#allocation4 + $0x18] sm:$0xff] }
 0x44f   : > { %v2055_v35 = vsel %vm1050_vm7, %v2011_v16, 0.0  ;;  %v2054_v37 = vsel %vm1050_vm7, %v2010_v24, 0.0  ;;  %v2004_v27 = vmul.f32 %v3635_v55, %v1924_v30  ;;  %v2005_v20 = vmul.f32 %v3607_v18, %v1925_v34 }
 0x450   : > { %v2039_v10 = vrot.slane %v2038_v29, 4  ;;  %v2049_v58 = vadd.f32 %v2048_v21, %v2047_v60  ;;  %v2056_v33 = vadd.f32 %v2055_v35, %v2054_v37  ;;  %v1985_v56 = vpop.permute.xlu0 %1984  ;;  %v1981_v42 = vpop.permute.xlu1 %1980  ;;  %v1935_v60 = vld [vmem:[#allocation4 + $0x68] sm:$0xff] }
 0x451   : > { %v2013_v13 = vmul.f32 %v1985_v56, %v1933_v53  ;;  %v2012_v44 = vmul.f32 %v1981_v42, %v1932_v41  ;;  %v2027_v32 = vsel %vm1050_vm7, %v2004_v27, 0.0  ;;  %v2028_v47 = vsel %vm1050_vm7, %v2005_v20, 0.0  ;;  %v1937_v27 = vld [vmem:[#allocation4 + $0x78] sm:$0xff] }
 0x452   : > { %v2040_v23 = vadd.f32 %v2039_v10, %v2038_v29  ;;  %v2050_v49 = vrot.slane %v2049_v58, 2  ;;  %v2057_v1 = vrot.slane %v2056_v33, 4  ;;  %v1922_v50 = vld [vmem:[#allocation4] sm:$0xff]  ;;  %v1923_v55 = vld [vmem:[#allocation4 + $0x8] sm:$0xff]  ;;  %v2029_v46 = vadd.f32 %v2028_v47, %v2027_v32  ;;  %v1936_v10 = vld [vmem:[#allocation4 + $0x70] sm:$0xff] }
 0x453   : > { %v2064_v18 = vsel %vm1050_vm7, %v2013_v13, 0.0  ;;  %v2063_v52 = vsel %vm1050_vm7, %v2012_v44, 0.0  ;;  %v2002_v54 = vmul.f32 %v3629_v48, %v1922_v50  ;;  %v2003_v57 = vmul.f32 %v3601_v62, %v1923_v55 }
 0x454   : > { %v2041_v0 = vrot.slane %v2040_v23, 2  ;;  %v2051_v4 = vadd.f32 %v2050_v49, %v2049_v58  ;;  %v2058_v6 = vadd.f32 %v2057_v1, %v2056_v33  ;;  %v2065_v59 = vadd.f32 %v2064_v18, %v2063_v52  ;;  %v1993_v7 = vpop.permute.xlu0 %1992  ;;  %v1989_v22 = vpop.permute.xlu1 %1988 }
 0x455   : > { %v2015_v8 = vmul.f32 %v1993_v7, %v1935_v60  ;;  %v2014_v2 = vmul.f32 %v1989_v22, %v1934_v3  ;;  %v2018_v17 = vsel %vm1050_vm7, %v2002_v54, 0.0  ;;  %v2019_v16 = vsel %vm1050_vm7, %v2003_v57, 0.0 }
 0x456   : > { %v2042_v24 = vadd.f32 %v2041_v0, %v2040_v23  ;;  %v2059_v29 = vrot.slane %v2058_v6, 2  ;;  %v2066_v21 = vrot.slane %v2065_v59, 4  ;;  %v2020_v30 = vadd.f32 %v2019_v16, %v2018_v17 }
 0x457   : > { %v2073_v48 = vsel %vm1050_vm7, %v2015_v8, 0.0  ;;  %v2072_v62 = vsel %vm1050_vm7, %v2014_v2, 0.0  ;;  %v2030_v34 = vrot.slane %v2029_v46, 4  ;;  %v2052_v35 = vrot.slane %v2051_v4, 1 }
 0x458   : > { %v2067_v37 = vadd.f32 %v2066_v21, %v2065_v59  ;;  %v2001_v20 = vpop.permute.xlu0 %2000  ;;  %v1997_v58 = vpop.permute.xlu1 %1996  ;;  %v2074_v33 = vadd.f32 %v2073_v48, %v2072_v62  ;;  %v2021_v41 = vrot.slane %v2020_v30, 4  ;;  %v2043_v42 = vrot.slane %v2042_v24, 1 }
 0x459   : > { %v2017_v53 = vmul.f32 %v2001_v20, %v1937_v27  ;;  %v2016_v56 = vmul.f32 %v1997_v58, %v1936_v10  ;;  %v2060_v13 = vadd.f32 %v2059_v29, %v2058_v6  ;;  %v2031_v32 = vadd.f32 %v2030_v34, %v2029_v46  ;;  %v2163_v20 = vld [vmem:[%s4015_s11 + $0x70] sm:$0xff]  ;;  %v2164_v10 = vld [vmem:[%s4015_s11 + $0x78] sm:$0xff] }
 0x45a   : > { %v2068_v44 = vrot.slane %v2067_v37, 2  ;;  %v2075_v47 = vrot.slane %v2074_v33, 4  ;;  %v2022_v1 = vadd.f32 %v2021_v41, %v2020_v30  ;;  %v3802_v50 = vadd.f32 %v2052_v35, %v2051_v4 }
 0x45b   : > { %v2082_v23 = vsel %vm1050_vm7, %v2017_v53, 0.0  ;;  %v2081_v49 = vsel %vm1050_vm7, %v2016_v56, 0.0  ;;  %v2032_v57 = vrot.slane %v2031_v32, 2  ;;  %v2044_v60 = vadd.f32 %v2043_v42, %v2042_v24 }
 0x45c   : > { %v2069_v55 = vadd.f32 %v2068_v44, %v2067_v37  ;;  %v2083_v18 = vadd.f32 %v2082_v23, %v2081_v49  ;;  %v1401_v52 = vpop.permute.xlu0 %1400  ;;  %v1397_v54 = vpop.permute.xlu1 %1396  ;;  %v2076_v0 = vadd.f32 %v2075_v47, %v2074_v33  ;;  %v2023_v59 = vrot.slane %v2022_v1, 2 }
 0x45d   : > { %v1459_v6 = vmul.f32 %v1401_v52, %v3776_v31  ;;  %v1458_v46 = vmul.f32 %v1397_v54, %v3778_v45  ;;  %v2061_v7 = vrot.slane %v2060_v13, 1  ;;  %v2033_v22 = vadd.f32 %v2032_v57, %v2031_v32 }
 0x45e   : > { %v2084_v3 = vrot.slane %v2083_v18, 4  ;;  %v2077_v8 = vrot.slane %v2076_v0, 2  ;;  %v2024_v17 = vadd.f32 %v2023_v59, %v2022_v1  ;;  %v2070_v16 = vrot.slane %v2069_v55, 1 }
 0x45f   : > { %v1475_v4 = vsel %vm1050_vm7, %v1459_v6, 0.0  ;;  %v1474_v2 = vsel %vm1050_vm7, %v1458_v46, 0.0  ;;  %v2034_v62 = vrot.slane %v2033_v22, 1  ;;  %v2752_v32 = vpack.c.bf16 %v2164_v10, %v2163_v20 }
 0x460   : > { %v2085_v29 = vadd.f32 %v2084_v3, %v2083_v18  ;;  %v1476_v21 = vadd.f32 %v1475_v4, %v1474_v2  ;;  %v1409_v48 = vpop.permute.xlu0 %1408  ;;  %v1405_v31 = vpop.permute.xlu1 %1404  ;;  %v2078_v45 = vadd.f32 %v2077_v8, %v2076_v0  ;;  %v2025_v34 = vrot.slane %v2024_v17, 1 }
 0x461   : > { %v1461_v24 = vmul.f32 %v1409_v48, %v3770_v15  ;;  %v1460_v30 = vmul.f32 %v1405_v31, %v3772_v40  ;;  %v2035_v27 = vadd.f32 %v2034_v62, %v2033_v22  ;;  %v2062_v47 = vadd.f32 %v2061_v7, %v2060_v13  ;;  %2753 = vmatpush3.bf16.msra.mxu0 %v2752_v32 }
 0x462   : > { %v2086_v35 = vrot.slane %v2085_v29, 2  ;;  %v1477_v37 = vrot.slane %v1476_v21, 4  ;;  %v2079_v58 = vrot.slane %v2078_v45, 1  ;;  %v2026_v15 = vadd.f32 %v2025_v34, %v2024_v17  ;;  %2760 = vmatprep.subr.bf16.mxu0 %v2989_v38 }
 0x463   : > { %v1484_v33 = vsel %vm1050_vm7, %v1461_v24, 0.0  ;;  %v1483_v53 = vsel %vm1050_vm7, %v1460_v30, 0.0  ;;  %v2071_v0 = vadd.f32 %v2070_v16, %v2069_v55 }
 0x464   : > { %v2087_v40 = vadd.f32 %v2086_v35, %v2085_v29  ;;  %v1478_v56 = vadd.f32 %v1477_v37, %v1476_v21  ;;  %v1485_v41 = vadd.f32 %v1484_v33, %v1483_v53  ;;  %v1417_v42 = vpop.permute.xlu0 %1416  ;;  %v1413_v44 = vpop.permute.xlu1 %1412  ;;  %v2121_v1 = vsel %vm2098_vm8, %v2035_v27, %v2026_v15 }
 0x465   : > { %v1463_v23 = vmul.f32 %v1417_v42, %v3762_v63  ;;  %v1462_v49 = vmul.f32 %v1413_v44, %v3766_v25  ;;  %v2122_v57 = vsel %vm2100_vm9, %v2044_v60, %v2121_v1  ;;  %v2080_v63 = vadd.f32 %v2079_v58, %v2078_v45 }
 0x466   : > { %v2088_v18 = vrot.slane %v2087_v40, 1  ;;  %v1479_v52 = vrot.slane %v1478_v56, 2  ;;  %v1486_v54 = vrot.slane %v1485_v41, 4  ;;  %v2123_v13 = vsel %vm2102_vm10, %v3802_v50, %v2122_v57 }
 0x467   : > { %v1493_v6 = vsel %vm1050_vm7, %v1463_v23, 0.0  ;;  %v1492_v46 = vsel %vm1050_vm7, %v1462_v49, 0.0  ;;  %v2124_v4 = vsel %vm2104_vm11, %v2062_v47, %v2123_v13 }
 0x468   : > { %v1480_v25 = vadd.f32 %v1479_v52, %v1478_v56  ;;  %v1487_v59 = vadd.f32 %v1486_v54, %v1485_v41  ;;  %v1494_v7 = vadd.f32 %v1493_v6, %v1492_v46  ;;  %v1425_v3 = vpop.permute.xlu0 %1424  ;;  %v1421_v22 = vpop.permute.xlu1 %1420  ;;  %v2089_v55 = vadd.f32 %v2088_v18, %v2087_v40 }
 0x469   : > { %v1465_v8 = vmul.f32 %v1425_v3, %v3756_v26  ;;  %v1464_v60 = vmul.f32 %v1421_v22, %v3758_v61  ;;  %v2125_v50 = vsel %vm2106_vm12, %v2071_v0, %v2124_v4 }
 0x46a   : > { %v1488_v2 = vrot.slane %v1487_v59, 2  ;;  %v1495_v17 = vrot.slane %v1494_v7, 4  ;;  %v1481_v16 = vrot.slane %v1480_v25, 1  ;;  %v2126_v48 = vsel %vm2108_vm13, %v2080_v63, %v2125_v50 }
 0x46b   : > { %v1502_v29 = vsel %vm1050_vm7, %v1465_v8, 0.0  ;;  %v1501_v21 = vsel %vm1050_vm7, %v1464_v60, 0.0  ;;  %v2127_v24 = vsel %vm2110_vm15, %v2089_v55, %v2126_v48 }
 0x46c   : > { %v1489_v31 = vadd.f32 %v1488_v2, %v1487_v59  ;;  %v1496_v62 = vadd.f32 %v1495_v17, %v1494_v7  ;;  %v1503_v26 = vadd.f32 %v1502_v29, %v1501_v21  ;;  %v1433_v45 = vpop.permute.xlu0 %1432  ;;  %v1429_v61 = vpop.permute.xlu1 %1428  ;;  %2128 = vrot.lane.b32.xlu1 %v2127_v24, %s2987_s24  ;;  %v1482_v20 = vadd.f32 %v1481_v16, %v1480_v25 }
 0x46d   : > { %v1467_v30 = vmul.f32 %v1433_v45, %v3748_v39  ;;  %v1466_v34 = vmul.f32 %v1429_v61, %v3750_v51 }
 0x46e   : > { %v1490_v35 = vrot.slane %v1489_v31, 1  ;;  %v1497_v37 = vrot.slane %v1496_v62, 2  ;;  %v1504_v27 = vrot.slane %v1503_v26, 4 }
 0x46f   : > { %v1511_v10 = vsel %vm1050_vm7, %v1467_v30, 0.0  ;;  %v1510_v58 = vsel %vm1050_vm7, %v1466_v34, 0.0 }
 0x470   : > { %v1491_v33 = vadd.f32 %v1490_v35, %v1489_v31  ;;  %v1498_v53 = vadd.f32 %v1497_v37, %v1496_v62  ;;  %v1505_v15 = vadd.f32 %v1504_v27, %v1503_v26  ;;  %v1512_v40 = vadd.f32 %v1511_v10, %v1510_v58  ;;  %v1441_v56 = vpop.permute.xlu0 %1440  ;;  %v1437_v41 = vpop.permute.xlu1 %1436 }
 0x471   : > { %v1469_v39 = vmul.f32 %v1441_v56, %v3743_v43  ;;  %v1468_v51 = vmul.f32 %v1437_v41, %v3738_v11 }
 0x472   : > { %v2099_v42 = vsel %vm2098_vm8, %v1491_v33, %v1482_v20  ;;  %v1499_v44 = vrot.slane %v1498_v53, 1  ;;  %v1506_v32 = vrot.slane %v1505_v15, 2  ;;  %v1513_v47 = vrot.slane %v1512_v40, 4 }
 0x473   : > { %v1520_v23 = vsel %vm1050_vm7, %v1469_v39, 0.0  ;;  %v1519_v49 = vsel %vm1050_vm7, %v1468_v51, 0.0  ;;  %v2560_v39 = vld [vmem:[%s4014_s10] ss:$0 sm:$0xff] }
 0x474   : > { %v1500_v1 = vadd.f32 %v1499_v44, %v1498_v53  ;;  %v1507_v18 = vadd.f32 %v1506_v32, %v1505_v15  ;;  %v1514_v52 = vadd.f32 %v1513_v47, %v1512_v40  ;;  %v1521_v54 = vadd.f32 %v1520_v23, %v1519_v49  ;;  %v1449_v57 = vpop.permute.xlu0 %1448  ;;  %v1445_v0 = vpop.permute.xlu1 %1444 }
 0x475   : > { %v1471_v6 = vmul.f32 %v1449_v57, %v3733_v28  ;;  %v1470_v43 = vmul.f32 %v1445_v0, %v3729_v19  ;;  %v2141_v15 = vsub.f32 0.0, %v3301_v36 }
 0x476   : > { %v2101_v11 = vsel %vm2100_vm9, %v1500_v1, %v2099_v42  ;;  %v1508_v46 = vrot.slane %v1507_v18, 1  ;;  %v1515_v13 = vrot.slane %v1514_v52, 2  ;;  %v1522_v63 = vrot.slane %v1521_v54, 4 }
 0x477   : > { %v1529_v25 = vsel %vm1050_vm7, %v1471_v6, 0.0  ;;  %v1528_v59 = vsel %vm1050_vm7, %v1470_v43, 0.0  ;;  %v2142_v40 = vmul.f32 1.442695, %v2141_v15  ;;  %v2139_v42 = vmul.f32 %v2560_v39, %v3318_v5  ;;  %v2266_v43 = vld [vmem:[%s4018_s14 + $0x10] sm:$0xff] }
 0x478   : > { %v1509_v7 = vadd.f32 %v1508_v46, %v1507_v18  ;;  %v1516_v3 = vadd.f32 %v1515_v13, %v1514_v52  ;;  %v1523_v22 = vadd.f32 %v1522_v63, %v1521_v54  ;;  %v1530_v8 = vadd.f32 %v1529_v25, %v1528_v59  ;;  %v1457_v60 = vpop.permute.xlu0 %1456  ;;  %v1453_v55 = vpop.permute.xlu1 %1452  ;;  %v2267_v46 = vld [vmem:[%s4018_s14 + $0x18] sm:$0xff] }
 0x479   : > { %v1473_v4 = vmul.f32 %v1457_v60, %v3722_v9  ;;  %v1472_v28 = vmul.f32 %v1453_v55, %v3724_v12  ;;  %2911 = vpow2.f32 %v2142_v40  ;;  %v2758_v13 = vpack.c.bf16 %v2267_v46, %v2266_v43 }
 0x47a   : > { %v1517_v19 = vrot.slane %v1516_v3, 1  ;;  %v1524_v2 = vrot.slane %v1523_v22, 2  ;;  %v1531_v17 = vrot.slane %v1530_v8, 4  ;;  %v2103_v50 = vsel %vm2102_vm10, %v1509_v7, %v2101_v11 }
 0x47b   : > { %v1538_v16 = vsel %vm1050_vm7, %v1473_v4, 0.0  ;;  %v1537_v29 = vsel %vm1050_vm7, %v1472_v28, 0.0  ;;  %v2375_v4 = vld [vmem:[%s4020_s16] sm:$0xff]  ;;  %v2376_v28 = vld [vmem:[%s4020_s16 + $0x8] sm:$0xff] }
 0x47c   : > { %v1518_v21 = vadd.f32 %v1517_v19, %v1516_v3  ;;  %v1525_v48 = vadd.f32 %v1524_v2, %v1523_v22  ;;  %v1532_v31 = vadd.f32 %v1531_v17, %v1530_v8  ;;  %v1539_v62 = vadd.f32 %v1538_v16, %v1537_v29  ;;  %v2561_v3 = vld [vmem:[%s4016_s12] ss:$0 sm:$0xff]  ;;  %v2377_v2 = vld [vmem:[%s4020_s16 + $0x10] sm:$0xff]  ;;  %v2378_v17 = vld [vmem:[%s4020_s16 + $0x18] sm:$0xff] }
 0x47d   : > { %v2562_v8 = vld [vmem:[%s4017_s13] ss:$0 sm:$0xff]  ;;  %v2761_v19 = vpack.c.bf16 %v2376_v28, %v2375_v4  ;;  %v2380_v29 = vld [vmem:[%s4020_s16 + $0x28] sm:$0xff] }
 0x47e   : > { %v1526_v26 = vrot.slane %v1525_v48, 1  ;;  %v1533_v45 = vrot.slane %v1532_v31, 2  ;;  %v1540_v61 = vrot.slane %v1539_v62, 4  ;;  %v2105_v9 = vsel %vm2104_vm11, %v1518_v21, %v2103_v50  ;;  %v2379_v16 = vld [vmem:[%s4020_s16 + $0x20] sm:$0xff] }
 0x47f   : > { %v2764_v50 = vpack.c.bf16 %v2378_v17, %v2377_v2  ;;  %v2767_v21 = vpack.c.bf16 %v2380_v29, %v2379_v16 }
 0x480   : > { %v1527_v24 = vadd.f32 %v1526_v26, %v1525_v48  ;;  %v1534_v12 = vadd.f32 %v1533_v45, %v1532_v31  ;;  %v1541_v30 = vadd.f32 %v1540_v61, %v1539_v62  ;;  %v2381_v48 = vld [vmem:[%s4020_s16 + $0x30] sm:$0xff]  ;;  %v2382_v31 = vld [vmem:[%s4020_s16 + $0x38] sm:$0xff]  ;;  %v2383_v26 = vld [vmem:[%s4020_s16 + $0x40] sm:$0xff] }
 0x481   : > { %v2770_v62 = vpack.c.bf16 %v2382_v31, %v2381_v48  ;;  %v2384_v45 = vld [vmem:[%s4020_s16 + $0x48] sm:$0xff] }
 0x482   : > { %v1535_v34 = vrot.slane %v1534_v12, 1  ;;  %v1542_v35 = vrot.slane %v1541_v30, 2  ;;  %v2107_v37 = vsel %vm2106_vm12, %v1527_v24, %v2105_v9  ;;  %v2773_v61 = vpack.c.bf16 %v2384_v45, %v2383_v26  ;;  %v2385_v9 = vld [vmem:[%s4020_s16 + $0x50] sm:$0xff]  ;;  %v2386_v24 = vld [vmem:[%s4020_s16 + $0x58] sm:$0xff] }
 0x483   : > { %v2912_v56 = vpop.eup %2911 }
 0x484   : > { %v1536_v27 = vadd.f32 %v1535_v34, %v1534_v12  ;;  %v1543_v20 = vadd.f32 %v1542_v35, %v1541_v30  ;;  %v2144_v41 = vadd.f32 1.0, %v2912_v56  ;;  %v2776_v12 = vpack.c.bf16 %v2386_v24, %v2385_v9  ;;  %v2387_v30 = vld [vmem:[%s4020_s16 + $0x60] sm:$0xff]  ;;  %v2388_v34 = vld [vmem:[%s4020_s16 + $0x68] sm:$0xff] }
 0x485   : > { %v2779_v35 = vpack.c.bf16 %v2388_v34, %v2387_v30 }
 0x486   : > { %v1544_v10 = vrot.slane %v1543_v20, 1  ;;  %v2109_v58 = vsel %vm2108_vm13, %v1536_v27, %v2107_v37  ;;  %2913 = vrcp.f32 %v2144_v41  ;;  %v2389_v37 = vld [vmem:[%s4020_s16 + $0x70] sm:$0xff]  ;;  %v2390_v27 = vld [vmem:[%s4020_s16 + $0x78] sm:$0xff] }
 0x488   : > { %v1545_v33 = vadd.f32 %v1544_v10, %v1543_v20  ;;  %v2782_v20 = vpack.c.bf16 %v2390_v27, %v2389_v37  ;;  %v2563_v10 = vld [vmem:[%s4019_s15] ss:$0 sm:$0xff] }
 0x48a   : > { %v2111_v53 = vsel %vm2110_vm15, %v1545_v33, %v2109_v58 }
 0x490   : > { %v2914_v51 = vpop.eup %2913 }
 0x491   : > { %v2147_v47 = vmul.f32 %v2914_v51, %v3301_v36  ;;  %v2264_v36 = vld [vmem:[%s4018_s14] sm:$0xff] }
 0x4de   : > { %v2129_v44 = vpop.permute.xlu1 %2128 }
 0x4df   : > { %v2131_v32 = vsel %vm1050_vm7, %v2111_v53, %v2129_v44 }
 0x4e0   : > { %v2140_v23 = vadd.f32 %v2139_v42, %v2131_v32 }
 0x4e2   : > { %v2148_v49 = vmul.f32 %v2147_v47, %v2140_v23 }
 0x4e4   : > { %2642 = vmatmul.mubr.f32.vlgmr.msra.gmra.mrb[0].mxu0 %v2148_v49 }
 0x4e5   : > { %2687 = vmatprep.mubr.msk.f32.mxu0 %vm2990_vm14, %v2986_v14  ;;  %v2265_v14 = vld [vmem:[%s4018_s14 + $0x8] sm:$0xff]  ;;  %2762 = vmatpush3.bf16.msra.mxu0 %v2761_v19 }
 0x4e6   : > { %v2755_v11 = vpack.c.bf16 %v2265_v14, %v2264_v36  ;;  %2763 = vmatprep.subr.bf16.mxu0 %v2989_v38 }
 0x4e8   : > { %2756 = vmatpush3.bf16.msra.mxu1 %v2755_v11 }
 0x4e9   : > { %2757 = vmatprep.subr.bf16.mxu1 %v2989_v38  ;;  %2765 = vmatpush3.bf16.msra.mxu0 %v2764_v50 }
 0x4ea   : > { %2766 = vmatprep.subr.bf16.mxu0 %v2989_v38 }
 0x4ec   : > { %2759 = vmatpush3.bf16.msra.mxu1 %v2758_v13  ;;  %v2565_v13 = vld [vmem:[%s4021_s17] ss:$0 sm:$0xff] }
 0x4ed   : > { %2768 = vmatpush3.bf16.msra.mxu0 %v2767_v21 }
 0x4ee   : > { %2769 = vmatprep.subr.bf16.mxu0 %v2989_v38 }
 0x4f1   : > { %2771 = vmatpush3.bf16.msra.mxu0 %v2770_v62 }
 0x4f2   : > { %2772 = vmatprep.subr.bf16.mxu0 %v2989_v38 }
 0x4f5   : > { %2774 = vmatpush3.bf16.msra.mxu0 %v2773_v61 }
 0x4f6   : > { %2775 = vmatprep.subr.bf16.mxu0 %v2989_v38 }
 0x4f9   : > { %2777 = vmatpush3.bf16.msra.mxu0 %v2776_v12 }
 0x4fa   : > { %2778 = vmatprep.subr.bf16.mxu0 %v2989_v38 }
 0x4fd   : > { %2780 = vmatpush3.bf16.msra.mxu0 %v2779_v35 }
 0x4fe   : > { %2781 = vmatprep.subr.bf16.mxu0 %v2989_v38 }
 0x501   : > { %2783 = vmatpush3.bf16.msra.mxu0 %v2782_v20 }
 0x5b7   : > { %v2231_v1 = vpop.f32.mrb[0].mxu0 }
 0x5b8   : > { %v2643_v18 = vpop.f32.mrb[1].mxu0  ;;  %v2235_v52 = vsel %vm572_vm0, %v2231_v1, 0.0 }
 0x5b9   : > { %2236 = vadd.xlane.f32.xlu0 %v2235_v52 }
 0x646   : > { %v2237_v54 = vpop.xlane.xlu0 %2236 }
 0x647   : > { %v2238_v57 = vmul.f32 0.03125, %v2237_v54 }
 0x649   : > { %v2239_v0 = vsub.f32 %v2231_v1, %v2238_v57 }
 0x64b   : > { %v2240_v5 = vmul.f32 %v2239_v0, %v2239_v0 }
 0x64d   : > { %v2241_v6 = vsel %vm572_vm0, %v2240_v5, 0.0 }
 0x64e   : > { %2242 = vadd.xlane.f32.xlu1 %v2241_v6  ;;  %v2991_v6 = vmov -1.0  }
 0x6db   : > { %v2243_v63 = vpop.xlane.xlu1 %2242 }
 0x6dc   : > { %v2244_v25 = vmul.f32 0.03125, %v2243_v63 }
 0x6de   : > { %v2245_v59 = vadd.f32 1e-05, %v2244_v25 }
 0x6e0   : > { %2915 = vrsqrt.f32 %v2245_v59 }
 0x6ea   : > { %v2916_v7 = vpop.eup %2915 }
 0x6eb   : > { %v2247_v22 = vmul.f32 %v2916_v7, %v2239_v0  ;;  %v2921_v7 = vld [vmem:[%s3141_s21] sm:$0xff]  ;;  %s2992_s21 = smov [#allocation5]  }
 0x6ec   : > { %s2926_s26 = sshll.u32 %s2992_s21, 4  ;;  %s2927_s26 = int_to_ptr.vmem [resolvable:$false] %s2926_s26 }
 0x6ed   : > { %v2255_v60 = vmul.f32 %v2561_v3, %v2247_v22  ;;  %s2928_s1 = scalar_lea.vmem %s2927_s26, 256  ;;  %p2929_p0 = scmp.lt.s32.totalorder %s3963_s25, %s2927_s26 }
 0x6ee   : > { %p2930_p1 = scmp.lt.s32.totalorder %s2928_s1, %s2922_s0 }
 0x6ef   : > { %v2263_v55 = vadd.f32 %v2562_v8, %v2255_v60 }
 0x6f0   : > { %p2931_p2 = por %p2930_p1, %p2929_p0 }
 0x6f1   : > { %2653 = vmatmul.mubr.msk.f32.vlgmr.msra.gmra.mrb[4].mxu1 %vm572_vm0, %v2263_v55 }
 0x6f2   : > { %p2932_p3 = pnand %p2931_p2, %p2925_p13 }
 0x7c4   : > { %v2344_v58 = vpop.f32.mrb[4].mxu1 }
 0x7c5   : > { %v2345_v33 = vadd.f32 %v2563_v10, %v2344_v58  ;;  %v2654_v53 = vpop.f32.mrb[5].mxu1 }
 0x7c7   : > { %v2349_v15 = vmul.f32 0.70710677, %v2345_v33  ;;  %v2348_v43 = vmul.f32 0.5, %v2345_v33 }
 0x7c9   : > { %v2352_v40 = vand.u32 2147483647, %v2349_v15  ;;  %vm2350_vm1 = vcmp.ge.f32.partialorder %v2349_v15, 0.0 }
 0x7ca   : > { %v2351_v36 = vsel %vm2350_vm1, 1.0, %v2991_v6 }
 0x7cb   : > { %v2353_v56 = vmul.f32 0.3275911, %v2352_v40  ;;  %v2366_v39 = vsub.f32 0.0, %v2352_v40 }
 0x7cd   : > { %v2354_v41 = vadd.f32 1.0, %v2353_v56  ;;  %v2367_v42 = vmul.f32 %v2366_v39, %v2352_v40 }
 0x7cf   : > { %2917 = vrcp.f32 %v2354_v41  ;;  %v2368_v47 = vmul.f32 1.442695, %v2367_v42 }
 0x7d1   : > { %2919 = vpow2.f32 %v2368_v47 }
 0x7d9   : > { %v2918_v51 = vpop.eup %2917 }
 0x7da   : > { %v2357_v44 = vmul.f32 1.0614054, %v2918_v51 }
 0x7db   : > { %v2920_v57 = vpop.eup %2919 }
 0x7dc   : > { %v2358_v32 = vadd.f32 -1.4531521, %v2357_v44 }
 0x7de   : > { %v2359_v38 = vmul.f32 %v2918_v51, %v2358_v32 }
 0x7e0   : > { %v2360_v23 = vadd.f32 1.4214138, %v2359_v38 }
 0x7e2   : > { %v2361_v49 = vmul.f32 %v2918_v51, %v2360_v23 }
 0x7e4   : > { %v2362_v1 = vadd.f32 -0.28449672, %v2361_v49 }
 0x7e6   : > { %v2363_v18 = vmul.f32 %v2918_v51, %v2362_v1 }
 0x7e8   : > { %v2364_v52 = vadd.f32 0.2548296, %v2363_v18 }
 0x7ea   : > { %v2365_v54 = vmul.f32 %v2918_v51, %v2364_v52 }
 0x7ec   : > { %v2370_v0 = vmul.f32 %v2920_v57, %v2365_v54 }
 0x7ee   : > { %v2371_v5 = vsub.f32 1.0, %v2370_v0 }
 0x7f0   : > { %v2372_v14 = vmul.f32 %v2371_v5, %v2351_v36 }
 0x7f2   : > { %v2373_v11 = vadd.f32 1.0, %v2372_v14 }
 0x7f4   : > { %v2374_v46 = vmul.f32 %v2373_v11, %v2348_v43 }
 0x7f6   : > { %2688 = vmatmul.mubr.f32.vlgmr.msra.gmra.mrb[2].mxu0 %v2374_v46 }
 0x8c9   : > { %v2464_v63 = vpop.f32.mrb[2].mxu0 }
 0x8ca   : > { %v2465_v25 = vadd.f32 %v2565_v13, %v2464_v63  ;;  %v2689_v59 = vpop.f32.mrb[3].mxu0 }
 0x8cc   : > { %v2468_v3 = vadd.f32 %v2921_v7, %v2465_v25 }
 0x8ce   : > { %2469 = vst.msk [vmem:[%s566_s23] sm:$0xff] %vm572_vm0, %v2468_v3 }
 0x8cf   : > { %2935 = shalt.err (!%p2932_p3)
}
 0x8d0   : > { %s2936_s29 = scalar_lea.hbm %s3961_s20, 128  ;;  %s2940_s23 = scalar_lea.hbm %s4022_s18, 256 }
 0x8d1   : > { %p2937_p4 = scmp.ne.s32.totalorder %s3961_s20, %s2936_s29  ;;  %p2941_p9 = scmp.lt.u32.totalorder %s3961_s20, %s4022_s18 }
 0x8d2   : > { %p2942_p10 = scmp.lt.u32.totalorder %s2940_s23, %s2936_s29  ;;  %p2944_p12 = scmp.lt.u32.totalorder %s2936_s29, %s3961_s20 }
 0x8d3   : > { %p2938_p7 = pnand %p2937_p4, %p3126_p5 }
 0x8d4   : > { %p2943_p11 = por %p2942_p10, %p2941_p9 }
 0x8d5   : > { %p2939_p8 = pneg %p2938_p7 }
 0x8d6   : > { %p2945_p13 = por %p2944_p12, %p2943_p11 }
 0x8d8   : > { %p2946_p0 = pnand %p2945_p13, %p2939_p8 }
 0x8da   : > { %2949 = shalt.err (!%p2946_p0)
}
 0x8db   : > { %2784 = dma.vmem_to_hbm [thread:$0]  (%p3126_p5), %s3963_s25, 128, %s3961_s20, %s2471_s22  }
 0x8dc PF: > { %s4043_s0 = sld [smem:[#allocation10_spill]]  ;;  %s4044_s21 = sld [smem:[#allocation8_spill]] }
 0x8e2   : > { %p2790_p1 = scmp.ge.s32.totalorder %s4043_s0, 2  ;;  %s2496_s1 = sand.u32 1, %s4044_s21  }
 0x8e3   : > { %s2497_s27 = scalar_lea.sflag [#allocation6], %s2496_s1 }
 0x8e4   : > { %p2787_p2 = pnand %p2790_p1, %p3130_p6 }
 0x8e6   : > { %2967 = dma.done.wait (!%p2787_p2), %s2497_s27, 128  }
 0x8e7   : > { %2969 = vsyncadd (!%p2787_p2), %s2497_s27, 4294967168  ;;  %s4046_s30 = sld [smem:[#allocation11_spill]]  ;;  %s4047_s29 = sld [smem:[#allocation9_spill]] }
 0x8e8   : > { %s4048_s23 = sld [smem:[#allocation12_spill]]  ;;  %s4049_s27 = smov %s2976_s28 }
 0x8ed   : > { %p28_p3 = scmp.ge.s32.totalorder %s4046_s30, 4   ;;  %s4050_s28 = smov %s4047_s29 }
 0x8ee   : > { %s4051_s29 = smov %s4048_s23 }
 0x8ef   :  { %30 = sbr.rel (!%p28_p3) target bundleno = 7 (0x7), region = 148 }
 0x8f6   :  { %2502 = vsyncpa [#allocation6], 1 }
 0x8f7   :  { %2504 = vsyncpa [#allocation6 + $0x1], 1 }

// kernel: tpu_custom_call.1
= control target key start
LH: loop header
LB: loop body
LE: loop exit
PB: predicated region body
PF: predicated region fallthrough
CT: control target
= control target key end

     0   :  { %s4004_s0 = inlined_call_operand.vmem [shape: f32[2,8,32], index: 0, kind: input, shape index: {}]   ;;  %s4005_s1 = inlined_call_operand.vmem [shape: f32[1,32], index: 1, kind: input, shape index: {}]   ;;  %s4006_s2 = inlined_call_operand.vmem [shape: f32[1,32], index: 2, kind: input, shape index: {}]   ;;  %s4007_s3 = inlined_call_operand.vmem [shape: f32[32,256], index: 3, kind: input, shape index: {}]   ;;  %s4008_s4 = inlined_call_operand.vmem [shape: f32[4,128], index: 4, kind: input, shape index: {}]   ;;  %s4009_s5 = inlined_call_operand.vmem [shape: f32[4,128], index: 5, kind: input, shape index: {}]   ;;  %s4010_s6 = inlined_call_operand.vmem [shape: f32[1,128], index: 6, kind: input, shape index: {}]   ;;  %s4011_s7 = inlined_call_operand.vmem [shape: f32[128,192], index: 7, kind: input, shape index: {}]   ;;  %s4012_s8 = inlined_call_operand.vmem [shape: f32[1,128], index: 8, kind: input, shape index: {}]   ;;  %s4013_s9 = inlined_call_operand.vmem [shape: f32[32,64], index: 9, kind: input, shape index: {}]   ;;  %s4014_s10 = inlined_call_operand.vmem [shape: f32[1,128], index: 10, kind: input, shape index: {}]   ;;  %s4015_s11 = inlined_call_operand.vmem [shape: f32[128,32], index: 11, kind: input, shape index: {}]   ;;  %s4016_s12 = inlined_call_operand.vmem [shape: f32[1,32], index: 12, kind: input, shape index: {}]   ;;  %s4017_s13 = inlined_call_operand.vmem [shape: f32[1,32], index: 13, kind: input, shape index: {}]   ;;  %s4018_s14 = inlined_call_operand.vmem [shape: f32[32,128], index: 14, kind: input, shape index: {}]   ;;  %s4019_s15 = inlined_call_operand.vmem [shape: f32[1,128], index: 15, kind: input, shape index: {}]   ;;  %s4020_s16 = inlined_call_operand.vmem [shape: f32[128,32], index: 16, kind: input, shape index: {}]   ;;  %s4021_s17 = inlined_call_operand.vmem [shape: f32[1,32], index: 17, kind: input, shape index: {}]   ;;  %s4022_s18 = inlined_call_operand.hbm [shape: f32[2,8,32], index: 18, kind: output, shape index: {}]  }
   0x1   :  { %4029 = sst [smem:[#allocation14_spill]] %s4004_s0 }
   0x2   :  { %4030 = sst [smem:[#allocation15_spill]] %s4005_s1 }
   0x3   :  { %4031 = sst [smem:[#allocation16_spill]] %s4006_s2 }
   0x4   :  { %23 = vsyncpa [#allocation6], 0 }
   0x5   :  { %25 = vsyncpa [#allocation6 + $0x1], 0  ;;  %s3088_s27 = smov 0   ;;  %s3090_s28 = smov 0  }
   0x6   :  { %s3092_s29 = smov 0   ;;  %s3094_s30 = smov 0  }
   0x7 LB: > { %4032 = sst [smem:[#allocation8_spill]] %s2972_s27  ;;  %s3109_s0 = sadd.s32 4294967295, %s2984_s30   ;;  %s2984_s30 = sphi %s3094_s30, %s4046_s30   ;;  %s2980_s29 = sphi %s3092_s29, %s4051_s29   ;;  %s2976_s28 = sphi %s3090_s28, %s4050_s28   ;;  %s2972_s27 = sphi %s3088_s27, %s4049_s27  }
   0x8   : > { %4033 = sst [smem:[#allocation9_spill]] %s2980_s29  ;;  %s2543_s19 = sadd.s32 4294967294, %s2984_s30  }
   0x9   : > { %4034 = sst [smem:[#allocation10_spill]] %s2984_s30  ;;  %s3113_s1 = sadd.s32 1, %s2984_s30  }
   0xa   : > { %4035 = sst [smem:[#allocation11_spill]] %s3113_s1  ;;  %s421_s20 = sadd.s32 1, %s2980_s29 }
   0xb   : > { %s418_s21 = ssub.s32 %s2984_s30, %s3113_s1  ;;  %p431_p0 = scmp.ne.s32.totalorder %s2980_s29, %s2976_s28 }
   0xc   : > { %p419_p1 = scmp.eq.s32.totalorder %s418_s21, 0  ;;  %p432_p2 = scmp.eq.s32.totalorder %s3109_s0, 1 }
   0xd   : > { %p437_p3 = scmp.ne.s32.totalorder %s2976_s28, %s2972_s27  ;;  %p438_p4 = scmp.eq.s32.totalorder %s2543_s19, 1 }
   0xe   : > { %s3124_s22 = scalar_select %p419_p1, %s2980_s29, %s421_s20  }
   0xf   : > { %p3126_p5 = por %p432_p2, %p431_p0  ;;  %p3130_p6 = por %p438_p4, %p437_p3 }
  0x10   : > { %4036 = sst [smem:[#allocation12_spill]] %s3124_s22  ;;  %p2546_p7 = scmp.ge.s32.totalorder %s2984_s30, 1 }
  0x11   : > { %s4038_s23 = scalar_select %p3130_p6, 1, 0 }
  0x12   : > { %p514_p8 = scmp.lt.s32.totalorder %s2984_s30, 3 }
  0x13   : > { %4039 = sst [smem:[#allocation13_spill]] %s4038_s23 }
  0x14   : > { %p515_p9 = pnand %p2546_p7, %p514_p8 }
  0x15   : > { %p567_p10 = scmp.lt.s32.totalorder (!%p515_p9), %s3109_s0, 1  ;;  %vm572_vm0 = vcmask (!%p515_p9), 261120   ;;  %s4040_s20 = sld [smem:[#allocation14_spill]] (!%p515_p9)  ;;  %v604_v7 = vld [vmem:[%s4007_s3 + $0x8] sm:$0xff] (!%p515_p9)  ;;  %v606_v8 = vld [vmem:[%s4007_s3 + $0x18] sm:$0xff] (!%p515_p9)  ;;  %v603_v9 = vld [vmem:[%s4007_s3] sm:$0xff] (!%p515_p9) }
  0x16   : > { %518 = sbr.rel (%p515_p9) target bundleno = 2268 (0x8dc), region = 92  ;;  %v2690_v10 = vpack.c.bf16 (!%p515_p9), %v606_v8, %v604_v7  ;;  %v605_v11 = vld [vmem:[%s4007_s3 + $0x10] sm:$0xff] (!%p515_p9)  ;;  %v608_v12 = vld [vmem:[%s4007_s3 + $0x28] sm:$0xff] (!%p515_p9)  ;;  %v610_v13 = vld [vmem:[%s4007_s3 + $0x38] sm:$0xff] (!%p515_p9)  ;;  %v2986_v14 = vmov (!%p515_p9), 0.0   ;;  %s4041_s23 = sld [smem:[#allocation15_spill]] (!%p515_p9) }
  0x17   : > { %678 = vmatprep.mubr.f32.mxu1 (!%p515_p9), %v2986_v14  ;;  %v2692_v15 = vpack.c.bf16 (!%p515_p9), %v605_v11, %v603_v9  ;;  %v2694_v16 = vpack.c.bf16 (!%p515_p9), %v610_v13, %v608_v12  ;;  %v607_v17 = vld [vmem:[%s4007_s3 + $0x20] sm:$0xff] (!%p515_p9)  ;;  %v609_v18 = vld [vmem:[%s4007_s3 + $0x30] sm:$0xff] (!%p515_p9)  ;;  %v776_v29 = vld [vmem:[%s4011_s7 + $0x8] sm:$0xff] (!%p515_p9)  ;;  %vm704_vm1 = vcmask (!%p515_p9), 1040384   ;;  %vm708_vm2 = vcmask (!%p515_p9), 1046528   ;;  %s564_s29 = sand.u32 (!%p515_p9), 1, %s2976_s28  }
  0x18   : > { %2691 = vmatprep.subr.bf16.mxu1 (!%p515_p9), %v2690_v10  ;;  %v2696_v19 = vpack.c.bf16 (!%p515_p9), %v609_v18, %v607_v17  ;;  %v778_v30 = vld [vmem:[%s4011_s7 + $0x18] sm:$0xff] (!%p515_p9)  ;;  %v775_v32 = vld [vmem:[%s4011_s7] sm:$0xff] (!%p515_p9)  ;;  %v777_v33 = vld [vmem:[%s4011_s7 + $0x10] sm:$0xff] (!%p515_p9)  ;;  %vm726_vm3 = vcmask (!%p515_p9), 1041408   ;;  %vm730_vm4 = vcmask (!%p515_p9), 1045504   ;;  %vm748_vm5 = vcmask (!%p515_p9), 1042432  }
  0x19   : > { %2693 = vmatpush1.bf16.msra.mxu1 (!%p515_p9), %v2692_v15  ;;  %v2698_v31 = vpack.c.bf16 (!%p515_p9), %v778_v30, %v776_v29  ;;  %v2700_v34 = vpack.c.bf16 (!%p515_p9), %v777_v33, %v775_v32  ;;  %v780_v35 = vld [vmem:[%s4011_s7 + $0x28] sm:$0xff] (!%p515_p9)  ;;  %v782_v36 = vld [vmem:[%s4011_s7 + $0x38] sm:$0xff] (!%p515_p9)  ;;  %v779_v38 = vld [vmem:[%s4011_s7 + $0x20] sm:$0xff] (!%p515_p9)  ;;  %vm752_vm6 = vcmask (!%p515_p9), 1044480   ;;  %vm1050_vm7 = vcmask (!%p515_p9), 523264   ;;  %s2547_s26 = sshll.u32 (!%p515_p9), %s564_s29, 3 }
  0x1a   : > { %2695 = vmatprep.subr.bf16.mxu1 (!%p515_p9), %v2694_v16  ;;  %v2702_v37 = vpack.c.bf16 (!%p515_p9), %v782_v36, %v780_v35  ;;  %v781_v39 = vld [vmem:[%s4011_s7 + $0x30] sm:$0xff] (!%p515_p9)  ;;  %v784_v41 = vld [vmem:[%s4011_s7 + $0x48] sm:$0xff] (!%p515_p9)  ;;  %v786_v42 = vld [vmem:[%s4011_s7 + $0x58] sm:$0xff] (!%p515_p9)  ;;  %vm2098_vm8 = vcmask (!%p515_p9), 1041409   ;;  %vm2100_vm9 = vcmask (!%p515_p9), 1042434   ;;  %vm2102_vm10 = vcmask (!%p515_p9), 1043459  }
  0x1b   : > { %v2704_v40 = vpack.c.bf16 (!%p515_p9), %v781_v39, %v779_v38  ;;  %v2706_v43 = vpack.c.bf16 (!%p515_p9), %v786_v42, %v784_v41  ;;  %v783_v44 = vld [vmem:[%s4011_s7 + $0x40] sm:$0xff] (!%p515_p9)  ;;  %v785_v45 = vld [vmem:[%s4011_s7 + $0x50] sm:$0xff] (!%p515_p9)  ;;  %v788_v47 = vld [vmem:[%s4011_s7 + $0x68] sm:$0xff] (!%p515_p9)  ;;  %vm2104_vm11 = vcmask (!%p515_p9), 1044484   ;;  %vm2106_vm12 = vcmask (!%p515_p9), 1045509   ;;  %s2567_s30 = sshll.u32 (!%p515_p9), %s3109_s0, 7 }
  0x1c   : > { %v2549_v24 = vld [vmem:[%s4041_s23] ss:$0 sm:$0xff] (!%p515_p9)  ;;  %v2708_v46 = vpack.c.bf16 (!%p515_p9), %v785_v45, %v783_v44  ;;  %v790_v48 = vld [vmem:[%s4011_s7 + $0x78] sm:$0xff] (!%p515_p9)  ;;  %v789_v51 = vld [vmem:[%s4011_s7 + $0x70] sm:$0xff] (!%p515_p9)  ;;  %vm2108_vm13 = vcmask (!%p515_p9), 1046534   ;;  %vm2990_vm14 = vmmov (!%p515_p9), 0  }
  0x1d   : > { %s568_s24 = scalar_select %p567_p10, %s3109_s0, 1  ;;  %2697 = vmatpush1.bf16.msra.mxu1 %v2696_v19  ;;  %v2710_v49 = vpack.c.bf16 %v790_v48, %v788_v47  ;;  %v787_v50 = vld [vmem:[%s4011_s7 + $0x60] sm:$0xff]  ;;  %v792_v53 = vld [vmem:[%s4011_s7 + $0x88] sm:$0xff]  ;;  %v794_v54 = vld [vmem:[%s4011_s7 + $0x98] sm:$0xff]  ;;  %2641 = vmatprep.mubr.msk.f32.mxu0 %vm2990_vm14, %v2986_v14  ;;  %vm2110_vm15 = vcmask 1047559  }
  0x1e   : > { %2699 = vmatprep.subr.bf16.mxu1 %v2698_v31  ;;  %v2712_v52 = vpack.c.bf16 %v789_v51, %v787_v50  ;;  %v791_v55 = vld [vmem:[%s4011_s7 + $0x80] sm:$0xff]  ;;  %v2714_v56 = vpack.c.bf16 %v794_v54, %v792_v53  ;;  %v793_v57 = vld [vmem:[%s4011_s7 + $0x90] sm:$0xff]  ;;  %v796_v58 = vld [vmem:[%s4011_s7 + $0xa8] sm:$0xff]  ;;  %s566_s23 = scalar_lea.vmem [#allocation5], %s2547_s26  ;;  %s2471_s22 = scalar_lea.sflag [#allocation6], %s564_s29 }
  0x1f   : > { %s2548_s25 = sshll.u32 %s568_s24, 3  ;;  %v798_v59 = vld [vmem:[%s4011_s7 + $0xb8] sm:$0xff]  ;;  %v2716_v60 = vpack.c.bf16 %v793_v57, %v791_v55  ;;  %v795_v62 = vld [vmem:[%s4011_s7 + $0xa0] sm:$0xff]  ;;  %v797_v63 = vld [vmem:[%s4011_s7 + $0xb0] sm:$0xff]  ;;  %s2987_s24 = smov 64  }
  0x20   : > { %s3141_s21 = scalar_lea.vmem %s4040_s20, %s2548_s25  ;;  %s4042_s20 = sld [smem:[#allocation16_spill]]  ;;  %v2718_v61 = vpack.c.bf16 %v798_v59, %v796_v58  ;;  %v806_v7 = vld [vmem:[%s4011_s7 + $0xf8] sm:$0xff]  ;;  %v803_v10 = vld [vmem:[%s4011_s7 + $0xe0] sm:$0xff]  ;;  %v805_v11 = vld [vmem:[%s4011_s7 + $0xf0] sm:$0xff] }
  0x21   : > { %v571_v0 = vld [vmem:[%s3141_s21] sm:$0xff]  ;;  %v2728_v12 = vpack.c.bf16 %v805_v11, %v803_v10  ;;  %v897_v13 = vld [vmem:[%s4013_s9 + $0x10] sm:$0xff]  ;;  %v898_v15 = vld [vmem:[%s4013_s9 + $0x18] sm:$0xff]  ;;  %s2484_s25 = sshll.u32 %s566_s23, 4  ;;  %s3963_s25 = int_to_ptr.vmem [resolvable:$true] %s2484_s25 }
  0x22   : > { %v573_v1 = vsel %vm572_vm0, %v571_v0, 0.0  ;;  %v903_v16 = vmul.f32 1.442695, %v897_v13  ;;  %v905_v17 = vmul.f32 1.442695, %v898_v15  ;;  %s2922_s0 = scalar_lea.vmem %s3963_s25, 128 }
  0x23   : > { %574 = vadd.xlane.f32.xlu0 %v573_v1  ;;  %v802_v1 = vld [vmem:[%s4011_s7 + $0xd8] sm:$0xff]  ;;  %v2552_v30 = vld [vmem:[%s4010_s6] ss:$0 sm:$0xff]  ;;  %v2555_v45 = vld [vmem:[%s4008_s4 + $0x2] ss:$0 sm:$0xff]  ;;  %p2923_p11 = scmp.ne.s32.totalorder %s3963_s25, %s2922_s0 }
  0x24   : > { %v2557_v54 = vld [vmem:[%s4008_s4 + $0x3] ss:$0 sm:$0xff] }
  0x25   : > { %v2558_v58 = vld [vmem:[%s4009_s5 + $0x3] ss:$0 sm:$0xff]  ;;  %p2924_p12 = pnand %p2923_p11, %p3126_p5 }
  0x26   : > { %v2550_v26 = vld [vmem:[%s4042_s20] ss:$0 sm:$0xff]  ;;  %s3961_s20 = scalar_lea.hbm %s4022_s18, %s2567_s30 }
  0x27   : > { %p2925_p13 = pneg %p2924_p12 }
  0xb0   : > { %v575_v2 = vpop.xlane.xlu0 %574 }
  0xb1   : > { %v577_v3 = vmul.f32 0.03125, %v575_v2  ;;  %v2720_v2 = vpack.c.bf16 %v797_v63, %v795_v62 }
  0xb3   : > { %v578_v4 = vsub.f32 %v571_v0, %v577_v3  ;;  %v800_v0 = vld [vmem:[%s4011_s7 + $0xc8] sm:$0xff] }
  0xb4   : > { %v2722_v3 = vpack.c.bf16 %v802_v1, %v800_v0 }
  0xb5   : > { %v579_v5 = vmul.f32 %v578_v4, %v578_v4 }
  0xb7   : > { %v580_v6 = vsel %vm572_vm0, %v579_v5, 0.0  ;;  %v801_v5 = vld [vmem:[%s4011_s7 + $0xd0] sm:$0xff] }
  0xb8   : > { %581 = vadd.xlane.f32.xlu0 %v580_v6  ;;  %v804_v6 = vld [vmem:[%s4011_s7 + $0xe8] sm:$0xff] }
  0xb9   : > { %v2726_v9 = vpack.c.bf16 %v806_v7, %v804_v6  ;;  %v2559_v6 = vld [vmem:[%s4012_s8] ss:$0 sm:$0xff] }
 0x145   : > { %v582_v20 = vpop.xlane.xlu0 %581 }
 0x146   : > { %v583_v21 = vmul.f32 0.03125, %v582_v20 }
 0x148   : > { %v584_v22 = vadd.f32 1e-05, %v583_v21 }
 0x14a   : > { %2829 = vrsqrt.f32 %v584_v22  ;;  %v688_v22 = vlaneseq }
 0x14b   : > { %2831 = vpow2.f32 %v903_v16 }
 0x14c   : > { %2833 = vpow2.f32 %v905_v17 }
 0x154   : > { %v2830_v23 = vpop.eup %2829 }
 0x155   : > { %v586_v25 = vmul.f32 %v2830_v23, %v578_v4  ;;  %v799_v4 = vld [vmem:[%s4011_s7 + $0xc0] sm:$0xff]  ;;  %v2832_v18 = vpop.eup %2831  ;;  %v3283_v23 = vshrl.u32 %v688_v22, 7 }
 0x156   : > { %v2724_v8 = vpack.c.bf16 %v801_v5, %v799_v4  ;;  %v2834_v19 = vpop.eup %2833  ;;  %v909_v20 = vsub.f32 0.0, %v2832_v18 }
 0x157   : > { %v594_v27 = vmul.f32 %v2549_v24, %v586_v25  ;;  %v910_v21 = vsub.f32 0.0, %v2834_v19  ;;  %v685_v24 = vld [vmem:[%s4008_s4] sm:$0x1]  ;;  %v1185_v13 = vsub.s32 6, %v3283_v23  ;;  %v1152_v18 = vsub.s32 3, %v3283_v23 }
 0x158   : > { %1548 = vrot.lane.b32.xlu1 %v909_v20, %s2987_s24  ;;  %v686_v25 = vld [vmem:[%s4009_s5] sm:$0x1] }
 0x159   : > { %v602_v28 = vadd.f32 %v2550_v26, %v594_v27  ;;  %v687_v26 = vadd.f32 %v686_v25, %v685_v24  ;;  %v3292_v27 = vsub.s32 0, %v3283_v23  ;;  %v1174_v24 = vsub.s32 5, %v3283_v23 }
 0x15a   : > { %v1130_v25 = vsub.s32 1, %v3283_v23 }
 0x15b   : > { %2551 = vmatmul.mubr.msk.f32.vlgmr.msra.gmra.mrb[0].mxu1 %vm572_vm0, %v602_v28  ;;  %v691_v28 = vrot.slane %v687_v26, %v3292_v27 }
 0x15c   : > { %871 = vmatprep.mubr.f32.mxu1 %v2986_v14  ;;  %2701 = vmatpush1.bf16.msra.mxu1 %v2700_v34  ;;  %v2553_v34 = vld [vmem:[%s4008_s4 + $0x1] ss:$0 sm:$0xff] }
 0x15d   : > { %2703 = vmatprep.subr.bf16.mxu1 %v2702_v37  ;;  %1550 = vrot.lane.b32.xlu1 %v910_v21, %s2987_s24  ;;  %v1141_v21 = vsub.s32 2, %v3283_v23 }
 0x160   : > { %2705 = vmatpush1.bf16.msra.mxu1 %v2704_v40  ;;  %v2554_v40 = vld [vmem:[%s4009_s5 + $0x1] ss:$0 sm:$0xff] }
 0x161   : > { %2707 = vmatprep.subr.bf16.mxu1 %v2706_v43 }
 0x164   : > { %2709 = vmatpush1.bf16.msra.mxu1 %v2708_v46 }
 0x165   : > { %2711 = vmatprep.subr.bf16.mxu1 %v2710_v49  ;;  %v2556_v49 = vld [vmem:[%s4009_s5 + $0x2] ss:$0 sm:$0xff] }
 0x168   : > { %2713 = vmatpush1.bf16.msra.mxu1 %v2712_v52 }
 0x169   : > { %2715 = vmatprep.subr.bf16.mxu1 %v2714_v56 }
 0x16c   : > { %2717 = vmatpush1.bf16.msra.mxu1 %v2716_v60 }
 0x16d   : > { %2719 = vmatprep.subr.bf16.mxu1 %v2718_v61 }
 0x170   : > { %2721 = vmatpush1.bf16.msra.mxu1 %v2720_v2 }
 0x171   : > { %2723 = vmatprep.subr.bf16.mxu1 %v2722_v3 }
 0x174   : > { %2725 = vmatpush1.bf16.msra.mxu1 %v2724_v8  ;;  %v1196_v8 = vsub.s32 7, %v3283_v23 }
 0x175   : > { %2727 = vmatprep.subr.bf16.mxu1 %v2726_v9 }
 0x178   : > { %2729 = vmatpush1.bf16.msra.mxu1 %v2728_v12  ;;  %v1163_v12 = vsub.s32 4, %v3283_v23 }
 0x22e   : > { %v680_v29 = vpop.f32.mrb[0].mxu1 }
 0x22f   : > { %v692_v31 = vmul.f32 %v691_v28, %v680_v29  ;;  %v702_v32 = vrot.slane %v680_v29, 7  ;;  %v706_v33 = vrot.slane %v680_v29, 1  ;;  %v724_v35 = vrot.slane %v680_v29, 6  ;;  %v3301_v36 = vpop.f32.mrb[1].mxu1 }
 0x230   : > { %v728_v41 = vrot.slane %v680_v29, 2  ;;  %v746_v44 = vrot.slane %v680_v29, 5  ;;  %v750_v50 = vrot.slane %v680_v29, 3 }
 0x231   : > { %v700_v37 = vadd.f32 %v2552_v30, %v692_v31  ;;  %v705_v38 = vsel %vm704_vm1, 0.0, %v702_v32  ;;  %v709_v39 = vsel %vm708_vm2, %v706_v33, 0.0  ;;  %v727_v43 = vsel %vm726_vm3, 0.0, %v724_v35 }
 0x232   : > { %v715_v42 = vmul.f32 %v2553_v34, %v705_v38  ;;  %v722_v46 = vmul.f32 %v2554_v40, %v709_v39  ;;  %v731_v48 = vsel %vm730_vm4, %v728_v41, 0.0  ;;  %v737_v52 = vmul.f32 %v2555_v45, %v727_v43 }
 0x233   : > { %v749_v53 = vsel %vm748_vm5, 0.0, %v746_v44  ;;  %v744_v56 = vmul.f32 %v2556_v49, %v731_v48  ;;  %v753_v57 = vsel %vm752_vm6, %v750_v50, 0.0  ;;  %v2988_v33 = vmov 1966171168   ;;  %v895_v50 = vld [vmem:[%s4013_s9] sm:$0xff] }
 0x234   : > { %v716_v47 = vadd.f32 %v715_v42, %v700_v37  ;;  %v759_v60 = vmul.f32 %v2557_v54, %v749_v53  ;;  %v766_v62 = vmul.f32 %v2558_v58, %v753_v57  ;;  %v915_v34 = vunpack.c.l.s4 %v2988_v33  ;;  %v896_v42 = vld [vmem:[%s4013_s9 + $0x8] sm:$0xff]  ;;  %v3374_v53 = vpop.permute.xlu1 %1548 }
 0x236   : > { %v723_v51 = vadd.f32 %v722_v46, %v716_v47  ;;  %v916_v35 = vunpack.c.0.s8 %v915_v34 }
 0x238   : > { %v738_v55 = vadd.f32 %v737_v52, %v723_v51  ;;  %v919_v40 = vsub.s32 %v916_v35, %v3283_v23  ;;  %v901_v23 = vmul.f32 1.442695, %v896_v42 }
 0x23a   : > { %v745_v59 = vadd.f32 %v744_v56, %v738_v55  ;;  %v899_v55 = vmul.f32 1.442695, %v895_v50 }
 0x23c   : > { %v760_v61 = vadd.f32 %v759_v60, %v745_v59 }
 0x23e   : > { %v767_v63 = vadd.f32 %v766_v62, %v760_v61 }
 0x240   : > { %v768_v0 = vsub.f32 0.0, %v767_v63 }
 0x242   : > { %v769_v1 = vmul.f32 1.442695, %v768_v0  ;;  %v3384_v0 = vpop.permute.xlu1 %1550 }
 0x244   : > { %2835 = vpow2.f32 %v769_v1 }
 0x24e   : > { %v2836_v2 = vpop.eup %2835 }
 0x24f   : > { %v771_v3 = vadd.f32 1.0, %v2836_v2 }
 0x251   : > { %2837 = vrcp.f32 %v771_v3 }
 0x25b   : > { %v2838_v4 = vpop.eup %2837 }
 0x25c   : > { %v3318_v5 = vmul.f32 %v2838_v4, %v767_v63 }
 0x25e   : > { %872 = vmatmul.mubr.f32.vlgmr.msra.gmra.mrb[2].mxu1 %v3318_v5 }
 0x25f   : > { %2652 = vmatprep.mubr.msk.f32.mxu1 %vm2990_vm14, %v2986_v14 }
 0x331   : > { %v873_v7 = vpop.f32.mrb[2].mxu1 }
 0x332   : > { %v885_v9 = vadd.f32 %v2559_v6, %v873_v7  ;;  %v875_v10 = vpop.f32.mrb[3].mxu1 }
 0x333   : > { %v3327_v15 = vrot.slane %v875_v10, %v1196_v8  ;;  %v3332_v19 = vrot.slane %v875_v10, %v1163_v12  ;;  %v3334_v20 = vrot.slane %v875_v10, %v1185_v13  ;;  %v3339_v22 = vrot.slane %v875_v10, %v1152_v18 }
 0x334   : > { %v887_v11 = vand.u32 2147483647, %v885_v9  ;;  %v3345_v26 = vrot.slane %v875_v10, %v1141_v21  ;;  %v3347_v28 = vrot.slane %v875_v10, %v1174_v24  ;;  %v3351_v31 = vrot.slane %v875_v10, %v1130_v25 }
 0x335   : > { %1744 = vbcast.lane.b32.xlu1 %v3327_v15, 280  ;;  %1740 = vbcast.lane.b32.xlu0 %v3327_v15, 272  ;;  %v3356_v32 = vrot.slane %v875_v10, %v3292_v27  ;;  %v886_v38 = vmax.f32 %v885_v9, 0.0 }
 0x336   : > { %v888_v16 = vsub.f32 0.0, %v887_v11 }
 0x338   : > { %v889_v17 = vmul.f32 1.442695, %v888_v16 }
 0x339   : > { %1732 = vbcast.lane.b32.xlu1 %v3334_v20, 272  ;;  %1720 = vbcast.lane.b32.xlu0 %v3332_v19, 280 }
 0x33a   : > { %2839 = vpow2.f32 %v889_v17 }
 0x33d   : > { %1736 = vbcast.lane.b32.xlu1 %v3334_v20, 280  ;;  %1712 = vbcast.lane.b32.xlu0 %v3339_v22, 280 }
 0x341   : > { %1724 = vbcast.lane.b32.xlu1 %v3347_v28, 272  ;;  %1704 = vbcast.lane.b32.xlu0 %v3345_v26, 280 }
 0x344   : > { %v2840_v29 = vpop.eup %2839 }
 0x345   : > { %v891_v30 = vadd.f32 1.0, %v2840_v29  ;;  %1728 = vbcast.lane.b32.xlu1 %v3347_v28, 280  ;;  %1696 = vbcast.lane.b32.xlu0 %v3351_v31, 280 }
 0x347   : > { %2841 = vlog2.f32 %v891_v30 }
 0x348   : > { %2843 = vpow2.f32 %v901_v23 }
 0x349   : > { %1716 = vbcast.lane.b32.xlu1 %v3332_v19, 272  ;;  %1688 = vbcast.lane.b32.xlu0 %v3356_v32, 280  ;;  %2845 = vpow2.f32 %v899_v55 }
 0x34d   : > { %1708 = vbcast.lane.b32.xlu1 %v3339_v22, 272  ;;  %1203 = vbcast.lane.b32.xlu0 %v3327_v15, 264 }
 0x351   : > { %v2842_v37 = vpop.eup %2841  ;;  %1700 = vbcast.lane.b32.xlu1 %v3345_v26, 272  ;;  %1192 = vbcast.lane.b32.xlu0 %v3334_v20, 264 }
 0x352   : > { %v893_v39 = vmul.f32 0.6931472, %v2842_v37  ;;  %v2844_v13 = vpop.eup %2843 }
 0x353   : > { %v908_v33 = vsub.f32 0.0, %v2844_v13  ;;  %v2846_v37 = vpop.eup %2845 }
 0x354   : > { %v894_v41 = vadd.f32 %v893_v39, %v886_v38 }
 0x355   : > { %1692 = vbcast.lane.b32.xlu1 %v3351_v31, 272  ;;  %1126 = vbcast.lane.b32.xlu0 %v3356_v32, 264 }
 0x356   : > { %v911_v43 = vmul.f32 %v894_v41, %v3318_v5  ;;  %v913_v44 = vcombine.high %v894_v41, %v894_v41  ;;  %v920_v45 = vrot.slane %v894_v41, %v919_v40 }
 0x358   : > { %v927_v46 = vrot.slane %v913_v44, %v919_v40  ;;  %v1068_v47 = vcombine.high %v911_v43, %v911_v43  ;;  %v1075_v48 = vrot.slane %v911_v43, %v919_v40  ;;  %v936_v49 = vrot.slane %v920_v45, %v919_v40 }
 0x359   : > { %v928_v51 = vcombine.high %v920_v45, %v920_v45  ;;  %1181 = vbcast.lane.b32.xlu0 %v3347_v28, 264  ;;  %1684 = vbcast.lane.b32.xlu1 %v3356_v32, 272 }
 0x35a   : > { %v1082_v52 = vrot.slane %v1068_v47, %v919_v40  ;;  %v943_v54 = vrot.slane %v927_v46, %v919_v40  ;;  %v929_v56 = vcombine.high %v927_v46, %v927_v46  ;;  %v958_v57 = vcombine.high %v936_v49, %v936_v49 }
 0x35b   : > { %v950_v58 = vrot.slane %v928_v51, %v919_v40  ;;  %v965_v61 = vrot.slane %v936_v49, %v3292_v27  ;;  %v1083_v62 = vcombine.high %v1075_v48, %v1075_v48  ;;  %v3404_v11 = vrot.slane %v1075_v48, %v919_v40 }
 0x35c   : > { %v1084_v59 = vcombine.high %v1082_v52, %v1082_v52  ;;  %v959_v60 = vcombine.high %v943_v54, %v943_v54  ;;  %v3382_v63 = vrot.slane %v943_v54, %v3292_v27  ;;  %v957_v1 = vrot.slane %v929_v56, %v919_v40 }
 0x35d   : > { %1137 = vbcast.lane.b32.xlu0 %v3351_v31, 264  ;;  %1199 = vbcast.lane.b32.xlu1 %v3327_v15, 256  ;;  %v3387_v2 = vrot.slane %v958_v57, %v3292_v27  ;;  %v960_v3 = vcombine.high %v950_v58, %v950_v58  ;;  %v3390_v4 = vrot.slane %v950_v58, %v3292_v27  ;;  %v907_v46 = vsub.f32 0.0, %v2846_v37 }
 0x35e   : > { %v3393_v6 = vrot.slane %v1084_v59, %v919_v40  ;;  %v3395_v7 = vrot.slane %v1082_v52, %v919_v40  ;;  %v3398_v8 = vrot.slane %v959_v60, %v3292_v27  ;;  %v1555_v9 = vmul.f32 %v3384_v0, %v965_v61 }
 0x35f   : > { %v3402_v10 = vrot.slane %v1083_v62, %v919_v40  ;;  %v1563_v12 = vmul.f32 %v3384_v0, %v3382_v63  ;;  %v3409_v16 = vrot.slane %v957_v1, %v3292_v27  ;;  %v1559_v17 = vmul.f32 %v3384_v0, %v3387_v2 }
 0x360   : > { %v1557_v18 = vmul.f32 %v3384_v0, %v3390_v4  ;;  %v3417_v21 = vrot.slane %v960_v3, %v3292_v27  ;;  %v1567_v24 = vmul.f32 %v3384_v0, %v3398_v8  ;;  %v1572_v25 = vmul.f32 1.442695, %v1555_v9 }
 0x361   : > { %1170 = vbcast.lane.b32.xlu0 %v3332_v19, 264  ;;  %1188 = vbcast.lane.b32.xlu1 %v3334_v20, 256  ;;  %v1554_v29 = vmul.f32 %v3374_v53, %v965_v61  ;;  %v1588_v30 = vmul.f32 1.442695, %v1563_v12  ;;  %v1565_v34 = vmul.f32 %v3384_v0, %v3409_v16  ;;  %v1580_v35 = vmul.f32 1.442695, %v1559_v17 }
 0x362   : > { %v1562_v38 = vmul.f32 %v3374_v53, %v3382_v63  ;;  %v1576_v39 = vmul.f32 1.442695, %v1557_v18  ;;  %v1561_v40 = vmul.f32 %v3384_v0, %v3417_v21  ;;  %2847 = vpow2.f32 %v1572_v25 }
 0x363   : > { %v1596_v41 = vmul.f32 1.442695, %v1567_v24  ;;  %2849 = vpow2.f32 %v1588_v30  ;;  %v1570_v42 = vmul.f32 1.442695, %v1554_v29  ;;  %v1003_v43 = vmul.f32 %v965_v61, %v908_v33 }
 0x364   : > { %2851 = vpow2.f32 %v1580_v35  ;;  %v1592_v44 = vmul.f32 1.442695, %v1565_v34  ;;  %v1011_v45 = vmul.f32 %v3382_v63, %v908_v33  ;;  %v961_v47 = vcombine.high %v957_v1, %v957_v1 }
 0x365   : > { %1148 = vbcast.lane.b32.xlu0 %v3345_v26, 264  ;;  %1122 = vbcast.lane.b32.xlu1 %v3356_v32, 256  ;;  %2853 = vpow2.f32 %v1576_v39  ;;  %v1586_v23 = vmul.f32 1.442695, %v1562_v38  ;;  %v1007_v48 = vmul.f32 %v3387_v2, %v908_v33  ;;  %v1584_v49 = vmul.f32 1.442695, %v1561_v40 }
 0x366   : > { %2855 = vpow2.f32 %v1596_v41  ;;  %v1005_v50 = vmul.f32 %v3390_v4, %v908_v33  ;;  %v1020_v51 = vmul.f32 1.442695, %v1003_v43  ;;  %v1015_v52 = vmul.f32 %v3398_v8, %v908_v33 }
 0x367   : > { %2857 = vpow2.f32 %v1570_v42  ;;  %v1036_v54 = vmul.f32 1.442695, %v1011_v45  ;;  %v1002_v55 = vmul.f32 %v965_v61, %v907_v46  ;;  %v3438_v56 = vrot.slane %v961_v47, %v3292_v27 }
 0x368   : > { %2859 = vpow2.f32 %v1592_v44  ;;  %v1028_v57 = vmul.f32 1.442695, %v1007_v48  ;;  %v1013_v58 = vmul.f32 %v3409_v16, %v908_v33  ;;  %v1024_v59 = vmul.f32 1.442695, %v1005_v50 }
 0x369   : > { %1159 = vbcast.lane.b32.xlu0 %v3339_v22, 264  ;;  %1177 = vbcast.lane.b32.xlu1 %v3347_v28, 256  ;;  %2861 = vpow2.f32 %v1586_v23  ;;  %v1010_v60 = vmul.f32 %v3382_v63, %v907_v46  ;;  %v1044_v62 = vmul.f32 1.442695, %v1015_v52  ;;  %v1009_v1 = vmul.f32 %v3417_v21, %v908_v33 }
 0x36a   : > { %2863 = vpow2.f32 %v1584_v49  ;;  %v1018_v3 = vmul.f32 1.442695, %v1002_v55  ;;  %v1006_v9 = vmul.f32 %v3387_v2, %v907_v46  ;;  %v1040_v13 = vmul.f32 1.442695, %v1013_v58 }
 0x36b   : > { %2865 = vpow2.f32 %v1020_v51  ;;  %v1017_v17 = vmul.f32 %v3438_v56, %v908_v33  ;;  %v1034_v63 = vmul.f32 1.442695, %v1010_v60  ;;  %v1004_v24 = vmul.f32 %v3390_v4, %v907_v46 }
 0x36c   : > { %v2848_v61 = vpop.eup %2847  ;;  %2867 = vpow2.f32 %v1036_v54  ;;  %v1032_v29 = vmul.f32 1.442695, %v1009_v1  ;;  %v1014_v30 = vmul.f32 %v3398_v8, %v907_v46  ;;  %v1026_v35 = vmul.f32 1.442695, %v1006_v9 }
 0x36d   : > { %1944 = vbcast.lane.b32.xlu0 %v3356_v32, 312  ;;  %1133 = vbcast.lane.b32.xlu1 %v3351_v31, 256  ;;  %v2850_v12 = vpop.eup %2849  ;;  %2869 = vpow2.f32 %v1028_v57  ;;  %v1012_v37 = vmul.f32 %v3409_v16, %v907_v46  ;;  %v1048_v33 = vmul.f32 1.442695, %v1017_v17  ;;  %v1008_v39 = vmul.f32 %v3417_v21, %v907_v46 }
 0x36e   : > { %v2852_v18 = vpop.eup %2851  ;;  %2871 = vpow2.f32 %v1024_v59  ;;  %v1022_v41 = vmul.f32 1.442695, %v1004_v24  ;;  %v1016_v42 = vmul.f32 %v3438_v56, %v907_v46  ;;  %v1558_v44 = vmul.f32 %v3374_v53, %v3387_v2 }
 0x36f   : > { %v2854_v25 = vpop.eup %2853  ;;  %2873 = vpow2.f32 %v1044_v62  ;;  %v1042_v45 = vmul.f32 1.442695, %v1014_v30  ;;  %v1038_v23 = vmul.f32 1.442695, %v1012_v37  ;;  %v1030_v49 = vmul.f32 1.442695, %v1008_v39 }
 0x370   : > { %v2856_v34 = vpop.eup %2855  ;;  %2875 = vpow2.f32 %v1018_v3  ;;  %v1569_v46 = vmul.f32 %v3384_v0, %v3438_v56  ;;  %v1046_v2 = vmul.f32 1.442695, %v1016_v42  ;;  %v1556_v52 = vmul.f32 %v3374_v53, %v3390_v4 }
 0x371   : > { %1952 = vbcast.lane.b32.xlu0 %v3351_v31, 312  ;;  %1166 = vbcast.lane.b32.xlu1 %v3332_v19, 256  ;;  %v2858_v38 = vpop.eup %2857  ;;  %2877 = vpow2.f32 %v1040_v13  ;;  %v1578_v54 = vmul.f32 1.442695, %v1558_v44  ;;  %v1566_v59 = vmul.f32 %v3374_v53, %v3398_v8  ;;  %v1564_v8 = vmul.f32 %v3374_v53, %v3409_v16 }
 0x372   : > { %v2860_v40 = vpop.eup %2859  ;;  %2879 = vpow2.f32 %v1034_v63  ;;  %v1600_v58 = vmul.f32 1.442695, %v1569_v46  ;;  %v1574_v60 = vmul.f32 1.442695, %v1556_v52  ;;  %v1560_v16 = vmul.f32 %v3374_v53, %v3417_v21 }
 0x373   : > { %v2862_v43 = vpop.eup %2861  ;;  %2881 = vpow2.f32 %v1032_v29  ;;  %v1594_v9 = vmul.f32 1.442695, %v1566_v59  ;;  %v1590_v63 = vmul.f32 1.442695, %v1564_v8  ;;  %v1568_v29 = vmul.f32 %v3374_v53, %v3438_v56 }
 0x374   : > { %v3458_v47 = vpop.eup %2863  ;;  %2883 = vpow2.f32 %v1026_v35  ;;  %v1582_v21 = vmul.f32 1.442695, %v1560_v16  ;;  %v1116_v56 = vcombine.high %v3393_v6, %v3393_v6 }
 0x375   : > { %1620 = vrot.lane.b32.xlu0 %v2848_v61, %s2987_s24  ;;  %1144 = vbcast.lane.b32.xlu1 %v3345_v26, 256  ;;  %v2866_v48 = vpop.eup %2865  ;;  %2885 = vpow2.f32 %v1048_v33  ;;  %v1598_v35 = vmul.f32 1.442695, %v1568_v29  ;;  %v1208_v29 = vrot.slane %v3404_v11, %v3292_v27 }
 0x376   : > { %v2868_v50 = vpop.eup %2867  ;;  %1052 = vst.msk [vmem:[#allocation2 + $0x8] sm:$0xff] %vm1050_vm7, %v2866_v48  ;;  %2887 = vpow2.f32 %v1022_v41  ;;  %v3508_v39 = vrot.slane %v1116_v56, %v3292_v27 }
 0x377   : > { %v2870_v51 = vpop.eup %2869  ;;  %1060 = vst.msk [vmem:[#allocation2 + $0x48] sm:$0xff] %vm1050_vm7, %v2868_v50  ;;  %2889 = vpow2.f32 %v1042_v45 }
 0x378   : > { %v2872_v55 = vpop.eup %2871  ;;  %1056 = vst.msk [vmem:[#allocation2 + $0x28] sm:$0xff] %vm1050_vm7, %v2870_v51  ;;  %2891 = vpow2.f32 %v1038_v23 }
 0x379   : > { %1636 = vrot.lane.b32.xlu0 %v2850_v12, %s2987_s24  ;;  %1155 = vbcast.lane.b32.xlu1 %v3339_v22, 256  ;;  %v2874_v57 = vpop.eup %2873  ;;  %1054 = vst.msk [vmem:[#allocation2 + $0x18] sm:$0xff] %vm1050_vm7, %v2872_v55  ;;  %2893 = vpow2.f32 %v1030_v49 }
 0x37a   : > { %v2876_v0 = vpop.eup %2875  ;;  %1064 = vst.msk [vmem:[#allocation2 + $0x68] sm:$0xff] %vm1050_vm7, %v2874_v57  ;;  %2895 = vpow2.f32 %v1046_v2  ;;  %v3525_v2 = vrot.slane %v3393_v6, %v3292_v27 }
 0x37b   : > { %v2878_v4 = vpop.eup %2877  ;;  %2897 = vpow2.f32 %v1578_v54  ;;  %1051 = vst.msk [vmem:[#allocation2] sm:$0xff] %vm1050_vm7, %v2876_v0 }
 0x37c   : > { %v2880_v62 = vpop.eup %2879  ;;  %1062 = vst.msk [vmem:[#allocation2 + $0x58] sm:$0xff] %vm1050_vm7, %v2878_v4  ;;  %2899 = vpow2.f32 %v1600_v58  ;;  %v3532_v58 = vrot.slane %v3395_v7, %v3292_v27  ;;  %v1115_v4 = vcombine.high %v3402_v10, %v3402_v10 }
 0x37d   : > { %1628 = vrot.lane.b32.xlu0 %v2852_v18, %s2987_s24  ;;  %1940 = vbcast.lane.b32.xlu1 %v3356_v32, 304  ;;  %v2882_v1 = vpop.eup %2881  ;;  %1059 = vst.msk [vmem:[#allocation2 + $0x40] sm:$0xff] %vm1050_vm7, %v2880_v62  ;;  %2901 = vpow2.f32 %v1574_v60 }
 0x37e   : > { %v2884_v61 = vpop.eup %2883  ;;  %1058 = vst.msk [vmem:[#allocation2 + $0x38] sm:$0xff] %vm1050_vm7, %v2882_v1  ;;  %2903 = vpow2.f32 %v1594_v9  ;;  %v3540_v1 = vrot.slane %v1115_v4, %v3292_v27 }
 0x37f   : > { %v2886_v3 = vpop.eup %2885  ;;  %1055 = vst.msk [vmem:[#allocation2 + $0x20] sm:$0xff] %vm1050_vm7, %v2884_v61  ;;  %2905 = vpow2.f32 %v1590_v63  ;;  %v1113_v61 = vcombine.high %v3404_v11, %v3404_v11 }
 0x380   : > { %v2888_v12 = vpop.eup %2887  ;;  %1066 = vst.msk [vmem:[#allocation2 + $0x78] sm:$0xff] %vm1050_vm7, %v2886_v3  ;;  %2907 = vpow2.f32 %v1582_v21 }
 0x381   : > { %1624 = vrot.lane.b32.xlu0 %v2854_v25, %s2987_s24  ;;  %1948 = vbcast.lane.b32.xlu1 %v3351_v31, 304  ;;  %v2890_v13 = vpop.eup %2889  ;;  %1053 = vst.msk [vmem:[#allocation2 + $0x10] sm:$0xff] %vm1050_vm7, %v2888_v12  ;;  %2909 = vpow2.f32 %v1598_v35 }
 0x382   : > { %v2892_v17 = vpop.eup %2891  ;;  %1063 = vst.msk [vmem:[#allocation2 + $0x60] sm:$0xff] %vm1050_vm7, %v2890_v13  ;;  %v3550_v13 = vrot.slane %v1113_v61, %v3292_v27  ;;  %v1302_v61 = vld [vmem:[#allocation2 + $0x28] sm:$0xff] }
 0x383   : > { %v2894_v18 = vpop.eup %2893  ;;  %1061 = vst.msk [vmem:[#allocation2 + $0x50] sm:$0xff] %vm1050_vm7, %v2892_v17 }
 0x384   : > { %v2896_v24 = vpop.eup %2895  ;;  %1057 = vst.msk [vmem:[#allocation2 + $0x30] sm:$0xff] %vm1050_vm7, %v2894_v18 }
 0x385   : > { %1644 = vrot.lane.b32.xlu0 %v2856_v34, %s2987_s24  ;;  %1618 = vrot.lane.b32.xlu1 %v2858_v38, %s2987_s24  ;;  %v2898_v25 = vpop.eup %2897  ;;  %1065 = vst.msk [vmem:[#allocation2 + $0x70] sm:$0xff] %vm1050_vm7, %v2896_v24 }
 0x386   : > { %v2900_v30 = vpop.eup %2899 }
 0x387   : > { %v2902_v34 = vpop.eup %2901 }
 0x388   : > { %v2904_v37 = vpop.eup %2903 }
 0x389   : > { %1640 = vrot.lane.b32.xlu0 %v2860_v40, %s2987_s24  ;;  %1634 = vrot.lane.b32.xlu1 %v2862_v43, %s2987_s24  ;;  %v2906_v38 = vpop.eup %2905  ;;  %v1114_v40 = vcombine.high %v3395_v7, %v3395_v7 }
 0x38a   : > { %v2908_v33 = vpop.eup %2907 }
 0x38b   : > { %v2910_v53 = vpop.eup %2909  ;;  %v3517_v45 = vrot.slane %v1114_v40, %v3292_v27 }
 0x38d   : > { %1632 = vrot.lane.b32.xlu0 %v3458_v47, %s2987_s24  ;;  %1626 = vrot.lane.b32.xlu1 %v2898_v25, %s2987_s24  ;;  %v3560_v25 = vrot.slane %v3402_v10, %v3292_v27 }
 0x391   : > { %1648 = vrot.lane.b32.xlu0 %v2900_v30, %s2987_s24  ;;  %1622 = vrot.lane.b32.xlu1 %v2902_v34, %s2987_s24 }
 0x395   : > { %1642 = vrot.lane.b32.xlu1 %v2904_v37, %s2987_s24 }
 0x399   : > { %1638 = vrot.lane.b32.xlu1 %v2906_v38, %s2987_s24 }
 0x39d   : > { %1630 = vrot.lane.b32.xlu1 %v2908_v33, %s2987_s24 }
 0x3a1   : > { %1646 = vrot.lane.b32.xlu1 %v2910_v53, %s2987_s24  ;;  %v1278_v53 = vld [vmem:[#allocation2 + $0x8] sm:$0xff] }
 0x3a7   : > { %v1745_v41 = vpop.permute.xlu1 %1744  ;;  %v1741_v42 = vpop.permute.xlu0 %1740 }
 0x3a8   : > { %v1761_v43 = vmul.f32 %v1745_v41, %v3508_v39  ;;  %v1760_v44 = vmul.f32 %v1741_v42, %v3508_v39  ;;  %v1280_v42 = vmul.f32 0.0, %v1278_v53 }
 0x3aa   : > { %1808 = vrot.lane.b32.xlu0 %v1761_v43, %s2987_s24  ;;  %1806 = vrot.lane.b32.xlu1 %v1760_v44, %s2987_s24 }
 0x3ab   : > { %v1733_v47 = vpop.permute.xlu1 %1732  ;;  %v1721_v23 = vpop.permute.xlu0 %1720 }
 0x3ac   : > { %v1758_v48 = vmul.f32 %v1733_v47, %v3517_v45  ;;  %v1755_v60 = vmul.f32 %v1721_v23, %v3532_v58 }
 0x3ae   : > { %1802 = vrot.lane.b32.xlu1 %v1758_v48, %s2987_s24 }
 0x3af   : > { %v1737_v49 = vpop.permute.xlu1 %1736  ;;  %v1713_v50 = vpop.permute.xlu0 %1712 }
 0x3b0   : > { %v1759_v46 = vmul.f32 %v1737_v49, %v3517_v45  ;;  %v1753_v8 = vmul.f32 %v1713_v50, %v3540_v1 }
 0x3b2   : > { %1804 = vrot.lane.b32.xlu0 %v1759_v46, %s2987_s24  ;;  %v1289_v46 = vld [vmem:[#allocation2 + $0x18] sm:$0xff] }
 0x3b3   : > { %v1725_v51 = vpop.permute.xlu1 %1724  ;;  %v1705_v52 = vpop.permute.xlu0 %1704 }
 0x3b4   : > { %v1756_v54 = vmul.f32 %v1725_v51, %v3525_v2  ;;  %v1751_v16 = vmul.f32 %v1705_v52, %v3550_v13 }
 0x3b6   : > { %1798 = vrot.lane.b32.xlu1 %v1756_v54, %s2987_s24 }
 0x3b7   : > { %v1729_v55 = vpop.permute.xlu1 %1728  ;;  %v1697_v57 = vpop.permute.xlu0 %1696 }
 0x3b8   : > { %v1757_v0 = vmul.f32 %v1729_v55, %v3525_v2  ;;  %v1749_v34 = vmul.f32 %v1697_v57, %v3560_v25 }
 0x3ba   : > { %1800 = vrot.lane.b32.xlu0 %v1757_v0, %s2987_s24 }
 0x3bb   : > { %v1717_v6 = vpop.permute.xlu1 %1716  ;;  %v1689_v59 = vpop.permute.xlu0 %1688 }
 0x3bc   : > { %v1754_v62 = vmul.f32 %v1717_v6, %v3532_v58  ;;  %v1747_v11 = vmul.f32 %v1689_v59, %v1208_v29 }
 0x3be   : > { %1796 = vrot.lane.b32.xlu0 %v1755_v60, %s2987_s24  ;;  %1794 = vrot.lane.b32.xlu1 %v1754_v62, %s2987_s24  ;;  %v1277_v60 = vld [vmem:[#allocation2] sm:$0xff] }
 0x3bf   : > { %v1709_v7 = vpop.permute.xlu1 %1708  ;;  %v1204_v3 = vpop.permute.xlu0 %1203 }
 0x3c0   : > { %v1752_v9 = vmul.f32 %v1709_v7, %v3540_v1  ;;  %v1260_v12 = vmul.f32 %v3508_v39, %v1204_v3 }
 0x3c2   : > { %1276 = vst.msk [vmem:[#allocation3 + $0x78] sm:$0xff] %vm1050_vm7, %v1260_v12  ;;  %1792 = vrot.lane.b32.xlu0 %v1753_v8, %s2987_s24  ;;  %1790 = vrot.lane.b32.xlu1 %v1752_v9, %s2987_s24  ;;  %v1279_v9 = vmul.f32 0.0, %v1277_v60 }
 0x3c3   : > { %v1701_v17 = vpop.permute.xlu1 %1700  ;;  %v1193_v18 = vpop.permute.xlu0 %1192 }
 0x3c4   : > { %v1750_v63 = vmul.f32 %v1701_v17, %v3550_v13  ;;  %v1258_v24 = vmul.f32 %v3517_v45, %v1193_v18 }
 0x3c6   : > { %1274 = vst.msk [vmem:[#allocation3 + $0x68] sm:$0xff] %vm1050_vm7, %v1258_v24  ;;  %1788 = vrot.lane.b32.xlu0 %v1751_v16, %s2987_s24  ;;  %1786 = vrot.lane.b32.xlu1 %v1750_v63, %s2987_s24  ;;  %v1315_v16 = vld [vmem:[#allocation2 + $0x38] sm:$0xff] }
 0x3c7   : > { %v1693_v21 = vpop.permute.xlu1 %1692  ;;  %v1127_v30 = vpop.permute.xlu0 %1126 }
 0x3c8   : > { %v1748_v35 = vmul.f32 %v1693_v21, %v3560_v25  ;;  %v1246_v37 = vmul.f32 %v1208_v29, %v1127_v30 }
 0x3ca   : > { %1262 = vst.msk [vmem:[#allocation3 + $0x8] sm:$0xff] %vm1050_vm7, %v1246_v37  ;;  %1784 = vrot.lane.b32.xlu0 %v1749_v34, %s2987_s24  ;;  %1782 = vrot.lane.b32.xlu1 %v1748_v35, %s2987_s24  ;;  %v1328_v35 = vld [vmem:[#allocation2 + $0x48] sm:$0xff] }
 0x3cb   : > { %v1182_v27 = vpop.permute.xlu0 %1181  ;;  %v1685_v10 = vpop.permute.xlu1 %1684 }
 0x3cc   : > { %v1256_v38 = vmul.f32 %v3525_v2, %v1182_v27  ;;  %v1746_v33 = vmul.f32 %v1685_v10, %v1208_v29  ;;  %v1288_v27 = vld [vmem:[#allocation2 + $0x10] sm:$0xff] }
 0x3ce   : > { %1272 = vst.msk [vmem:[#allocation3 + $0x58] sm:$0xff] %vm1050_vm7, %v1256_v38  ;;  %1780 = vrot.lane.b32.xlu0 %v1747_v11, %s2987_s24  ;;  %1778 = vrot.lane.b32.xlu1 %v1746_v33, %s2987_s24 }
 0x3cf   : > { %v1138_v56 = vpop.permute.xlu0 %1137  ;;  %v1200_v41 = vpop.permute.xlu1 %1199 }
 0x3d0   : > { %v1248_v40 = vmul.f32 %v3560_v25, %v1138_v56  ;;  %v1259_v43 = vmul.f32 %v3508_v39, %v1200_v41 }
 0x3d1   : > { %v1282_v44 = vld [vmem:[#allocation3 + $0x8] sm:$0xff] }
 0x3d2   : > { %1264 = vst.msk [vmem:[#allocation3 + $0x18] sm:$0xff] %vm1050_vm7, %v1248_v40  ;;  %1960 = vbcast.lane.b32.xlu0 %v3345_v26, 312  ;;  %1956 = vbcast.lane.b32.xlu1 %v3345_v26, 304  ;;  %v1284_v47 = vadd.f32 %v1282_v44, %v1280_v42  ;;  %1275 = vst.msk [vmem:[#allocation3 + $0x70] sm:$0xff] %vm1050_vm7, %v1259_v43  ;;  %v1341_v40 = vld [vmem:[#allocation2 + $0x58] sm:$0xff] }
 0x3d3   : > { %v1171_v23 = vpop.permute.xlu0 %1170  ;;  %v1189_v49 = vpop.permute.xlu1 %1188 }
 0x3d4   : > { %v1254_v48 = vmul.f32 %v3532_v58, %v1171_v23  ;;  %1286 = vst.msk [vmem:[#allocation4 + $0x8] sm:$0xff] %vm1050_vm7, %v1284_v47  ;;  %v1257_v50 = vmul.f32 %v3517_v45, %v1189_v49  ;;  %v1291_v54 = vmul.f32 %v1289_v46, %v1284_v47  ;;  %v1354_v23 = vld [vmem:[#allocation2 + $0x68] sm:$0xff]  ;;  %v1301_v49 = vld [vmem:[#allocation2 + $0x20] sm:$0xff] }
 0x3d5   : > { %v1346_v44 = vld [vmem:[#allocation3 + $0x58] sm:$0xff] }
 0x3d6   : > { %1270 = vst.msk [vmem:[#allocation3 + $0x48] sm:$0xff] %vm1050_vm7, %v1254_v48  ;;  %1968 = vbcast.lane.b32.xlu0 %v3339_v22, 312  ;;  %1964 = vbcast.lane.b32.xlu1 %v3339_v22, 304  ;;  %1273 = vst.msk [vmem:[#allocation3 + $0x60] sm:$0xff] %vm1050_vm7, %v1257_v50  ;;  %v1359_v50 = vld [vmem:[#allocation3 + $0x68] sm:$0xff] }
 0x3d7   : > { %v1149_v39 = vpop.permute.xlu0 %1148  ;;  %v1123_v52 = vpop.permute.xlu1 %1122 }
 0x3d8   : > { %v1250_v51 = vmul.f32 %v3550_v13, %v1149_v39  ;;  %v1245_v55 = vmul.f32 %v1208_v29, %v1123_v52  ;;  %v1367_v52 = vld [vmem:[#allocation2 + $0x78] sm:$0xff] }
 0x3d9   : > { %v1294_v57 = vld [vmem:[#allocation3 + $0x18] sm:$0xff] }
 0x3da   : > { %1266 = vst.msk [vmem:[#allocation3 + $0x28] sm:$0xff] %vm1050_vm7, %v1250_v51  ;;  %1976 = vbcast.lane.b32.xlu0 %v3332_v19, 312  ;;  %1972 = vbcast.lane.b32.xlu1 %v3332_v19, 304  ;;  %v1296_v45 = vadd.f32 %v1294_v57, %v1291_v54  ;;  %1261 = vst.msk [vmem:[#allocation3] sm:$0xff] %vm1050_vm7, %v1245_v55  ;;  %v1314_v57 = vld [vmem:[#allocation2 + $0x30] sm:$0xff] }
 0x3db   : > { %v1160_v0 = vpop.permute.xlu0 %1159  ;;  %v1178_v6 = vpop.permute.xlu1 %1177 }
 0x3dc   : > { %v1252_v4 = vmul.f32 %v3540_v1, %v1160_v0  ;;  %1299 = vst.msk [vmem:[#allocation4 + $0x18] sm:$0xff] %vm1050_vm7, %v1296_v45  ;;  %v1255_v59 = vmul.f32 %v3525_v2, %v1178_v6  ;;  %v1304_v3 = vmul.f32 %v1302_v61, %v1296_v45  ;;  %v1372_v0 = vld [vmem:[#allocation3 + $0x78] sm:$0xff] }
 0x3dd   : > { %v1333_v11 = vld [vmem:[#allocation3 + $0x48] sm:$0xff] }
 0x3de   : > { %1268 = vst.msk [vmem:[#allocation3 + $0x38] sm:$0xff] %vm1050_vm7, %v1252_v4  ;;  %1984 = vbcast.lane.b32.xlu0 %v3347_v28, 312  ;;  %1980 = vbcast.lane.b32.xlu1 %v3347_v28, 304  ;;  %1271 = vst.msk [vmem:[#allocation3 + $0x50] sm:$0xff] %vm1050_vm7, %v1255_v59 }
 0x3df   : > { %v3601_v62 = vpop.permute.xlu0 %1944  ;;  %v1134_v7 = vpop.permute.xlu1 %1133 }
 0x3e0   : > { %v1247_v8 = vmul.f32 %v3560_v25, %v1134_v7  ;;  %v1327_v7 = vld [vmem:[#allocation2 + $0x40] sm:$0xff] }
 0x3e1   : > { %v1307_v12 = vld [vmem:[#allocation3 + $0x28] sm:$0xff]  ;;  %v1281_v17 = vld [vmem:[#allocation3] sm:$0xff] }
 0x3e2   : > { %1992 = vbcast.lane.b32.xlu0 %v3334_v20, 312  ;;  %1988 = vbcast.lane.b32.xlu1 %v3334_v20, 304  ;;  %v1309_v2 = vadd.f32 %v1307_v12, %v1304_v3  ;;  %1263 = vst.msk [vmem:[#allocation3 + $0x10] sm:$0xff] %vm1050_vm7, %v1247_v8  ;;  %v1283_v63 = vadd.f32 %v1281_v17, %v1279_v9 }
 0x3e3   : > { %v3607_v18 = vpop.permute.xlu0 %1952  ;;  %v1167_v24 = vpop.permute.xlu1 %1166 }
 0x3e4   : > { %1312 = vst.msk [vmem:[#allocation4 + $0x28] sm:$0xff] %vm1050_vm7, %v1309_v2  ;;  %v1317_v29 = vmul.f32 %v1315_v16, %v1309_v2  ;;  %v1253_v25 = vmul.f32 %v3532_v58, %v1167_v24  ;;  %1285 = vst.msk [vmem:[#allocation4] sm:$0xff] %vm1050_vm7, %v1283_v63  ;;  %v1290_v38 = vmul.f32 %v1288_v27, %v1283_v63  ;;  %v1340_v2 = vld [vmem:[#allocation2 + $0x50] sm:$0xff] }
 0x3e5   : > { %v1320_v21 = vld [vmem:[#allocation3 + $0x38] sm:$0xff]  ;;  %v1345_v16 = vld [vmem:[#allocation3 + $0x50] sm:$0xff] }
 0x3e6   : > { %2000 = vbcast.lane.b32.xlu0 %v3327_v15, 312  ;;  %1996 = vbcast.lane.b32.xlu1 %v3327_v15, 304  ;;  %v1322_v30 = vadd.f32 %v1320_v21, %v1317_v29  ;;  %1269 = vst.msk [vmem:[#allocation3 + $0x40] sm:$0xff] %vm1050_vm7, %v1253_v25  ;;  %v1353_v29 = vld [vmem:[#allocation2 + $0x60] sm:$0xff] }
 0x3e7   : > { %v1621_v34 = vpop.permute.xlu0 %1620  ;;  %v1145_v37 = vpop.permute.xlu1 %1144  ;;  %v1358_v21 = vld [vmem:[#allocation3 + $0x60] sm:$0xff] }
 0x3e8   : > { %1667 = vst.msk [vmem:[#allocation2 + $0x8] sm:$0xff] %vm1050_vm7, %v1621_v34  ;;  %1325 = vst.msk [vmem:[#allocation4 + $0x38] sm:$0xff] %vm1050_vm7, %v1322_v30  ;;  %v1330_v10 = vmul.f32 %v1328_v35, %v1322_v30  ;;  %v1249_v58 = vmul.f32 %v3550_v13, %v1145_v37  ;;  %v1366_v35 = vld [vmem:[#allocation2 + $0x70] sm:$0xff] }
 0x3e9   : > { %v1293_v33 = vld [vmem:[#allocation3 + $0x10] sm:$0xff] }
 0x3ea   : > { %1400 = vbcast.lane.b32.xlu0 %v3356_v32, 296  ;;  %1396 = vbcast.lane.b32.xlu1 %v3356_v32, 288  ;;  %v1335_v53 = vadd.f32 %v1333_v11, %v1330_v10  ;;  %1265 = vst.msk [vmem:[#allocation3 + $0x20] sm:$0xff] %vm1050_vm7, %v1249_v58  ;;  %v1295_v41 = vadd.f32 %v1293_v33, %v1290_v38  ;;  %v1371_v37 = vld [vmem:[#allocation3 + $0x70] sm:$0xff]  ;;  %v2150_v10 = vld [vmem:[%s4015_s11 + $0x8] sm:$0xff]  ;;  %v2989_v38 = vmov 0.0|0.0  }
 0x3eb   : > { %v1637_v56 = vpop.permute.xlu0 %1636  ;;  %v1156_v42 = vpop.permute.xlu1 %1155  ;;  %v2151_v58 = vld [vmem:[%s4015_s11 + $0x10] sm:$0xff]  ;;  %2730 = vmatprep.subr.bf16.mxu0 %v2989_v38  ;;  %2754 = vmatprep.subr.bf16.mxu1 %v2989_v38 }
 0x3ec   : > { %1675 = vst.msk [vmem:[#allocation2 + $0x48] sm:$0xff] %vm1050_vm7, %v1637_v56  ;;  %1338 = vst.msk [vmem:[#allocation4 + $0x48] sm:$0xff] %vm1050_vm7, %v1335_v53  ;;  %v1343_v43 = vmul.f32 %v1341_v40, %v1335_v53  ;;  %v1251_v13 = vmul.f32 %v3540_v1, %v1156_v42  ;;  %v1303_v39 = vmul.f32 %v1301_v49, %v1295_v41  ;;  %v2153_v40 = vld [vmem:[%s4015_s11 + $0x20] sm:$0xff]  ;;  %v2158_v49 = vld [vmem:[%s4015_s11 + $0x48] sm:$0xff] }
 0x3ed   : > { %1298 = vst.msk [vmem:[#allocation4 + $0x10] sm:$0xff] %vm1050_vm7, %v1295_v41  ;;  %v2154_v41 = vld [vmem:[%s4015_s11 + $0x28] sm:$0xff] }
 0x3ee   : > { %1408 = vbcast.lane.b32.xlu0 %v3351_v31, 296  ;;  %1404 = vbcast.lane.b32.xlu1 %v3351_v31, 288  ;;  %v1348_v32 = vadd.f32 %v1346_v44, %v1343_v43  ;;  %1267 = vst.msk [vmem:[#allocation3 + $0x30] sm:$0xff] %vm1050_vm7, %v1251_v13  ;;  %v2737_v43 = vpack.c.bf16 %v2154_v41, %v2153_v40  ;;  %v2155_v13 = vld [vmem:[%s4015_s11 + $0x30] sm:$0xff]  ;;  %v2156_v44 = vld [vmem:[%s4015_s11 + $0x38] sm:$0xff] }
 0x3ef   : > { %v1629_v47 = vpop.permute.xlu0 %1628  ;;  %v3629_v48 = vpop.permute.xlu1 %1940 }
 0x3f0   : > { %1671 = vst.msk [vmem:[#allocation2 + $0x28] sm:$0xff] %vm1050_vm7, %v1629_v47  ;;  %1351 = vst.msk [vmem:[#allocation4 + $0x58] sm:$0xff] %vm1050_vm7, %v1348_v32  ;;  %v1356_v1 = vmul.f32 %v1354_v23, %v1348_v32  ;;  %v2740_v47 = vpack.c.bf16 %v2156_v44, %v2155_v13  ;;  %v2157_v23 = vld [vmem:[%s4015_s11 + $0x40] sm:$0xff] }
 0x3f1   : > { %v1306_v31 = vld [vmem:[#allocation3 + $0x20] sm:$0xff] }
 0x3f2   : > { %1416 = vbcast.lane.b32.xlu0 %v3345_v26, 296  ;;  %1412 = vbcast.lane.b32.xlu1 %v3345_v26, 288  ;;  %v1361_v46 = vadd.f32 %v1359_v50, %v1356_v1  ;;  %v1308_v54 = vadd.f32 %v1306_v31, %v1303_v39  ;;  %v2743_v50 = vpack.c.bf16 %v2158_v49, %v2157_v23  ;;  %v2159_v39 = vld [vmem:[%s4015_s11 + $0x50] sm:$0xff]  ;;  %v2160_v31 = vld [vmem:[%s4015_s11 + $0x58] sm:$0xff] }
 0x3f3   : > { %v1625_v51 = vpop.permute.xlu0 %1624  ;;  %v3635_v55 = vpop.permute.xlu1 %1948  ;;  %v1873_v41 = vld [vmem:[#allocation2 + $0x48] sm:$0xff] }
 0x3f4   : > { %1669 = vst.msk [vmem:[#allocation2 + $0x18] sm:$0xff] %vm1050_vm7, %v1625_v51  ;;  %1364 = vst.msk [vmem:[#allocation4 + $0x68] sm:$0xff] %vm1050_vm7, %v1361_v46  ;;  %v1369_v45 = vmul.f32 %v1367_v52, %v1361_v46  ;;  %v1316_v4 = vmul.f32 %v1314_v57, %v1308_v54  ;;  %v2746_v46 = vpack.c.bf16 %v2160_v31, %v2159_v39  ;;  %v2161_v51 = vld [vmem:[%s4015_s11 + $0x60] sm:$0xff]  ;;  %v2162_v52 = vld [vmem:[%s4015_s11 + $0x68] sm:$0xff] }
 0x3f5   : > { %1311 = vst.msk [vmem:[#allocation4 + $0x20] sm:$0xff] %vm1050_vm7, %v1308_v54  ;;  %v1319_v26 = vld [vmem:[#allocation3 + $0x30] sm:$0xff]  ;;  %v3748_v39 = vld [vmem:[#allocation4 + $0x48] sm:$0xff] }
 0x3f6   : > { %1424 = vbcast.lane.b32.xlu0 %v3339_v22, 296  ;;  %1420 = vbcast.lane.b32.xlu1 %v3339_v22, 288  ;;  %v1374_v6 = vadd.f32 %v1372_v0, %v1369_v45  ;;  %v1321_v60 = vadd.f32 %v1319_v26, %v1316_v4  ;;  %v1332_v22 = vld [vmem:[#allocation3 + $0x40] sm:$0xff]  ;;  %v2749_v45 = vpack.c.bf16 %v2162_v52, %v2161_v51 }
 0x3f7   : > { %v1645_v59 = vpop.permute.xlu0 %1644  ;;  %v1619_v61 = vpop.permute.xlu1 %1618 }
 0x3f8   : > { %1679 = vst.msk [vmem:[#allocation2 + $0x68] sm:$0xff] %vm1050_vm7, %v1645_v59  ;;  %1377 = vst.msk [vmem:[#allocation4 + $0x78] sm:$0xff] %vm1050_vm7, %v1374_v6  ;;  %v1329_v3 = vmul.f32 %v1327_v7, %v1321_v60 }
 0x3f9   : > { %1666 = vst.msk [vmem:[#allocation2] sm:$0xff] %vm1050_vm7, %v1619_v61  ;;  %1324 = vst.msk [vmem:[#allocation4 + $0x30] sm:$0xff] %vm1050_vm7, %v1321_v60 }
 0x3fa   : > { %1432 = vbcast.lane.b32.xlu0 %v3332_v19, 296  ;;  %1428 = vbcast.lane.b32.xlu1 %v3332_v19, 288  ;;  %v1334_v9 = vadd.f32 %v1332_v22, %v1329_v3 }
 0x3fb   : > { %v1641_v8 = vpop.permute.xlu0 %1640  ;;  %v1635_v12 = vpop.permute.xlu1 %1634 }
 0x3fc   : > { %1677 = vst.msk [vmem:[#allocation2 + $0x58] sm:$0xff] %vm1050_vm7, %v1641_v8  ;;  %1674 = vst.msk [vmem:[#allocation2 + $0x40] sm:$0xff] %vm1050_vm7, %v1635_v12  ;;  %v1342_v17 = vmul.f32 %v1340_v2, %v1334_v9 }
 0x3fd   : > { %1337 = vst.msk [vmem:[#allocation4 + $0x40] sm:$0xff] %vm1050_vm7, %v1334_v9 }
 0x3fe   : > { %1440 = vbcast.lane.b32.xlu0 %v3347_v28, 296  ;;  %1436 = vbcast.lane.b32.xlu1 %v3347_v28, 288  ;;  %v1347_v24 = vadd.f32 %v1345_v16, %v1342_v17 }
 0x3ff   : > { %v1633_v63 = vpop.permute.xlu0 %1632  ;;  %v1627_v19 = vpop.permute.xlu1 %1626  ;;  %v3722_v9 = vld [vmem:[#allocation4 + $0x78] sm:$0xff] }
 0x400   : > { %1673 = vst.msk [vmem:[#allocation2 + $0x38] sm:$0xff] %vm1050_vm7, %v1633_v63  ;;  %1670 = vst.msk [vmem:[#allocation2 + $0x20] sm:$0xff] %vm1050_vm7, %v1627_v19  ;;  %v1355_v25 = vmul.f32 %v1353_v29, %v1347_v24 }
 0x401   : > { %1350 = vst.msk [vmem:[#allocation4 + $0x50] sm:$0xff] %vm1050_vm7, %v1347_v24  ;;  %v1853_v24 = vld [vmem:[#allocation2 + $0x68] sm:$0xff] }
 0x402   : > { %1448 = vbcast.lane.b32.xlu0 %v3334_v20, 296  ;;  %1444 = vbcast.lane.b32.xlu1 %v3334_v20, 288  ;;  %v1360_v34 = vadd.f32 %v1358_v21, %v1355_v25  ;;  %v2149_v20 = vld [vmem:[%s4015_s11] sm:$0xff] }
 0x403   : > { %v1649_v30 = vpop.permute.xlu0 %1648  ;;  %v1623_v28 = vpop.permute.xlu1 %1622  ;;  %v2731_v33 = vpack.c.bf16 %v2150_v10, %v2149_v20 }
 0x404   : > { %1681 = vst.msk [vmem:[#allocation2 + $0x78] sm:$0xff] %vm1050_vm7, %v1649_v30  ;;  %1668 = vst.msk [vmem:[#allocation2 + $0x10] sm:$0xff] %vm1050_vm7, %v1623_v28  ;;  %v1368_v27 = vmul.f32 %v1366_v35, %v1360_v34  ;;  %v3733_v28 = vld [vmem:[#allocation4 + $0x68] sm:$0xff]  ;;  %v3750_v51 = vld [vmem:[#allocation4 + $0x40] sm:$0xff] }
 0x405   : > { %1363 = vst.msk [vmem:[#allocation4 + $0x60] sm:$0xff] %vm1050_vm7, %v1360_v34  ;;  %2732 = vmatpush3.bf16.msra.mxu0 %v2731_v33 }
 0x406   : > { %1456 = vbcast.lane.b32.xlu0 %v3327_v15, 296  ;;  %1452 = vbcast.lane.b32.xlu1 %v3327_v15, 288  ;;  %v1373_v11 = vadd.f32 %v1371_v37, %v1368_v27  ;;  %v2152_v15 = vld [vmem:[%s4015_s11 + $0x18] sm:$0xff] }
 0x407   : > { %v1643_v53 = vpop.permute.xlu1 %1642  ;;  %v2734_v56 = vpack.c.bf16 %v2152_v15, %v2151_v58  ;;  %2733 = vmatprep.subr.bf16.mxu0 %v2989_v38  ;;  %v1863_v58 = vld [vmem:[#allocation2 + $0x58] sm:$0xff] }
 0x408   : > { %1678 = vst.msk [vmem:[#allocation2 + $0x60] sm:$0xff] %vm1050_vm7, %v1643_v53  ;;  %1376 = vst.msk [vmem:[#allocation4 + $0x70] sm:$0xff] %vm1050_vm7, %v1373_v11  ;;  %v3738_v11 = vld [vmem:[#allocation4 + $0x50] sm:$0xff]  ;;  %v1883_v31 = vld [vmem:[#allocation2 + $0x38] sm:$0xff] }
 0x409   : > { %2735 = vmatpush3.bf16.msra.mxu0 %v2734_v56 }
 0x40a   : > { %2736 = vmatprep.subr.bf16.mxu0 %v2989_v38 }
 0x40b   : > { %v1639_v42 = vpop.permute.xlu1 %1638  ;;  %v1843_v0 = vld [vmem:[#allocation2 + $0x78] sm:$0xff] }
 0x40c   : > { %1676 = vst.msk [vmem:[#allocation2 + $0x50] sm:$0xff] %vm1050_vm7, %v1639_v42  ;;  %v1845_v6 = vmul.f32 0.0, %v1843_v0  ;;  %v3729_v19 = vld [vmem:[#allocation4 + $0x60] sm:$0xff] }
 0x40d   : > { %2738 = vmatpush3.bf16.msra.mxu0 %v2737_v43  ;;  %v1872_v42 = vld [vmem:[#allocation2 + $0x40] sm:$0xff]  ;;  %v3743_v43 = vld [vmem:[#allocation4 + $0x58] sm:$0xff] }
 0x40e   : > { %2739 = vmatprep.subr.bf16.mxu0 %v2989_v38 }
 0x40f   : > { %v1631_v32 = vpop.permute.xlu1 %1630  ;;  %v1852_v8 = vld [vmem:[#allocation2 + $0x60] sm:$0xff]  ;;  %v3724_v12 = vld [vmem:[#allocation4 + $0x70] sm:$0xff] }
 0x410   : > { %1672 = vst.msk [vmem:[#allocation2 + $0x30] sm:$0xff] %vm1050_vm7, %v1631_v32 }
 0x411   : > { %2741 = vmatpush3.bf16.msra.mxu0 %v2740_v47 }
 0x412   : > { %2742 = vmatprep.subr.bf16.mxu0 %v2989_v38 }
 0x413   : > { %v1647_v1 = vpop.permute.xlu1 %1646  ;;  %v1862_v34 = vld [vmem:[#allocation2 + $0x50] sm:$0xff] }
 0x414   : > { %1680 = vst.msk [vmem:[#allocation2 + $0x70] sm:$0xff] %vm1050_vm7, %v1647_v1 }
 0x415   : > { %2744 = vmatpush3.bf16.msra.mxu0 %v2743_v50 }
 0x416   : > { %2745 = vmatprep.subr.bf16.mxu0 %v2989_v38 }
 0x419   : > { %2747 = vmatpush3.bf16.msra.mxu0 %v2746_v46  ;;  %v1882_v46 = vld [vmem:[#allocation2 + $0x30] sm:$0xff] }
 0x41a   : > { %2748 = vmatprep.subr.bf16.mxu0 %v2989_v38 }
 0x41b   : > { %v1842_v4 = vld [vmem:[#allocation2 + $0x70] sm:$0xff] }
 0x41c   : > { %v1809_v54 = vpop.permute.xlu0 %1808  ;;  %v1807_v57 = vpop.permute.xlu1 %1806  ;;  %v1844_v59 = vmul.f32 0.0, %v1842_v4 }
 0x41d   : > { %1841 = vst.msk [vmem:[#allocation3 + $0x78] sm:$0xff] %vm1050_vm7, %v1809_v54  ;;  %1840 = vst.msk [vmem:[#allocation3 + $0x70] sm:$0xff] %vm1050_vm7, %v1807_v57  ;;  %2750 = vmatpush3.bf16.msra.mxu0 %v2749_v45 }
 0x41e   : > { %2751 = vmatprep.subr.bf16.mxu0 %v2989_v38 }
 0x420   : > { %v1803_v26 = vpop.permute.xlu1 %1802 }
 0x421   : > { %1838 = vst.msk [vmem:[#allocation3 + $0x60] sm:$0xff] %vm1050_vm7, %v1803_v26  ;;  %v3756_v26 = vld [vmem:[#allocation4 + $0x38] sm:$0xff] }
 0x424   : > { %v1847_v60 = vld [vmem:[#allocation3 + $0x78] sm:$0xff]  ;;  %v1846_v61 = vld [vmem:[#allocation3 + $0x70] sm:$0xff]  ;;  %v1805_v7 = vpop.permute.xlu0 %1804 }
 0x425   : > { %v1849_v3 = vadd.f32 %v1847_v60, %v1845_v6  ;;  %v1848_v22 = vadd.f32 %v1846_v61, %v1844_v59  ;;  %1839 = vst.msk [vmem:[#allocation3 + $0x68] sm:$0xff] %vm1050_vm7, %v1805_v7  ;;  %v1893_v60 = vld [vmem:[#allocation2 + $0x28] sm:$0xff]  ;;  %v3758_v61 = vld [vmem:[#allocation4 + $0x30] sm:$0xff]  ;;  %v1892_v7 = vld [vmem:[#allocation2 + $0x20] sm:$0xff] }
 0x427   : > { %v1854_v2 = vmul.f32 %v1852_v8, %v1848_v22  ;;  %1851 = vst.msk [vmem:[#allocation4 + $0x78] sm:$0xff] %vm1050_vm7, %v1849_v3  ;;  %1850 = vst.msk [vmem:[#allocation4 + $0x70] sm:$0xff] %vm1050_vm7, %v1848_v22  ;;  %v1855_v29 = vmul.f32 %v1853_v24, %v1849_v3 }
 0x428   : > { %v1856_v17 = vld [vmem:[#allocation3 + $0x60] sm:$0xff]  ;;  %v1799_v16 = vpop.permute.xlu1 %1798 }
 0x429   : > { %v1858_v63 = vadd.f32 %v1856_v17, %v1854_v2  ;;  %1836 = vst.msk [vmem:[#allocation3 + $0x50] sm:$0xff] %vm1050_vm7, %v1799_v16 }
 0x42b   : > { %1860 = vst.msk [vmem:[#allocation4 + $0x60] sm:$0xff] %vm1050_vm7, %v1858_v63  ;;  %v1864_v35 = vmul.f32 %v1862_v34, %v1858_v63  ;;  %v3762_v63 = vld [vmem:[#allocation4 + $0x28] sm:$0xff] }
 0x42c   : > { %v1857_v25 = vld [vmem:[#allocation3 + $0x68] sm:$0xff]  ;;  %v1801_v21 = vpop.permute.xlu0 %1800 }
 0x42d   : > { %v1859_v30 = vadd.f32 %v1857_v25, %v1855_v29  ;;  %1837 = vst.msk [vmem:[#allocation3 + $0x58] sm:$0xff] %vm1050_vm7, %v1801_v21  ;;  %v3766_v25 = vld [vmem:[#allocation4 + $0x20] sm:$0xff]  ;;  %v1903_v21 = vld [vmem:[#allocation2 + $0x18] sm:$0xff] }
 0x42f   : > { %1861 = vst.msk [vmem:[#allocation4 + $0x68] sm:$0xff] %vm1050_vm7, %v1859_v30  ;;  %v1865_v33 = vmul.f32 %v1863_v58, %v1859_v30  ;;  %v1902_v30 = vld [vmem:[#allocation2 + $0x10] sm:$0xff] }
 0x430   : > { %v1866_v37 = vld [vmem:[#allocation3 + $0x50] sm:$0xff]  ;;  %v1797_v27 = vpop.permute.xlu0 %1796  ;;  %v1795_v20 = vpop.permute.xlu1 %1794 }
 0x431   : > { %v1868_v10 = vadd.f32 %v1866_v37, %v1864_v35  ;;  %1835 = vst.msk [vmem:[#allocation3 + $0x48] sm:$0xff] %vm1050_vm7, %v1797_v27  ;;  %1834 = vst.msk [vmem:[#allocation3 + $0x40] sm:$0xff] %vm1050_vm7, %v1795_v20 }
 0x433   : > { %1870 = vst.msk [vmem:[#allocation4 + $0x50] sm:$0xff] %vm1050_vm7, %v1868_v10  ;;  %v1874_v44 = vmul.f32 %v1872_v42, %v1868_v10 }
 0x434   : > { %v1867_v15 = vld [vmem:[#allocation3 + $0x58] sm:$0xff]  ;;  %v1793_v53 = vpop.permute.xlu0 %1792  ;;  %v1791_v56 = vpop.permute.xlu1 %1790 }
 0x435   : > { %v1869_v40 = vadd.f32 %v1867_v15, %v1865_v33  ;;  %1833 = vst.msk [vmem:[#allocation3 + $0x38] sm:$0xff] %vm1050_vm7, %v1793_v53  ;;  %1832 = vst.msk [vmem:[#allocation3 + $0x30] sm:$0xff] %vm1050_vm7, %v1791_v56  ;;  %v3770_v15 = vld [vmem:[#allocation4 + $0x18] sm:$0xff]  ;;  %v1913_v53 = vld [vmem:[#allocation2 + $0x8] sm:$0xff] }
 0x436   : > { %v1912_v56 = vld [vmem:[#allocation2] sm:$0xff] }
 0x437   : > { %v1875_v13 = vmul.f32 %v1873_v41, %v1869_v40  ;;  %1871 = vst.msk [vmem:[#allocation4 + $0x58] sm:$0xff] %vm1050_vm7, %v1869_v40  ;;  %v3772_v40 = vld [vmem:[#allocation4 + $0x10] sm:$0xff] }
 0x438   : > { %v1877_v32 = vld [vmem:[#allocation3 + $0x48] sm:$0xff]  ;;  %v1876_v47 = vld [vmem:[#allocation3 + $0x40] sm:$0xff]  ;;  %v1789_v23 = vpop.permute.xlu0 %1788  ;;  %v1787_v49 = vpop.permute.xlu1 %1786 }
 0x439   : > { %v1879_v1 = vadd.f32 %v1877_v32, %v1875_v13  ;;  %v1878_v50 = vadd.f32 %v1876_v47, %v1874_v44  ;;  %1831 = vst.msk [vmem:[#allocation3 + $0x28] sm:$0xff] %vm1050_vm7, %v1789_v23  ;;  %1830 = vst.msk [vmem:[#allocation3 + $0x20] sm:$0xff] %vm1050_vm7, %v1787_v49 }
 0x43b   : > { %1881 = vst.msk [vmem:[#allocation4 + $0x48] sm:$0xff] %vm1050_vm7, %v1879_v1  ;;  %v1885_v52 = vmul.f32 %v1883_v31, %v1879_v1  ;;  %1880 = vst.msk [vmem:[#allocation4 + $0x40] sm:$0xff] %vm1050_vm7, %v1878_v50  ;;  %v1884_v54 = vmul.f32 %v1882_v46, %v1878_v50  ;;  %v3776_v31 = vld [vmem:[#allocation4 + $0x8] sm:$0xff] }
 0x43c   : > { %v1785_v57 = vpop.permute.xlu0 %1784  ;;  %v1783_v45 = vpop.permute.xlu1 %1782  ;;  %v1887_v0 = vld [vmem:[#allocation3 + $0x38] sm:$0xff]  ;;  %v1886_v4 = vld [vmem:[#allocation3 + $0x30] sm:$0xff] }
 0x43d   : > { %1829 = vst.msk [vmem:[#allocation3 + $0x18] sm:$0xff] %vm1050_vm7, %v1785_v57  ;;  %1828 = vst.msk [vmem:[#allocation3 + $0x10] sm:$0xff] %vm1050_vm7, %v1783_v45  ;;  %v1889_v6 = vadd.f32 %v1887_v0, %v1885_v52  ;;  %v1888_v59 = vadd.f32 %v1886_v4, %v1884_v54  ;;  %v3778_v45 = vld [vmem:[#allocation4] sm:$0xff] }
 0x43f   : > { %1891 = vst.msk [vmem:[#allocation4 + $0x38] sm:$0xff] %vm1050_vm7, %v1889_v6  ;;  %v1895_v3 = vmul.f32 %v1893_v60, %v1889_v6  ;;  %1890 = vst.msk [vmem:[#allocation4 + $0x30] sm:$0xff] %vm1050_vm7, %v1888_v59  ;;  %v1894_v22 = vmul.f32 %v1892_v7, %v1888_v59 }
 0x440   : > { %v1897_v8 = vld [vmem:[#allocation3 + $0x28] sm:$0xff]  ;;  %v1781_v2 = vpop.permute.xlu0 %1780  ;;  %v1896_v17 = vld [vmem:[#allocation3 + $0x20] sm:$0xff]  ;;  %v1779_v16 = vpop.permute.xlu1 %1778 }
 0x441   : > { %v1899_v24 = vadd.f32 %v1897_v8, %v1895_v3  ;;  %1827 = vst.msk [vmem:[#allocation3 + $0x8] sm:$0xff] %vm1050_vm7, %v1781_v2  ;;  %v1898_v29 = vadd.f32 %v1896_v17, %v1894_v22  ;;  %1826 = vst.msk [vmem:[#allocation3] sm:$0xff] %vm1050_vm7, %v1779_v16 }
 0x442   : > { %v1931_v7 = vld [vmem:[#allocation4 + $0x48] sm:$0xff]  ;;  %v1930_v22 = vld [vmem:[#allocation4 + $0x40] sm:$0xff] }
 0x443   : > { %1901 = vst.msk [vmem:[#allocation4 + $0x28] sm:$0xff] %vm1050_vm7, %v1899_v24  ;;  %1900 = vst.msk [vmem:[#allocation4 + $0x20] sm:$0xff] %vm1050_vm7, %v1898_v29  ;;  %v1905_v34 = vmul.f32 %v1903_v21, %v1899_v24  ;;  %v1904_v35 = vmul.f32 %v1902_v30, %v1898_v29 }
 0x444   : > { %v1961_v37 = vpop.permute.xlu0 %1960  ;;  %v1957_v27 = vpop.permute.xlu1 %1956  ;;  %v1907_v20 = vld [vmem:[#allocation3 + $0x18] sm:$0xff]  ;;  %v1906_v10 = vld [vmem:[#allocation3 + $0x10] sm:$0xff] }
 0x445   : > { %v1909_v58 = vadd.f32 %v1907_v20, %v1905_v34  ;;  %v1908_v33 = vadd.f32 %v1906_v10, %v1904_v35 }
 0x446   : > { %v1929_v41 = vld [vmem:[#allocation4 + $0x38] sm:$0xff]  ;;  %v1928_v32 = vld [vmem:[#allocation4 + $0x30] sm:$0xff] }
 0x447   : > { %v1915_v42 = vmul.f32 %v1913_v53, %v1909_v58  ;;  %v1914_v13 = vmul.f32 %v1912_v56, %v1908_v33  ;;  %1911 = vst.msk [vmem:[#allocation4 + $0x18] sm:$0xff] %vm1050_vm7, %v1909_v58  ;;  %1910 = vst.msk [vmem:[#allocation4 + $0x10] sm:$0xff] %vm1050_vm7, %v1908_v33  ;;  %v1933_v53 = vld [vmem:[#allocation4 + $0x58] sm:$0xff] }
 0x448   : > { %v1969_v44 = vpop.permute.xlu0 %1968  ;;  %v1965_v47 = vpop.permute.xlu1 %1964  ;;  %v1917_v23 = vld [vmem:[#allocation3 + $0x8] sm:$0xff]  ;;  %v1916_v49 = vld [vmem:[#allocation3] sm:$0xff] }
 0x449   : > { %v2009_v1 = vmul.f32 %v1969_v44, %v1929_v41  ;;  %v2008_v50 = vmul.f32 %v1965_v47, %v1928_v32  ;;  %v1919_v46 = vadd.f32 %v1917_v23, %v1915_v42  ;;  %v1918_v52 = vadd.f32 %v1916_v49, %v1914_v13  ;;  %v1932_v41 = vld [vmem:[#allocation4 + $0x50] sm:$0xff] }
 0x44a   : > { %v1927_v54 = vld [vmem:[#allocation4 + $0x28] sm:$0xff]  ;;  %v1926_v57 = vld [vmem:[#allocation4 + $0x20] sm:$0xff] }
 0x44b   : > { %v2007_v0 = vmul.f32 %v1961_v37, %v1927_v54  ;;  %v2006_v4 = vmul.f32 %v1957_v27, %v1926_v57  ;;  %v2046_v6 = vsel %vm1050_vm7, %v2009_v1, 0.0  ;;  %v2045_v59 = vsel %vm1050_vm7, %v2008_v50, 0.0  ;;  %1921 = vst.msk [vmem:[#allocation4 + $0x8] sm:$0xff] %vm1050_vm7, %v1919_v46  ;;  %1920 = vst.msk [vmem:[#allocation4] sm:$0xff] %vm1050_vm7, %v1918_v52 }
 0x44c   : > { %v2047_v60 = vadd.f32 %v2046_v6, %v2045_v59  ;;  %v1977_v3 = vpop.permute.xlu0 %1976  ;;  %v1973_v8 = vpop.permute.xlu1 %1972 }
 0x44d   : > { %v2037_v2 = vsel %vm1050_vm7, %v2007_v0, 0.0  ;;  %v2036_v17 = vsel %vm1050_vm7, %v2006_v4, 0.0  ;;  %v2011_v16 = vmul.f32 %v1977_v3, %v1931_v7  ;;  %v2010_v24 = vmul.f32 %v1973_v8, %v1930_v22  ;;  %v1934_v3 = vld [vmem:[#allocation4 + $0x60] sm:$0xff] }
 0x44e   : > { %v2038_v29 = vadd.f32 %v2037_v2, %v2036_v17  ;;  %v2048_v21 = vrot.slane %v2047_v60, 4  ;;  %v1924_v30 = vld [vmem:[#allocation4 + $0x10] sm:$0xff]  ;;  %v1925_v34 = vld [vmem:[#allocation4 + $0x18] sm:$0xff] }
 0x44f   : > { %v2055_v35 = vsel %vm1050_vm7, %v2011_v16, 0.0  ;;  %v2054_v37 = vsel %vm1050_vm7, %v2010_v24, 0.0  ;;  %v2004_v27 = vmul.f32 %v3635_v55, %v1924_v30  ;;  %v2005_v20 = vmul.f32 %v3607_v18, %v1925_v34 }
 0x450   : > { %v2039_v10 = vrot.slane %v2038_v29, 4  ;;  %v2049_v58 = vadd.f32 %v2048_v21, %v2047_v60  ;;  %v2056_v33 = vadd.f32 %v2055_v35, %v2054_v37  ;;  %v1985_v56 = vpop.permute.xlu0 %1984  ;;  %v1981_v42 = vpop.permute.xlu1 %1980  ;;  %v1935_v60 = vld [vmem:[#allocation4 + $0x68] sm:$0xff] }
 0x451   : > { %v2013_v13 = vmul.f32 %v1985_v56, %v1933_v53  ;;  %v2012_v44 = vmul.f32 %v1981_v42, %v1932_v41  ;;  %v2027_v32 = vsel %vm1050_vm7, %v2004_v27, 0.0  ;;  %v2028_v47 = vsel %vm1050_vm7, %v2005_v20, 0.0  ;;  %v1937_v27 = vld [vmem:[#allocation4 + $0x78] sm:$0xff] }
 0x452   : > { %v2040_v23 = vadd.f32 %v2039_v10, %v2038_v29  ;;  %v2050_v49 = vrot.slane %v2049_v58, 2  ;;  %v2057_v1 = vrot.slane %v2056_v33, 4  ;;  %v1922_v50 = vld [vmem:[#allocation4] sm:$0xff]  ;;  %v1923_v55 = vld [vmem:[#allocation4 + $0x8] sm:$0xff]  ;;  %v2029_v46 = vadd.f32 %v2028_v47, %v2027_v32  ;;  %v1936_v10 = vld [vmem:[#allocation4 + $0x70] sm:$0xff] }
 0x453   : > { %v2064_v18 = vsel %vm1050_vm7, %v2013_v13, 0.0  ;;  %v2063_v52 = vsel %vm1050_vm7, %v2012_v44, 0.0  ;;  %v2002_v54 = vmul.f32 %v3629_v48, %v1922_v50  ;;  %v2003_v57 = vmul.f32 %v3601_v62, %v1923_v55 }
 0x454   : > { %v2041_v0 = vrot.slane %v2040_v23, 2  ;;  %v2051_v4 = vadd.f32 %v2050_v49, %v2049_v58  ;;  %v2058_v6 = vadd.f32 %v2057_v1, %v2056_v33  ;;  %v2065_v59 = vadd.f32 %v2064_v18, %v2063_v52  ;;  %v1993_v7 = vpop.permute.xlu0 %1992  ;;  %v1989_v22 = vpop.permute.xlu1 %1988 }
 0x455   : > { %v2015_v8 = vmul.f32 %v1993_v7, %v1935_v60  ;;  %v2014_v2 = vmul.f32 %v1989_v22, %v1934_v3  ;;  %v2018_v17 = vsel %vm1050_vm7, %v2002_v54, 0.0  ;;  %v2019_v16 = vsel %vm1050_vm7, %v2003_v57, 0.0 }
 0x456   : > { %v2042_v24 = vadd.f32 %v2041_v0, %v2040_v23  ;;  %v2059_v29 = vrot.slane %v2058_v6, 2  ;;  %v2066_v21 = vrot.slane %v2065_v59, 4  ;;  %v2020_v30 = vadd.f32 %v2019_v16, %v2018_v17 }
 0x457   : > { %v2073_v48 = vsel %vm1050_vm7, %v2015_v8, 0.0  ;;  %v2072_v62 = vsel %vm1050_vm7, %v2014_v2, 0.0  ;;  %v2030_v34 = vrot.slane %v2029_v46, 4  ;;  %v2052_v35 = vrot.slane %v2051_v4, 1 }
 0x458   : > { %v2067_v37 = vadd.f32 %v2066_v21, %v2065_v59  ;;  %v2001_v20 = vpop.permute.xlu0 %2000  ;;  %v1997_v58 = vpop.permute.xlu1 %1996  ;;  %v2074_v33 = vadd.f32 %v2073_v48, %v2072_v62  ;;  %v2021_v41 = vrot.slane %v2020_v30, 4  ;;  %v2043_v42 = vrot.slane %v2042_v24, 1 }
 0x459   : > { %v2017_v53 = vmul.f32 %v2001_v20, %v1937_v27  ;;  %v2016_v56 = vmul.f32 %v1997_v58, %v1936_v10  ;;  %v2060_v13 = vadd.f32 %v2059_v29, %v2058_v6  ;;  %v2031_v32 = vadd.f32 %v2030_v34, %v2029_v46  ;;  %v2163_v20 = vld [vmem:[%s4015_s11 + $0x70] sm:$0xff]  ;;  %v2164_v10 = vld [vmem:[%s4015_s11 + $0x78] sm:$0xff] }
 0x45a   : > { %v2068_v44 = vrot.slane %v2067_v37, 2  ;;  %v2075_v47 = vrot.slane %v2074_v33, 4  ;;  %v2022_v1 = vadd.f32 %v2021_v41, %v2020_v30  ;;  %v3802_v50 = vadd.f32 %v2052_v35, %v2051_v4 }
 0x45b   : > { %v2082_v23 = vsel %vm1050_vm7, %v2017_v53, 0.0  ;;  %v2081_v49 = vsel %vm1050_vm7, %v2016_v56, 0.0  ;;  %v2032_v57 = vrot.slane %v2031_v32, 2  ;;  %v2044_v60 = vadd.f32 %v2043_v42, %v2042_v24 }
 0x45c   : > { %v2069_v55 = vadd.f32 %v2068_v44, %v2067_v37  ;;  %v2083_v18 = vadd.f32 %v2082_v23, %v2081_v49  ;;  %v1401_v52 = vpop.permute.xlu0 %1400  ;;  %v1397_v54 = vpop.permute.xlu1 %1396  ;;  %v2076_v0 = vadd.f32 %v2075_v47, %v2074_v33  ;;  %v2023_v59 = vrot.slane %v2022_v1, 2 }
 0x45d   : > { %v1459_v6 = vmul.f32 %v1401_v52, %v3776_v31  ;;  %v1458_v46 = vmul.f32 %v1397_v54, %v3778_v45  ;;  %v2061_v7 = vrot.slane %v2060_v13, 1  ;;  %v2033_v22 = vadd.f32 %v2032_v57, %v2031_v32 }
 0x45e   : > { %v2084_v3 = vrot.slane %v2083_v18, 4  ;;  %v2077_v8 = vrot.slane %v2076_v0, 2  ;;  %v2024_v17 = vadd.f32 %v2023_v59, %v2022_v1  ;;  %v2070_v16 = vrot.slane %v2069_v55, 1 }
 0x45f   : > { %v1475_v4 = vsel %vm1050_vm7, %v1459_v6, 0.0  ;;  %v1474_v2 = vsel %vm1050_vm7, %v1458_v46, 0.0  ;;  %v2034_v62 = vrot.slane %v2033_v22, 1  ;;  %v2752_v32 = vpack.c.bf16 %v2164_v10, %v2163_v20 }
 0x460   : > { %v2085_v29 = vadd.f32 %v2084_v3, %v2083_v18  ;;  %v1476_v21 = vadd.f32 %v1475_v4, %v1474_v2  ;;  %v1409_v48 = vpop.permute.xlu0 %1408  ;;  %v1405_v31 = vpop.permute.xlu1 %1404  ;;  %v2078_v45 = vadd.f32 %v2077_v8, %v2076_v0  ;;  %v2025_v34 = vrot.slane %v2024_v17, 1 }
 0x461   : > { %v1461_v24 = vmul.f32 %v1409_v48, %v3770_v15  ;;  %v1460_v30 = vmul.f32 %v1405_v31, %v3772_v40  ;;  %v2035_v27 = vadd.f32 %v2034_v62, %v2033_v22  ;;  %v2062_v47 = vadd.f32 %v2061_v7, %v2060_v13  ;;  %2753 = vmatpush3.bf16.msra.mxu0 %v2752_v32 }
 0x462   : > { %v2086_v35 = vrot.slane %v2085_v29, 2  ;;  %v1477_v37 = vrot.slane %v1476_v21, 4  ;;  %v2079_v58 = vrot.slane %v2078_v45, 1  ;;  %v2026_v15 = vadd.f32 %v2025_v34, %v2024_v17  ;;  %2760 = vmatprep.subr.bf16.mxu0 %v2989_v38 }
 0x463   : > { %v1484_v33 = vsel %vm1050_vm7, %v1461_v24, 0.0  ;;  %v1483_v53 = vsel %vm1050_vm7, %v1460_v30, 0.0  ;;  %v2071_v0 = vadd.f32 %v2070_v16, %v2069_v55 }
 0x464   : > { %v2087_v40 = vadd.f32 %v2086_v35, %v2085_v29  ;;  %v1478_v56 = vadd.f32 %v1477_v37, %v1476_v21  ;;  %v1485_v41 = vadd.f32 %v1484_v33, %v1483_v53  ;;  %v1417_v42 = vpop.permute.xlu0 %1416  ;;  %v1413_v44 = vpop.permute.xlu1 %1412  ;;  %v2121_v1 = vsel %vm2098_vm8, %v2035_v27, %v2026_v15 }
 0x465   : > { %v1463_v23 = vmul.f32 %v1417_v42, %v3762_v63  ;;  %v1462_v49 = vmul.f32 %v1413_v44, %v3766_v25  ;;  %v2122_v57 = vsel %vm2100_vm9, %v2044_v60, %v2121_v1  ;;  %v2080_v63 = vadd.f32 %v2079_v58, %v2078_v45 }
 0x466   : > { %v2088_v18 = vrot.slane %v2087_v40, 1  ;;  %v1479_v52 = vrot.slane %v1478_v56, 2  ;;  %v1486_v54 = vrot.slane %v1485_v41, 4  ;;  %v2123_v13 = vsel %vm2102_vm10, %v3802_v50, %v2122_v57 }
 0x467   : > { %v1493_v6 = vsel %vm1050_vm7, %v1463_v23, 0.0  ;;  %v1492_v46 = vsel %vm1050_vm7, %v1462_v49, 0.0  ;;  %v2124_v4 = vsel %vm2104_vm11, %v2062_v47, %v2123_v13 }
 0x468   : > { %v1480_v25 = vadd.f32 %v1479_v52, %v1478_v56  ;;  %v1487_v59 = vadd.f32 %v1486_v54, %v1485_v41  ;;  %v1494_v7 = vadd.f32 %v1493_v6, %v1492_v46  ;;  %v1425_v3 = vpop.permute.xlu0 %1424  ;;  %v1421_v22 = vpop.permute.xlu1 %1420  ;;  %v2089_v55 = vadd.f32 %v2088_v18, %v2087_v40 }
 0x469   : > { %v1465_v8 = vmul.f32 %v1425_v3, %v3756_v26  ;;  %v1464_v60 = vmul.f32 %v1421_v22, %v3758_v61  ;;  %v2125_v50 = vsel %vm2106_vm12, %v2071_v0, %v2124_v4 }
 0x46a   : > { %v1488_v2 = vrot.slane %v1487_v59, 2  ;;  %v1495_v17 = vrot.slane %v1494_v7, 4  ;;  %v1481_v16 = vrot.slane %v1480_v25, 1  ;;  %v2126_v48 = vsel %vm2108_vm13, %v2080_v63, %v2125_v50 }
 0x46b   : > { %v1502_v29 = vsel %vm1050_vm7, %v1465_v8, 0.0  ;;  %v1501_v21 = vsel %vm1050_vm7, %v1464_v60, 0.0  ;;  %v2127_v24 = vsel %vm2110_vm15, %v2089_v55, %v2126_v48 }
 0x46c   : > { %v1489_v31 = vadd.f32 %v1488_v2, %v1487_v59  ;;  %v1496_v62 = vadd.f32 %v1495_v17, %v1494_v7  ;;  %v1503_v26 = vadd.f32 %v1502_v29, %v1501_v21  ;;  %v1433_v45 = vpop.permute.xlu0 %1432  ;;  %v1429_v61 = vpop.permute.xlu1 %1428  ;;  %2128 = vrot.lane.b32.xlu1 %v2127_v24, %s2987_s24  ;;  %v1482_v20 = vadd.f32 %v1481_v16, %v1480_v25 }
 0x46d   : > { %v1467_v30 = vmul.f32 %v1433_v45, %v3748_v39  ;;  %v1466_v34 = vmul.f32 %v1429_v61, %v3750_v51 }
 0x46e   : > { %v1490_v35 = vrot.slane %v1489_v31, 1  ;;  %v1497_v37 = vrot.slane %v1496_v62, 2  ;;  %v1504_v27 = vrot.slane %v1503_v26, 4 }
 0x46f   : > { %v1511_v10 = vsel %vm1050_vm7, %v1467_v30, 0.0  ;;  %v1510_v58 = vsel %vm1050_vm7, %v1466_v34, 0.0 }
 0x470   : > { %v1491_v33 = vadd.f32 %v1490_v35, %v1489_v31  ;;  %v1498_v53 = vadd.f32 %v1497_v37, %v1496_v62  ;;  %v1505_v15 = vadd.f32 %v1504_v27, %v1503_v26  ;;  %v1512_v40 = vadd.f32 %v1511_v10, %v1510_v58  ;;  %v1441_v56 = vpop.permute.xlu0 %1440  ;;  %v1437_v41 = vpop.permute.xlu1 %1436 }
 0x471   : > { %v1469_v39 = vmul.f32 %v1441_v56, %v3743_v43  ;;  %v1468_v51 = vmul.f32 %v1437_v41, %v3738_v11 }
 0x472   : > { %v2099_v42 = vsel %vm2098_vm8, %v1491_v33, %v1482_v20  ;;  %v1499_v44 = vrot.slane %v1498_v53, 1  ;;  %v1506_v32 = vrot.slane %v1505_v15, 2  ;;  %v1513_v47 = vrot.slane %v1512_v40, 4 }
 0x473   : > { %v1520_v23 = vsel %vm1050_vm7, %v1469_v39, 0.0  ;;  %v1519_v49 = vsel %vm1050_vm7, %v1468_v51, 0.0  ;;  %v2560_v39 = vld [vmem:[%s4014_s10] ss:$0 sm:$0xff] }
 0x474   : > { %v1500_v1 = vadd.f32 %v1499_v44, %v1498_v53  ;;  %v1507_v18 = vadd.f32 %v1506_v32, %v1505_v15  ;;  %v1514_v52 = vadd.f32 %v1513_v47, %v1512_v40  ;;  %v1521_v54 = vadd.f32 %v1520_v23, %v1519_v49  ;;  %v1449_v57 = vpop.permute.xlu0 %1448  ;;  %v1445_v0 = vpop.permute.xlu1 %1444 }
 0x475   : > { %v1471_v6 = vmul.f32 %v1449_v57, %v3733_v28  ;;  %v1470_v43 = vmul.f32 %v1445_v0, %v3729_v19  ;;  %v2141_v15 = vsub.f32 0.0, %v3301_v36 }
 0x476   : > { %v2101_v11 = vsel %vm2100_vm9, %v1500_v1, %v2099_v42  ;;  %v1508_v46 = vrot.slane %v1507_v18, 1  ;;  %v1515_v13 = vrot.slane %v1514_v52, 2  ;;  %v1522_v63 = vrot.slane %v1521_v54, 4 }
 0x477   : > { %v1529_v25 = vsel %vm1050_vm7, %v1471_v6, 0.0  ;;  %v1528_v59 = vsel %vm1050_vm7, %v1470_v43, 0.0  ;;  %v2142_v40 = vmul.f32 1.442695, %v2141_v15  ;;  %v2139_v42 = vmul.f32 %v2560_v39, %v3318_v5  ;;  %v2266_v43 = vld [vmem:[%s4018_s14 + $0x10] sm:$0xff] }
 0x478   : > { %v1509_v7 = vadd.f32 %v1508_v46, %v1507_v18  ;;  %v1516_v3 = vadd.f32 %v1515_v13, %v1514_v52  ;;  %v1523_v22 = vadd.f32 %v1522_v63, %v1521_v54  ;;  %v1530_v8 = vadd.f32 %v1529_v25, %v1528_v59  ;;  %v1457_v60 = vpop.permute.xlu0 %1456  ;;  %v1453_v55 = vpop.permute.xlu1 %1452  ;;  %v2267_v46 = vld [vmem:[%s4018_s14 + $0x18] sm:$0xff] }
 0x479   : > { %v1473_v4 = vmul.f32 %v1457_v60, %v3722_v9  ;;  %v1472_v28 = vmul.f32 %v1453_v55, %v3724_v12  ;;  %2911 = vpow2.f32 %v2142_v40  ;;  %v2758_v13 = vpack.c.bf16 %v2267_v46, %v2266_v43 }
 0x47a   : > { %v1517_v19 = vrot.slane %v1516_v3, 1  ;;  %v1524_v2 = vrot.slane %v1523_v22, 2  ;;  %v1531_v17 = vrot.slane %v1530_v8, 4  ;;  %v2103_v50 = vsel %vm2102_vm10, %v1509_v7, %v2101_v11 }
 0x47b   : > { %v1538_v16 = vsel %vm1050_vm7, %v1473_v4, 0.0  ;;  %v1537_v29 = vsel %vm1050_vm7, %v1472_v28, 0.0  ;;  %v2375_v4 = vld [vmem:[%s4020_s16] sm:$0xff]  ;;  %v2376_v28 = vld [vmem:[%s4020_s16 + $0x8] sm:$0xff] }
 0x47c   : > { %v1518_v21 = vadd.f32 %v1517_v19, %v1516_v3  ;;  %v1525_v48 = vadd.f32 %v1524_v2, %v1523_v22  ;;  %v1532_v31 = vadd.f32 %v1531_v17, %v1530_v8  ;;  %v1539_v62 = vadd.f32 %v1538_v16, %v1537_v29  ;;  %v2561_v3 = vld [vmem:[%s4016_s12] ss:$0 sm:$0xff]  ;;  %v2377_v2 = vld [vmem:[%s4020_s16 + $0x10] sm:$0xff]  ;;  %v2378_v17 = vld [vmem:[%s4020_s16 + $0x18] sm:$0xff] }
 0x47d   : > { %v2562_v8 = vld [vmem:[%s4017_s13] ss:$0 sm:$0xff]  ;;  %v2761_v19 = vpack.c.bf16 %v2376_v28, %v2375_v4  ;;  %v2380_v29 = vld [vmem:[%s4020_s16 + $0x28] sm:$0xff] }
 0x47e   : > { %v1526_v26 = vrot.slane %v1525_v48, 1  ;;  %v1533_v45 = vrot.slane %v1532_v31, 2  ;;  %v1540_v61 = vrot.slane %v1539_v62, 4  ;;  %v2105_v9 = vsel %vm2104_vm11, %v1518_v21, %v2103_v50  ;;  %v2379_v16 = vld [vmem:[%s4020_s16 + $0x20] sm:$0xff] }
 0x47f   : > { %v2764_v50 = vpack.c.bf16 %v2378_v17, %v2377_v2  ;;  %v2767_v21 = vpack.c.bf16 %v2380_v29, %v2379_v16 }
 0x480   : > { %v1527_v24 = vadd.f32 %v1526_v26, %v1525_v48  ;;  %v1534_v12 = vadd.f32 %v1533_v45, %v1532_v31  ;;  %v1541_v30 = vadd.f32 %v1540_v61, %v1539_v62  ;;  %v2381_v48 = vld [vmem:[%s4020_s16 + $0x30] sm:$0xff]  ;;  %v2382_v31 = vld [vmem:[%s4020_s16 + $0x38] sm:$0xff]  ;;  %v2383_v26 = vld [vmem:[%s4020_s16 + $0x40] sm:$0xff] }
 0x481   : > { %v2770_v62 = vpack.c.bf16 %v2382_v31, %v2381_v48  ;;  %v2384_v45 = vld [vmem:[%s4020_s16 + $0x48] sm:$0xff] }
 0x482   : > { %v1535_v34 = vrot.slane %v1534_v12, 1  ;;  %v1542_v35 = vrot.slane %v1541_v30, 2  ;;  %v2107_v37 = vsel %vm2106_vm12, %v1527_v24, %v2105_v9  ;;  %v2773_v61 = vpack.c.bf16 %v2384_v45, %v2383_v26  ;;  %v2385_v9 = vld [vmem:[%s4020_s16 + $0x50] sm:$0xff]  ;;  %v2386_v24 = vld [vmem:[%s4020_s16 + $0x58] sm:$0xff] }
 0x483   : > { %v2912_v56 = vpop.eup %2911 }
 0x484   : > { %v1536_v27 = vadd.f32 %v1535_v34, %v1534_v12  ;;  %v1543_v20 = vadd.f32 %v1542_v35, %v1541_v30  ;;  %v2144_v41 = vadd.f32 1.0, %v2912_v56  ;;  %v2776_v12 = vpack.c.bf16 %v2386_v24, %v2385_v9  ;;  %v2387_v30 = vld [vmem:[%s4020_s16 + $0x60] sm:$0xff]  ;;  %v2388_v34 = vld [vmem:[%s4020_s16 + $0x68] sm:$0xff] }
 0x485   : > { %v2779_v35 = vpack.c.bf16 %v2388_v34, %v2387_v30 }
 0x486   : > { %v1544_v10 = vrot.slane %v1543_v20, 1  ;;  %v2109_v58 = vsel %vm2108_vm13, %v1536_v27, %v2107_v37  ;;  %2913 = vrcp.f32 %v2144_v41  ;;  %v2389_v37 = vld [vmem:[%s4020_s16 + $0x70] sm:$0xff]  ;;  %v2390_v27 = vld [vmem:[%s4020_s16 + $0x78] sm:$0xff] }
 0x488   : > { %v1545_v33 = vadd.f32 %v1544_v10, %v1543_v20  ;;  %v2782_v20 = vpack.c.bf16 %v2390_v27, %v2389_v37  ;;  %v2563_v10 = vld [vmem:[%s4019_s15] ss:$0 sm:$0xff] }
 0x48a   : > { %v2111_v53 = vsel %vm2110_vm15, %v1545_v33, %v2109_v58 }
 0x490   : > { %v2914_v51 = vpop.eup %2913 }
 0x491   : > { %v2147_v47 = vmul.f32 %v2914_v51, %v3301_v36  ;;  %v2264_v36 = vld [vmem:[%s4018_s14] sm:$0xff] }
 0x4de   : > { %v2129_v44 = vpop.permute.xlu1 %2128 }
 0x4df   : > { %v2131_v32 = vsel %vm1050_vm7, %v2111_v53, %v2129_v44 }
 0x4e0   : > { %v2140_v23 = vadd.f32 %v2139_v42, %v2131_v32 }
 0x4e2   : > { %v2148_v49 = vmul.f32 %v2147_v47, %v2140_v23 }
 0x4e4   : > { %2642 = vmatmul.mubr.f32.vlgmr.msra.gmra.mrb[0].mxu0 %v2148_v49 }
 0x4e5   : > { %2687 = vmatprep.mubr.msk.f32.mxu0 %vm2990_vm14, %v2986_v14  ;;  %v2265_v14 = vld [vmem:[%s4018_s14 + $0x8] sm:$0xff]  ;;  %2762 = vmatpush3.bf16.msra.mxu0 %v2761_v19 }
 0x4e6   : > { %v2755_v11 = vpack.c.bf16 %v2265_v14, %v2264_v36  ;;  %2763 = vmatprep.subr.bf16.mxu0 %v2989_v38 }
 0x4e8   : > { %2756 = vmatpush3.bf16.msra.mxu1 %v2755_v11 }
 0x4e9   : > { %2757 = vmatprep.subr.bf16.mxu1 %v2989_v38  ;;  %2765 = vmatpush3.bf16.msra.mxu0 %v2764_v50 }
 0x4ea   : > { %2766 = vmatprep.subr.bf16.mxu0 %v2989_v38 }
 0x4ec   : > { %2759 = vmatpush3.bf16.msra.mxu1 %v2758_v13  ;;  %v2565_v13 = vld [vmem:[%s4021_s17] ss:$0 sm:$0xff] }
 0x4ed   : > { %2768 = vmatpush3.bf16.msra.mxu0 %v2767_v21 }
 0x4ee   : > { %2769 = vmatprep.subr.bf16.mxu0 %v2989_v38 }
 0x4f1   : > { %2771 = vmatpush3.bf16.msra.mxu0 %v2770_v62 }
 0x4f2   : > { %2772 = vmatprep.subr.bf16.mxu0 %v2989_v38 }
 0x4f5   : > { %2774 = vmatpush3.bf16.msra.mxu0 %v2773_v61 }
 0x4f6   : > { %2775 = vmatprep.subr.bf16.mxu0 %v2989_v38 }
 0x4f9   : > { %2777 = vmatpush3.bf16.msra.mxu0 %v2776_v12 }
 0x4fa   : > { %2778 = vmatprep.subr.bf16.mxu0 %v2989_v38 }
 0x4fd   : > { %2780 = vmatpush3.bf16.msra.mxu0 %v2779_v35 }
 0x4fe   : > { %2781 = vmatprep.subr.bf16.mxu0 %v2989_v38 }
 0x501   : > { %2783 = vmatpush3.bf16.msra.mxu0 %v2782_v20 }
 0x5b7   : > { %v2231_v1 = vpop.f32.mrb[0].mxu0 }
 0x5b8   : > { %v2643_v18 = vpop.f32.mrb[1].mxu0  ;;  %v2235_v52 = vsel %vm572_vm0, %v2231_v1, 0.0 }
 0x5b9   : > { %2236 = vadd.xlane.f32.xlu0 %v2235_v52 }
 0x646   : > { %v2237_v54 = vpop.xlane.xlu0 %2236 }
 0x647   : > { %v2238_v57 = vmul.f32 0.03125, %v2237_v54 }
 0x649   : > { %v2239_v0 = vsub.f32 %v2231_v1, %v2238_v57 }
 0x64b   : > { %v2240_v5 = vmul.f32 %v2239_v0, %v2239_v0 }
 0x64d   : > { %v2241_v6 = vsel %vm572_vm0, %v2240_v5, 0.0 }
 0x64e   : > { %2242 = vadd.xlane.f32.xlu1 %v2241_v6  ;;  %v2991_v6 = vmov -1.0  }
 0x6db   : > { %v2243_v63 = vpop.xlane.xlu1 %2242 }
 0x6dc   : > { %v2244_v25 = vmul.f32 0.03125, %v2243_v63 }
 0x6de   : > { %v2245_v59 = vadd.f32 1e-05, %v2244_v25 }
 0x6e0   : > { %2915 = vrsqrt.f32 %v2245_v59 }
 0x6ea   : > { %v2916_v7 = vpop.eup %2915 }
 0x6eb   : > { %v2247_v22 = vmul.f32 %v2916_v7, %v2239_v0  ;;  %v2921_v7 = vld [vmem:[%s3141_s21] sm:$0xff]  ;;  %s2992_s21 = smov [#allocation5]  }
 0x6ec   : > { %s2926_s26 = sshll.u32 %s2992_s21, 4  ;;  %s2927_s26 = int_to_ptr.vmem [resolvable:$false] %s2926_s26 }
 0x6ed   : > { %v2255_v60 = vmul.f32 %v2561_v3, %v2247_v22  ;;  %s2928_s1 = scalar_lea.vmem %s2927_s26, 256  ;;  %p2929_p0 = scmp.lt.s32.totalorder %s3963_s25, %s2927_s26 }
 0x6ee   : > { %p2930_p1 = scmp.lt.s32.totalorder %s2928_s1, %s2922_s0 }
 0x6ef   : > { %v2263_v55 = vadd.f32 %v2562_v8, %v2255_v60 }
 0x6f0   : > { %p2931_p2 = por %p2930_p1, %p2929_p0 }
 0x6f1   : > { %2653 = vmatmul.mubr.msk.f32.vlgmr.msra.gmra.mrb[4].mxu1 %vm572_vm0, %v2263_v55 }
 0x6f2   : > { %p2932_p3 = pnand %p2931_p2, %p2925_p13 }
 0x7c4   : > { %v2344_v58 = vpop.f32.mrb[4].mxu1 }
 0x7c5   : > { %v2345_v33 = vadd.f32 %v2563_v10, %v2344_v58  ;;  %v2654_v53 = vpop.f32.mrb[5].mxu1 }
 0x7c7   : > { %v2349_v15 = vmul.f32 0.70710677, %v2345_v33  ;;  %v2348_v43 = vmul.f32 0.5, %v2345_v33 }
 0x7c9   : > { %v2352_v40 = vand.u32 2147483647, %v2349_v15  ;;  %vm2350_vm1 = vcmp.ge.f32.partialorder %v2349_v15, 0.0 }
 0x7ca   : > { %v2351_v36 = vsel %vm2350_vm1, 1.0, %v2991_v6 }
 0x7cb   : > { %v2353_v56 = vmul.f32 0.3275911, %v2352_v40  ;;  %v2366_v39 = vsub.f32 0.0, %v2352_v40 }
 0x7cd   : > { %v2354_v41 = vadd.f32 1.0, %v2353_v56  ;;  %v2367_v42 = vmul.f32 %v2366_v39, %v2352_v40 }
 0x7cf   : > { %2917 = vrcp.f32 %v2354_v41  ;;  %v2368_v47 = vmul.f32 1.442695, %v2367_v42 }
 0x7d1   : > { %2919 = vpow2.f32 %v2368_v47 }
 0x7d9   : > { %v2918_v51 = vpop.eup %2917 }
 0x7da   : > { %v2357_v44 = vmul.f32 1.0614054, %v2918_v51 }
 0x7db   : > { %v2920_v57 = vpop.eup %2919 }
 0x7dc   : > { %v2358_v32 = vadd.f32 -1.4531521, %v2357_v44 }
 0x7de   : > { %v2359_v38 = vmul.f32 %v2918_v51, %v2358_v32 }
 0x7e0   : > { %v2360_v23 = vadd.f32 1.4214138, %v2359_v38 }
 0x7e2   : > { %v2361_v49 = vmul.f32 %v2918_v51, %v2360_v23 }
 0x7e4   : > { %v2362_v1 = vadd.f32 -0.28449672, %v2361_v49 }
 0x7e6   : > { %v2363_v18 = vmul.f32 %v2918_v51, %v2362_v1 }
 0x7e8   : > { %v2364_v52 = vadd.f32 0.2548296, %v2363_v18 }
 0x7ea   : > { %v2365_v54 = vmul.f32 %v2918_v51, %v2364_v52 }
 0x7ec   : > { %v2370_v0 = vmul.f32 %v2920_v57, %v2365_v54 }
 0x7ee   : > { %v2371_v5 = vsub.f32 1.0, %v2370_v0 }
 0x7f0   : > { %v2372_v14 = vmul.f32 %v2371_v5, %v2351_v36 }
 0x7f2   : > { %v2373_v11 = vadd.f32 1.0, %v2372_v14 }
 0x7f4   : > { %v2374_v46 = vmul.f32 %v2373_v11, %v2348_v43 }
 0x7f6   : > { %2688 = vmatmul.mubr.f32.vlgmr.msra.gmra.mrb[2].mxu0 %v2374_v46 }
 0x8c9   : > { %v2464_v63 = vpop.f32.mrb[2].mxu0 }
 0x8ca   : > { %v2465_v25 = vadd.f32 %v2565_v13, %v2464_v63  ;;  %v2689_v59 = vpop.f32.mrb[3].mxu0 }
 0x8cc   : > { %v2468_v3 = vadd.f32 %v2921_v7, %v2465_v25 }
 0x8ce   : > { %2469 = vst.msk [vmem:[%s566_s23] sm:$0xff] %vm572_vm0, %v2468_v3 }
 0x8cf   : > { %2935 = shalt.err (!%p2932_p3)
}
 0x8d0   : > { %s2936_s29 = scalar_lea.hbm %s3961_s20, 128  ;;  %s2940_s23 = scalar_lea.hbm %s4022_s18, 256 }
 0x8d1   : > { %p2937_p4 = scmp.ne.s32.totalorder %s3961_s20, %s2936_s29  ;;  %p2941_p9 = scmp.lt.u32.totalorder %s3961_s20, %s4022_s18 }
 0x8d2   : > { %p2942_p10 = scmp.lt.u32.totalorder %s2940_s23, %s2936_s29  ;;  %p2944_p12 = scmp.lt.u32.totalorder %s2936_s29, %s3961_s20 }
 0x8d3   : > { %p2938_p7 = pnand %p2937_p4, %p3126_p5 }
 0x8d4   : > { %p2943_p11 = por %p2942_p10, %p2941_p9 }
 0x8d5   : > { %p2939_p8 = pneg %p2938_p7 }
 0x8d6   : > { %p2945_p13 = por %p2944_p12, %p2943_p11 }
 0x8d8   : > { %p2946_p0 = pnand %p2945_p13, %p2939_p8 }
 0x8da   : > { %2949 = shalt.err (!%p2946_p0)
}
 0x8db   : > { %2784 = dma.vmem_to_hbm [thread:$0]  (%p3126_p5), %s3963_s25, 128, %s3961_s20, %s2471_s22  }
 0x8dc PF: > { %s4043_s0 = sld [smem:[#allocation10_spill]]  ;;  %s4044_s21 = sld [smem:[#allocation8_spill]] }
 0x8e2   : > { %p2790_p1 = scmp.ge.s32.totalorder %s4043_s0, 2  ;;  %s2496_s1 = sand.u32 1, %s4044_s21  }
 0x8e3   : > { %s2497_s27 = scalar_lea.sflag [#allocation6], %s2496_s1 }
 0x8e4   : > { %p2787_p2 = pnand %p2790_p1, %p3130_p6 }
 0x8e6   : > { %2967 = dma.done.wait (!%p2787_p2), %s2497_s27, 128  }
 0x8e7   : > { %2969 = vsyncadd (!%p2787_p2), %s2497_s27, 4294967168  ;;  %s4046_s30 = sld [smem:[#allocation11_spill]]  ;;  %s4047_s29 = sld [smem:[#allocation9_spill]] }
 0x8e8   : > { %s4048_s23 = sld [smem:[#allocation12_spill]]  ;;  %s4049_s27 = smov %s2976_s28 }
 0x8ed   : > { %p28_p3 = scmp.ge.s32.totalorder %s4046_s30, 4   ;;  %s4050_s28 = smov %s4047_s29 }
 0x8ee   : > { %s4051_s29 = smov %s4048_s23 }
 0x8ef   :  { %30 = sbr.rel (!%p28_p3) target bundleno = 7 (0x7), region = 148 }
 0x8f6   :  { %2502 = vsyncpa [#allocation6], 1 }
 0x8f7   :  { %2504 = vsyncpa [#allocation6 + $0x1], 1 }

</bundles_post_ra>
